<compile_context>
chip_gen: v7x
topology: tpu7x:2x2x1
jax: 0.10.0
libtpu: 0.0.40
codegen_flags: <defaults>
</compile_context>

<pallas_src>
import numpy as np
import jax
import jax.numpy as jnp
from jax.experimental import pallas as pl
from jax.experimental.pallas import tpu as pltpu

# ---------------------------------------------------------------------------
# Static sizes
# ---------------------------------------------------------------------------
KK = 5            # conv kernel size
C1, C1P = 6, 8    # conv1 out channels (padded to 8)
C2 = 16           # conv2 out channels
HW1 = 24          # conv1 output spatial (28 - 5 + 1)
HW2 = 20          # conv2 output spatial (24 - 5 + 1)
L1 = HW1 * C1P    # 192   conv1 activation lanes: (ow, c)
L2 = HW2 * C2     # 320   conv2 activation lanes: (ow, c)
NFLAT = HW2 * L2  # 6400  flattened features
FCP = 128         # lane padding for all FC outputs


def _round_up(a, b):
    return (a + b - 1) // b * b


# ---------------------------------------------------------------------------
# Fused forward kernel (one batch tile per grid step)
# ---------------------------------------------------------------------------
def _net_kernel(x_ref, m1_ref, b1_ref, m2_ref, b2_ref, w3_ref, b3_ref,
                w4_ref, b4_ref, w5_ref, b5_ref, o_ref):
    bt = x_ref.shape[0]
    x = x_ref[...]                                           # [bt, 28, 28] bf16

    # ---- conv1 + ReLU: banded matmul over W, 5 H-taps, f32 accumulate ----
    # rows = (b, oh), lanes = ow*C1P + oc
    acc1 = None
    for ki in range(KK):
        xs = x[:, ki:ki + HW1, :].reshape(bt * HW1, 28)      # bf16, no per-tap cast
        t = jnp.dot(xs, m1_ref[ki], preferred_element_type=jnp.float32)
        acc1 = t if acc1 is None else acc1 + t               # [bt*24, 192] f32
    y1 = jnp.maximum(acc1 + b1_ref[...], 0.0).astype(jnp.bfloat16)
    y1r = y1.reshape(bt, HW1, L1)                            # [bt, 24, 192] bf16

    # ---- conv2 + ReLU: input-side tap slicing (only bt*20 rows per tap) --
    acc2 = None
    for ki in range(KK):
        lhs = y1r[:, ki:ki + HW2, :].reshape(bt * HW2, L1)   # [bt*20, 192] bf16
        t = jnp.dot(lhs, m2_ref[ki], preferred_element_type=jnp.float32)
        acc2 = t if acc2 is None else acc2 + t               # [bt*20, 320] f32
    y2 = jnp.maximum(acc2 + b2_ref[...], 0.0).astype(jnp.bfloat16)
    y2r = y2.reshape(bt, HW2, L2)                            # [bt, 20, 320] bf16

    # ---- fc1: NCHW flatten absorbed into per-row accumulation ------------
    # w3 is pre-permuted/padded to [HW2, L2, 128]; h1 = sum_r y2[:,r,:] @ w3[r]
    h1a = None
    for r in range(HW2):
        t = jnp.dot(y2r[:, r, :], w3_ref[r], preferred_element_type=jnp.float32)
        h1a = t if h1a is None else h1a + t                  # [bt, 128] f32
    h1 = jnp.maximum(h1a + b3_ref[...], 0.0).astype(jnp.bfloat16)

    # ---- fc2 / fc3 (lane-padded to 128, zero-padded weights) -------------
    h2 = jnp.maximum(
        jnp.dot(h1, w4_ref[...], preferred_element_type=jnp.float32) + b4_ref[...],
        0.0).astype(jnp.bfloat16)                            # [bt, 128]
    out = jnp.dot(h2, w5_ref[...], preferred_element_type=jnp.float32) + b5_ref[...]
    o_ref[...] = out                                         # lane-dense [bt, 128] f32


# ---------------------------------------------------------------------------
# Host wrapper: single pallas_call, grid over batch tiles
# ---------------------------------------------------------------------------
def net_forward(x, pp, *, block_b=128):
    n = x.shape[0]
    # Large batch tile for MXU row utilization (biggest perf lever), capped to
    # the 8-rounded batch so tiny test batches don't pay for 128 padded rows.
    # For n > block_b the grid has >= 2 steps -> v7x megacore sharding.
    bt = min(block_b, max(8, _round_up(n, 8)))
    npad = _round_up(n, bt)
    xs = x.reshape(n, 28, 28).astype(jnp.bfloat16)           # squeeze C=1, ship bf16
    if npad != n:
        xs = jnp.pad(xs, ((0, npad - n), (0, 0), (0, 0)))

    out = pl.pallas_call(
        _net_kernel,
        out_shape=jax.ShapeDtypeStruct((npad, FCP), jnp.float32),
        grid=(npad // bt,),
        in_specs=[
            pl.BlockSpec((bt, 28, 28), lambda i: (i, 0, 0)),    # x (bf16)
            pl.BlockSpec((KK, 28, L1), lambda i: (0, 0, 0)),    # conv1 banded
            pl.BlockSpec((1, L1), lambda i: (0, 0)),            # conv1 bias (tiled)
            pl.BlockSpec((KK, L1, L2), lambda i: (0, 0, 0)),    # conv2 banded
            pl.BlockSpec((1, L2), lambda i: (0, 0)),            # conv2 bias (tiled)
            pl.BlockSpec((HW2, L2, FCP), lambda i: (0, 0, 0)),  # fc1 w [20,320,128]
            pl.BlockSpec((1, FCP), lambda i: (0, 0)),           # fc1 b
            pl.BlockSpec((FCP, FCP), lambda i: (0, 0)),         # fc2 w
            pl.BlockSpec((1, FCP), lambda i: (0, 0)),           # fc2 b
            pl.BlockSpec((FCP, FCP), lambda i: (0, 0)),         # fc3 w
            pl.BlockSpec((1, FCP), lambda i: (0, 0)),           # fc3 b
        ],
        out_specs=pl.BlockSpec((bt, FCP), lambda i: (i, 0)),
        compiler_params=pltpu.CompilerParams(
            dimension_semantics=("parallel",),
            vmem_limit_bytes=48 * 1024 * 1024,
        ),
    )(xs, pp["m1"], pp["b1"], pp["m2"], pp["b2"],
      pp["w3"], pp["b3"], pp["w4"], pp["b4"], pp["w5"], pp["b5"])

    return out[:n, :10]


# ---------------------------------------------------------------------------
# One-time weight preparation (host side): banded conv matrices, fc1 row
# permutation to absorb the NCHW flatten, zero lane/row padding, bf16 cast.
# ---------------------------------------------------------------------------
def prepare_params(params):
    f32 = np.float32
    w1 = np.asarray(params["conv1_w"], f32)    # [6, 1, 5, 5]
    b1 = np.asarray(params["conv1_b"], f32)
    w2 = np.asarray(params["conv2_w"], f32)    # [16, 6, 5, 5]
    b2 = np.asarray(params["conv2_b"], f32)
    fc1_w = np.asarray(params["fc1_w"], f32)   # [120, 6400]
    fc1_b = np.asarray(params["fc1_b"], f32)
    fc2_w = np.asarray(params["fc2_w"], f32)   # [84, 120]
    fc2_b = np.asarray(params["fc2_b"], f32)
    fc3_w = np.asarray(params["fc3_w"], f32)   # [10, 84]
    fc3_b = np.asarray(params["fc3_b"], f32)

    # conv1 banded matrices: m1[ki, w, ow*C1P + oc] = w1[oc, 0, ki, w - ow]
    m1 = np.zeros((KK, 28, L1), f32)
    for ki in range(KK):
        for kj in range(KK):
            for ow in range(HW1):
                m1[ki, ow + kj, ow * C1P: ow * C1P + C1] = w1[:, 0, ki, kj]
    b1t = np.tile(np.concatenate([b1, np.zeros(C1P - C1, f32)]), HW1)[None, :]

    # conv2 banded matrices: m2[ki, w*C1P + ic, ow2*C2 + oc] = w2[oc, ic, ki, w - ow2]
    m2 = np.zeros((KK, L1, L2), f32)
    for ki in range(KK):
        for kj in range(KK):
            for ow in range(HW2):
                m2[ki, (ow + kj) * C1P:(ow + kj) * C1P + C1,
                       ow * C2:(ow + 1) * C2] = w2[:, :, ki, kj].T
    b2t = np.tile(b2, HW2)[None, :]

    # fc1: permute rows from torch's (c, oh, ow) flatten order to the kernel's
    # (oh, ow, c) order; pad output lanes 120 -> 128; reshape to [oh, 320, 128]
    # so the kernel can accumulate h1 = sum_oh y2[:, oh, :] @ w3[oh].
    w3 = fc1_w.reshape(120, C2, HW2, HW2).transpose(2, 3, 1, 0).reshape(NFLAT, 120)
    w3 = np.pad(w3, ((0, 0), (0, FCP - 120))).reshape(HW2, L2, FCP)
    b3 = np.pad(fc1_b, (0, FCP - 120))[None, :]

    w4 = np.zeros((FCP, FCP), f32); w4[:120, :84] = fc2_w.T
    b4 = np.pad(fc2_b, (0, FCP - 84))[None, :]
    w5 = np.zeros((FCP, FCP), f32); w5[:84, :10] = fc3_w.T
    b5 = np.pad(fc3_b, (0, FCP - 10))[None, :]

    bf = jnp.bfloat16
    return {
        "m1": jnp.asarray(m1, bf), "b1": jnp.asarray(b1t, jnp.float32),
        "m2": jnp.asarray(m2, bf), "b2": jnp.asarray(b2t, jnp.float32),
        "w3": jnp.asarray(w3, bf), "b3": jnp.asarray(b3, jnp.float32),
        "w4": jnp.asarray(w4, bf), "b4": jnp.asarray(b4, jnp.float32),
        "w5": jnp.asarray(w5, bf), "b5": jnp.asarray(b5, jnp.float32),
    }


# ---------------------------------------------------------------------------
# Pure-JAX f32 reference (PyTorch semantics) for a correctness check.
# ---------------------------------------------------------------------------
def net_reference(x, params):
    hp = jax.lax.Precision.HIGHEST
    f32 = jnp.float32
    dn = ("NCHW", "OIHW", "NCHW")
    h = jax.lax.conv_general_dilated(x.astype(f32), params["conv1_w"].astype(f32),
                                     (1, 1), "VALID", dimension_numbers=dn,
                                     precision=hp) + params["conv1_b"].reshape(1, -1, 1, 1)
    h = jnp.maximum(h, 0.0)
    h = jax.lax.conv_general_dilated(h, params["conv2_w"].astype(f32),
                                     (1, 1), "VALID", dimension_numbers=dn,
                                     precision=hp) + params["conv2_b"].reshape(1, -1, 1, 1)
    h = jnp.maximum(h, 0.0)
    h = h.reshape(h.shape[0], -1)
    h = jnp.maximum(jnp.dot(h, params["fc1_w"].T, precision=hp) + params["fc1_b"], 0.0)
    h = jnp.maximum(jnp.dot(h, params["fc2_w"].T, precision=hp) + params["fc2_b"], 0.0)
    return jnp.dot(h, params["fc3_w"].T, precision=hp) + params["fc3_b"]


def init_params(key):
    ks = jax.random.split(key, 10)
    def w(k, shape, fan_in):
        return jax.random.normal(k, shape, jnp.float32) / jnp.sqrt(fan_in)
    return {
        "conv1_w": w(ks[0], (6, 1, 5, 5), 25.0),
        "conv1_b": w(ks[1], (6,), 25.0),
        "conv2_w": w(ks[2], (16, 6, 5, 5), 150.0),
        "conv2_b": w(ks[3], (16,), 150.0),
        "fc1_w":   w(ks[4], (120, 6400), 6400.0),   # PyTorch Linear: [out, in]
        "fc1_b":   w(ks[5], (120,), 6400.0),
        "fc2_w":   w(ks[6], (84, 120), 120.0),
        "fc2_b":   w(ks[7], (84,), 120.0),
        "fc3_w":   w(ks[8], (10, 84), 84.0),
        "fc3_b":   w(ks[9], (10,), 84.0),
    }


if __name__ == "__main__":
    key = jax.random.PRNGKey(0)
    pkey, xkey = jax.random.split(key)
    params = init_params(pkey)
    packed = prepare_params(params)                           # one-time prep

    fwd = jax.jit(net_forward)
    ref_fn = jax.jit(net_reference)

    # Small-batch correctness check (batch=2, the tiny test shape).
    x_small = jax.random.normal(xkey, (2, 1, 28, 28), jnp.float32)   # NCHW
    out_small = jax.block_until_ready(fwd(x_small, packed))
    assert out_small.shape == (2, 10) and out_small.dtype == jnp.float32
    ref_small = jax.block_until_ready(ref_fn(x_small, params))
    err_small = float(jnp.max(jnp.abs(out_small - ref_small)))
    assert err_small < 0.15, f"small-batch mismatch vs reference: {err_small}"

    # Larger batch exercising the perf path: bt=128, 2 grid tiles (megacore).
    x_big = jax.random.normal(jax.random.PRNGKey(1), (256, 1, 28, 28), jnp.float32)
    out_big = jax.block_until_ready(fwd(x_big, packed))
    assert out_big.shape == (256, 10)
    ref_big = jax.block_until_ready(ref_fn(x_big, params))
    err_big = float(jnp.max(jnp.abs(out_big - ref_big)))
    assert err_big < 0.25, f"large-batch mismatch vs reference: {err_big}"

    print("KERNEL_OK")
</pallas_src>

<mosaic_0001>
module attributes {stable_mosaic.version = 11 : i64} {
  func.func @_net_kernel(%arg0: i32, %arg1: memref<8x28x28xbf16, #tpu.memory_space<vmem>>, %arg2: memref<5x28x192xbf16, #tpu.memory_space<vmem>>, %arg3: memref<1x192xf32, #tpu.memory_space<vmem>>, %arg4: memref<5x192x320xbf16, #tpu.memory_space<vmem>>, %arg5: memref<1x320xf32, #tpu.memory_space<vmem>>, %arg6: memref<20x320x128xbf16, #tpu.memory_space<vmem>>, %arg7: memref<1x128xf32, #tpu.memory_space<vmem>>, %arg8: memref<128x128xbf16, #tpu.memory_space<vmem>>, %arg9: memref<1x128xf32, #tpu.memory_space<vmem>>, %arg10: memref<128x128xbf16, #tpu.memory_space<vmem>>, %arg11: memref<1x128xf32, #tpu.memory_space<vmem>>, %arg12: memref<8x128xf32, #tpu.memory_space<vmem>>) attributes {dimension_semantics = [#tpu.dimension_semantics<parallel>], iteration_bounds = array<i64: 1>, scalar_prefetch = 0 : i64, scratch_operands = 0 : i64, tpu.core_type = #tpu.core_type<tc>, window_params = [{transform_indices = @transform_0, window_bounds = array<i64: 8, 28, 28>}, {pipeline_mode = #tpu.pipeline_mode<synchronous>, transform_indices = @transform_1, window_bounds = array<i64: 5, 28, 192>}, {pipeline_mode = #tpu.pipeline_mode<synchronous>, transform_indices = @transform_2, window_bounds = array<i64: 1, 192>}, {pipeline_mode = #tpu.pipeline_mode<synchronous>, transform_indices = @transform_3, window_bounds = array<i64: 5, 192, 320>}, {pipeline_mode = #tpu.pipeline_mode<synchronous>, transform_indices = @transform_4, window_bounds = array<i64: 1, 320>}, {pipeline_mode = #tpu.pipeline_mode<synchronous>, transform_indices = @transform_5, window_bounds = array<i64: 20, 320, 128>}, {pipeline_mode = #tpu.pipeline_mode<synchronous>, transform_indices = @transform_6, window_bounds = array<i64: 1, 128>}, {pipeline_mode = #tpu.pipeline_mode<synchronous>, transform_indices = @transform_7, window_bounds = array<i64: 128, 128>}, {pipeline_mode = #tpu.pipeline_mode<synchronous>, transform_indices = @transform_8, window_bounds = array<i64: 1, 128>}, {pipeline_mode = #tpu.pipeline_mode<synchronous>, transform_indices = @transform_9, window_bounds = array<i64: 128, 128>}, {pipeline_mode = #tpu.pipeline_mode<synchronous>, transform_indices = @transform_10, window_bounds = array<i64: 1, 128>}, {transform_indices = @transform_11, window_bounds = array<i64: 8, 128>}]} {
    %c0 = arith.constant 0 : index
    %c0_0 = arith.constant 0 : index
    %c0_1 = arith.constant 0 : index
    %0 = vector.load %arg1[%c0, %c0_0, %c0_1] : memref<8x28x28xbf16, #tpu.memory_space<vmem>>, vector<8x28x28xbf16>
    %1 = vector.extract_strided_slice %0 {offsets = [0, 0, 0], sizes = [8, 24, 28], strides = [1, 1, 1]} : vector<8x28x28xbf16> to vector<8x24x28xbf16>
    %2 = vector.shape_cast %1 : vector<8x24x28xbf16> to vector<192x28xbf16>
    %c0_2 = arith.constant 0 : index
    %c0_3 = arith.constant 0 : index
    %c0_4 = arith.constant 0 : index
    %3 = vector.load %arg2[%c0_2, %c0_3, %c0_4] : memref<5x28x192xbf16, #tpu.memory_space<vmem>>, vector<1x28x192xbf16>
    %4 = vector.shape_cast %3 : vector<1x28x192xbf16> to vector<28x192xbf16>
    %cst = arith.constant dense<0.000000e+00> : vector<192x192xf32>
    %5 = tpu.matmul %2, %4, %cst {dimension_numbers = #tpu.dot_dimension_numbers<[1], [0], [0], [1], [0, 0, 1, 1], [], []>} : vector<192x28xbf16>, vector<28x192xbf16>, vector<192x192xf32> -> vector<192x192xf32>
    %6 = vector.extract_strided_slice %0 {offsets = [0, 1, 0], sizes = [8, 24, 28], strides = [1, 1, 1]} : vector<8x28x28xbf16> to vector<8x24x28xbf16>
    %7 = vector.shape_cast %6 : vector<8x24x28xbf16> to vector<192x28xbf16>
    %c1 = arith.constant 1 : index
    %c0_5 = arith.constant 0 : index
    %c0_6 = arith.constant 0 : index
    %8 = vector.load %arg2[%c1, %c0_5, %c0_6] : memref<5x28x192xbf16, #tpu.memory_space<vmem>>, vector<1x28x192xbf16>
    %9 = vector.shape_cast %8 : vector<1x28x192xbf16> to vector<28x192xbf16>
    %cst_7 = arith.constant dense<0.000000e+00> : vector<192x192xf32>
    %10 = tpu.matmul %7, %9, %cst_7 {dimension_numbers = #tpu.dot_dimension_numbers<[1], [0], [0], [1], [0, 0, 1, 1], [], []>} : vector<192x28xbf16>, vector<28x192xbf16>, vector<192x192xf32> -> vector<192x192xf32>
    %11 = arith.addf %5, %10 : vector<192x192xf32>
    %12 = vector.extract_strided_slice %0 {offsets = [0, 2, 0], sizes = [8, 24, 28], strides = [1, 1, 1]} : vector<8x28x28xbf16> to vector<8x24x28xbf16>
    %13 = vector.shape_cast %12 : vector<8x24x28xbf16> to vector<192x28xbf16>
    %c2 = arith.constant 2 : index
    %c0_8 = arith.constant 0 : index
    %c0_9 = arith.constant 0 : index
    %14 = vector.load %arg2[%c2, %c0_8, %c0_9] : memref<5x28x192xbf16, #tpu.memory_space<vmem>>, vector<1x28x192xbf16>
    %15 = vector.shape_cast %14 : vector<1x28x192xbf16> to vector<28x192xbf16>
    %cst_10 = arith.constant dense<0.000000e+00> : vector<192x192xf32>
    %16 = tpu.matmul %13, %15, %cst_10 {dimension_numbers = #tpu.dot_dimension_numbers<[1], [0], [0], [1], [0, 0, 1, 1], [], []>} : vector<192x28xbf16>, vector<28x192xbf16>, vector<192x192xf32> -> vector<192x192xf32>
    %17 = arith.addf %11, %16 : vector<192x192xf32>
    %18 = vector.extract_strided_slice %0 {offsets = [0, 3, 0], sizes = [8, 24, 28], strides = [1, 1, 1]} : vector<8x28x28xbf16> to vector<8x24x28xbf16>
    %19 = vector.shape_cast %18 : vector<8x24x28xbf16> to vector<192x28xbf16>
    %c3 = arith.constant 3 : index
    %c0_11 = arith.constant 0 : index
    %c0_12 = arith.constant 0 : index
    %20 = vector.load %arg2[%c3, %c0_11, %c0_12] : memref<5x28x192xbf16, #tpu.memory_space<vmem>>, vector<1x28x192xbf16>
    %21 = vector.shape_cast %20 : vector<1x28x192xbf16> to vector<28x192xbf16>
    %cst_13 = arith.constant dense<0.000000e+00> : vector<192x192xf32>
    %22 = tpu.matmul %19, %21, %cst_13 {dimension_numbers = #tpu.dot_dimension_numbers<[1], [0], [0], [1], [0, 0, 1, 1], [], []>} : vector<192x28xbf16>, vector<28x192xbf16>, vector<192x192xf32> -> vector<192x192xf32>
    %23 = arith.addf %17, %22 : vector<192x192xf32>
    %24 = vector.extract_strided_slice %0 {offsets = [0, 4, 0], sizes = [8, 24, 28], strides = [1, 1, 1]} : vector<8x28x28xbf16> to vector<8x24x28xbf16>
    %25 = vector.shape_cast %24 : vector<8x24x28xbf16> to vector<192x28xbf16>
    %c4 = arith.constant 4 : index
    %c0_14 = arith.constant 0 : index
    %c0_15 = arith.constant 0 : index
    %26 = vector.load %arg2[%c4, %c0_14, %c0_15] : memref<5x28x192xbf16, #tpu.memory_space<vmem>>, vector<1x28x192xbf16>
    %27 = vector.shape_cast %26 : vector<1x28x192xbf16> to vector<28x192xbf16>
    %cst_16 = arith.constant dense<0.000000e+00> : vector<192x192xf32>
    %28 = tpu.matmul %25, %27, %cst_16 {dimension_numbers = #tpu.dot_dimension_numbers<[1], [0], [0], [1], [0, 0, 1, 1], [], []>} : vector<192x28xbf16>, vector<28x192xbf16>, vector<192x192xf32> -> vector<192x192xf32>
    %29 = arith.addf %23, %28 : vector<192x192xf32>
    %c0_17 = arith.constant 0 : index
    %c0_18 = arith.constant 0 : index
    %30 = vector.load %arg3[%c0_17, %c0_18] : memref<1x192xf32, #tpu.memory_space<vmem>>, vector<1x192xf32>
    %31 = vector.broadcast %30 : vector<1x192xf32> to vector<192x192xf32>
    %32 = arith.addf %29, %31 : vector<192x192xf32>
    %cst_19 = arith.constant 0.000000e+00 : f32
    %33 = vector.broadcast %cst_19 : f32 to vector<192x192xf32>
    %34 = arith.maximumf %32, %33 : vector<192x192xf32>
    %35 = arith.truncf %34 : vector<192x192xf32> to vector<192x192xbf16>
    %36 = vector.shape_cast %35 : vector<192x192xbf16> to vector<8x24x192xbf16>
    %37 = vector.extract_strided_slice %36 {offsets = [0, 0, 0], sizes = [8, 20, 192], strides = [1, 1, 1]} : vector<8x24x192xbf16> to vector<8x20x192xbf16>
    %38 = vector.shape_cast %37 : vector<8x20x192xbf16> to vector<160x192xbf16>
    %c0_20 = arith.constant 0 : index
    %c0_21 = arith.constant 0 : index
    %c0_22 = arith.constant 0 : index
    %39 = vector.load %arg4[%c0_20, %c0_21, %c0_22] : memref<5x192x320xbf16, #tpu.memory_space<vmem>>, vector<1x192x320xbf16>
    %40 = vector.shape_cast %39 : vector<1x192x320xbf16> to vector<192x320xbf16>
    %cst_23 = arith.constant dense<0.000000e+00> : vector<160x320xf32>
    %41 = tpu.matmul %38, %40, %cst_23 {dimension_numbers = #tpu.dot_dimension_numbers<[1], [0], [0], [1], [0, 0, 1, 1], [], []>} : vector<160x192xbf16>, vector<192x320xbf16>, vector<160x320xf32> -> vector<160x320xf32>
    %42 = vector.extract_strided_slice %36 {offsets = [0, 1, 0], sizes = [8, 20, 192], strides = [1, 1, 1]} : vector<8x24x192xbf16> to vector<8x20x192xbf16>
    %43 = vector.shape_cast %42 : vector<8x20x192xbf16> to vector<160x192xbf16>
    %c1_24 = arith.constant 1 : index
    %c0_25 = arith.constant 0 : index
    %c0_26 = arith.constant 0 : index
    %44 = vector.load %arg4[%c1_24, %c0_25, %c0_26] : memref<5x192x320xbf16, #tpu.memory_space<vmem>>, vector<1x192x320xbf16>
    %45 = vector.shape_cast %44 : vector<1x192x320xbf16> to vector<192x320xbf16>
    %cst_27 = arith.constant dense<0.000000e+00> : vector<160x320xf32>
    %46 = tpu.matmul %43, %45, %cst_27 {dimension_numbers = #tpu.dot_dimension_numbers<[1], [0], [0], [1], [0, 0, 1, 1], [], []>} : vector<160x192xbf16>, vector<192x320xbf16>, vector<160x320xf32> -> vector<160x320xf32>
    %47 = arith.addf %41, %46 : vector<160x320xf32>
    %48 = vector.extract_strided_slice %36 {offsets = [0, 2, 0], sizes = [8, 20, 192], strides = [1, 1, 1]} : vector<8x24x192xbf16> to vector<8x20x192xbf16>
    %49 = vector.shape_cast %48 : vector<8x20x192xbf16> to vector<160x192xbf16>
    %c2_28 = arith.constant 2 : index
    %c0_29 = arith.constant 0 : index
    %c0_30 = arith.constant 0 : index
    %50 = vector.load %arg4[%c2_28, %c0_29, %c0_30] : memref<5x192x320xbf16, #tpu.memory_space<vmem>>, vector<1x192x320xbf16>
    %51 = vector.shape_cast %50 : vector<1x192x320xbf16> to vector<192x320xbf16>
    %cst_31 = arith.constant dense<0.000000e+00> : vector<160x320xf32>
    %52 = tpu.matmul %49, %51, %cst_31 {dimension_numbers = #tpu.dot_dimension_numbers<[1], [0], [0], [1], [0, 0, 1, 1], [], []>} : vector<160x192xbf16>, vector<192x320xbf16>, vector<160x320xf32> -> vector<160x320xf32>
    %53 = arith.addf %47, %52 : vector<160x320xf32>
    %54 = vector.extract_strided_slice %36 {offsets = [0, 3, 0], sizes = [8, 20, 192], strides = [1, 1, 1]} : vector<8x24x192xbf16> to vector<8x20x192xbf16>
    %55 = vector.shape_cast %54 : vector<8x20x192xbf16> to vector<160x192xbf16>
    %c3_32 = arith.constant 3 : index
    %c0_33 = arith.constant 0 : index
    %c0_34 = arith.constant 0 : index
    %56 = vector.load %arg4[%c3_32, %c0_33, %c0_34] : memref<5x192x320xbf16, #tpu.memory_space<vmem>>, vector<1x192x320xbf16>
    %57 = vector.shape_cast %56 : vector<1x192x320xbf16> to vector<192x320xbf16>
    %cst_35 = arith.constant dense<0.000000e+00> : vector<160x320xf32>
    %58 = tpu.matmul %55, %57, %cst_35 {dimension_numbers = #tpu.dot_dimension_numbers<[1], [0], [0], [1], [0, 0, 1, 1], [], []>} : vector<160x192xbf16>, vector<192x320xbf16>, vector<160x320xf32> -> vector<160x320xf32>
    %59 = arith.addf %53, %58 : vector<160x320xf32>
    %60 = vector.extract_strided_slice %36 {offsets = [0, 4, 0], sizes = [8, 20, 192], strides = [1, 1, 1]} : vector<8x24x192xbf16> to vector<8x20x192xbf16>
    %61 = vector.shape_cast %60 : vector<8x20x192xbf16> to vector<160x192xbf16>
    %c4_36 = arith.constant 4 : index
    %c0_37 = arith.constant 0 : index
    %c0_38 = arith.constant 0 : index
    %62 = vector.load %arg4[%c4_36, %c0_37, %c0_38] : memref<5x192x320xbf16, #tpu.memory_space<vmem>>, vector<1x192x320xbf16>
    %63 = vector.shape_cast %62 : vector<1x192x320xbf16> to vector<192x320xbf16>
    %cst_39 = arith.constant dense<0.000000e+00> : vector<160x320xf32>
    %64 = tpu.matmul %61, %63, %cst_39 {dimension_numbers = #tpu.dot_dimension_numbers<[1], [0], [0], [1], [0, 0, 1, 1], [], []>} : vector<160x192xbf16>, vector<192x320xbf16>, vector<160x320xf32> -> vector<160x320xf32>
    %65 = arith.addf %59, %64 : vector<160x320xf32>
    %c0_40 = arith.constant 0 : index
    %c0_41 = arith.constant 0 : index
    %66 = vector.load %arg5[%c0_40, %c0_41] : memref<1x320xf32, #tpu.memory_space<vmem>>, vector<1x320xf32>
    %67 = vector.broadcast %66 : vector<1x320xf32> to vector<160x320xf32>
    %68 = arith.addf %65, %67 : vector<160x320xf32>
    %cst_42 = arith.constant 0.000000e+00 : f32
    %69 = vector.broadcast %cst_42 : f32 to vector<160x320xf32>
    %70 = arith.maximumf %68, %69 : vector<160x320xf32>
    %71 = arith.truncf %70 : vector<160x320xf32> to vector<160x320xbf16>
    %72 = vector.shape_cast %71 : vector<160x320xbf16> to vector<8x20x320xbf16>
    %73 = vector.extract_strided_slice %72 {offsets = [0, 0, 0], sizes = [8, 1, 320], strides = [1, 1, 1]} : vector<8x20x320xbf16> to vector<8x1x320xbf16>
    %74 = vector.shape_cast %73 : vector<8x1x320xbf16> to vector<8x320xbf16>
    %c0_43 = arith.constant 0 : index
    %c0_44 = arith.constant 0 : index
    %c0_45 = arith.constant 0 : index
    %75 = vector.load %arg6[%c0_43, %c0_44, %c0_45] : memref<20x320x128xbf16, #tpu.memory_space<vmem>>, vector<1x320x128xbf16>
    %76 = vector.shape_cast %75 : vector<1x320x128xbf16> to vector<320x128xbf16>
    %cst_46 = arith.constant dense<0.000000e+00> : vector<8x128xf32>
    %77 = tpu.matmul %74, %76, %cst_46 {dimension_numbers = #tpu.dot_dimension_numbers<[1], [0], [0], [1], [0, 0, 1, 1], [], []>} : vector<8x320xbf16>, vector<320x128xbf16>, vector<8x128xf32> -> vector<8x128xf32>
    %78 = vector.extract_strided_slice %72 {offsets = [0, 1, 0], sizes = [8, 1, 320], strides = [1, 1, 1]} : vector<8x20x320xbf16> to vector<8x1x320xbf16>
    %79 = vector.shape_cast %78 : vector<8x1x320xbf16> to vector<8x320xbf16>
    %c1_47 = arith.constant 1 : index
    %c0_48 = arith.constant 0 : index
    %c0_49 = arith.constant 0 : index
    %80 = vector.load %arg6[%c1_47, %c0_48, %c0_49] : memref<20x320x128xbf16, #tpu.memory_space<vmem>>, vector<1x320x128xbf16>
    %81 = vector.shape_cast %80 : vector<1x320x128xbf16> to vector<320x128xbf16>
    %cst_50 = arith.constant dense<0.000000e+00> : vector<8x128xf32>
    %82 = tpu.matmul %79, %81, %cst_50 {dimension_numbers = #tpu.dot_dimension_numbers<[1], [0], [0], [1], [0, 0, 1, 1], [], []>} : vector<8x320xbf16>, vector<320x128xbf16>, vector<8x128xf32> -> vector<8x128xf32>
    %83 = arith.addf %77, %82 : vector<8x128xf32>
    %84 = vector.extract_strided_slice %72 {offsets = [0, 2, 0], sizes = [8, 1, 320], strides = [1, 1, 1]} : vector<8x20x320xbf16> to vector<8x1x320xbf16>
    %85 = vector.shape_cast %84 : vector<8x1x320xbf16> to vector<8x320xbf16>
    %c2_51 = arith.constant 2 : index
    %c0_52 = arith.constant 0 : index
    %c0_53 = arith.constant 0 : index
    %86 = vector.load %arg6[%c2_51, %c0_52, %c0_53] : memref<20x320x128xbf16, #tpu.memory_space<vmem>>, vector<1x320x128xbf16>
    %87 = vector.shape_cast %86 : vector<1x320x128xbf16> to vector<320x128xbf16>
    %cst_54 = arith.constant dense<0.000000e+00> : vector<8x128xf32>
    %88 = tpu.matmul %85, %87, %cst_54 {dimension_numbers = #tpu.dot_dimension_numbers<[1], [0], [0], [1], [0, 0, 1, 1], [], []>} : vector<8x320xbf16>, vector<320x128xbf16>, vector<8x128xf32> -> vector<8x128xf32>
    %89 = arith.addf %83, %88 : vector<8x128xf32>
    %90 = vector.extract_strided_slice %72 {offsets = [0, 3, 0], sizes = [8, 1, 320], strides = [1, 1, 1]} : vector<8x20x320xbf16> to vector<8x1x320xbf16>
    %91 = vector.shape_cast %90 : vector<8x1x320xbf16> to vector<8x320xbf16>
    %c3_55 = arith.constant 3 : index
    %c0_56 = arith.constant 0 : index
    %c0_57 = arith.constant 0 : index
    %92 = vector.load %arg6[%c3_55, %c0_56, %c0_57] : memref<20x320x128xbf16, #tpu.memory_space<vmem>>, vector<1x320x128xbf16>
    %93 = vector.shape_cast %92 : vector<1x320x128xbf16> to vector<320x128xbf16>
    %cst_58 = arith.constant dense<0.000000e+00> : vector<8x128xf32>
    %94 = tpu.matmul %91, %93, %cst_58 {dimension_numbers = #tpu.dot_dimension_numbers<[1], [0], [0], [1], [0, 0, 1, 1], [], []>} : vector<8x320xbf16>, vector<320x128xbf16>, vector<8x128xf32> -> vector<8x128xf32>
    %95 = arith.addf %89, %94 : vector<8x128xf32>
    %96 = vector.extract_strided_slice %72 {offsets = [0, 4, 0], sizes = [8, 1, 320], strides = [1, 1, 1]} : vector<8x20x320xbf16> to vector<8x1x320xbf16>
    %97 = vector.shape_cast %96 : vector<8x1x320xbf16> to vector<8x320xbf16>
    %c4_59 = arith.constant 4 : index
    %c0_60 = arith.constant 0 : index
    %c0_61 = arith.constant 0 : index
    %98 = vector.load %arg6[%c4_59, %c0_60, %c0_61] : memref<20x320x128xbf16, #tpu.memory_space<vmem>>, vector<1x320x128xbf16>
    %99 = vector.shape_cast %98 : vector<1x320x128xbf16> to vector<320x128xbf16>
    %cst_62 = arith.constant dense<0.000000e+00> : vector<8x128xf32>
    %100 = tpu.matmul %97, %99, %cst_62 {dimension_numbers = #tpu.dot_dimension_numbers<[1], [0], [0], [1], [0, 0, 1, 1], [], []>} : vector<8x320xbf16>, vector<320x128xbf16>, vector<8x128xf32> -> vector<8x128xf32>
    %101 = arith.addf %95, %100 : vector<8x128xf32>
    %102 = vector.extract_strided_slice %72 {offsets = [0, 5, 0], sizes = [8, 1, 320], strides = [1, 1, 1]} : vector<8x20x320xbf16> to vector<8x1x320xbf16>
    %103 = vector.shape_cast %102 : vector<8x1x320xbf16> to vector<8x320xbf16>
    %c5 = arith.constant 5 : index
    %c0_63 = arith.constant 0 : index
    %c0_64 = arith.constant 0 : index
    %104 = vector.load %arg6[%c5, %c0_63, %c0_64] : memref<20x320x128xbf16, #tpu.memory_space<vmem>>, vector<1x320x128xbf16>
    %105 = vector.shape_cast %104 : vector<1x320x128xbf16> to vector<320x128xbf16>
    %cst_65 = arith.constant dense<0.000000e+00> : vector<8x128xf32>
    %106 = tpu.matmul %103, %105, %cst_65 {dimension_numbers = #tpu.dot_dimension_numbers<[1], [0], [0], [1], [0, 0, 1, 1], [], []>} : vector<8x320xbf16>, vector<320x128xbf16>, vector<8x128xf32> -> vector<8x128xf32>
    %107 = arith.addf %101, %106 : vector<8x128xf32>
    %108 = vector.extract_strided_slice %72 {offsets = [0, 6, 0], sizes = [8, 1, 320], strides = [1, 1, 1]} : vector<8x20x320xbf16> to vector<8x1x320xbf16>
    %109 = vector.shape_cast %108 : vector<8x1x320xbf16> to vector<8x320xbf16>
    %c6 = arith.constant 6 : index
    %c0_66 = arith.constant 0 : index
    %c0_67 = arith.constant 0 : index
    %110 = vector.load %arg6[%c6, %c0_66, %c0_67] : memref<20x320x128xbf16, #tpu.memory_space<vmem>>, vector<1x320x128xbf16>
    %111 = vector.shape_cast %110 : vector<1x320x128xbf16> to vector<320x128xbf16>
    %cst_68 = arith.constant dense<0.000000e+00> : vector<8x128xf32>
    %112 = tpu.matmul %109, %111, %cst_68 {dimension_numbers = #tpu.dot_dimension_numbers<[1], [0], [0], [1], [0, 0, 1, 1], [], []>} : vector<8x320xbf16>, vector<320x128xbf16>, vector<8x128xf32> -> vector<8x128xf32>
    %113 = arith.addf %107, %112 : vector<8x128xf32>
    %114 = vector.extract_strided_slice %72 {offsets = [0, 7, 0], sizes = [8, 1, 320], strides = [1, 1, 1]} : vector<8x20x320xbf16> to vector<8x1x320xbf16>
    %115 = vector.shape_cast %114 : vector<8x1x320xbf16> to vector<8x320xbf16>
    %c7 = arith.constant 7 : index
    %c0_69 = arith.constant 0 : index
    %c0_70 = arith.constant 0 : index
    %116 = vector.load %arg6[%c7, %c0_69, %c0_70] : memref<20x320x128xbf16, #tpu.memory_space<vmem>>, vector<1x320x128xbf16>
    %117 = vector.shape_cast %116 : vector<1x320x128xbf16> to vector<320x128xbf16>
    %cst_71 = arith.constant dense<0.000000e+00> : vector<8x128xf32>
    %118 = tpu.matmul %115, %117, %cst_71 {dimension_numbers = #tpu.dot_dimension_numbers<[1], [0], [0], [1], [0, 0, 1, 1], [], []>} : vector<8x320xbf16>, vector<320x128xbf16>, vector<8x128xf32> -> vector<8x128xf32>
    %119 = arith.addf %113, %118 : vector<8x128xf32>
    %120 = vector.extract_strided_slice %72 {offsets = [0, 8, 0], sizes = [8, 1, 320], strides = [1, 1, 1]} : vector<8x20x320xbf16> to vector<8x1x320xbf16>
    %121 = vector.shape_cast %120 : vector<8x1x320xbf16> to vector<8x320xbf16>
    %c8 = arith.constant 8 : index
    %c0_72 = arith.constant 0 : index
    %c0_73 = arith.constant 0 : index
    %122 = vector.load %arg6[%c8, %c0_72, %c0_73] : memref<20x320x128xbf16, #tpu.memory_space<vmem>>, vector<1x320x128xbf16>
    %123 = vector.shape_cast %122 : vector<1x320x128xbf16> to vector<320x128xbf16>
    %cst_74 = arith.constant dense<0.000000e+00> : vector<8x128xf32>
    %124 = tpu.matmul %121, %123, %cst_74 {dimension_numbers = #tpu.dot_dimension_numbers<[1], [0], [0], [1], [0, 0, 1, 1], [], []>} : vector<8x320xbf16>, vector<320x128xbf16>, vector<8x128xf32> -> vector<8x128xf32>
    %125 = arith.addf %119, %124 : vector<8x128xf32>
    %126 = vector.extract_strided_slice %72 {offsets = [0, 9, 0], sizes = [8, 1, 320], strides = [1, 1, 1]} : vector<8x20x320xbf16> to vector<8x1x320xbf16>
    %127 = vector.shape_cast %126 : vector<8x1x320xbf16> to vector<8x320xbf16>
    %c9 = arith.constant 9 : index
    %c0_75 = arith.constant 0 : index
    %c0_76 = arith.constant 0 : index
    %128 = vector.load %arg6[%c9, %c0_75, %c0_76] : memref<20x320x128xbf16, #tpu.memory_space<vmem>>, vector<1x320x128xbf16>
    %129 = vector.shape_cast %128 : vector<1x320x128xbf16> to vector<320x128xbf16>
    %cst_77 = arith.constant dense<0.000000e+00> : vector<8x128xf32>
    %130 = tpu.matmul %127, %129, %cst_77 {dimension_numbers = #tpu.dot_dimension_numbers<[1], [0], [0], [1], [0, 0, 1, 1], [], []>} : vector<8x320xbf16>, vector<320x128xbf16>, vector<8x128xf32> -> vector<8x128xf32>
    %131 = arith.addf %125, %130 : vector<8x128xf32>
    %132 = vector.extract_strided_slice %72 {offsets = [0, 10, 0], sizes = [8, 1, 320], strides = [1, 1, 1]} : vector<8x20x320xbf16> to vector<8x1x320xbf16>
    %133 = vector.shape_cast %132 : vector<8x1x320xbf16> to vector<8x320xbf16>
    %c10 = arith.constant 10 : index
    %c0_78 = arith.constant 0 : index
    %c0_79 = arith.constant 0 : index
    %134 = vector.load %arg6[%c10, %c0_78, %c0_79] : memref<20x320x128xbf16, #tpu.memory_space<vmem>>, vector<1x320x128xbf16>
    %135 = vector.shape_cast %134 : vector<1x320x128xbf16> to vector<320x128xbf16>
    %cst_80 = arith.constant dense<0.000000e+00> : vector<8x128xf32>
    %136 = tpu.matmul %133, %135, %cst_80 {dimension_numbers = #tpu.dot_dimension_numbers<[1], [0], [0], [1], [0, 0, 1, 1], [], []>} : vector<8x320xbf16>, vector<320x128xbf16>, vector<8x128xf32> -> vector<8x128xf32>
    %137 = arith.addf %131, %136 : vector<8x128xf32>
    %138 = vector.extract_strided_slice %72 {offsets = [0, 11, 0], sizes = [8, 1, 320], strides = [1, 1, 1]} : vector<8x20x320xbf16> to vector<8x1x320xbf16>
    %139 = vector.shape_cast %138 : vector<8x1x320xbf16> to vector<8x320xbf16>
    %c11 = arith.constant 11 : index
    %c0_81 = arith.constant 0 : index
    %c0_82 = arith.constant 0 : index
    %140 = vector.load %arg6[%c11, %c0_81, %c0_82] : memref<20x320x128xbf16, #tpu.memory_space<vmem>>, vector<1x320x128xbf16>
    %141 = vector.shape_cast %140 : vector<1x320x128xbf16> to vector<320x128xbf16>
    %cst_83 = arith.constant dense<0.000000e+00> : vector<8x128xf32>
    %142 = tpu.matmul %139, %141, %cst_83 {dimension_numbers = #tpu.dot_dimension_numbers<[1], [0], [0], [1], [0, 0, 1, 1], [], []>} : vector<8x320xbf16>, vector<320x128xbf16>, vector<8x128xf32> -> vector<8x128xf32>
    %143 = arith.addf %137, %142 : vector<8x128xf32>
    %144 = vector.extract_strided_slice %72 {offsets = [0, 12, 0], sizes = [8, 1, 320], strides = [1, 1, 1]} : vector<8x20x320xbf16> to vector<8x1x320xbf16>
    %145 = vector.shape_cast %144 : vector<8x1x320xbf16> to vector<8x320xbf16>
    %c12 = arith.constant 12 : index
    %c0_84 = arith.constant 0 : index
    %c0_85 = arith.constant 0 : index
    %146 = vector.load %arg6[%c12, %c0_84, %c0_85] : memref<20x320x128xbf16, #tpu.memory_space<vmem>>, vector<1x320x128xbf16>
    %147 = vector.shape_cast %146 : vector<1x320x128xbf16> to vector<320x128xbf16>
    %cst_86 = arith.constant dense<0.000000e+00> : vector<8x128xf32>
    %148 = tpu.matmul %145, %147, %cst_86 {dimension_numbers = #tpu.dot_dimension_numbers<[1], [0], [0], [1], [0, 0, 1, 1], [], []>} : vector<8x320xbf16>, vector<320x128xbf16>, vector<8x128xf32> -> vector<8x128xf32>
    %149 = arith.addf %143, %148 : vector<8x128xf32>
    %150 = vector.extract_strided_slice %72 {offsets = [0, 13, 0], sizes = [8, 1, 320], strides = [1, 1, 1]} : vector<8x20x320xbf16> to vector<8x1x320xbf16>
    %151 = vector.shape_cast %150 : vector<8x1x320xbf16> to vector<8x320xbf16>
    %c13 = arith.constant 13 : index
    %c0_87 = arith.constant 0 : index
    %c0_88 = arith.constant 0 : index
    %152 = vector.load %arg6[%c13, %c0_87, %c0_88] : memref<20x320x128xbf16, #tpu.memory_space<vmem>>, vector<1x320x128xbf16>
    %153 = vector.shape_cast %152 : vector<1x320x128xbf16> to vector<320x128xbf16>
    %cst_89 = arith.constant dense<0.000000e+00> : vector<8x128xf32>
    %154 = tpu.matmul %151, %153, %cst_89 {dimension_numbers = #tpu.dot_dimension_numbers<[1], [0], [0], [1], [0, 0, 1, 1], [], []>} : vector<8x320xbf16>, vector<320x128xbf16>, vector<8x128xf32> -> vector<8x128xf32>
    %155 = arith.addf %149, %154 : vector<8x128xf32>
    %156 = vector.extract_strided_slice %72 {offsets = [0, 14, 0], sizes = [8, 1, 320], strides = [1, 1, 1]} : vector<8x20x320xbf16> to vector<8x1x320xbf16>
    %157 = vector.shape_cast %156 : vector<8x1x320xbf16> to vector<8x320xbf16>
    %c14 = arith.constant 14 : index
    %c0_90 = arith.constant 0 : index
    %c0_91 = arith.constant 0 : index
    %158 = vector.load %arg6[%c14, %c0_90, %c0_91] : memref<20x320x128xbf16, #tpu.memory_space<vmem>>, vector<1x320x128xbf16>
    %159 = vector.shape_cast %158 : vector<1x320x128xbf16> to vector<320x128xbf16>
    %cst_92 = arith.constant dense<0.000000e+00> : vector<8x128xf32>
    %160 = tpu.matmul %157, %159, %cst_92 {dimension_numbers = #tpu.dot_dimension_numbers<[1], [0], [0], [1], [0, 0, 1, 1], [], []>} : vector<8x320xbf16>, vector<320x128xbf16>, vector<8x128xf32> -> vector<8x128xf32>
    %161 = arith.addf %155, %160 : vector<8x128xf32>
    %162 = vector.extract_strided_slice %72 {offsets = [0, 15, 0], sizes = [8, 1, 320], strides = [1, 1, 1]} : vector<8x20x320xbf16> to vector<8x1x320xbf16>
    %163 = vector.shape_cast %162 : vector<8x1x320xbf16> to vector<8x320xbf16>
    %c15 = arith.constant 15 : index
    %c0_93 = arith.constant 0 : index
    %c0_94 = arith.constant 0 : index
    %164 = vector.load %arg6[%c15, %c0_93, %c0_94] : memref<20x320x128xbf16, #tpu.memory_space<vmem>>, vector<1x320x128xbf16>
    %165 = vector.shape_cast %164 : vector<1x320x128xbf16> to vector<320x128xbf16>
    %cst_95 = arith.constant dense<0.000000e+00> : vector<8x128xf32>
    %166 = tpu.matmul %163, %165, %cst_95 {dimension_numbers = #tpu.dot_dimension_numbers<[1], [0], [0], [1], [0, 0, 1, 1], [], []>} : vector<8x320xbf16>, vector<320x128xbf16>, vector<8x128xf32> -> vector<8x128xf32>
    %167 = arith.addf %161, %166 : vector<8x128xf32>
    %168 = vector.extract_strided_slice %72 {offsets = [0, 16, 0], sizes = [8, 1, 320], strides = [1, 1, 1]} : vector<8x20x320xbf16> to vector<8x1x320xbf16>
    %169 = vector.shape_cast %168 : vector<8x1x320xbf16> to vector<8x320xbf16>
    %c16 = arith.constant 16 : index
    %c0_96 = arith.constant 0 : index
    %c0_97 = arith.constant 0 : index
    %170 = vector.load %arg6[%c16, %c0_96, %c0_97] : memref<20x320x128xbf16, #tpu.memory_space<vmem>>, vector<1x320x128xbf16>
    %171 = vector.shape_cast %170 : vector<1x320x128xbf16> to vector<320x128xbf16>
    %cst_98 = arith.constant dense<0.000000e+00> : vector<8x128xf32>
    %172 = tpu.matmul %169, %171, %cst_98 {dimension_numbers = #tpu.dot_dimension_numbers<[1], [0], [0], [1], [0, 0, 1, 1], [], []>} : vector<8x320xbf16>, vector<320x128xbf16>, vector<8x128xf32> -> vector<8x128xf32>
    %173 = arith.addf %167, %172 : vector<8x128xf32>
    %174 = vector.extract_strided_slice %72 {offsets = [0, 17, 0], sizes = [8, 1, 320], strides = [1, 1, 1]} : vector<8x20x320xbf16> to vector<8x1x320xbf16>
    %175 = vector.shape_cast %174 : vector<8x1x320xbf16> to vector<8x320xbf16>
    %c17 = arith.constant 17 : index
    %c0_99 = arith.constant 0 : index
    %c0_100 = arith.constant 0 : index
    %176 = vector.load %arg6[%c17, %c0_99, %c0_100] : memref<20x320x128xbf16, #tpu.memory_space<vmem>>, vector<1x320x128xbf16>
    %177 = vector.shape_cast %176 : vector<1x320x128xbf16> to vector<320x128xbf16>
    %cst_101 = arith.constant dense<0.000000e+00> : vector<8x128xf32>
    %178 = tpu.matmul %175, %177, %cst_101 {dimension_numbers = #tpu.dot_dimension_numbers<[1], [0], [0], [1], [0, 0, 1, 1], [], []>} : vector<8x320xbf16>, vector<320x128xbf16>, vector<8x128xf32> -> vector<8x128xf32>
    %179 = arith.addf %173, %178 : vector<8x128xf32>
    %180 = vector.extract_strided_slice %72 {offsets = [0, 18, 0], sizes = [8, 1, 320], strides = [1, 1, 1]} : vector<8x20x320xbf16> to vector<8x1x320xbf16>
    %181 = vector.shape_cast %180 : vector<8x1x320xbf16> to vector<8x320xbf16>
    %c18 = arith.constant 18 : index
    %c0_102 = arith.constant 0 : index
    %c0_103 = arith.constant 0 : index
    %182 = vector.load %arg6[%c18, %c0_102, %c0_103] : memref<20x320x128xbf16, #tpu.memory_space<vmem>>, vector<1x320x128xbf16>
    %183 = vector.shape_cast %182 : vector<1x320x128xbf16> to vector<320x128xbf16>
    %cst_104 = arith.constant dense<0.000000e+00> : vector<8x128xf32>
    %184 = tpu.matmul %181, %183, %cst_104 {dimension_numbers = #tpu.dot_dimension_numbers<[1], [0], [0], [1], [0, 0, 1, 1], [], []>} : vector<8x320xbf16>, vector<320x128xbf16>, vector<8x128xf32> -> vector<8x128xf32>
    %185 = arith.addf %179, %184 : vector<8x128xf32>
    %186 = vector.extract_strided_slice %72 {offsets = [0, 19, 0], sizes = [8, 1, 320], strides = [1, 1, 1]} : vector<8x20x320xbf16> to vector<8x1x320xbf16>
    %187 = vector.shape_cast %186 : vector<8x1x320xbf16> to vector<8x320xbf16>
    %c19 = arith.constant 19 : index
    %c0_105 = arith.constant 0 : index
    %c0_106 = arith.constant 0 : index
    %188 = vector.load %arg6[%c19, %c0_105, %c0_106] : memref<20x320x128xbf16, #tpu.memory_space<vmem>>, vector<1x320x128xbf16>
    %189 = vector.shape_cast %188 : vector<1x320x128xbf16> to vector<320x128xbf16>
    %cst_107 = arith.constant dense<0.000000e+00> : vector<8x128xf32>
    %190 = tpu.matmul %187, %189, %cst_107 {dimension_numbers = #tpu.dot_dimension_numbers<[1], [0], [0], [1], [0, 0, 1, 1], [], []>} : vector<8x320xbf16>, vector<320x128xbf16>, vector<8x128xf32> -> vector<8x128xf32>
    %191 = arith.addf %185, %190 : vector<8x128xf32>
    %c0_108 = arith.constant 0 : index
    %c0_109 = arith.constant 0 : index
    %192 = vector.load %arg7[%c0_108, %c0_109] : memref<1x128xf32, #tpu.memory_space<vmem>>, vector<1x128xf32>
    %193 = vector.broadcast %192 : vector<1x128xf32> to vector<8x128xf32>
    %194 = arith.addf %191, %193 : vector<8x128xf32>
    %cst_110 = arith.constant 0.000000e+00 : f32
    %195 = vector.broadcast %cst_110 : f32 to vector<8x128xf32>
    %196 = arith.maximumf %194, %195 : vector<8x128xf32>
    %197 = arith.truncf %196 : vector<8x128xf32> to vector<8x128xbf16>
    %c0_111 = arith.constant 0 : index
    %c0_112 = arith.constant 0 : index
    %198 = vector.load %arg8[%c0_111, %c0_112] : memref<128x128xbf16, #tpu.memory_space<vmem>>, vector<128x128xbf16>
    %cst_113 = arith.constant dense<0.000000e+00> : vector<8x128xf32>
    %199 = tpu.matmul %197, %198, %cst_113 {dimension_numbers = #tpu.dot_dimension_numbers<[1], [0], [0], [1], [0, 0, 1, 1], [], []>} : vector<8x128xbf16>, vector<128x128xbf16>, vector<8x128xf32> -> vector<8x128xf32>
    %c0_114 = arith.constant 0 : index
    %c0_115 = arith.constant 0 : index
    %200 = vector.load %arg9[%c0_114, %c0_115] : memref<1x128xf32, #tpu.memory_space<vmem>>, vector<1x128xf32>
    %201 = vector.broadcast %200 : vector<1x128xf32> to vector<8x128xf32>
    %202 = arith.addf %199, %201 : vector<8x128xf32>
    %cst_116 = arith.constant 0.000000e+00 : f32
    %203 = vector.broadcast %cst_116 : f32 to vector<8x128xf32>
    %204 = arith.maximumf %202, %203 : vector<8x128xf32>
    %205 = arith.truncf %204 : vector<8x128xf32> to vector<8x128xbf16>
    %c0_117 = arith.constant 0 : index
    %c0_118 = arith.constant 0 : index
    %206 = vector.load %arg10[%c0_117, %c0_118] : memref<128x128xbf16, #tpu.memory_space<vmem>>, vector<128x128xbf16>
    %cst_119 = arith.constant dense<0.000000e+00> : vector<8x128xf32>
    %207 = tpu.matmul %205, %206, %cst_119 {dimension_numbers = #tpu.dot_dimension_numbers<[1], [0], [0], [1], [0, 0, 1, 1], [], []>} : vector<8x128xbf16>, vector<128x128xbf16>, vector<8x128xf32> -> vector<8x128xf32>
    %c0_120 = arith.constant 0 : index
    %c0_121 = arith.constant 0 : index
    %208 = vector.load %arg11[%c0_120, %c0_121] : memref<1x128xf32, #tpu.memory_space<vmem>>, vector<1x128xf32>
    %209 = vector.broadcast %208 : vector<1x128xf32> to vector<8x128xf32>
    %210 = arith.addf %207, %209 : vector<8x128xf32>
    %c0_122 = arith.constant 0 : index
    %c0_123 = arith.constant 0 : index
    %211 = vector.load %arg12[%c0_122, %c0_123] : memref<8x128xf32, #tpu.memory_space<vmem>>, vector<8x128xf32>
    tpu.vector_store %arg12[%c0_122, %c0_123], %210 {strides = array<i32>} : memref<8x128xf32, #tpu.memory_space<vmem>>, vector<8x128xf32>,
    return
  }
  func.func @transform_0(%arg0: i32) -> (i32, i32, i32) {
    %c0_i32 = arith.constant 0 : i32
    %c0_i32_0 = arith.constant 0 : i32
    %c0_i32_1 = arith.constant 0 : i32
    return %arg0, %c0_i32, %c0_i32_0 : i32, i32, i32
  }
  func.func @transform_1(%arg0: i32) -> (i32, i32, i32) {
    %c0_i32 = arith.constant 0 : i32
    %c0_i32_0 = arith.constant 0 : i32
    %c0_i32_1 = arith.constant 0 : i32
    %c0_i32_2 = arith.constant 0 : i32
    return %c0_i32, %c0_i32_0, %c0_i32_1 : i32, i32, i32
  }
  func.func @transform_2(%arg0: i32) -> (i32, i32) {
    %c0_i32 = arith.constant 0 : i32
    %c0_i32_0 = arith.constant 0 : i32
    %c0_i32_1 = arith.constant 0 : i32
    return %c0_i32, %c0_i32_0 : i32, i32
  }
  func.func @transform_3(%arg0: i32) -> (i32, i32, i32) {
    %c0_i32 = arith.constant 0 : i32
    %c0_i32_0 = arith.constant 0 : i32
    %c0_i32_1 = arith.constant 0 : i32
    %c0_i32_2 = arith.constant 0 : i32
    return %c0_i32, %c0_i32_0, %c0_i32_1 : i32, i32, i32
  }
  func.func @transform_4(%arg0: i32) -> (i32, i32) {
    %c0_i32 = arith.constant 0 : i32
    %c0_i32_0 = arith.constant 0 : i32
    %c0_i32_1 = arith.constant 0 : i32
    return %c0_i32, %c0_i32_0 : i32, i32
  }
  func.func @transform_5(%arg0: i32) -> (i32, i32, i32) {
    %c0_i32 = arith.constant 0 : i32
    %c0_i32_0 = arith.constant 0 : i32
    %c0_i32_1 = arith.constant 0 : i32
    %c0_i32_2 = arith.constant 0 : i32
    return %c0_i32, %c0_i32_0, %c0_i32_1 : i32, i32, i32
  }
  func.func @transform_6(%arg0: i32) -> (i32, i32) {
    %c0_i32 = arith.constant 0 : i32
    %c0_i32_0 = arith.constant 0 : i32
    %c0_i32_1 = arith.constant 0 : i32
    return %c0_i32, %c0_i32_0 : i32, i32
  }
  func.func @transform_7(%arg0: i32) -> (i32, i32) {
    %c0_i32 = arith.constant 0 : i32
    %c0_i32_0 = arith.constant 0 : i32
    %c0_i32_1 = arith.constant 0 : i32
    return %c0_i32, %c0_i32_0 : i32, i32
  }
  func.func @transform_8(%arg0: i32) -> (i32, i32) {
    %c0_i32 = arith.constant 0 : i32
    %c0_i32_0 = arith.constant 0 : i32
    %c0_i32_1 = arith.constant 0 : i32
    return %c0_i32, %c0_i32_0 : i32, i32
  }
  func.func @transform_9(%arg0: i32) -> (i32, i32) {
    %c0_i32 = arith.constant 0 : i32
    %c0_i32_0 = arith.constant 0 : i32
    %c0_i32_1 = arith.constant 0 : i32
    return %c0_i32, %c0_i32_0 : i32, i32
  }
  func.func @transform_10(%arg0: i32) -> (i32, i32) {
    %c0_i32 = arith.constant 0 : i32
    %c0_i32_0 = arith.constant 0 : i32
    %c0_i32_1 = arith.constant 0 : i32
    return %c0_i32, %c0_i32_0 : i32, i32
  }
  func.func @transform_11(%arg0: i32) -> (i32, i32) {
    %c0_i32 = arith.constant 0 : i32
    %c0_i32_0 = arith.constant 0 : i32
    return %arg0, %c0_i32 : i32, i32
  }
}

</mosaic_0001>

<bundles_post_ra>
// kernel: net_forward.1
= control target key start
LH: loop header
LB: loop body
LE: loop exit
PB: predicated region body
PF: predicated region fallthrough
CT: control target
= control target key end

     0   :  { %16 = vsyncpa [#allocation3], 0  ;;  %s23561_s0 = inlined_call_operand.vmem [shape: bf16[8,28,28], index: 0, kind: input, shape index: {}]   ;;  %s23562_s1 = inlined_call_operand.hbm [shape: bf16[5,28,192], index: 1, kind: input, shape index: {}]   ;;  %s23563_s2 = inlined_call_operand.hbm [shape: f32[1,192], index: 2, kind: input, shape index: {}]   ;;  %s23564_s3 = inlined_call_operand.hbm [shape: bf16[5,192,320], index: 3, kind: input, shape index: {}]   ;;  %s23565_s4 = inlined_call_operand.hbm [shape: f32[1,320], index: 4, kind: input, shape index: {}]   ;;  %s23566_s5 = inlined_call_operand.hbm [shape: bf16[20,320,128], index: 5, kind: input, shape index: {}]   ;;  %s23567_s6 = inlined_call_operand.hbm [shape: f32[1,128], index: 6, kind: input, shape index: {}]   ;;  %s23568_s7 = inlined_call_operand.hbm [shape: bf16[128,128], index: 7, kind: input, shape index: {}]   ;;  %s23569_s8 = inlined_call_operand.hbm [shape: f32[1,128], index: 8, kind: input, shape index: {}]   ;;  %s23570_s9 = inlined_call_operand.hbm [shape: bf16[128,128], index: 9, kind: input, shape index: {}]   ;;  %s23571_s10 = inlined_call_operand.hbm [shape: f32[1,128], index: 10, kind: input, shape index: {}]   ;;  %s23572_s11 = inlined_call_operand.vmem [shape: f32[8,128], index: 11, kind: output, shape index: {}]  }
   0x1   :  { %17 = vsyncpa [#allocation5], 0 }
   0x2   :  { %18 = vsyncpa [#allocation8], 0 }
   0x3   :  { %19 = vsyncpa [#allocation11], 0 }
   0x4   :  { %20 = vsyncpa [#allocation14], 0 }
   0x5   :  { %21 = vsyncpa [#allocation17], 0  ;;  %s17766_s17 = smov [#allocation4]   ;;  %s17767_s19 = smov [#allocation7]  }
   0x6   :  { %s42_s18 = sshll.u32 %s17766_s17, 4  ;;  %s64_s20 = sshll.u32 %s17767_s19, 4  ;;  %s43_s18 = int_to_ptr.vmem [resolvable:$true] %s42_s18  ;;  %s65_s20 = int_to_ptr.vmem [resolvable:$true] %s64_s20 }
   0x7   :  { %s17534_s23 = scalar_lea.hbm %s23563_s2, 32 }
   0x8   :  { %p17535_p0 = scmp.ne.s32.totalorder %s23563_s2, %s17534_s23  ;;  %p17538_p1 = scmp.lt.u32.totalorder %s17534_s23, %s23563_s2 }
   0xa   :  { %p17540_p2 = pnand %p17538_p1, %p17535_p0 }
   0xc   :  { %17543 = shalt.err (!%p17540_p2)
}
   0xd   :  { %s17544_s28 = scalar_lea.vmem %s43_s18, 32  ;;  %p17549_p4 = scmp.lt.s32.totalorder %s43_s18, %s43_s18 }
   0xe   :  { %p17545_p3 = scmp.ne.s32.totalorder %s43_s18, %s17544_s28  ;;  %p17550_p5 = scmp.lt.s32.totalorder %s17544_s28, %s17544_s28 }
  0x10   :  { %p17551_p6 = por %p17550_p5, %p17549_p4 }
  0x12   :  { %p17552_p7 = pnand %p17551_p6, %p17545_p3 }
  0x14   :  { %17555 = shalt.err (!%p17552_p7)
}
  0x15   :  { %45 = dma.hbm_to_vmem [thread:$0]  %s23563_s2, 32, %s43_s18, [#allocation5]  }
  0x16   :  { %s17556_s14 = scalar_lea.hbm %s23565_s4, 48 }
  0x17   :  { %p17557_p8 = scmp.ne.s32.totalorder %s23565_s4, %s17556_s14  ;;  %p17560_p9 = scmp.lt.u32.totalorder %s17556_s14, %s23565_s4 }
  0x19   :  { %p17562_p10 = pnand %p17560_p9, %p17557_p8 }
  0x1b   :  { %17565 = shalt.err (!%p17562_p10)
}
  0x1c   :  { %s17566_s21 = scalar_lea.vmem %s65_s20, 48  ;;  %s17570_s22 = scalar_lea.vmem %s65_s20, 64 }
  0x1d   :  { %p17567_p11 = scmp.ne.s32.totalorder %s65_s20, %s17566_s21  ;;  %p17571_p12 = scmp.lt.s32.totalorder %s65_s20, %s65_s20 }
  0x1e   :  { %p17572_p13 = scmp.lt.s32.totalorder %s17570_s22, %s17566_s21 }
  0x20   :  { %p17573_p0 = por %p17572_p13, %p17571_p12 }
  0x22   :  { %p17574_p1 = pnand %p17573_p0, %p17567_p11 }
  0x24   :  { %17577 = shalt.err (!%p17574_p1)
}
  0x25   :  { %67 = dma.hbm_to_vmem [thread:$0]  %s23565_s4, 48, %s65_s20, [#allocation8]  }
  0x26   :  { %s17768_s23 = smov [#allocation10]   ;;  %s17769_s25 = smov [#allocation13]  }
  0x27   :  { %s86_s24 = sshll.u32 %s17768_s23, 4  ;;  %s108_s26 = sshll.u32 %s17769_s25, 4  ;;  %s87_s24 = int_to_ptr.vmem [resolvable:$true] %s86_s24  ;;  %s109_s26 = int_to_ptr.vmem [resolvable:$true] %s108_s26 }
  0x28   :  { %s17578_s29 = scalar_lea.hbm %s23567_s6, 16 }
  0x29   :  { %p17579_p2 = scmp.ne.s32.totalorder %s23567_s6, %s17578_s29  ;;  %p17582_p3 = scmp.lt.u32.totalorder %s17578_s29, %s23567_s6 }
  0x2b   :  { %p17584_p4 = pnand %p17582_p3, %p17579_p2 }
  0x2d   :  { %17587 = shalt.err (!%p17584_p4)
}
  0x2e   :  { %s17588_s4 = scalar_lea.vmem %s87_s24, 16  ;;  %s17592_s20 = scalar_lea.vmem %s87_s24, 32 }
  0x2f   :  { %p17589_p5 = scmp.ne.s32.totalorder %s87_s24, %s17588_s4  ;;  %p17593_p6 = scmp.lt.s32.totalorder %s87_s24, %s87_s24 }
  0x30   :  { %p17594_p7 = scmp.lt.s32.totalorder %s17592_s20, %s17588_s4 }
  0x32   :  { %p17595_p8 = por %p17594_p7, %p17593_p6 }
  0x34   :  { %p17596_p9 = pnand %p17595_p8, %p17589_p5 }
  0x36   :  { %17599 = shalt.err (!%p17596_p9)
}
  0x37   :  { %89 = dma.hbm_to_vmem [thread:$0]  %s23567_s6, 16, %s87_s24, [#allocation11]  }
  0x38   :  { %s17600_s21 = scalar_lea.hbm %s23569_s8, 16 }
  0x39   :  { %p17601_p10 = scmp.ne.s32.totalorder %s23569_s8, %s17600_s21  ;;  %p17604_p11 = scmp.lt.u32.totalorder %s17600_s21, %s23569_s8 }
  0x3b   :  { %p17606_p12 = pnand %p17604_p11, %p17601_p10 }
  0x3d   :  { %17609 = shalt.err (!%p17606_p12)
}
  0x3e   :  { %s17610_s25 = scalar_lea.vmem %s109_s26, 16  ;;  %s17614_s27 = scalar_lea.vmem %s109_s26, 32 }
  0x3f   :  { %p17611_p13 = scmp.ne.s32.totalorder %s109_s26, %s17610_s25  ;;  %p17615_p0 = scmp.lt.s32.totalorder %s109_s26, %s109_s26 }
  0x40   :  { %p17616_p1 = scmp.lt.s32.totalorder %s17614_s27, %s17610_s25 }
  0x42   :  { %p17617_p2 = por %p17616_p1, %p17615_p0 }
  0x44   :  { %p17618_p3 = pnand %p17617_p2, %p17611_p13 }
  0x46   :  { %17621 = shalt.err (!%p17618_p3)
}
  0x47   :  { %111 = dma.hbm_to_vmem [thread:$0]  %s23569_s8, 16, %s109_s26, [#allocation14]  }
  0x48   :  { %s17770_s28 = smov [#allocation2]   ;;  %s17622_s13 = scalar_lea.hbm %s23562_s1, 2560 }
  0x49   :  { %s29_s29 = sshll.u32 %s17770_s28, 4  ;;  %p17623_p4 = scmp.ne.s32.totalorder %s23562_s1, %s17622_s13  ;;  %s30_s29 = int_to_ptr.vmem [resolvable:$true] %s29_s29 }
  0x4a   :  { %p17626_p5 = scmp.lt.u32.totalorder %s17622_s13, %s23562_s1 }
  0x4c   :  { %p17628_p6 = pnand %p17626_p5, %p17623_p4 }
  0x4e   :  { %17631 = shalt.err (!%p17628_p6)
}
  0x4f   :  { %s17632_s16 = scalar_lea.vmem %s30_s29, 2560  ;;  %p17637_p8 = scmp.lt.s32.totalorder %s30_s29, %s30_s29 }
  0x50   :  { %p17633_p7 = scmp.ne.s32.totalorder %s30_s29, %s17632_s16  ;;  %p17638_p9 = scmp.lt.s32.totalorder %s17632_s16, %s17632_s16 }
  0x52   :  { %p17639_p10 = por %p17638_p9, %p17637_p8 }
  0x54   :  { %p17640_p11 = pnand %p17639_p10, %p17633_p7 }
  0x56   :  { %17643 = shalt.err (!%p17640_p11)
}
  0x57   :  { %s17771_s8 = smov 128   ;;  %s17772_s26 = smov 8  }
  0x58   :  { %35 = dma.hbm_to_vmem [thread:$0]  %s23562_s1, 2560, %s30_s29, [#allocation3], %s17771_s8, %s17771_s8, %s17772_s26  }
  0x59   :  { %s17773_s21 = smov [#allocation6]   ;;  %s17644_s23 = scalar_lea.hbm %s23564_s3, 23040 }
  0x5a   :  { %s51_s22 = sshll.u32 %s17773_s21, 4  ;;  %p17645_p12 = scmp.ne.s32.totalorder %s23564_s3, %s17644_s23  ;;  %s52_s22 = int_to_ptr.vmem [resolvable:$true] %s51_s22 }
  0x5b   :  { %p17648_p13 = scmp.lt.u32.totalorder %s17644_s23, %s23564_s3 }
  0x5d   :  { %p17650_p0 = pnand %p17648_p13, %p17645_p12 }
  0x5f   :  { %17653 = shalt.err (!%p17650_p0)
}
  0x60   :  { %s17654_s28 = scalar_lea.vmem %s52_s22, 23040  ;;  %p17659_p2 = scmp.lt.s32.totalorder %s52_s22, %s52_s22 }
  0x61   :  { %p17655_p1 = scmp.ne.s32.totalorder %s52_s22, %s17654_s28  ;;  %p17660_p3 = scmp.lt.s32.totalorder %s17654_s28, %s17654_s28 }
  0x63   :  { %p17661_p4 = por %p17660_p3, %p17659_p2 }
  0x65   :  { %p17662_p5 = pnand %p17661_p4, %p17655_p1 }
  0x67   :  { %17665 = shalt.err (!%p17662_p5)
}
  0x68   :  { %s17774_s1 = smov 192   ;;  %s17775_s29 = smov 12  }
  0x69   :  { %57 = dma.hbm_to_vmem [thread:$0]  %s23564_s3, 23040, %s52_s22, [#allocation5], %s17774_s1, %s17774_s1, %s17775_s29  }
  0x6a   :  { %s17776_s13 = smov [#allocation9]   ;;  %s17666_s15 = scalar_lea.hbm %s23566_s5, 51200 }
  0x6b   :  { %s73_s14 = sshll.u32 %s17776_s13, 4  ;;  %p17667_p6 = scmp.ne.s32.totalorder %s23566_s5, %s17666_s15  ;;  %s74_s14 = int_to_ptr.vmem [resolvable:$true] %s73_s14 }
  0x6c   :  { %p17670_p7 = scmp.lt.u32.totalorder %s17666_s15, %s23566_s5 }
  0x6e   :  { %p17672_p8 = pnand %p17670_p7, %p17667_p6 }
  0x70   :  { %17675 = shalt.err (!%p17672_p8)
}
  0x71   :  { %s17676_s19 = scalar_lea.vmem %s74_s14, 51200  ;;  %p17681_p10 = scmp.lt.s32.totalorder %s74_s14, %s74_s14 }
  0x72   :  { %p17677_p9 = scmp.ne.s32.totalorder %s74_s14, %s17676_s19  ;;  %p17682_p11 = scmp.lt.s32.totalorder %s17676_s19, %s17676_s19 }
  0x74   :  { %p17683_p12 = por %p17682_p11, %p17681_p10 }
  0x76   :  { %p17684_p13 = pnand %p17683_p12, %p17677_p9 }
  0x78   :  { %17687 = shalt.err (!%p17684_p13)
}
  0x79   :  { %s17777_s3 = smov 64   ;;  %s17778_s21 = smov 4  }
  0x7a   :  { %79 = dma.hbm_to_vmem [thread:$0]  %s23566_s5, 51200, %s74_s14, [#allocation8], %s17777_s3, %s17777_s3, %s17778_s21  }
  0x7b   :  { %s17779_s18 = smov [#allocation12]   ;;  %s17780_s25 = smov [#allocation15]  }
  0x7c   :  { %s95_s23 = sshll.u32 %s17779_s18, 4  ;;  %s117_s27 = sshll.u32 %s17780_s25, 4  ;;  %s96_s23 = int_to_ptr.vmem [resolvable:$true] %s95_s23  ;;  %s118_s27 = int_to_ptr.vmem [resolvable:$true] %s117_s27 }
  0x7d   :  { %s17688_s28 = scalar_lea.hbm %s23568_s7, 1024 }
  0x7e   :  { %p17689_p0 = scmp.ne.s32.totalorder %s23568_s7, %s17688_s28  ;;  %p17692_p1 = scmp.lt.u32.totalorder %s17688_s28, %s23568_s7 }
  0x80   :  { %p17694_p2 = pnand %p17692_p1, %p17689_p0 }
  0x82   :  { %17697 = shalt.err (!%p17694_p2)
}
  0x83   :  { %s17698_s5 = scalar_lea.vmem %s96_s23, 1024  ;;  %p17703_p4 = scmp.lt.s32.totalorder %s96_s23, %s96_s23 }
  0x84   :  { %p17699_p3 = scmp.ne.s32.totalorder %s96_s23, %s17698_s5  ;;  %p17704_p5 = scmp.lt.s32.totalorder %s17698_s5, %s17698_s5 }
  0x86   :  { %p17705_p6 = por %p17704_p5, %p17703_p4 }
  0x88   :  { %p17706_p7 = pnand %p17705_p6, %p17699_p3 }
  0x8a   :  { %17709 = shalt.err (!%p17706_p7)
}
  0x8b   :  { %101 = dma.hbm_to_vmem [thread:$0]  %s23568_s7, 1024, %s96_s23, [#allocation11], %s17777_s3, %s17777_s3, %s17778_s21  }
  0x8c   :  { %s17710_s15 = scalar_lea.hbm %s23570_s9, 1024 }
  0x8d   :  { %p17711_p8 = scmp.ne.s32.totalorder %s23570_s9, %s17710_s15  ;;  %p17714_p9 = scmp.lt.u32.totalorder %s17710_s15, %s23570_s9 }
  0x8f   :  { %p17716_p10 = pnand %p17714_p9, %p17711_p8 }
  0x91   :  { %17719 = shalt.err (!%p17716_p10)
}
  0x92   :  { %s17720_s19 = scalar_lea.vmem %s118_s27, 1024  ;;  %p17725_p12 = scmp.lt.s32.totalorder %s118_s27, %s118_s27 }
  0x93   :  { %p17721_p11 = scmp.ne.s32.totalorder %s118_s27, %s17720_s19  ;;  %p17726_p13 = scmp.lt.s32.totalorder %s17720_s19, %s17720_s19 }
  0x95   :  { %p17727_p0 = por %p17726_p13, %p17725_p12 }
  0x97   :  { %p17728_p1 = pnand %p17727_p0, %p17721_p11 }
  0x99   :  { %17731 = shalt.err (!%p17728_p1)
}
  0x9a   :  { %123 = dma.hbm_to_vmem [thread:$0]  %s23570_s9, 1024, %s118_s27, [#allocation14], %s17777_s3, %s17777_s3, %s17778_s21  }
  0x9b   :  { %s17781_s2 = smov [#allocation16]   ;;  %s17732_s6 = scalar_lea.hbm %s23571_s10, 16 }
  0x9c   :  { %s130_s18 = sshll.u32 %s17781_s2, 4  ;;  %p17733_p2 = scmp.ne.s32.totalorder %s23571_s10, %s17732_s6  ;;  %s131_s18 = int_to_ptr.vmem [resolvable:$true] %s130_s18 }
  0x9d   :  { %p17736_p3 = scmp.lt.u32.totalorder %s17732_s6, %s23571_s10 }
  0x9f   :  { %p17738_p4 = pnand %p17736_p3, %p17733_p2 }
  0xa1   :  { %17741 = shalt.err (!%p17738_p4)
}
  0xa2   :  { %s17742_s30 = scalar_lea.vmem %s131_s18, 16  ;;  %s17746_s9 = scalar_lea.vmem %s131_s18, 32 }
  0xa3   :  { %p17743_p5 = scmp.ne.s32.totalorder %s131_s18, %s17742_s30  ;;  %p17747_p6 = scmp.lt.s32.totalorder %s131_s18, %s131_s18 }
  0xa4   :  { %p17748_p7 = scmp.lt.s32.totalorder %s17746_s9, %s17742_s30 }
  0xa6   :  { %p17749_p8 = por %p17748_p7, %p17747_p6 }
  0xa8   :  { %p17750_p9 = pnand %p17749_p8, %p17743_p5 }
  0xaa   :  { %17753 = shalt.err (!%p17750_p9)
}
  0xab   :  { %133 = dma.hbm_to_vmem [thread:$0]  %s23571_s10, 16, %s131_s18, [#allocation17]  }
  0xac   :  { %17754 = dma.done.wait [#allocation3], 2560  }
  0xad   :  { %17755 = vsyncadd [#allocation3], 4294964736 }
  0xae   :  { %17756 = dma.done.wait [#allocation5], 23072  }
  0xaf   :  { %17757 = vsyncadd [#allocation5], 4294944224 }
  0xb0   :  { %17758 = dma.done.wait [#allocation8], 51248  }
  0xb1   :  { %17759 = vsyncadd [#allocation8], 4294916048 }
  0xb2   :  { %17760 = dma.done.wait [#allocation11], 1040  }
  0xb3   :  { %17761 = vsyncadd [#allocation11], 4294966256 }
  0xb4   :  { %17762 = dma.done.wait [#allocation14], 1040  }
  0xb5   :  { %17763 = vsyncadd [#allocation14], 4294966256 }
  0xb6   :  { %17764 = dma.done.wait [#allocation17], 16  }
  0xb7   :  { %17765 = vsyncadd [#allocation17], 4294967280  ;;  %v23624_v0 = vmov 0   ;;  %v16772_v1 = vld [vmem:[#allocation2 + $0x24] ss:$8 sps:$4 sm:$0xff]   ;;  %vm572_vm0 = vcmask 1045504  }
  0xb8   :  { %611 = vmatprep.mubr.bf16.mxu0 %v23624_v0  ;;  %v16774_v2 = vld [vmem:[#allocation2 + $0x20] ss:$8 sps:$4 sm:$0xff]   ;;  %579 = vmatprep.subr.bf16.mxu0 %v16772_v1  ;;  %v16775_v3 = vld [vmem:[#allocation2 + $0x34] ss:$8 sps:$4 sm:$0x3f]   ;;  %vm535_vm4 = vcmask 228352  }
  0xb9   :  { %v16777_v4 = vld [vmem:[#allocation2 + $0x30] ss:$8 sps:$4 sm:$0x3f]   ;;  %580 = vmatpush1.bf16.msra.mxu0 %v16774_v2  ;;  %vm201_vm1 = vsmask.f32 3328  ;;  %vm1013_vm8 = vcmask 1042432  }
  0xba   :  { %vm202_vm2 = vsmask.f32 7440  ;;  %14560 = vmatprep.subr.msk.bf16.mxu0 %vm572_vm0, %v16775_v3  ;;  %v574_v5 = vsel %vm572_vm0, %v16777_v4, 0  ;;  %v16780_v6 = vld [vmem:[#allocation2 + $0x4] ss:$8 sps:$4 sm:$0xff]   ;;  %vm1014_vm9 = vcmask 1046532  }
  0xbb   :  { %v17981_v7 = vld [vmem:[%s23561_s0] sm:$0xf]  ;;  %v17986_v8 = vld [vmem:[%s23561_s0 + $0x4] sm:$0xf]  ;;  %v167_v9 = vld [vmem:[%s23561_s0 + $0x8] sm:$0xf] }
  0xbc   :  { %v205_v10 = vshrl.u32 %v17981_v7, 16  ;;  %v208_v11 = vshll.u32 %v17981_v7, 16  ;;  %v214_v12 = vshll.u32 %v17986_v8, 16  ;;  %v218_v13 = vshrl.u32 %v17986_v8, 16  ;;  %v17998_v15 = vld [vmem:[%s23561_s0 + $0xc] sm:$0x3]  ;;  %vm18013_vm3 = vmor %vm201_vm1, %vm202_vm2 }
  0xbd   :  { %v224_v14 = vshll.u32 %v167_v9, 16  ;;  %v228_v16 = vshrl.u32 %v167_v9, 16  ;;  %582 = vmatpush1.bf16.msra.mxu0 %v574_v5  ;;  %v18007_v21 = vld [vmem:[%s23561_s0 + $0x10] sm:$0xf]  ;;  %v18020_v31 = vld [vmem:[%s23561_s0 + $0x14] sm:$0xf]  ;;  %vm18479_vm10 = vmor %vm1013_vm8, %vm1014_vm9 }
  0xbe   :  { %v207_v17 = vrot.slane %v205_v10, 4  ;;  %v210_v18 = vrot.slane %v208_v11, 5  ;;  %v18000_v19 = vrot.slane %v205_v10, 5  ;;  %v18002_v20 = vrot.slane %v208_v11, 6  ;;  %852 = vmatprep.subr.bf16.mxu0 %v16780_v6  ;;  %v16778_v39 = vld [vmem:[#allocation2] ss:$8 sps:$4 sm:$0xff]  }
  0xbf   :  { %v216_v22 = vrot.slane %v214_v12, 5  ;;  %v220_v23 = vrot.slane %v218_v13, 4  ;;  %v1405_v24 = vrot.slane %v218_v13, 5  ;;  %v226_v26 = vrot.slane %v224_v14, 5  ;;  %v18034_v44 = vld [vmem:[%s23561_s0 + $0x18] sm:$0xf] }
  0xc0   :  { %v211_v25 = vor.u32 %v210_v18, %v207_v17  ;;  %v1403_v27 = vor.u32 %v18002_v20, %v18000_v19  ;;  %v1406_v28 = vrot.slane %v214_v12, 6  ;;  %v230_v32 = vrot.slane %v228_v16, 4  ;;  %v18044_v48 = vld [vmem:[%s23561_s0 + $0x1c] sm:$0x3]  ;;  %v18052_v53 = vld [vmem:[%s23561_s0 + $0x20] sm:$0xf] }
  0xc1   :  { %v221_v30 = vor.u32 %v220_v23, %v216_v22  ;;  %v23588_v33 = vshll.u32 %v17998_v15, 16  ;;  %v23622_v34 = vshrl.u32 %v18007_v21, 16  ;;  %v1411_v37 = vrot.slane %v224_v14, 6  ;;  %v18060_v58 = vld [vmem:[%s23561_s0 + $0x24] sm:$0xf] }
  0xc2   :  { %v212_v35 = vrot.slane %v211_v25, 4  ;;  %v18024_v36 = vor.u32 %v1406_v28, %v1405_v24  ;;  %v23605_v38 = vshll.u32 %v18007_v21, 16  ;;  %v231_v41 = vor.u32 %v230_v32, %v226_v26  ;;  %v16781_v10 = vld [vmem:[#allocation2 + $0x14] ss:$8 sps:$4 sm:$0x3f]  }
  0xc3   :  { %v222_v40 = vrot.slane %v221_v30, 4  ;;  %v236_v42 = vrot.slane %v23588_v33, 5  ;;  %v241_v43 = vrot.slane %v23622_v34, 4  ;;  %v23603_v47 = vshll.u32 %v18020_v31, 16  ;;  %v18101_v28 = vld [vmem:[%s23561_s0 + $0x30] sm:$0xf] }
  0xc4   :  { %v217_v45 = vsel %vm18013_vm3, %v212_v35, %v216_v22  ;;  %v244_v46 = vrot.slane %v23605_v38, 5  ;;  %v232_v50 = vrot.slane %v231_v41, 4  ;;  %v1410_v51 = vrot.slane %v228_v16, 5  ;;  %v18441_v19 = vld [vmem:[%s23561_s0 + $0x54] sm:$0xf] }
  0xc5   :  { %v227_v49 = vsel %vm18013_vm3, %v222_v40, %v226_v26  ;;  %v23604_v52 = vshrl.u32 %v18020_v31, 16  ;;  %v250_v56 = vrot.slane %v23603_v47, 5  ;;  %v23601_v57 = vshll.u32 %v18034_v44, 16  ;;  %v18096_v26 = vld [vmem:[%s23561_s0 + $0x28] sm:$0xf] }
  0xc6   :  { %v14544_v54 = vcombine.low %v217_v45, %v227_v49  ;;  %v245_v55 = vor.u32 %v244_v46, %v241_v43  ;;  %v237_v59 = vsel %vm18013_vm3, %v232_v50, %v236_v42  ;;  %v18064_v60 = vor.u32 %v1411_v37, %v1410_v51  ;;  %v18118_v45 = vld [vmem:[%s23561_s0 + $0x2c] sm:$0x3]  ;;  %v18123_v46 = vld [vmem:[%s23561_s0 + $0x34] sm:$0xf]  ;;  %v18446_v20 = vld [vmem:[%s23561_s0 + $0x58] sm:$0xf] }
  0xc7   :  { %v254_v61 = vrot.slane %v23604_v52, 4  ;;  %v23602_v62 = vshrl.u32 %v18034_v44, 16  ;;  %v260_v1 = vrot.slane %v23601_v57, 5  ;;  %v23587_v2 = vshll.u32 %v18044_v48, 16 }
  0xc8   :  { %23903 = vst [vmem:[#allocation24_spill] sm:$0xff] %v18064_v60  ;;  %14561 = vmatmul.mubr.msk.bf16.vlgmr.msra.gmra.mrb[0].mxu0 %vm535_vm4, %v14544_v54  ;;  %v246_v63 = vrot.slane %v245_v55, 4  ;;  %v23595_v3 = vshrl.u32 %v18052_v53, 16  ;;  %v23594_v6 = vshll.u32 %v18052_v53, 16  ;;  %v23589_v9 = vshll.u32 %v18060_v58, 16 }
  0xc9   :  { %853 = vmatpush1.bf16.msra.mxu0 %v16778_v39  ;;  %621 = vmatprep.mubr.bf16.mxu0 %v23624_v0  ;;  %v255_v4 = vor.u32 %v254_v61, %v250_v56  ;;  %v264_v5 = vrot.slane %v23602_v62, 4  ;;  %v23593_v12 = vshrl.u32 %v18060_v58, 16  ;;  %v270_v25 = vrot.slane %v23587_v2, 5  ;;  %v18130_v55 = vld [vmem:[%s23561_s0 + $0x38] sm:$0xf] }
  0xca   :  { %v251_v11 = vsel %vm18013_vm3, %v246_v63, %v250_v56  ;;  %v275_v14 = vrot.slane %v23595_v3, 4  ;;  %14589 = vmatprep.subr.msk.bf16.mxu0 %vm572_vm0, %v16781_v10  ;;  %v278_v17 = vrot.slane %v23594_v6, 5  ;;  %v284_v18 = vrot.slane %v23589_v9, 5  ;;  %v16783_v61 = vld [vmem:[#allocation2 + $0x10] ss:$8 sps:$4 sm:$0x3f]  }
  0xcb   :  { %v265_v13 = vor.u32 %v264_v5, %v260_v1  ;;  %v14545_v16 = vcombine.low %v237_v59, %v251_v11  ;;  %v288_v22 = vrot.slane %v23593_v12, 4  ;;  %v256_v23 = vrot.slane %v255_v4, 4  ;;  %v18140_v4 = vld [vmem:[%s23561_s0 + $0x3c] sm:$0x3]  ;;  %v18147_v11 = vld [vmem:[%s23561_s0 + $0x40] sm:$0xf] }
  0xcc   :  { %v23586_v30 = vshrl.u32 %v18096_v26, 16  ;;  %v279_v32 = vor.u32 %v278_v17, %v275_v14  ;;  %v23583_v37 = vshll.u32 %v18096_v26, 16  ;;  %v23582_v41 = vshrl.u32 %v18101_v28, 16 }
  0xcd   :  { %v266_v24 = vrot.slane %v265_v13, 4  ;;  %v289_v35 = vor.u32 %v288_v22, %v284_v18  ;;  %v261_v39 = vsel %vm18013_vm3, %v256_v23, %v260_v1  ;;  %v23578_v42 = vshll.u32 %v18101_v28, 16  ;;  %v16786_v22 = vld [vmem:[#allocation2 + $0x44] ss:$8 sps:$4 sm:$0xff]  }
  0xce   :  { %v298_v43 = vrot.slane %v23586_v30, 4  ;;  %v280_v50 = vrot.slane %v279_v32, 4  ;;  %v294_v54 = vrot.slane %v23583_v37, 5  ;;  %v309_v56 = vrot.slane %v23582_v41, 4  ;;  %v18244_v30 = vld [vmem:[%s23561_s0 + $0x60] sm:$0xf] }
  0xcf   :  { %v271_v40 = vsel %vm18013_vm3, %v266_v24, %v270_v25  ;;  %v290_v51 = vrot.slane %v289_v35, 4  ;;  %v312_v59 = vrot.slane %v23578_v42, 5  ;;  %v23577_v1 = vshll.u32 %v18118_v45, 16  ;;  %23908 = vst [vmem:[#allocation29_spill] sm:$0xff] %v18244_v30 }
  0xd0   :  { %14562 = vmatmul.mubr.msk.bf16.gmra.mrb[4].mxu0 %vm535_vm4, %v14545_v16  ;;  %v14546_v49 = vcombine.low %v261_v39, %v271_v40  ;;  %v299_v63 = vor.u32 %v298_v43, %v294_v54  ;;  %v23575_v5 = vshll.u32 %v18123_v46, 16  ;;  %v23576_v10 = vshrl.u32 %v18123_v46, 16 }
  0xd1   :  { %631 = vmatprep.mubr.bf16.mxu0 %v23624_v0  ;;  %v285_v13 = vsel %vm18013_vm3, %v280_v50, %v284_v18  ;;  %v295_v14 = vsel %vm18013_vm3, %v290_v51, %v294_v54  ;;  %v23573_v16 = vshll.u32 %v18130_v55, 16  ;;  %v23574_v17 = vshrl.u32 %v18130_v55, 16  ;;  %v18164_v18 = vld [vmem:[%s23561_s0 + $0x44] sm:$0xf]  ;;  %v18184_v54 = vld [vmem:[%s23561_s0 + $0x48] sm:$0xf] }
  0xd2   :  { %v313_v23 = vor.u32 %v312_v59, %v309_v56  ;;  %v847_v24 = vsel %vm572_vm0, %v16783_v61, 0  ;;  %v300_v25 = vrot.slane %v299_v63, 4  ;;  %v304_v32 = vrot.slane %v23577_v1, 5 }
  0xd3   :  { %v23579_v35 = vshll.u32 %v18140_v4, 16  ;;  %855 = vmatpush1.bf16.msra.mxu0 %v847_v24  ;;  %v14547_v39 = vcombine.low %v285_v13, %v295_v14  ;;  %v318_v40 = vrot.slane %v23575_v5, 5  ;;  %v322_v43 = vrot.slane %v23576_v10, 4  ;;  %v18193_v14 = vld [vmem:[%s23561_s0 + $0x54] sm:$0xf] }
  0xd4   :  { %1197 = vmatprep.subr.bf16.mxu0 %v16786_v22  ;;  %v18177_v50 = vrot.slane %v23573_v16, 5  ;;  %v332_v51 = vrot.slane %v23574_v17, 4  ;;  %v23580_v56 = vshrl.u32 %v18147_v11, 16  ;;  %v23581_v59 = vshll.u32 %v18147_v11, 16  ;;  %23904 = vst [vmem:[#allocation25_spill] sm:$0xff] %v18193_v14 }
  0xd5   :  { %v314_v61 = vrot.slane %v313_v23, 4  ;;  %v23584_v63 = vshll.u32 %v18164_v18, 16  ;;  %v23585_v13 = vshrl.u32 %v18164_v18, 16  ;;  %v18198_v22 = vld [vmem:[%s23561_s0 + $0x58] sm:$0xf]  ;;  %v305_v24 = vsel %vm18013_vm3, %v300_v25, %v304_v32 }
  0xd6   :  { %23905 = vst [vmem:[#allocation26_spill] sm:$0xff] %v18198_v22  ;;  %v338_v23 = vrot.slane %v23579_v35, 5  ;;  %v323_v16 = vor.u32 %v322_v43, %v318_v40  ;;  %v23590_v17 = vshrl.u32 %v18184_v54, 16  ;;  %v333_v1 = vor.u32 %v332_v51, %v18177_v50 }
  0xd7   :  { %v343_v42 = vrot.slane %v23580_v56, 4  ;;  %v346_v25 = vrot.slane %v23581_v59, 5  ;;  %v23596_v32 = vshrl.u32 %v18193_v14, 16  ;;  %v319_v43 = vsel %vm18013_vm3, %v314_v61, %v318_v40  ;;  %v18225_v56 = vld [vmem:[%s23561_s0 + $0x4c] sm:$0x3] }
  0xd8   :  { %14563 = vmatmul.mubr.msk.bf16.gmra.mrb[8].mxu0 %vm535_vm4, %v14546_v49  ;;  %v18173_v49 = vld [vmem:[%s23561_s0 + $0x50] sm:$0xf]  ;;  %v352_v35 = vrot.slane %v23584_v63, 5  ;;  %v23600_v51 = vshll.u32 %v18184_v54, 16  ;;  %23906 = vst [vmem:[#allocation27_spill] sm:$0xff] %v18225_v56  ;;  %v23597_v59 = vshll.u32 %v18193_v14, 16  ;;  %v14548_v2 = vcombine.low %v305_v24, %v319_v43 }
  0xd9   :  { %641 = vmatprep.mubr.bf16.mxu0 %v23624_v0  ;;  %v23592_v5 = vshrl.u32 %v18173_v49, 16  ;;  %v23591_v10 = vshll.u32 %v18173_v49, 16  ;;  %v23598_v41 = vshll.u32 %v18198_v22, 16  ;;  %v23599_v37 = vshrl.u32 %v18198_v22, 16 }
  0xda   :  { %v366_v40 = vrot.slane %v23590_v17, 4  ;;  %v324_v33 = vrot.slane %v323_v16, 4  ;;  %v334_v9 = vrot.slane %v333_v1, 4  ;;  %v390_v17 = vrot.slane %v23596_v32, 4 }
  0xdb   :  { %v377_v61 = vrot.slane %v23592_v5, 4  ;;  %v380_v63 = vrot.slane %v23591_v10, 5  ;;  %v18251_v10 = vld [vmem:[%s23561_s0 + $0x64] sm:$0xf]  ;;  %v347_v5 = vor.u32 %v346_v25, %v343_v42  ;;  %v362_v6 = vrot.slane %v23600_v51, 5 }
  0xdc   :  { %23909 = vst [vmem:[#allocation30_spill] sm:$0xff] %v18251_v10  ;;  %v23621_v3 = vshll.u32 %v18225_v56, 16  ;;  %v386_v24 = vrot.slane %v23597_v59, 5  ;;  %v396_v1 = vrot.slane %v23598_v41, 5  ;;  %v400_v16 = vrot.slane %v23599_v37, 4 }
  0xdd   :  { %v367_v43 = vor.u32 %v366_v40, %v362_v6  ;;  %v381_v32 = vor.u32 %v380_v63, %v377_v61  ;;  %v23620_v59 = vshrl.u32 %v18244_v30, 16  ;;  %v329_v41 = vsel %vm18013_vm3, %v324_v33, %v18177_v50 }
  0xde   :  { %v391_v42 = vor.u32 %v390_v17, %v386_v24  ;;  %v339_v63 = vsel %vm18013_vm3, %v334_v9, %v338_v23  ;;  %v23607_v17 = vshll.u32 %v18251_v10, 16  ;;  %v348_v40 = vrot.slane %v347_v5, 4 }
  0xdf   :  { %v372_v37 = vrot.slane %v23621_v3, 5  ;;  %v401_v51 = vor.u32 %v400_v16, %v396_v1  ;;  %v368_v57 = vrot.slane %v367_v43, 4  ;;  %v382_v62 = vrot.slane %v381_v32, 4  ;;  %v18580_v3 = vld [vmem:[%s23561_s0 + $0x64] sm:$0xf] }
  0xe0   :  { %14564 = vmatmul.mubr.msk.bf16.gmra.mrb[12].mxu0 %vm535_vm4, %v14547_v39  ;;  %v356_v39 = vrot.slane %v23585_v13, 4  ;;  %v18239_v13 = vld [vmem:[%s23561_s0 + $0x5c] sm:$0x3]  ;;  %v23608_v47 = vshrl.u32 %v18251_v10, 16  ;;  %v14549_v52 = vcombine.low %v329_v41, %v339_v63  ;;  %v392_v38 = vrot.slane %v391_v42, 4 }
  0xe1   :  { %651 = vmatprep.mubr.bf16.mxu0 %v23624_v0  ;;  %23907 = vst [vmem:[#allocation28_spill] sm:$0xff] %v18239_v13  ;;  %v23606_v25 = vshll.u32 %v18239_v13, 16  ;;  %v411_v9 = vrot.slane %v23620_v59, 4  ;;  %v420_v50 = vrot.slane %v23607_v17, 5  ;;  %v402_v23 = vrot.slane %v401_v51, 4 }
  0xe2   :  { %v357_v12 = vor.u32 %v356_v39, %v352_v35  ;;  %v18267_v39 = vld [vmem:[%s23561_s0 + $0x68] sm:$0xf]  ;;  %v424_v32 = vrot.slane %v23608_v47, 4  ;;  %v353_v43 = vsel %vm18013_vm3, %v348_v40, %v352_v35  ;;  %v387_v17 = vsel %vm18013_vm3, %v382_v62, %v386_v24  ;;  %v18592_v59 = vld [vmem:[%s23561_s0 + $0x40] sm:$0xf] }
  0xe3   :  { %23910 = vst [vmem:[#allocation31_spill] sm:$0xff] %v18267_v39  ;;  %v406_v33 = vrot.slane %v23606_v25, 5  ;;  %v23617_v41 = vshll.u32 %v18267_v39, 16  ;;  %v23618_v16 = vshrl.u32 %v18267_v39, 16  ;;  %vm1398_vm5 = vsmask.f32 2304 }
  0xe4   :  { %v358_v61 = vrot.slane %v357_v12, 4  ;;  %v18288_v12 = vld [vmem:[%s23561_s0 + $0x70] sm:$0xf]  ;;  %v425_v40 = vor.u32 %v424_v32, %v420_v50  ;;  %vm1399_vm6 = vsmask.f32 6416  ;;  %v23932_v14 = vshrl.u32 %v18007_v21, 16 }
  0xe5   :  { %23911 = vst [vmem:[#allocation32_spill] sm:$0xff] %v18288_v12  ;;  %v23610_v63 = vshrl.u32 %v18288_v12, 16  ;;  %v23609_v25 = vshll.u32 %v18288_v12, 16  ;;  %v407_v62 = vsel %vm18013_vm3, %v402_v23, %v406_v33  ;;  %vm18434_vm7 = vmor %vm1398_vm5, %vm1399_vm6  ;;  %vm1863_vm11 = vcmask 1041408  }
  0xe6   :  { %v363_v42 = vsel %vm18013_vm3, %v358_v61, %v362_v6  ;;  %v18315_v6 = vld [vmem:[%s23561_s0 + $0x6c] sm:$0x3]  ;;  %v434_v61 = vrot.slane %v23618_v16, 4  ;;  %v426_v23 = vrot.slane %v425_v40, 4  ;;  %v1421_v56 = vrot.slane %v23932_v14, 5 }
  0xe7   :  { %v14550_v51 = vcombine.low %v353_v43, %v363_v42  ;;  %23912 = vst [vmem:[#allocation33_spill] sm:$0xff] %v18315_v6  ;;  %v448_v24 = vrot.slane %v23609_v25, 5  ;;  %v23613_v33 = vshll.u32 %v18315_v6, 16  ;;  %v23939_v14 = vshll.u32 %v18052_v53, 16 }
  0xe8   :  { %14565 = vmatmul.mubr.msk.bf16.gmra.mrb[16].mxu0 %vm535_vm4, %v14548_v2  ;;  %v23619_v2 = vshll.u32 %v18244_v30, 16  ;;  %vm1864_vm12 = vcmask 1045508   ;;  %vm2716_vm14 = vsmask.f32 1280  ;;  %vm2717_vm15 = vsmask.f32 3336 }
  0xe9   :  { %661 = vmatprep.mubr.bf16.mxu0 %v23624_v0  ;;  %vm19252_vm13 = vmor %vm1863_vm11, %vm1864_vm12  ;;  %vm2721_vm2 = vsmask.f32 7448  ;;  %vm5426_vm6 = vsmask.f32 4368  ;;  %vm5428_vm8 = vsmask.f32 6424 }
  0xea   :  { %v414_v5 = vrot.slane %v23619_v2, 5  ;;  %v16810_v2 = vld [vmem:[#allocation2 + $0x84] ss:$8 sps:$4 sm:$0xff]   ;;  %vm19474_vm1 = vmor %vm2716_vm14, %vm2717_vm15  ;;  %vm4522_vm14 = vcmask 1042434  }
  0xec   :  { %v415_v35 = vor.u32 %v414_v5, %v411_v9  ;;  %v18345_v9 = vld [vmem:[%s23561_s0 + $0x7c] sm:$0x3] }
  0xed   :  { %23915 = vst [vmem:[#allocation36_spill] sm:$0xff] %v18345_v9 }
  0xf0   :  { %14566 = vmatmul.mubr.msk.bf16.gmra.mrb[20].mxu0 %vm535_vm4, %v14549_v52  ;;  %v373_v52 = vsel %vm18013_vm3, %v368_v57, %v372_v37  ;;  %v397_v57 = vsel %vm18013_vm3, %v392_v38, %v396_v1  ;;  %v18328_v37 = vld [vmem:[%s23561_s0 + $0x74] sm:$0xf]  ;;  %v18339_v38 = vld [vmem:[%s23561_s0 + $0x78] sm:$0xf]  ;;  %v416_v1 = vrot.slane %v415_v35, 4 }
  0xf1   :  { %671 = vmatprep.mubr.bf16.mxu0 %v23624_v0  ;;  %v14551_v47 = vcombine.low %v373_v52, %v387_v17  ;;  %23913 = vst [vmem:[#allocation34_spill] sm:$0xff] %v18328_v37  ;;  %v430_v17 = vrot.slane %v23617_v41, 5  ;;  %23914 = vst [vmem:[#allocation35_spill] sm:$0xff] %v18339_v38  ;;  %v14552_v5 = vcombine.low %v397_v57, %v407_v62  ;;  %v23611_v43 = vshll.u32 %v18328_v37, 16 }
  0xf2   :  { %v23614_v52 = vshll.u32 %v18339_v38, 16  ;;  %v23616_v25 = vshrl.u32 %v18339_v38, 16  ;;  %v421_v35 = vsel %vm18013_vm3, %v416_v1, %v420_v50  ;;  %v23615_v62 = vshll.u32 %v18345_v9, 16 }
  0xf3   :  { %v435_v32 = vor.u32 %v434_v61, %v430_v17  ;;  %v431_v40 = vsel %vm18013_vm3, %v426_v23, %v430_v17  ;;  %v454_v57 = vrot.slane %v23611_v43, 5 }
  0xf4   :  { %v468_v1 = vrot.slane %v23616_v25, 4 }
  0xf5   :  { %v436_v61 = vrot.slane %v435_v32, 4 }
  0xf8   :  { %14567 = vmatmul.mubr.msk.bf16.gmra.mrb[24].mxu0 %vm535_vm4, %v14550_v51  ;;  %v23612_v51 = vshrl.u32 %v18328_v37, 16 }
  0xf9   :  { %681 = vmatprep.mubr.bf16.mxu0 %v23624_v0 }
  0xfa   :  { %v458_v50 = vrot.slane %v23612_v51, 4 }
  0xfc   :  { %v459_v32 = vor.u32 %v458_v50, %v454_v57  ;;  %v16796_v50 = vld [vmem:[#allocation2 + $0x50] ss:$8 sps:$4 sm:$0x3f]  }
  0xfd   :  { %v1192_v29 = vsel %vm572_vm0, %v16796_v50, 0  ;;  %v17476_v50 = vld [vmem:[%s23561_s0 + $0x4] sm:$0xf] }
  0xfe   :  { %v460_v51 = vrot.slane %v459_v32, 4  ;;  %v18428_v32 = vld [vmem:[%s23561_s0 + $0x50] sm:$0xf] }
 0x100   :  { %14568 = vmatmul.mubr.msk.bf16.gmra.mrb[28].mxu0 %vm535_vm4, %v14551_v47  ;;  %v445_v47 = vrot.slane %v23610_v63, 4  ;;  %v440_v63 = vrot.slane %v23613_v33, 5 }
 0x101   :  { %691 = vmatprep.mubr.bf16.mxu0 %v23624_v0 }
 0x102   :  { %v449_v42 = vor.u32 %v448_v24, %v445_v47  ;;  %v464_v24 = vrot.slane %v23614_v52, 5  ;;  %v441_v17 = vsel %vm18013_vm3, %v436_v61, %v440_v63  ;;  %v474_v52 = vrot.slane %v23615_v62, 5  ;;  %v16784_v61 = vld [vmem:[#allocation2 + $0x40] ss:$8 sps:$4 sm:$0xff]  }
 0x104   :  { %v450_v47 = vrot.slane %v449_v42, 4  ;;  %v469_v42 = vor.u32 %v468_v1, %v464_v24  ;;  %v14578_v1 = vcombine.low %v18123_v46, %v18130_v55 }
 0x106   :  { %v455_v23 = vsel %vm18013_vm3, %v450_v47, %v454_v57  ;;  %v470_v33 = vrot.slane %v469_v42, 4  ;;  %v14573_v57 = vcombine.low %v17981_v7, %v17986_v8  ;;  %v16793_v47 = vld [vmem:[#allocation2 + $0x54] ss:$8 sps:$4 sm:$0x3f]   ;;  %v14580_v42 = vcombine.low %v18184_v54, %v18428_v32 }
 0x107   :  { %v14554_v43 = vcombine.low %v441_v17, %v455_v23  ;;  %v18399_v7 = vld [vmem:[%s23561_s0 + $0x14] sm:$0xf]  ;;  %v1404_v17 = vrot.slane %v1403_v27, 4  ;;  %v1409_v23 = vrot.slane %v18024_v36, 4  ;;  %v14581_v27 = vcombine.low %v18441_v19, %v18446_v20 }
 0x108   :  { %14569 = vmatmul.mubr.msk.bf16.gmra.mrb[32].mxu0 %vm535_vm4, %v14552_v5  ;;  %v14553_v5 = vcombine.low %v421_v35, %v431_v40  ;;  %v465_v35 = vsel %vm18013_vm3, %v460_v51, %v464_v24  ;;  %v475_v63 = vsel %vm18013_vm3, %v470_v33, %v474_v52  ;;  %v17470_v33 = vld [vmem:[%s23561_s0 + $0x8] sm:$0xf]  ;;  %v14575_v8 = vcombine.low %v18399_v7, %v18034_v44 }
 0x109   :  { %701 = vmatprep.mubr.bf16.mxu0 %v23624_v0  ;;  %v14555_v40 = vcombine.low %v465_v35, %v475_v63  ;;  %v14574_v51 = vcombine.low %v17470_v33, %v18007_v21  ;;  %v14576_v52 = vcombine.low %v18052_v53, %v18060_v58  ;;  %v14577_v24 = vcombine.low %v18096_v26, %v18101_v28 }
 0x10a   :  { %v23916_v35 = vmov 0  ;;  %v1408_v63 = vsel %vm18434_vm7, %v1404_v17, %v18024_v36  ;;  %v14583_v36 = vcombine.low %v18267_v39, %v18288_v12  ;;  %v18664_v39 = vld [vmem:[%s23561_s0 + $0x70] sm:$0xf]  ;;  %vm5423_vm3 = vsmask.f32 256 }
 0x10b   :  { %v23917_v35 = vsel %vm18434_vm7, 4294967295, %v23916_v35 }
 0x10c   :  { %23918 = vst [vmem:[#allocation37_spill] sm:$0xff] %v23917_v35 }
 0x110   :  { %14570 = vmatmul.mubr.msk.bf16.gmra.mrb[36].mxu0 %vm535_vm4, %v14553_v5  ;;  %v14579_v5 = vcombine.low %v18147_v11, %v18164_v18 }
 0x111   :  { %711 = vmatprep.mubr.bf16.mxu0 %v23624_v0 }
 0x118   :  { %14571 = vmatmul.mubr.msk.bf16.gmra.mrb[40].mxu0 %vm535_vm4, %v14554_v43  ;;  %v16804_v43 = vld [vmem:[#allocation2 + $0x64] ss:$8 sps:$4 sm:$0xff]  }
 0x119   :  { %721 = vmatprep.mubr.bf16.mxu0 %v23624_v0 }
 0x120   :  { %14572 = vmatmul.mubr.msk.bf16.gmra.mrb[44].mxu0 %vm535_vm4, %v14555_v40  ;;  %v1413_v40 = vsel %vm18434_vm7, %v1409_v23, %v18064_v60  ;;  %v23938_v60 = vshrl.u32 %v18052_v53, 16  ;;  %v23943_v53 = vshll.u32 %v18060_v58, 16 }
 0x121   :  { %884 = vmatprep.mubr.bf16.mxu0 %v23624_v0 }
 0x128   :  { %14590 = vmatmul.mubr.msk.bf16.vlgmr.msra.gmra.mrb[0].mxu0 %vm535_vm4, %v14573_v57  ;;  %v18463_v57 = vld [vmem:[%s23561_s0 + $0x60] sm:$0xf] }
 0x129   :  { %1198 = vmatpush1.bf16.msra.mxu0 %v16784_v61  ;;  %894 = vmatprep.mubr.bf16.mxu0 %v23624_v0  ;;  %v18456_v61 = vcombine.low %v1408_v63, %v1413_v40  ;;  %v17479_v63 = vld [vmem:[%s23561_s0 + $0x10] sm:$0xf] }
 0x12a   :  { %14626 = vmatprep.subr.msk.bf16.mxu0 %vm572_vm0, %v16793_v47  ;;  %v14582_v47 = vcombine.low %v18463_v57, %v18251_v10  ;;  %v14603_v40 = vrot.slane %v17479_v63, 9  ;;  %v17482_v63 = vld [vmem:[%s23561_s0 + $0x20] sm:$0xf] }
 0x12b   :  { %23919 = vst [vmem:[#allocation38_spill] sm:$0xff] %v18456_v61  ;;  %v14604_v62 = vrot.slane %v17482_v63, 9  ;;  %v17484_v63 = vld [vmem:[%s23561_s0 + $0x28] sm:$0xf] }
 0x12c   :  { %v1041_v41 = vrot.slane %v17484_v63, 5 }
 0x12d   :  { %1200 = vmatpush1.bf16.msra.mxu0 %v1192_v29  ;;  %v17477_v29 = vld [vmem:[%s23561_s0] sm:$0xf] }
 0x12e   :  { %1662 = vmatprep.subr.bf16.mxu0 %v16804_v43  ;;  %v1018_v43 = vrot.slane %v17476_v50, 5  ;;  %v17480_v50 = vld [vmem:[%s23561_s0 + $0x18] sm:$0xf] }
 0x130   :  { %14591 = vmatmul.mubr.msk.bf16.gmra.mrb[4].mxu0 %vm535_vm4, %v14574_v51  ;;  %v14602_v51 = vrot.slane %v17477_v29, 9 }
 0x131   :  { %904 = vmatprep.mubr.bf16.mxu0 %v23624_v0 }
 0x138   :  { %14592 = vmatmul.mubr.msk.bf16.gmra.mrb[8].mxu0 %vm535_vm4, %v14575_v8 }
 0x139   :  { %914 = vmatprep.mubr.bf16.mxu0 %v23624_v0 }
 0x140   :  { %14593 = vmatmul.mubr.msk.bf16.gmra.mrb[12].mxu0 %vm535_vm4, %v14576_v52  ;;  %v1020_v52 = vrot.slane %v1018_v43, 4 }
 0x141   :  { %924 = vmatprep.mubr.bf16.mxu0 %v23624_v0 }
 0x148   :  { %14594 = vmatmul.mubr.msk.bf16.gmra.mrb[16].mxu0 %vm535_vm4, %v14577_v24  ;;  %v1021_v24 = vrot.slane %v17470_v33, 5  ;;  %v18495_v33 = vld [vmem:[%s23561_s0 + $0xc] sm:$0x3] }
 0x149   :  { %934 = vmatprep.mubr.bf16.mxu0 %v23624_v0  ;;  %v1415_v13 = vshrl.u32 %v18495_v33, 16 }
 0x14a   :  { %v1022_v17 = vsel %vm18479_vm10, %v1020_v52, %v1021_v24  ;;  %v1023_v23 = vrot.slane %v1021_v24, 4  ;;  %v18507_v24 = vld [vmem:[%s23561_s0 + $0x1c] sm:$0x3] }
 0x14b   :  { %v18690_v22 = vrot.slane %v1415_v13, 5 }
 0x14d   :  { %23931 = vst [vmem:[#allocation41_spill] sm:$0xff] %v18690_v22  ;;  %v1441_v22 = vrot.slane %v23938_v60, 5  ;;  %v23942_v60 = vshrl.u32 %v18060_v58, 16 }
 0x150   :  { %14595 = vmatmul.mubr.msk.bf16.gmra.mrb[20].mxu0 %vm535_vm4, %v14578_v1  ;;  %v14584_v1 = vcombine.low %v18328_v37, %v18339_v38 }
 0x151   :  { %944 = vmatprep.mubr.bf16.mxu0 %v23624_v0 }
 0x158   :  { %14596 = vmatmul.mubr.msk.bf16.gmra.mrb[24].mxu0 %vm535_vm4, %v14579_v5  ;;  %v1019_v5 = vsel %vm18479_vm10, %v14602_v51, %v1018_v43  ;;  %v1031_v43 = vrot.slane %v17480_v50, 5  ;;  %v16805_v51 = vld [vmem:[#allocation2 + $0x74] ss:$8 sps:$4 sm:$0x3f]   ;;  %v17483_v50 = vld [vmem:[%s23561_s0 + $0x24] sm:$0xf] }
 0x159   :  { %954 = vmatprep.mubr.bf16.mxu0 %v23624_v0  ;;  %v14610_v29 = vcombine.low %v1019_v5, %v1022_v17  ;;  %v1038_v25 = vrot.slane %v17483_v50, 5 }
 0x15a   :  { %v1033_v52 = vrot.slane %v1031_v43, 4 }
 0x160   :  { %14597 = vmatmul.mubr.msk.bf16.gmra.mrb[28].mxu0 %vm535_vm4, %v14580_v42  ;;  %v1028_v42 = vrot.slane %v18399_v7, 5  ;;  %v16807_v7 = vld [vmem:[#allocation2 + $0x70] ss:$8 sps:$4 sm:$0x3f]  }
 0x161   :  { %964 = vmatprep.mubr.bf16.mxu0 %v23624_v0  ;;  %v1657_v16 = vsel %vm572_vm0, %v16807_v7, 0 }
 0x162   :  { %v1029_v17 = vsel %vm18479_vm10, %v14603_v40, %v1028_v42  ;;  %v18536_v40 = vld [vmem:[%s23561_s0 + $0x2c] sm:$0x3] }
 0x163   :  { %v1044_v7 = vrot.slane %v18536_v40, 5 }
 0x168   :  { %14598 = vmatmul.mubr.msk.bf16.gmra.mrb[32].mxu0 %vm535_vm4, %v14581_v27  ;;  %v1024_v27 = vrot.slane %v18495_v33, 5  ;;  %v18678_v33 = vld [vmem:[%s23561_s0 + $0x7c] sm:$0x3] }
 0x169   :  { %974 = vmatprep.mubr.bf16.mxu0 %v23624_v0  ;;  %23929 = vst [vmem:[#allocation40_spill] sm:$0xff] %v18678_v33 }
 0x16a   :  { %v1025_v5 = vsel %vm18479_vm10, %v1023_v23, %v1024_v27 }
 0x16b   :  { %v14611_v27 = vcombine.low %v1025_v5, %v1029_v17  ;;  %v18555_v5 = vld [vmem:[%s23561_s0 + $0x38] sm:$0xf] }
 0x16c   :  { %v23627_v17 = vrot.slane %v18555_v5, 5 }
 0x170   :  { %14599 = vmatmul.mubr.msk.bf16.gmra.mrb[36].mxu0 %vm535_vm4, %v14582_v47  ;;  %v16802_v47 = vld [vmem:[#allocation2 + $0x60] ss:$8 sps:$4 sm:$0xff]  }
 0x171   :  { %984 = vmatprep.mubr.bf16.mxu0 %v23624_v0 }
 0x178   :  { %14600 = vmatmul.mubr.msk.bf16.gmra.mrb[40].mxu0 %vm535_vm4, %v14583_v36  ;;  %v1030_v36 = vrot.slane %v1028_v42, 4  ;;  %v1043_v42 = vrot.slane %v1041_v41, 4 }
 0x179   :  { %994 = vmatprep.mubr.bf16.mxu0 %v23624_v0 }
 0x180   :  { %14601 = vmatmul.mubr.msk.bf16.gmra.mrb[44].mxu0 %vm535_vm4, %v14584_v1  ;;  %v1034_v1 = vrot.slane %v18507_v24, 5 }
 0x181   :  { %1229 = vmatprep.mubr.bf16.mxu0 %v23624_v0 }
 0x188   :  { %14627 = vmatmul.mubr.msk.bf16.vlgmr.msra.gmra.mrb[0].mxu0 %vm535_vm4, %v14610_v29  ;;  %v1040_v29 = vrot.slane %v1038_v25, 4 }
 0x189   :  { %1663 = vmatpush1.bf16.msra.mxu0 %v16802_v47  ;;  %1239 = vmatprep.mubr.bf16.mxu0 %v23624_v0  ;;  %v18530_v47 = vld [vmem:[%s23561_s0 + $0x34] sm:$0xf] }
 0x18a   :  { %14655 = vmatprep.subr.msk.bf16.mxu0 %vm572_vm0, %v16805_v51  ;;  %v23623_v23 = vrot.slane %v18530_v47, 5  ;;  %v17487_v51 = vld [vmem:[%s23561_s0 + $0x30] sm:$0xf]  ;;  %v23930_v30 = vrot.slane %v18530_v47, 5  ;;  %v23935_v47 = vshll.u32 %v18020_v31, 16 }
 0x18b   :  { %v14605_v50 = vrot.slane %v17487_v51, 9  ;;  %v18561_v51 = vld [vmem:[%s23561_s0 + $0x3c] sm:$0x3] }
 0x18c   :  { %v18544_v63 = vrot.slane %v23623_v23, 4  ;;  %v1039_v23 = vsel %vm18479_vm10, %v14604_v62, %v1038_v25  ;;  %v18608_v62 = vld [vmem:[%s23561_s0 + $0x4c] sm:$0x3] }
 0x18d   :  { %1665 = vmatpush1.bf16.msra.mxu0 %v1657_v16  ;;  %v1035_v16 = vsel %vm18479_vm10, %v1033_v52, %v1034_v1  ;;  %v18573_v52 = vld [vmem:[%s23561_s0 + $0x48] sm:$0xf]  ;;  %v23924_v1 = vmov 0  }
 0x18e   :  { %2047 = vmatprep.subr.bf16.mxu0 %v16810_v2  ;;  %v1032_v2 = vsel %vm18479_vm10, %v1030_v36, %v1031_v43  ;;  %v18567_v36 = vld [vmem:[%s23561_s0 + $0x44] sm:$0xf]  ;;  %v1053_v43 = vrot.slane %v23627_v17, 4  ;;  %v23923_v25 = vrot.slane %v18573_v52, 5  ;;  %v23925_v17 = vrot.slane %v18446_v20, 5 }
 0x18f   :  { %v14612_v34 = vcombine.low %v1032_v2, %v1035_v16  ;;  %v23922_v9 = vrot.slane %v18567_v36, 5  ;;  %v23633_v2 = vrot.slane %v18441_v19, 5  ;;  %v18630_v16 = vld [vmem:[%s23561_s0 + $0x5c] sm:$0x3] }
 0x190   :  { %14628 = vmatmul.mubr.msk.bf16.gmra.mrb[4].mxu0 %vm535_vm4, %v14611_v27  ;;  %v18625_v38 = vrot.slane %v23925_v17, 4  ;;  %v18645_v17 = vld [vmem:[%s23561_s0 + $0x6c] sm:$0x3] }
 0x191   :  { %1249 = vmatprep.mubr.bf16.mxu0 %v23624_v0  ;;  %v1042_v0 = vsel %vm18479_vm10, %v1040_v29, %v1041_v41  ;;  %v18597_v27 = vrot.slane %v23922_v9, 4  ;;  %v18603_v41 = vrot.slane %v23923_v25, 4  ;;  %v18615_v9 = vld [vmem:[%s23561_s0 + $0x68] sm:$0xf]  ;;  %v18621_v25 = vrot.slane %v23633_v2, 4 }
 0x192   :  { %v23927_v2 = vrot.slane %v18615_v9, 5  ;;  %v18651_v29 = vld [vmem:[%s23561_s0 + $0x74] sm:$0xf]  ;;  %v14613_v10 = vcombine.low %v1039_v23, %v1042_v0  ;;  %v1045_v23 = vsel %vm18479_vm10, %v1043_v42, %v1044_v7  ;;  %v23933_v0 = vshll.u32 %v18007_v21, 16 }
 0x193   :  { %v23645_v37 = vrot.slane %v18651_v29, 5  ;;  %v1426_v7 = vrot.slane %v23935_v47, 6  ;;  %v1442_v21 = vrot.slane %v23939_v14, 6  ;;  %v1435_v47 = vshrl.u32 %v18507_v24, 16 }
 0x194   :  { %v18640_v12 = vrot.slane %v23927_v2, 4  ;;  %v23947_v24 = vrot.slane %v18592_v59, 9  ;;  %v23950_v59 = vshll.u32 %v18096_v26, 16 }
 0x195   :  { %v18669_v35 = vrot.slane %v23645_v37, 4  ;;  %v1049_v37 = vsel %vm18479_vm10, %v14605_v50, %v23930_v30  ;;  %v23936_v30 = vshrl.u32 %v18034_v44, 16 }
 0x196   :  { %v14614_v33 = vcombine.low %v1045_v23, %v1049_v37 }
 0x197   :  { %v1430_v50 = vrot.slane %v23936_v30, 5 }
 0x198   :  { %14629 = vmatmul.mubr.msk.bf16.gmra.mrb[8].mxu0 %vm535_vm4, %v14612_v34  ;;  %v23926_v34 = vrot.slane %v18580_v3, 5 }
 0x199   :  { %1259 = vmatprep.mubr.bf16.mxu0 %v23924_v1 }
 0x19a   :  { %v18636_v6 = vrot.slane %v23926_v34, 4  ;;  %v18657_v34 = vld [vmem:[%s23561_s0 + $0x78] sm:$0xf] }
 0x19b   :  { %v23646_v2 = vrot.slane %v18657_v34, 5 }
 0x19d   :  { %v18673_v61 = vrot.slane %v23646_v2, 4  ;;  %v23937_v2 = vshll.u32 %v18034_v44, 16 }
 0x19f   :  { %23928 = vst [vmem:[#allocation39_spill] sm:$0xff] %v18673_v61  ;;  %v23934_v61 = vshrl.u32 %v18020_v31, 16  ;;  %v1431_v13 = vrot.slane %v23937_v2, 6  ;;  %v23940_v31 = vrot.slane %v18555_v5, 5  ;;  %v1445_v2 = vrot.slane %v23942_v60, 5 }
 0x1a0   :  { %14630 = vmatmul.mubr.msk.bf16.gmra.mrb[12].mxu0 %vm535_vm4, %v14613_v10  ;;  %v1422_v10 = vrot.slane %v23933_v0, 6  ;;  %v1446_v0 = vrot.slane %v23943_v53, 6  ;;  %v18737_v60 = vrot.slane %v1435_v47, 5 }
 0x1a1   :  { %1269 = vmatprep.mubr.bf16.mxu0 %v23924_v1  ;;  %v1425_v42 = vrot.slane %v23934_v61, 5  ;;  %v1052_v37 = vsel %vm18479_vm10, %v18544_v63, %v23940_v31  ;;  %v23941_v61 = vrot.slane %v18561_v51, 5  ;;  %v18730_v14 = vor.u32 %v1431_v13, %v1430_v50 }
 0x1a2   :  { %v1423_v5 = vor.u32 %v1422_v10, %v1421_v56  ;;  %v1443_v31 = vor.u32 %v1442_v21, %v1441_v22  ;;  %v23946_v56 = vrot.slane %v18567_v36, 5  ;;  %v23948_v10 = vrot.slane %v18573_v52, 5 }
 0x1a3   :  { %v1055_v44 = vsel %vm18479_vm10, %v1053_v43, %v23941_v61  ;;  %v18728_v63 = vor.u32 %v1426_v7, %v1425_v42  ;;  %v18732_v43 = vor.u32 %v1446_v0, %v1445_v2  ;;  %v23949_v50 = vshrl.u32 %v18096_v26, 16 }
 0x1a4   :  { %v14615_v30 = vcombine.low %v1052_v37, %v1055_v44  ;;  %v18734_v61 = vrot.slane %v1423_v5, 4  ;;  %v1059_v22 = vsel %vm18479_vm10, %v23947_v24, %v23946_v56  ;;  %v1062_v42 = vsel %vm18479_vm10, %v18597_v27, %v23948_v10 }
 0x1a5   :  { %v1429_v58 = vrot.slane %v18728_v63, 4  ;;  %v18757_v7 = vrot.slane %v1443_v31, 4  ;;  %v1450_v36 = vrot.slane %v23949_v50, 5  ;;  %v1451_v13 = vrot.slane %v23950_v59, 6 }
 0x1a6   :  { %v1449_v21 = vrot.slane %v18732_v43, 4  ;;  %v1455_v52 = vshrl.u32 %v18536_v40, 16  ;;  %v23951_v37 = vshrl.u32 %v18101_v28, 16  ;;  %v23952_v27 = vshll.u32 %v18101_v28, 16 }
 0x1a7   :  { %v14616_v0 = vcombine.low %v1059_v22, %v1062_v42  ;;  %v23953_v26 = vshll.u32 %v18118_v45, 16  ;;  %v23954_v40 = vrot.slane %v18608_v62, 5  ;;  %v23956_v56 = vrot.slane %v18428_v32, 9 }
 0x1a8   :  { %14631 = vmatmul.mubr.msk.bf16.gmra.mrb[16].mxu0 %vm535_vm4, %v14614_v33  ;;  %v23944_v33 = vshll.u32 %v17998_v15, 16  ;;  %v23945_v15 = vshll.u32 %v18044_v48, 16  ;;  %v1434_v48 = vrot.slane %v18730_v14, 4  ;;  %v1461_v44 = vrot.slane %v23951_v37, 5 }
 0x1a9   :  { %1279 = vmatprep.mubr.bf16.mxu0 %v23924_v1  ;;  %v1462_v2 = vrot.slane %v23952_v27, 6  ;;  %v18772_v47 = vrot.slane %v1455_v52, 5  ;;  %v1065_v28 = vsel %vm18479_vm10, %v18603_v41, %v23954_v40  ;;  %v23957_v45 = vshrl.u32 %v18123_v46, 16 }
 0x1aa   :  { %v18725_v23 = vrot.slane %v23944_v33, 6  ;;  %v18741_v53 = vrot.slane %v23945_v15, 6  ;;  %v18769_v33 = vor.u32 %v1451_v13, %v1450_v36  ;;  %v23955_v15 = vrot.slane %v18441_v19, 5 }
 0x1ab   :  { %v1463_v31 = vor.u32 %v1462_v2, %v1461_v44  ;;  %v1465_v22 = vrot.slane %v23957_v45, 5  ;;  %v23958_v10 = vshll.u32 %v18123_v46, 16  ;;  %v23959_v50 = vshrl.u32 %v18130_v55, 16 }
 0x1ac   :  { %v1454_v5 = vrot.slane %v18769_v33, 4  ;;  %v1069_v24 = vsel %vm18479_vm10, %v23956_v56, %v23955_v15  ;;  %v23960_v41 = vshll.u32 %v18130_v55, 16  ;;  %v1475_v32 = vshrl.u32 %v18561_v51, 16 }
 0x1ad   :  { %v1466_v42 = vrot.slane %v23958_v10, 6  ;;  %v1470_v36 = vrot.slane %v23959_v50, 5  ;;  %v18799_v19 = vrot.slane %v1463_v31, 4  ;;  %v14617_v13 = vcombine.low %v1065_v28, %v1069_v24 }
 0x1ae   :  { %v1471_v59 = vrot.slane %v23960_v41, 6  ;;  %v23961_v46 = vrot.slane %v18446_v20, 5  ;;  %v23962_v55 = vrot.slane %v18630_v16, 5  ;;  %v18819_v2 = vrot.slane %v1475_v32, 5 }
 0x1af   :  { %v18804_v37 = vor.u32 %v1466_v42, %v1465_v22  ;;  %v23964_v20 = vshll.u32 %v18147_v11, 16  ;;  %v23965_v40 = vshll.u32 %v18140_v4, 16  ;;  %v23967_v56 = vshll.u32 %v18164_v18, 16 }
 0x1b0   :  { %14632 = vmatmul.mubr.msk.bf16.gmra.mrb[20].mxu0 %vm535_vm4, %v14615_v30  ;;  %v18776_v30 = vrot.slane %v23953_v26, 6  ;;  %v18802_v52 = vor.u32 %v1471_v59, %v1470_v36  ;;  %v1072_v44 = vsel %vm18479_vm10, %v18621_v25, %v23961_v46  ;;  %v1075_v27 = vsel %vm18479_vm10, %v18625_v38, %v23962_v55 }
 0x1b1   :  { %1289 = vmatprep.mubr.bf16.mxu0 %v23924_v1  ;;  %v1469_v51 = vrot.slane %v18804_v37, 4  ;;  %v1482_v31 = vrot.slane %v23964_v20, 6  ;;  %v18828_v28 = vrot.slane %v23965_v40, 6  ;;  %v23966_v38 = vshrl.u32 %v18164_v18, 16 }
 0x1b2   :  { %v1474_v25 = vrot.slane %v18802_v52, 4  ;;  %v1486_v24 = vrot.slane %v23967_v56, 6  ;;  %v14618_v45 = vcombine.low %v1072_v44, %v1075_v27  ;;  %v23968_v10 = vrot.slane %v18580_v3, 5  ;;  %v23979_v56 = vld [vmem:[#allocation40_spill] sm:$0xff] }
 0x1b3   :  { %v1485_v15 = vrot.slane %v23966_v38, 5  ;;  %v23970_v4 = vrot.slane %v18615_v9, 5  ;;  %v23971_v36 = vshrl.u32 %v18184_v54, 16  ;;  %v23972_v3 = vshll.u32 %v18184_v54, 16 }
 0x1b4   :  { %v23973_v9 = vrot.slane %v18645_v17, 5  ;;  %v23974_v46 = vrot.slane %v18651_v29, 5  ;;  %v23975_v44 = vrot.slane %v18664_v39, 9  ;;  %v23976_v27 = vshrl.u32 %v18173_v49, 16 }
 0x1b5   :  { %v1082_v50 = vsel %vm18479_vm10, %v18636_v6, %v23970_v4  ;;  %v1490_v41 = vrot.slane %v23971_v36, 5  ;;  %v1491_v59 = vrot.slane %v23972_v3, 6  ;;  %v23978_v38 = vrot.slane %v18657_v34, 5  ;;  %v23984_v4 = vld [vmem:[#allocation25_spill] sm:$0xff] }
 0x1b6   :  { %v1085_v6 = vsel %vm18479_vm10, %v18640_v12, %v23973_v9  ;;  %v1089_v54 = vsel %vm18479_vm10, %v23975_v44, %v23974_v46  ;;  %v16813_v12 = vld [vmem:[#allocation2 + $0x90] ss:$8 sps:$4 sm:$0x3f]   ;;  %v23985_v34 = vshrl.u32 %v23984_v4, 16  ;;  %v23986_v36 = vshll.u32 %v23984_v4, 16  ;;  %v23998_v4 = vld [vmem:[#allocation30_spill] sm:$0xff] }
 0x1b7   :  { %v18870_v55 = vor.u32 %v1491_v59, %v1490_v41  ;;  %v14620_v39 = vcombine.low %v1085_v6, %v1089_v54  ;;  %v1515_v3 = vshrl.u32 %v18630_v16, 16 }
 0x1b8   :  { %14633 = vmatmul.mubr.msk.bf16.gmra.mrb[24].mxu0 %vm535_vm4, %v14616_v0  ;;  %v23963_v0 = vshrl.u32 %v18147_v11, 16  ;;  %v23969_v11 = vrot.slane %v18463_v57, 9  ;;  %v1495_v57 = vshrl.u32 %v18608_v62, 16 }
 0x1b9   :  { %1299 = vmatprep.mubr.bf16.mxu0 %v23924_v1  ;;  %v1494_v29 = vrot.slane %v18870_v55, 4  ;;  %v18912_v54 = vrot.slane %v1515_v3, 5 }
 0x1ba   :  { %v1481_v26 = vrot.slane %v23963_v0, 5  ;;  %v1079_v42 = vsel %vm18479_vm10, %v23969_v11, %v23968_v10  ;;  %v1501_v0 = vrot.slane %v23976_v27, 5  ;;  %v23982_v10 = vld [vmem:[#allocation27_spill] sm:$0xff] }
 0x1bb   :  { %v14619_v32 = vcombine.low %v1079_v42, %v1082_v50  ;;  %v23983_v11 = vshll.u32 %v23982_v10, 16  ;;  %v1505_v50 = vrot.slane %v23985_v34, 5  ;;  %v16808_v27 = vld [vmem:[#allocation2 + $0x80] ss:$8 sps:$4 sm:$0xff]   ;;  %v23999_v34 = vshrl.u32 %v23998_v4, 16 }
 0x1bc   :  { %v1483_v22 = vor.u32 %v1482_v31, %v1481_v26  ;;  %v23977_v26 = vshll.u32 %v18173_v49, 16  ;;  %v18877_v31 = vrot.slane %v1495_v57, 5 }
 0x1bd   :  { %v18894_v42 = vrot.slane %v23983_v11, 6 }
 0x1be   :  { %v18847_v18 = vrot.slane %v1483_v22, 4  ;;  %v1502_v20 = vrot.slane %v23977_v26, 6  ;;  %v2042_v22 = vsel %vm572_vm0, %v16813_v12, 0  ;;  %v16811_v26 = vld [vmem:[#allocation2 + $0x94] ss:$8 sps:$4 sm:$0x3f]  }
 0x1bf   :  { %v23991_v12 = vld [vmem:[#allocation38_spill] sm:$0xff] }
 0x1c0   :  { %14634 = vmatmul.mubr.msk.bf16.gmra.mrb[28].mxu0 %vm535_vm4, %v14617_v13  ;;  %v18854_v13 = vor.u32 %v1486_v24, %v1485_v15  ;;  %v1503_v40 = vor.u32 %v1502_v20, %v1501_v0  ;;  %v1092_v15 = vsel %vm18479_vm10, %v18669_v35, %v23978_v38  ;;  %v23980_v24 = vrot.slane %v23979_v56, 5  ;;  %v23990_v0 = vld [vmem:[#allocation41_spill] sm:$0xff] }
 0x1c1   :  { %1309 = vmatprep.mubr.bf16.mxu0 %v23924_v1  ;;  %v1506_v35 = vrot.slane %v23986_v36, 6  ;;  %v1419_v16 = vor.u32 %v18725_v23, %v23990_v0  ;;  %v23995_v23 = vld [vmem:[#allocation29_spill] sm:$0xff]  ;;  %v24000_v36 = vshll.u32 %v23998_v4, 16 }
 0x1c2   :  { %v1489_v62 = vrot.slane %v18854_v13, 4  ;;  %v18900_v41 = vrot.slane %v1503_v40, 4  ;;  %v23997_v10 = vshll.u32 %v23995_v23, 16  ;;  %v16817_v38 = vld [vmem:[#allocation6 + $0x368] ss:$12 sps:$4 sm:$0xff]  }
 0x1c3   :  { %v18903_v59 = vor.u32 %v1506_v35, %v1505_v50  ;;  %v1525_v50 = vrot.slane %v23999_v34, 5  ;;  %v1526_v35 = vrot.slane %v24000_v36, 6  ;;  %v1468_v36 = vsel %vm18434_vm7, %v18799_v19, %v18804_v37  ;;  %v19042_v37 = vld [vmem:[%s23561_s0 + $0x4] sm:$0xf] }
 0x1c4   :  { %v1522_v11 = vrot.slane %v23997_v10, 6  ;;  %v1479_v19 = vor.u32 %v18828_v28, %v18819_v2 }
 0x1c5   :  { %v1509_v57 = vrot.slane %v18903_v59, 4 }
 0x1c8   :  { %14635 = vmatmul.mubr.msk.bf16.gmra.mrb[32].mxu0 %vm535_vm4, %v14618_v45  ;;  %v23981_v45 = vld [vmem:[#allocation39_spill] sm:$0xff] }
 0x1c9   :  { %1319 = vmatprep.mubr.bf16.mxu0 %v23924_v1  ;;  %v1095_v49 = vsel %vm18479_vm10, %v23981_v45, %v23980_v24  ;;  %v1428_v24 = vsel %vm18434_vm7, %v18734_v61, %v18728_v63  ;;  %v23996_v45 = vshrl.u32 %v23995_v23, 16  ;;  %v24001_v61 = vld [vmem:[#allocation28_spill] sm:$0xff]  ;;  %v1453_v23 = vsel %vm18434_vm7, %v1449_v21, %v18769_v33 }
 0x1ca   :  { %v14621_v8 = vcombine.low %v1092_v15, %v1095_v49  ;;  %vm3586_vm10 = vcmask 523264  }
 0x1cb   :  { %v1521_v49 = vrot.slane %v23996_v45, 5 }
 0x1d0   :  { %14636 = vmatmul.mubr.msk.bf16.gmra.mrb[36].mxu0 %vm535_vm4, %v14619_v32  ;;  %v23987_v32 = vld [vmem:[#allocation26_spill] sm:$0xff] }
 0x1d1   :  { %1329 = vmatprep.mubr.bf16.mxu0 %v23924_v1  ;;  %v23988_v9 = vshrl.u32 %v23987_v32, 16  ;;  %v23989_v46 = vshll.u32 %v23987_v32, 16 }
 0x1d3   :  { %v1510_v6 = vrot.slane %v23988_v9, 5  ;;  %v1511_v44 = vrot.slane %v23989_v46, 6  ;;  %v1523_v46 = vor.u32 %v1522_v11, %v1521_v49  ;;  %v24008_v49 = vld [vmem:[#allocation33_spill] sm:$0xff] }
 0x1d4   :  { %v24009_v10 = vshll.u32 %v24008_v49, 16 }
 0x1d5   :  { %v18916_v20 = vor.u32 %v1511_v44, %v1510_v6  ;;  %v1439_v6 = vor.u32 %v18741_v53, %v18737_v60  ;;  %v18945_v44 = vor.u32 %v1526_v35, %v1525_v50  ;;  %v18959_v60 = vrot.slane %v1523_v46, 4  ;;  %v24011_v35 = vld [vmem:[#allocation34_spill] sm:$0xff] }
 0x1d6   :  { %v18987_v11 = vrot.slane %v24009_v10, 6 }
 0x1d7   :  { %v1514_v3 = vrot.slane %v18916_v20, 4  ;;  %v1440_v0 = vsel %vm18434_vm7, %v1434_v48, %v1439_v6  ;;  %v1529_v53 = vrot.slane %v18945_v44, 4  ;;  %v1448_v48 = vsel %vm18434_vm7, %v18757_v7, %v18732_v43 }
 0x1d8   :  { %14637 = vmatmul.mubr.msk.bf16.gmra.mrb[40].mxu0 %vm535_vm4, %v14620_v39  ;;  %v23992_v39 = vld [vmem:[#allocation24_spill] sm:$0xff]  ;;  %v14642_v7 = vcombine.low %v1448_v48, %v1453_v23  ;;  %v1459_v43 = vor.u32 %v18776_v30, %v18772_v47  ;;  %v24013_v47 = vshll.u32 %v24011_v35, 16  ;;  %v1493_v48 = vsel %vm18434_vm7, %v1489_v62, %v18870_v55  ;;  %v19065_v23 = vld [vmem:[%s23561_s0] sm:$0xf] }
 0x1d9   :  { %1339 = vmatprep.mubr.bf16.mxu0 %v23924_v1  ;;  %v23993_v40 = vrot.slane %v23992_v39, 4  ;;  %v1535_v39 = vshrl.u32 %v18645_v17, 16  ;;  %v14668_v49 = vrot.slane %v19065_v23, 10  ;;  %v19103_v55 = vld [vmem:[%s23561_s0 + $0x10] sm:$0xf] }
 0x1da   :  { %v1460_v21 = vsel %vm18434_vm7, %v1454_v5, %v1459_v43  ;;  %v1546_v30 = vrot.slane %v24013_v47, 6  ;;  %v1508_v43 = vsel %vm18434_vm7, %v18900_v41, %v18903_v59  ;;  %v19113_v41 = vld [vmem:[%s23561_s0 + $0x18] sm:$0xf] }
 0x1db   :  { %v1420_v15 = vsel %vm18434_vm7, %v23993_v40, %v1419_v16  ;;  %v18983_v45 = vrot.slane %v1535_v39, 5  ;;  %v24017_v39 = vld [vmem:[#allocation36_spill] sm:$0xff] }
 0x1dc   :  { %v14640_v9 = vcombine.low %v1420_v15, %v1428_v24 }
 0x1e0   :  { %14638 = vmatmul.mubr.msk.bf16.gmra.mrb[44].mxu0 %vm535_vm4, %v14621_v8  ;;  %v24002_v8 = vshll.u32 %v24001_v61, 16  ;;  %v24012_v61 = vshrl.u32 %v24011_v35, 16 }
 0x1e1   :  { %1694 = vmatprep.mubr.bf16.mxu0 %v23924_v1 }
 0x1e2   :  { %v18941_v32 = vrot.slane %v24002_v8, 6  ;;  %v1545_v8 = vrot.slane %v24012_v61, 5  ;;  %v19125_v61 = vld [vmem:[%s23561_s0 + $0x38] sm:$0xf] }
 0x1e8   :  { %14656 = vmatmul.mubr.msk.bf16.vlgmr.msra.gmra.mrb[0].mxu0 %vm535_vm4, %v23991_v12 }
 0x1e9   :  { %2048 = vmatpush1.bf16.msra.mxu0 %v16808_v27  ;;  %1704 = vmatprep.mubr.bf16.mxu0 %v23924_v1  ;;  %v1433_v27 = vsel %vm18434_vm7, %v1429_v58, %v18730_v14  ;;  %v24006_v58 = vld [vmem:[#allocation32_spill] sm:$0xff] }
 0x1ea   :  { %14692 = vmatprep.subr.msk.bf16.mxu0 %vm572_vm0, %v16811_v26  ;;  %v24007_v40 = vshrl.u32 %v24006_v58, 16  ;;  %v14641_v15 = vcombine.low %v1433_v27, %v1440_v0  ;;  %v24010_v4 = vshll.u32 %v24006_v58, 16  ;;  %v1555_v0 = vshrl.u32 %v23979_v56, 16 }
 0x1eb   :  { %v1480_v56 = vsel %vm18434_vm7, %v1474_v25, %v1479_v19  ;;  %v24018_v58 = vshll.u32 %v24017_v39, 16  ;;  %v19172_v19 = vld [vmem:[%s23561_s0 + $0x34] sm:$0xf]  ;;  %vm2719_vm0 = vsmask.f32 5392 }
 0x1ec   :  { %v1541_v14 = vrot.slane %v24007_v40, 5  ;;  %v1542_v34 = vrot.slane %v24010_v4, 6  ;;  %vm19491_vm5 = vmor %vm19474_vm1, %vm2719_vm0  ;;  %vm4524_vm0 = vcmask 1044484  }
 0x1ed   :  { %2050 = vmatpush1.bf16.msra.mxu0 %v2042_v22  ;;  %v24003_v22 = vld [vmem:[#allocation31_spill] sm:$0xff]  ;;  %v19037_v40 = vrot.slane %v24018_v58, 6 }
 0x1ee   :  { %6208 = vmatprep.subr.bf16.mxu0 %v23924_v1  ;;  %v24004_v16 = vshrl.u32 %v24003_v22, 16  ;;  %v24005_v12 = vshll.u32 %v24003_v22, 16  ;;  %v1543_v50 = vor.u32 %v1542_v34, %v1541_v14  ;;  %v14643_v22 = vcombine.low %v1460_v21, %v1468_v36  ;;  %v19119_v36 = vld [vmem:[%s23561_s0 + $0x24] sm:$0xf] }
 0x1ef   :  { %v1499_v34 = vor.u32 %v18894_v42, %v18877_v31  ;;  %v1881_v21 = vrot.slane %v19113_v41, 6  ;;  %v23658_v35 = vrot.slane %v19119_v36, 6 }
 0x1f0   :  { %14657 = vmatmul.mubr.msk.bf16.gmra.mrb[4].mxu0 %vm535_vm4, %v14640_v9  ;;  %v1530_v26 = vrot.slane %v24004_v16, 5  ;;  %v1531_v63 = vrot.slane %v24005_v12, 6  ;;  %v24014_v9 = vld [vmem:[#allocation35_spill] sm:$0xff]  ;;  %v19011_v5 = vrot.slane %v1543_v50, 4  ;;  %v1473_v12 = vsel %vm18434_vm7, %v1469_v51, %v18802_v52  ;;  %v19097_v50 = vld [vmem:[%s23561_s0 + $0xc] sm:$0x3] }
 0x1f1   :  { %1714 = vmatprep.mubr.bf16.mxu0 %v23924_v1  ;;  %v24015_v6 = vshrl.u32 %v24014_v9, 16  ;;  %v24016_v33 = vshll.u32 %v24014_v9, 16  ;;  %v1868_v52 = vrot.slane %v19042_v37, 6  ;;  %v19048_v51 = vld [vmem:[%s23561_s0 + $0x8] sm:$0xf]  ;;  %v14644_v14 = vcombine.low %v1473_v12, %v1480_v56 }
 0x1f2   :  { %v18969_v24 = vor.u32 %v1531_v63, %v1530_v26  ;;  %v19018_v26 = vor.u32 %v1546_v30, %v1545_v8  ;;  %v19033_v63 = vrot.slane %v1555_v0, 5  ;;  %v1871_v25 = vrot.slane %v19048_v51, 6  ;;  %v19166_v0 = vld [vmem:[%s23561_s0 + $0x20] sm:$0xf]  ;;  %v16825_v37 = vld [vmem:[#allocation6 + $0x398] ss:$12 sps:$4 sm:$0xff]  }
 0x1f3   :  { %v1550_v46 = vrot.slane %v24015_v6, 5  ;;  %v1551_v27 = vrot.slane %v24016_v33, 6  ;;  %v19070_v10 = vrot.slane %v1868_v52, 4  ;;  %v1874_v31 = vrot.slane %v19097_v50, 6  ;;  %v16816_v33 = vld [vmem:[#allocation6 + $0x120] ss:$12 sps:$4 sm:$0xff]  }
 0x1f4   :  { %v1534_v17 = vrot.slane %v18969_v24, 4  ;;  %v1549_v2 = vrot.slane %v19018_v26, 4  ;;  %v23656_v8 = vrot.slane %v19125_v61, 6  ;;  %v1519_v30 = vor.u32 %v18941_v32, %v18912_v54  ;;  %v19149_v32 = vld [vmem:[%s23561_s0 + $0x44] sm:$0xf] }
 0x1f5   :  { %v19016_v16 = vor.u32 %v1551_v27, %v1550_v46  ;;  %v1513_v9 = vsel %vm18434_vm7, %v1509_v57, %v18916_v20  ;;  %v19143_v46 = vld [vmem:[%s23561_s0 + $0x28] sm:$0xf]  ;;  %v1908_v59 = vrot.slane %v19149_v32, 6  ;;  %v19155_v20 = vrot.slane %v1881_v21, 4  ;;  %v16829_v51 = vld [vmem:[#allocation6 + $0x3b0] ss:$12 sps:$4 sm:$0xff]  }
 0x1f6   :  { %v1520_v6 = vsel %vm18434_vm7, %v1514_v3, %v1519_v30  ;;  %v23657_v54 = vrot.slane %v19143_v46, 6  ;;  %v16814_v57 = vld [vmem:[#allocation6 + $0x124] ss:$12 sps:$4 sm:$0xff]   ;;  %v19160_v3 = vld [vmem:[%s23561_s0 + $0x1c] sm:$0x3]  ;;  %v23655_v12 = vrot.slane %v19172_v19, 6 }
 0x1f7   :  { %v1554_v28 = vrot.slane %v19016_v16, 4  ;;  %v1884_v27 = vrot.slane %v19160_v3, 6  ;;  %v16818_v56 = vld [vmem:[#allocation6 + $0x13c] ss:$12 sps:$4 sm:$0xff]   ;;  %v19177_v39 = vrot.slane %v23658_v35, 4  ;;  %3617 = vmatprep.subr.bf16.mxu1 %v16814_v57 }
 0x1f8   :  { %14658 = vmatmul.mubr.msk.bf16.gmra.mrb[8].mxu0 %vm535_vm4, %v14641_v15  ;;  %v1488_v15 = vsel %vm18434_vm7, %v18847_v18, %v18854_v13  ;;  %v19074_v18 = vrot.slane %v1871_v25, 4  ;;  %v19079_v13 = vld [vmem:[%s23561_s0 + $0x14] sm:$0xf]  ;;  %v19181_v58 = vrot.slane %v23657_v54, 4  ;;  %v19212_v30 = vld [vmem:[%s23561_s0 + $0x40] sm:$0xf]  ;;  %3618 = vmatpush1.bf16.msra.mxu1 %v16816_v33 }
 0x1f9   :  { %1724 = vmatprep.mubr.bf16.mxu0 %v23924_v1  ;;  %v1878_v62 = vrot.slane %v19079_v13, 6  ;;  %v14645_v4 = vcombine.low %v1488_v15, %v1493_v48  ;;  %v19192_v48 = vld [vmem:[%s23561_s0 + $0x30] sm:$0xf]  ;;  %v14672_v57 = vrot.slane %v19212_v30, 10  ;;  %v19222_v15 = vld [vmem:[%s23561_s0 + $0x48] sm:$0xf]  ;;  %3619 = vmatprep.subr.bf16.mxu1 %v16818_v56  ;;  %v1885_v23 = vsel %vm19252_vm13, %v19155_v20, %v1884_v27 }
 0x1fa   :  { %v16822_v54 = vld [vmem:[#allocation6 + $0x154] ss:$12 sps:$4 sm:$0xff]   ;;  %v16826_v35 = vld [vmem:[#allocation6 + $0x16c] ss:$12 sps:$4 sm:$0xff]   ;;  %v16830_v56 = vld [vmem:[#allocation6 + $0x184] ss:$12 sps:$4 sm:$0xff]  }
 0x1fb   :  { %v19108_v42 = vrot.slane %v1878_v62, 4  ;;  %v16828_v33 = vld [vmem:[#allocation6 + $0x168] ss:$12 sps:$4 sm:$0xff]   ;;  %v24026_v41 = vrot.slane %v19192_v48, 10 }
 0x200   :  { %14659 = vmatmul.mubr.msk.bf16.gmra.mrb[12].mxu0 %vm535_vm4, %v14642_v7  ;;  %v1500_v7 = vsel %vm18434_vm7, %v1494_v29, %v1499_v34  ;;  %v14669_v29 = vrot.slane %v19103_v55, 10  ;;  %v19197_v34 = vrot.slane %v23655_v12, 4  ;;  %v14647_v12 = vcombine.low %v1513_v9, %v1520_v6 }
 0x201   :  { %1734 = vmatprep.mubr.bf16.mxu0 %v23924_v1  ;;  %v14646_v47 = vcombine.low %v1500_v7, %v1508_v43  ;;  %v19201_v7 = vrot.slane %v23656_v8, 4  ;;  %v19206_v43 = vld [vmem:[%s23561_s0 + $0x3c] sm:$0x3]  ;;  %v19217_v8 = vrot.slane %v1908_v59, 4  ;;  %v1528_v9 = vsel %vm18434_vm7, %v18959_v60, %v18945_v44 }
 0x202   :  { %v1533_v6 = vsel %vm18434_vm7, %v1529_v53, %v18969_v24  ;;  %v1548_v60 = vsel %vm18434_vm7, %v19011_v5, %v19018_v26  ;;  %v1553_v24 = vsel %vm18434_vm7, %v1549_v2, %v19016_v16  ;;  %v1869_v26 = vsel %vm19252_vm13, %v14668_v49, %v1868_v52 }
 0x203   :  { %v1872_v16 = vsel %vm19252_vm13, %v19070_v10, %v1871_v25  ;;  %v1882_v25 = vsel %vm19252_vm13, %v19108_v42, %v1881_v21  ;;  %v24021_v10 = vrot.slane %v19119_v36, 6  ;;  %v24025_v42 = vrot.slane %v19172_v19, 6 }
 0x204   :  { %v14676_v2 = vcombine.low %v1869_v26, %v1872_v16  ;;  %v14678_v49 = vcombine.low %v1882_v25, %v1885_v23  ;;  %v24028_v20 = vrot.slane %v19206_v43, 6  ;;  %v17529_v16 = vld [vmem:[%s23561_s0 + $0x6c] sm:$0x3] }
 0x205   :  { %v1899_v21 = vsel %vm19252_vm13, %v24026_v41, %v24025_v42  ;;  %v16836_v42 = vld [vmem:[#allocation6 + $0x198] ss:$12 sps:$4 sm:$0xff]   ;;  %v16837_v41 = vld [vmem:[#allocation6 + $0x3e0] ss:$12 sps:$4 sm:$0xff]  }
 0x206   :  { %v1905_v3 = vsel %vm19252_vm13, %v19201_v7, %v24028_v20  ;;  %v16845_v20 = vld [vmem:[#allocation6 + $0x410] ss:$12 sps:$4 sm:$0xff]  }
 0x208   :  { %14660 = vmatmul.mubr.msk.bf16.gmra.mrb[16].mxu0 %vm535_vm4, %v14643_v22  ;;  %v16824_v22 = vld [vmem:[#allocation6 + $0x150] ss:$12 sps:$4 sm:$0xff]  }
 0x209   :  { %1744 = vmatprep.mubr.bf16.mxu0 %v23924_v1 }
 0x210   :  { %14661 = vmatmul.mubr.msk.bf16.gmra.mrb[20].mxu0 %vm535_vm4, %v14644_v14  ;;  %v19186_v14 = vld [vmem:[%s23561_s0 + $0x2c] sm:$0x3] }
 0x211   :  { %1754 = vmatprep.mubr.bf16.mxu0 %v23924_v1  ;;  %v24024_v55 = vrot.slane %v19186_v14, 6  ;;  %v17523_v14 = vld [vmem:[%s23561_s0 + $0x54] sm:$0xf] }
 0x212   :  { %v1918_v48 = vrot.slane %v17523_v14, 6  ;;  %v16860_v14 = vld [vmem:[#allocation6 + $0x228] ss:$12 sps:$4 sm:$0xff]  }
 0x218   :  { %14662 = vmatmul.mubr.msk.bf16.gmra.mrb[24].mxu0 %vm535_vm4, %v14645_v4  ;;  %v16820_v4 = vld [vmem:[#allocation6 + $0x138] ss:$12 sps:$4 sm:$0xff]  }
 0x219   :  { %1764 = vmatprep.mubr.bf16.mxu0 %v23924_v1  ;;  %3620 = vmatpush1.bf16.msra.mxu1 %v16820_v4  ;;  %v16832_v4 = vld [vmem:[#allocation6 + $0x180] ss:$12 sps:$4 sm:$0xff]  }
 0x21a   :  { %3621 = vmatprep.subr.bf16.mxu1 %v16822_v54  ;;  %v1539_v54 = vor.u32 %v18987_v11, %v18983_v45  ;;  %v1559_v45 = vor.u32 %v19037_v40, %v19033_v63  ;;  %v1875_v63 = vsel %vm19252_vm13, %v19074_v18, %v1874_v31  ;;  %v1879_v40 = vsel %vm19252_vm13, %v14669_v29, %v1878_v62  ;;  %v16841_v11 = vld [vmem:[#allocation6 + $0x3f8] ss:$12 sps:$4 sm:$0xff]  }
 0x21b   :  { %v14677_v52 = vcombine.low %v1875_v63, %v1879_v40  ;;  %v24022_v18 = vrot.slane %v19166_v0, 10  ;;  %v24023_v62 = vrot.slane %v19143_v46, 6  ;;  %v1895_v29 = vsel %vm19252_vm13, %v19181_v58, %v24024_v55  ;;  %v17522_v58 = vld [vmem:[%s23561_s0 + $0x50] sm:$0xf]  ;;  %v17531_v63 = vld [vmem:[%s23561_s0 + $0x74] sm:$0xf] }
 0x21c   :  { %v1540_v44 = vsel %vm18434_vm7, %v1534_v17, %v1539_v54  ;;  %v1560_v17 = vsel %vm18434_vm7, %v1554_v28, %v1559_v45  ;;  %v16821_v28 = vld [vmem:[#allocation6 + $0x380] ss:$12 sps:$4 sm:$0xff]   ;;  %v14680_v36 = vcombine.low %v1895_v29, %v1899_v21  ;;  %v1938_v40 = vrot.slane %v17531_v63, 6  ;;  %v16834_v55 = vld [vmem:[#allocation6 + $0x19c] ss:$12 sps:$4 sm:$0xff]   ;;  %vm19509_vm7 = vmor %vm19491_vm5, %vm2721_vm2 }
 0x21d   :  { %3622 = vmatpush1.bf16.msra.mxu1 %v16824_v22  ;;  %v14649_v53 = vcombine.low %v1540_v44, %v1548_v60  ;;  %v14650_v5 = vcombine.low %v1553_v24, %v1560_v17  ;;  %v1889_v13 = vsel %vm19252_vm13, %v24022_v18, %v24021_v10  ;;  %v1892_v50 = vsel %vm19252_vm13, %v19177_v39, %v24023_v62  ;;  %v17521_v39 = vld [vmem:[%s23561_s0 + $0x4c] sm:$0x3]  ;;  %v17533_v18 = vld [vmem:[%s23561_s0 + $0x7c] sm:$0x3]  ;;  %v16838_v21 = vld [vmem:[#allocation6 + $0x1b4] ss:$12 sps:$4 sm:$0xff]  }
 0x21e   :  { %3623 = vmatprep.subr.bf16.mxu1 %v16826_v35  ;;  %v14679_v31 = vcombine.low %v1889_v13, %v1892_v50  ;;  %v24027_v35 = vrot.slane %v19125_v61, 6  ;;  %v1909_v61 = vsel %vm19252_vm13, %v14672_v57, %v1908_v59  ;;  %v1914_v32 = vrot.slane %v17521_v39, 6  ;;  %v17525_v57 = vld [vmem:[%s23561_s0 + $0x5c] sm:$0x3]  ;;  %v16854_v39 = vld [vmem:[#allocation6 + $0x214] ss:$12 sps:$4 sm:$0xff]  }
 0x21f   :  { %v14673_v59 = vrot.slane %v17522_v58, 10  ;;  %v1944_v13 = vrot.slane %v17533_v18, 6  ;;  %v16857_v58 = vld [vmem:[#allocation6 + $0x458] ss:$12 sps:$4 sm:$0xff]   ;;  %vm4526_vm2 = vcmask 1046534   ;;  %vm7935_vm5 = vcmask 1043459  }
 0x220   :  { %14663 = vmatmul.mubr.msk.bf16.gmra.mrb[28].mxu0 %vm535_vm4, %v14646_v47  ;;  %v1911_v47 = vrot.slane %v19222_v15, 6  ;;  %v1902_v46 = vsel %vm19252_vm13, %v19197_v34, %v24027_v35  ;;  %v17524_v34 = vld [vmem:[%s23561_s0 + $0x58] sm:$0xf] }
 0x221   :  { %1774 = vmatprep.mubr.bf16.mxu0 %v23924_v1  ;;  %3624 = vmatpush1.bf16.msra.mxu1 %v16828_v33  ;;  %v14681_v27 = vcombine.low %v1902_v46, %v1905_v3  ;;  %v1919_v15 = vsel %vm19252_vm13, %v14673_v59, %v1918_v48  ;;  %v1921_v7 = vrot.slane %v17524_v34, 6  ;;  %v16842_v35 = vld [vmem:[#allocation6 + $0x1cc] ss:$12 sps:$4 sm:$0xff]   ;;  %v16844_v46 = vld [vmem:[#allocation6 + $0x1c8] ss:$12 sps:$4 sm:$0xff]  }
 0x222   :  { %3625 = vmatprep.subr.bf16.mxu1 %v16830_v56  ;;  %v1912_v0 = vsel %vm19252_vm13, %v19217_v8, %v1911_v47  ;;  %v1913_v19 = vrot.slane %v1911_v47, 4  ;;  %v1920_v47 = vrot.slane %v1918_v48, 4  ;;  %v17526_v56 = vld [vmem:[%s23561_s0 + $0x64] sm:$0xf]  ;;  %v16858_v59 = vld [vmem:[#allocation6 + $0x22c] ss:$12 sps:$4 sm:$0xff]  }
 0x223   :  { %v14682_v22 = vcombine.low %v1909_v61, %v1912_v0  ;;  %v1923_v30 = vrot.slane %v1921_v7, 4  ;;  %v16846_v3 = vld [vmem:[#allocation6 + $0x1e4] ss:$12 sps:$4 sm:$0xff]   ;;  %v16849_v61 = vld [vmem:[#allocation6 + $0x428] ss:$12 sps:$4 sm:$0xff]  }
 0x224   :  { %v1915_v8 = vsel %vm19252_vm13, %v1913_v19, %v1914_v32  ;;  %v16850_v0 = vld [vmem:[#allocation6 + $0x1fc] ss:$12 sps:$4 sm:$0xff]   ;;  %v16853_v19 = vld [vmem:[#allocation6 + $0x440] ss:$12 sps:$4 sm:$0xff]  }
 0x225   :  { %3626 = vmatpush1.bf16.msra.mxu1 %v16832_v4  ;;  %v14683_v43 = vcombine.low %v1915_v8, %v1919_v15  ;;  %v17527_v4 = vld [vmem:[%s23561_s0 + $0x60] sm:$0xf]  ;;  %v2250_v8 = vlaneseq }
 0x226   :  { %v14674_v44 = vrot.slane %v17527_v4, 10  ;;  %3627 = vmatprep.subr.bf16.mxu1 %v16834_v55  ;;  %v16856_v32 = vld [vmem:[#allocation6 + $0x210] ss:$12 sps:$4 sm:$0xff]  }
 0x227   :  { %v16861_v48 = vld [vmem:[#allocation6 + $0x470] ss:$12 sps:$4 sm:$0xff]   ;;  %v19441_v15 = vshrl.u32 %v2250_v8, 7 }
 0x228   :  { %14664 = vmatmul.mubr.msk.bf16.gmra.mrb[32].mxu0 %vm535_vm4, %v14647_v12  ;;  %v14648_v12 = vcombine.low %v1528_v9, %v1533_v6  ;;  %v1924_v9 = vrot.slane %v17525_v57, 6  ;;  %v1922_v6 = vsel %vm19252_vm13, %v1920_v47, %v1921_v7  ;;  %v2248_v7 = vld [vmem:[#allocation4] sm:$0x3]  ;;  %v17783_v47 = vmov 1983009808  }
 0x229   :  { %1784 = vmatprep.mubr.bf16.mxu0 %v23924_v1  ;;  %3628 = vmatpush1.bf16.msra.mxu1 %v16836_v42  ;;  %24029 = vst [vmem:[#allocation40_spill] sm:$0xff] %v19441_v15  ;;  %v23660_v34 = vsub.s32 0, %v19441_v15 }
 0x22a   :  { %v1925_v33 = vsel %vm19252_vm13, %v1923_v30, %v1924_v9  ;;  %3629 = vmatprep.subr.bf16.mxu1 %v16838_v21  ;;  %v2477_v30 = vunpack.c.l.s4 %v17783_v47 }
 0x22b   :  { %v14684_v54 = vcombine.low %v1922_v6, %v1925_v33  ;;  %v19447_v57 = vrot.slane %v2248_v7, %v23660_v34 }
 0x22c   :  { %v2478_v33 = vunpack.c.0.s8 %v2477_v30 }
 0x230   :  { %14665 = vmatmul.mubr.msk.bf16.gmra.mrb[36].mxu0 %vm535_vm4, %v14648_v12  ;;  %v1928_v12 = vrot.slane %v17526_v56, 6 }
 0x231   :  { %1794 = vmatprep.mubr.bf16.mxu0 %v23924_v1 }
 0x232   :  { %v1930_v60 = vrot.slane %v1928_v12, 4  ;;  %v1929_v24 = vsel %vm19252_vm13, %v14674_v44, %v1928_v12 }
 0x238   :  { %14666 = vmatmul.mubr.msk.bf16.gmra.mrb[40].mxu0 %vm535_vm4, %v14649_v53  ;;  %v17528_v53 = vld [vmem:[%s23561_s0 + $0x68] sm:$0xf] }
 0x239   :  { %1804 = vmatprep.mubr.bf16.mxu0 %v23924_v1  ;;  %v1931_v45 = vrot.slane %v17528_v53, 6 }
 0x23b   :  { %v1932_v17 = vsel %vm19252_vm13, %v1930_v60, %v1931_v45  ;;  %v1933_v26 = vrot.slane %v1931_v45, 4 }
 0x240   :  { %14667 = vmatmul.mubr.msk.bf16.gmra.mrb[44].mxu0 %vm535_vm4, %v14650_v5  ;;  %v14685_v5 = vcombine.low %v1929_v24, %v1932_v17  ;;  %v19457_v24 = vsub.s32 %v2478_v33, %v19441_v15 }
 0x241   :  { %2079 = vmatprep.mubr.bf16.mxu0 %v23924_v1 }
 0x248   :  { %14693 = vmatmul.mubr.msk.bf16.vlgmr.msra.gmra.mrb[0].mxu0 %vm535_vm4, %v14676_v2  ;;  %v17530_v2 = vld [vmem:[%s23561_s0 + $0x70] sm:$0xf] }
 0x249   :  { %2089 = vmatprep.mubr.bf16.mxu0 %v23924_v1  ;;  %6209 = vmatpush1.bf16.msra.mxu0 %v16817_v38  ;;  %v1934_v38 = vrot.slane %v17529_v16, 6 }
 0x24a   :  { %6210 = vmatprep.subr.bf16.mxu0 %v23924_v1 }
 0x24d   :  { %6211 = vmatpush1.bf16.msra.mxu0 %v16821_v28  ;;  %v14675_v28 = vrot.slane %v17530_v2, 10 }
 0x24e   :  { %6212 = vmatprep.subr.bf16.mxu0 %v23924_v1 }
 0x250   :  { %14694 = vmatmul.mubr.msk.bf16.gmra.mrb[4].mxu0 %vm535_vm4, %v14677_v52  ;;  %v1939_v52 = vsel %vm19252_vm13, %v14675_v28, %v1938_v40 }
 0x251   :  { %2099 = vmatprep.mubr.bf16.mxu0 %v23924_v1  ;;  %6213 = vmatpush1.bf16.msra.mxu0 %v16825_v37  ;;  %v1935_v37 = vsel %vm19252_vm13, %v1933_v26, %v1934_v38 }
 0x252   :  { %6214 = vmatprep.subr.bf16.mxu0 %v23924_v1  ;;  %v14686_v23 = vcombine.low %v1935_v37, %v1939_v52 }
 0x255   :  { %6215 = vmatpush1.bf16.msra.mxu0 %v16829_v51  ;;  %v17532_v51 = vld [vmem:[%s23561_s0 + $0x78] sm:$0xf] }
 0x256   :  { %6216 = vmatprep.subr.bf16.mxu0 %v23924_v1  ;;  %v1941_v25 = vrot.slane %v17532_v51, 6 }
 0x258   :  { %14695 = vmatmul.mubr.msk.bf16.gmra.mrb[8].mxu0 %vm535_vm4, %v14678_v49  ;;  %v1940_v49 = vrot.slane %v1938_v40, 4  ;;  %v1943_v10 = vrot.slane %v1941_v25, 4 }
 0x259   :  { %2109 = vmatprep.mubr.bf16.mxu0 %v23924_v1 }
 0x25a   :  { %v1942_v62 = vsel %vm19252_vm13, %v1940_v49, %v1941_v25  ;;  %v1945_v50 = vsel %vm19252_vm13, %v1943_v10, %v1944_v13  ;;  %vm4521_vm13 = vcmask 1040384  }
 0x25b   :  { %v14687_v29 = vcombine.low %v1942_v62, %v1945_v50  ;;  %vm4523_vm15 = vmor %vm4521_vm13, %vm4522_vm14 }
 0x25c   :  { %vm4525_vm1 = vmor %vm4523_vm15, %vm4524_vm0 }
 0x260   :  { %14696 = vmatmul.mubr.msk.bf16.gmra.mrb[12].mxu0 %vm535_vm4, %v14679_v31  ;;  %v16833_v31 = vld [vmem:[#allocation6 + $0x3c8] ss:$12 sps:$4 sm:$0xff]  }
 0x261   :  { %2119 = vmatprep.mubr.bf16.mxu0 %v23924_v1  ;;  %6217 = vmatpush1.bf16.msra.mxu0 %v16833_v31 }
 0x262   :  { %6218 = vmatprep.subr.bf16.mxu0 %v23924_v1 }
 0x265   :  { %6219 = vmatpush1.bf16.msra.mxu0 %v16837_v41 }
 0x266   :  { %6220 = vmatprep.subr.bf16.mxu0 %v23924_v1 }
 0x268   :  { %14697 = vmatmul.mubr.msk.bf16.gmra.mrb[16].mxu0 %vm535_vm4, %v14680_v36  ;;  %v16840_v36 = vld [vmem:[#allocation6 + $0x1b0] ss:$12 sps:$4 sm:$0xff]  }
 0x269   :  { %2129 = vmatprep.mubr.bf16.mxu0 %v23924_v1  ;;  %3630 = vmatpush1.bf16.msra.mxu1 %v16840_v36 }
 0x26a   :  { %6221 = vmatpush1.bf16.msra.mxu0 %v16841_v11  ;;  %3631 = vmatprep.subr.bf16.mxu1 %v16842_v35 }
 0x26b   :  { %6222 = vmatprep.subr.bf16.mxu0 %v23924_v1 }
 0x26d   :  { %3632 = vmatpush1.bf16.msra.mxu1 %v16844_v46 }
 0x26e   :  { %6223 = vmatpush1.bf16.msra.mxu0 %v16845_v20  ;;  %3633 = vmatprep.subr.bf16.mxu1 %v16846_v3 }
 0x26f   :  { %6224 = vmatprep.subr.bf16.mxu0 %v23924_v1 }
 0x270   :  { %14698 = vmatmul.mubr.msk.bf16.gmra.mrb[20].mxu0 %vm535_vm4, %v14681_v27  ;;  %v16848_v27 = vld [vmem:[#allocation6 + $0x1e0] ss:$12 sps:$4 sm:$0xff]  }
 0x271   :  { %2139 = vmatprep.mubr.bf16.mxu0 %v23924_v1  ;;  %3634 = vmatpush1.bf16.msra.mxu1 %v16848_v27 }
 0x272   :  { %6225 = vmatpush1.bf16.msra.mxu0 %v16849_v61  ;;  %3635 = vmatprep.subr.bf16.mxu1 %v16850_v0 }
 0x273   :  { %6226 = vmatprep.subr.bf16.mxu0 %v23924_v1 }
 0x276   :  { %6227 = vmatpush1.bf16.msra.mxu0 %v16853_v19 }
 0x277   :  { %6228 = vmatprep.subr.bf16.mxu0 %v23924_v1 }
 0x278   :  { %14699 = vmatmul.mubr.msk.bf16.gmra.mrb[24].mxu0 %vm535_vm4, %v14682_v22  ;;  %v16852_v22 = vld [vmem:[#allocation6 + $0x1f8] ss:$12 sps:$4 sm:$0xff]  }
 0x279   :  { %2149 = vmatprep.mubr.bf16.mxu0 %v23924_v1  ;;  %3636 = vmatpush1.bf16.msra.mxu1 %v16852_v22 }
 0x27a   :  { %3637 = vmatprep.subr.bf16.mxu1 %v16854_v39  ;;  %6229 = vmatpush1.bf16.msra.mxu0 %v16857_v58 }
 0x27b   :  { %6230 = vmatprep.subr.bf16.mxu0 %v23924_v1 }
 0x27d   :  { %3638 = vmatpush1.bf16.msra.mxu1 %v16856_v32 }
 0x27e   :  { %3639 = vmatprep.subr.bf16.mxu1 %v16858_v59  ;;  %6231 = vmatpush1.bf16.msra.mxu0 %v16861_v48 }
 0x27f   :  { %6975 = vmatprep.subr.bf16.mxu0 %v23924_v1 }
 0x280   :  { %14700 = vmatmul.mubr.msk.bf16.gmra.mrb[28].mxu0 %vm535_vm4, %v14683_v43  ;;  %v23659_v43 = vsub.s32 1, %v19441_v15 }
 0x281   :  { %2159 = vmatprep.mubr.bf16.mxu0 %v23924_v1  ;;  %3640 = vmatpush1.bf16.msra.mxu1 %v16860_v14 }
 0x282   :  { %3750 = vmatprep.subr.bf16.mxu1 %v23924_v1  ;;  %v19451_v9 = vrot.slane %v2248_v7, %v23659_v43 }
 0x288   :  { %14701 = vmatmul.mubr.msk.bf16.gmra.mrb[32].mxu0 %vm535_vm4, %v14684_v54 }
 0x289   :  { %2169 = vmatprep.mubr.bf16.mxu0 %v23924_v1 }
 0x290   :  { %14702 = vmatmul.mubr.msk.bf16.gmra.mrb[36].mxu0 %vm535_vm4, %v14685_v5 }
 0x291   :  { %2179 = vmatprep.mubr.bf16.mxu0 %v23924_v1 }
 0x298   :  { %14703 = vmatmul.mubr.msk.bf16.gmra.mrb[40].mxu0 %vm535_vm4, %v14686_v23 }
 0x299   :  { %2189 = vmatprep.mubr.bf16.mxu0 %v23924_v1 }
 0x2a0   :  { %14704 = vmatmul.mubr.msk.bf16.gmra.mrb[44].mxu0 %vm535_vm4, %v14687_v29  ;;  %vm5424_vm4 = vsmask.f32 2312 }
 0x2a1   :  { %vm19534_vm9 = vmor %vm5423_vm3, %vm5424_vm4  ;;  %vm7929_vm4 = vcmask 1041409  }
 0x2a2   :  { %vm5427_vm11 = vmor %vm19534_vm9, %vm5426_vm6  ;;  %vm7941_vm6 = vcmask 1045509  }
 0x2a3   :  { %vm19571_vm12 = vmor %vm5427_vm11, %vm5428_vm8  ;;  %vm17785_vm8 = vmmov 0  }
 0x2a4   :  { %vm20737_vm3 = vmor %vm4525_vm1, %vm4526_vm2 }
 0x31b   :  { %v2081_v6 = vpop.f32.mrb[0].mxu0 }
 0x31c   :  { %v2260_v56 = vadd.f32 %v19447_v57, %v2081_v6  ;;  %v2083_v12 = vpop.f32.mrb[1].mxu0 }
 0x31d   :  { %v2261_v54 = vadd.f32 %v19451_v9, %v2083_v12  ;;  %v2085_v4 = vpop.f32.mrb[2].mxu0 }
 0x31e   :  { %v2308_v44 = vmax.f32 %v2260_v56, 0.0  ;;  %v2262_v60 = vadd.f32 %v19447_v57, %v2085_v4  ;;  %v2087_v53 = vpop.f32.mrb[3].mxu0 }
 0x31f   :  { %v2309_v45 = vmax.f32 %v2261_v54, 0.0  ;;  %v2263_v17 = vadd.f32 %v19451_v9, %v2087_v53 }
 0x320   :  { %v2310_v5 = vmax.f32 %v2262_v60, 0.0 }
 0x321   :  { %v15538_v26 = vpack.c.bf16 %v2309_v45, %v2308_v44  ;;  %v2311_v16 = vmax.f32 %v2263_v17, 0.0 }
 0x323   :  { %v19461_v38 = vrot.slane %v15538_v26, %v19457_v24  ;;  %v15539_v2 = vpack.c.bf16 %v2311_v16, %v2310_v5  ;;  %v2091_v28 = vpop.f32.mrb[4].mxu0 }
 0x324   :  { %v2264_v63 = vadd.f32 %v19447_v57, %v2091_v28  ;;  %v2093_v40 = vpop.f32.mrb[5].mxu0 }
 0x325   :  { %24030 = vst [vmem:[#allocation39_spill] sm:$0xff] %v19461_v38  ;;  %v19466_v37 = vcombine.high %v19461_v38, %v19461_v38  ;;  %v19469_v52 = vrot.slane %v15539_v2, %v19457_v24  ;;  %v2265_v51 = vadd.f32 %v19451_v9, %v2093_v40  ;;  %v2095_v25 = vpop.f32.mrb[6].mxu0  ;;  %v2724_v23 = vshrl.u32 %v19461_v38, 16 }
 0x326   :  { %v2312_v49 = vmax.f32 %v2264_v63, 0.0  ;;  %v2266_v10 = vadd.f32 %v19447_v57, %v2095_v25  ;;  %v2097_v18 = vpop.f32.mrb[7].mxu0  ;;  %v2727_v62 = vshll.u32 %v19461_v38, 16 }
 0x327   :  { %24031 = vst [vmem:[#allocation27_spill] sm:$0xff] %v19466_v37  ;;  %v19481_v50 = vcombine.high %v19469_v52, %v19469_v52  ;;  %v2313_v31 = vmax.f32 %v2265_v51, 0.0  ;;  %v2267_v55 = vadd.f32 %v19451_v9, %v2097_v18  ;;  %v2726_v29 = vrot.slane %v2724_v23, 6 }
 0x328   :  { %v2314_v42 = vmax.f32 %v2266_v10, 0.0  ;;  %v2729_v41 = vrot.slane %v2727_v62, 7  ;;  %v2733_v21 = vshll.u32 %v19466_v37, 16  ;;  %v2737_v36 = vshrl.u32 %v19466_v37, 16 }
 0x329   :  { %v15540_v11 = vpack.c.bf16 %v2313_v31, %v2312_v49  ;;  %v2315_v35 = vmax.f32 %v2267_v55, 0.0  ;;  %v2743_v20 = vshll.u32 %v19469_v52, 16  ;;  %v2747_v3 = vshrl.u32 %v19469_v52, 16 }
 0x32a   :  { %v2730_v27 = vor.u32 %v2729_v41, %v2726_v29  ;;  %v2735_v61 = vrot.slane %v2733_v21, 7  ;;  %v2739_v0 = vrot.slane %v2737_v36, 6  ;;  %v2753_v22 = vshll.u32 %v19481_v50, 16 }
 0x32b   :  { %v15541_v19 = vpack.c.bf16 %v2315_v35, %v2314_v42  ;;  %v2101_v39 = vpop.f32.mrb[8].mxu0  ;;  %v2745_v32 = vrot.slane %v2743_v20, 7  ;;  %v2749_v58 = vrot.slane %v2747_v3, 6  ;;  %v19503_v59 = vrot.slane %v15540_v11, %v19457_v24 }
 0x32c   :  { %v2268_v14 = vadd.f32 %v19447_v57, %v2101_v39  ;;  %v2103_v48 = vpop.f32.mrb[9].mxu0  ;;  %v2731_v7 = vrot.slane %v2730_v27, 2  ;;  %v2740_v47 = vor.u32 %v2739_v0, %v2735_v61  ;;  %v2757_v12 = vshrl.u32 %v19481_v50, 16 }
 0x32d   :  { %v19514_v30 = vrot.slane %v15541_v19, %v19457_v24  ;;  %v2269_v6 = vadd.f32 %v19451_v9, %v2103_v48  ;;  %v2105_v33 = vpop.f32.mrb[10].mxu0  ;;  %v2750_v56 = vor.u32 %v2749_v58, %v2745_v32  ;;  %v2755_v53 = vrot.slane %v2753_v22, 7 }
 0x32e   :  { %v2316_v54 = vmax.f32 %v2268_v14, 0.0  ;;  %v2270_v4 = vadd.f32 %v19447_v57, %v2105_v33  ;;  %v2107_v44 = vpop.f32.mrb[11].mxu0  ;;  %v2741_v60 = vrot.slane %v2740_v47, 2  ;;  %v2736_v5 = vsel %vm19509_vm7, %v2731_v7, %v2735_v61 }
 0x32f   :  { %24038 = vst [vmem:[#allocation25_spill] sm:$0xff] %v19514_v30  ;;  %v2317_v45 = vmax.f32 %v2269_v6, 0.0  ;;  %v2271_v17 = vadd.f32 %v19451_v9, %v2107_v44  ;;  %v2751_v26 = vrot.slane %v2750_v56, 2  ;;  %v2759_v28 = vrot.slane %v2757_v12, 6 }
 0x330   :  { %v2318_v16 = vmax.f32 %v2270_v4, 0.0  ;;  %v2746_v2 = vsel %vm19509_vm7, %v2741_v60, %v2745_v32  ;;  %v2763_v63 = vshll.u32 %v19503_v59, 16  ;;  %v19529_v40 = vcombine.high %v19514_v30, %v19514_v30 }
 0x331   :  { %v15542_v51 = vpack.c.bf16 %v2317_v45, %v2316_v54  ;;  %v2319_v25 = vmax.f32 %v2271_v17, 0.0  ;;  %v2767_v49 = vshrl.u32 %v19503_v59, 16  ;;  %v2760_v10 = vor.u32 %v2759_v28, %v2755_v53 }
 0x332   :  { %24039 = vst [vmem:[#allocation26_spill] sm:$0xff] %v19529_v40  ;;  %v2765_v18 = vrot.slane %v2763_v63, 7  ;;  %v3204_v13 = vcombine.low %v2736_v5, %v2746_v2  ;;  %v5432_v62 = vrot.slane %v2737_v36, 7  ;;  %v5436_v11 = vrot.slane %v2747_v3, 7 }
 0x333   :  { %v19539_v55 = vrot.slane %v15542_v51, %v19457_v24  ;;  %v15543_v29 = vpack.c.bf16 %v2319_v25, %v2318_v16  ;;  %v2111_v42 = vpop.f32.mrb[12].mxu0  ;;  %v2769_v41 = vrot.slane %v2767_v49, 6  ;;  %v2756_v36 = vsel %vm19509_vm7, %v2751_v26, %v2755_v53 }
 0x334   :  { %v2272_v35 = vadd.f32 %v19447_v57, %v2111_v42  ;;  %v2113_v46 = vpop.f32.mrb[13].mxu0  ;;  %v2761_v27 = vrot.slane %v2760_v10, 2  ;;  %v3212_v61 = vrot.slane %v3204_v13, %v19457_v24  ;;  %v5433_v3 = vor.u32 %v5432_v62, %v2733_v21 }
 0x335   :  { %24042 = vst [vmem:[#allocation41_spill] sm:$0xff] %v19539_v55  ;;  %v19547_v0 = vcombine.high %v19539_v55, %v19539_v55  ;;  %v19550_v19 = vrot.slane %v15543_v29, %v19457_v24  ;;  %v2273_v39 = vadd.f32 %v19451_v9, %v2113_v46  ;;  %v2115_v32 = vpop.f32.mrb[14].mxu0  ;;  %v2770_v47 = vor.u32 %v2769_v41, %v2765_v18 }
 0x336   :  { %v2320_v58 = vmax.f32 %v2272_v35, 0.0  ;;  %v2274_v14 = vadd.f32 %v19447_v57, %v2115_v32  ;;  %v2117_v48 = vpop.f32.mrb[15].mxu0  ;;  %v2766_v7 = vsel %vm19509_vm7, %v2761_v27, %v2765_v18  ;;  %v5437_v21 = vor.u32 %v5436_v11, %v2743_v20 }
 0x337   :  { %24043 = vst [vmem:[#allocation38_spill] sm:$0xff] %v19547_v0  ;;  %24044 = vst [vmem:[#allocation24_spill] sm:$0xff] %v19550_v19  ;;  %v19563_v6 = vcombine.high %v19550_v19, %v19550_v19  ;;  %v2321_v33 = vmax.f32 %v2273_v39, 0.0  ;;  %v2275_v56 = vadd.f32 %v19451_v9, %v2117_v48  ;;  %v3205_v4 = vcombine.low %v2756_v36, %v2766_v7 }
 0x338   :  { %v2322_v54 = vmax.f32 %v2274_v14, 0.0  ;;  %v5440_v44 = vrot.slane %v2757_v12, 7  ;;  %v19568_v60 = vrot.slane %v2767_v49, 7  ;;  %v14905_v5 = vrot.slane %v2724_v23, 9 }
 0x339   :  { %24045 = vst [vmem:[#allocation37_spill] sm:$0xff] %v19563_v6  ;;  %v15544_v45 = vpack.c.bf16 %v2321_v33, %v2320_v58  ;;  %v2323_v17 = vmax.f32 %v2275_v56, 0.0  ;;  %v5435_v26 = vrot.slane %v5432_v62, 2  ;;  %v3219_v16 = vrot.slane %v3205_v4, %v19457_v24  ;;  %v16862_v62 = vld [vmem:[#allocation6 + $0x128] ss:$12 sps:$4 sm:$0xff]  }
 0x33a   :  { %v5441_v20 = vor.u32 %v5440_v44, %v2753_v22  ;;  %v5445_v12 = vor.u32 %v19568_v60, %v2763_v63  ;;  %v5439_v2 = vrot.slane %v5436_v11, 2  ;;  %v5434_v25 = vsel %vm19571_vm12, %v14905_v5, %v5433_v3  ;;  %v16863_v33 = vld [vmem:[#allocation6 + $0x140] ss:$12 sps:$4 sm:$0xff]  }
 0x33b   :  { %v19582_v28 = vrot.slane %v15544_v45, %v19457_v24  ;;  %v15545_v51 = vpack.c.bf16 %v2323_v17, %v2322_v54  ;;  %v5438_v49 = vsel %vm19571_vm12, %v5435_v26, %v5437_v21  ;;  %v2121_v23 = vpop.f32.mrb[16].mxu0  ;;  %v19588_v10 = vrot.slane %v2770_v47, 2 }
 0x33c   :  { %v19590_v18 = vcombine.high %v3212_v61, %v3219_v16  ;;  %v19592_v13 = vcombine.low %v3212_v61, %v3219_v16  ;;  %v5443_v22 = vrot.slane %v5440_v44, 2  ;;  %v2123_v63 = vpop.f32.mrb[17].mxu0  ;;  %v5442_v41 = vsel %vm19571_vm12, %v5439_v2, %v5441_v20 }
 0x33d   :  { %24048 = vst [vmem:[#allocation29_spill] sm:$0xff] %v19582_v28  ;;  %v19596_v31 = vcombine.high %v19582_v28, %v19582_v28  ;;  %v2835_v42 = vshll.u32 %v19582_v28, 16  ;;  %v2125_v11 = vpop.f32.mrb[18].mxu0  ;;  %v5663_v46 = vcombine.low %v5434_v25, %v5438_v49  ;;  %v2276_v36 = vadd.f32 %v19447_v57, %v2121_v23 }
 0x33e   :  { %24049 = vst [vmem:[#allocation30_spill] sm:$0xff] %v19590_v18  ;;  %24050 = vst [vmem:[#allocation28_spill] sm:$0xff] %v19592_v13  ;;  %14765 = vmatprep.mubr.msk.bf16.mxu1 %vm3586_vm10, %v19590_v18  ;;  %v5446_v35 = vsel %vm19571_vm12, %v5443_v22, %v5445_v12  ;;  %v2277_v27 = vadd.f32 %v19451_v9, %v2123_v63  ;;  %v2127_v61 = vpop.f32.mrb[19].mxu0  ;;  %v19611_v32 = vrot.slane %v15545_v51, %v19457_v24  ;;  %v16867_v51 = vld [vmem:[#allocation6 + $0x488] ss:$12 sps:$4 sm:$0xff]  }
 0x33f   :  { %24051 = vst [vmem:[#allocation31_spill] sm:$0xff] %v19596_v31  ;;  %v19608_v39 = vrot.slane %v2835_v42, 7  ;;  %3650 = vmatmul.mubr.bf16.vlgmr.msra.gmra.mrb[0].mxu1 %v19592_v13  ;;  %v5664_v3 = vcombine.low %v5442_v41, %v5446_v35  ;;  %v2278_v58 = vadd.f32 %v19447_v57, %v2125_v11  ;;  %v5671_v14 = vrot.slane %v5663_v46, %v19457_v24  ;;  %v16878_v13 = vld [vmem:[#allocation6 + $0x200] ss:$12 sps:$4 sm:$0xff]  }
 0x340   :  { %24052 = vst [vmem:[#allocation32_spill] sm:$0xff] %v19611_v32  ;;  %v2324_v48 = vmax.f32 %v2276_v36, 0.0  ;;  %v2325_v7 = vmax.f32 %v2277_v27, 0.0  ;;  %v2279_v47 = vadd.f32 %v19451_v9, %v2127_v61  ;;  %3751 = vmatpush1.bf16.msra.mxu1 %v16862_v62  ;;  %v19620_v54 = vcombine.high %v19503_v59, %v19503_v59  ;;  %v16864_v62 = vld [vmem:[#allocation6 + $0x158] ss:$12 sps:$4 sm:$0xff]  }
 0x341   :  { %v5678_v56 = vrot.slane %v5664_v3, %v19457_v24  ;;  %v2326_v21 = vmax.f32 %v2278_v58, 0.0  ;;  %v2778_v4 = vshrl.u32 %v19514_v30, 16  ;;  %3752 = vmatprep.subr.bf16.mxu1 %v23924_v1  ;;  %v2781_v17 = vshll.u32 %v19514_v30, 16 }
 0x342   :  { %24053 = vst [vmem:[#allocation33_spill] sm:$0xff] %v19620_v54  ;;  %v15546_v44 = vpack.c.bf16 %v2325_v7, %v2324_v48  ;;  %v2327_v45 = vmax.f32 %v2279_v47, 0.0  ;;  %v2787_v5 = vshll.u32 %v19529_v40, 16  ;;  %v2773_v12 = vshll.u32 %v19620_v54, 16 }
 0x343   :  { %v19626_v26 = vcombine.low %v5671_v14, %v5678_v56  ;;  %v19628_v16 = vcombine.high %v5671_v14, %v5678_v56  ;;  %v2131_v20 = vpop.f32.mrb[20].mxu0  ;;  %v2780_v2 = vrot.slane %v2778_v4, 6  ;;  %v19635_v25 = vcombine.high %v19611_v32, %v19611_v32 }
 0x344   :  { %v15547_v49 = vpack.c.bf16 %v2327_v45, %v2326_v21  ;;  %v2280_v23 = vadd.f32 %v19447_v57, %v2131_v20  ;;  %v2133_v22 = vpop.f32.mrb[21].mxu0  ;;  %v2783_v63 = vrot.slane %v2781_v17, 7  ;;  %3753 = vmatpush1.bf16.msra.mxu1 %v16863_v33  ;;  %v2775_v41 = vrot.slane %v2773_v12, 7  ;;  %v16869_v33 = vld [vmem:[#allocation6 + $0x4a0] ss:$12 sps:$4 sm:$0xff]  }
 0x345   :  { %24054 = vst [vmem:[#allocation34_spill] sm:$0xff] %v19626_v26  ;;  %24055 = vst [vmem:[#allocation35_spill] sm:$0xff] %v19628_v16  ;;  %14959 = vmatprep.mubr.msk.bf16.mxu0 %vm3586_vm10, %v19628_v16  ;;  %v2281_v42 = vadd.f32 %v19451_v9, %v2133_v22  ;;  %v2789_v11 = vrot.slane %v2787_v5, 7  ;;  %v2791_v35 = vshrl.u32 %v19529_v40, 16  ;;  %v2135_v46 = vpop.f32.mrb[22].mxu0  ;;  %3754 = vmatprep.subr.bf16.mxu1 %v23924_v1  ;;  %v2797_v3 = vshll.u32 %v19539_v55, 16 }
 0x346   :  { %24056 = vst [vmem:[#allocation36_spill] sm:$0xff] %v19635_v25  ;;  %6241 = vmatmul.mubr.bf16.vlgmr.msra.gmra.mrb[48].mxu0 %v19626_v26  ;;  %v19649_v36 = vrot.slane %v15547_v49, %v19457_v24  ;;  %v2328_v27 = vmax.f32 %v2280_v23, 0.0  ;;  %v2784_v61 = vor.u32 %v2783_v63, %v2780_v2  ;;  %v19652_v58 = vpop.f32.mrb[23].mxu0  ;;  %v19655_v14 = vrot.slane %v15546_v44, %v19457_v24  ;;  %v16865_v20 = vld [vmem:[#allocation6 + $0x170] ss:$12 sps:$4 sm:$0xff]  }
 0x347   :  { %v2329_v48 = vmax.f32 %v2281_v42, 0.0  ;;  %v2793_v7 = vrot.slane %v2791_v35, 6  ;;  %v2801_v47 = vshrl.u32 %v19539_v55, 16  ;;  %6976 = vmatpush1.bf16.msra.mxu0 %v16867_v51  ;;  %v2776_v56 = vsel %vm19509_vm7, %v19588_v10, %v2775_v41 }
 0x348   :  { %24057 = vst [vmem:[#allocation42_spill] sm:$0xff] %v19649_v36  ;;  %24058 = vst [vmem:[#allocation43_spill] sm:$0xff] %v19655_v14  ;;  %v2785_v21 = vrot.slane %v2784_v61, 2  ;;  %v2799_v45 = vrot.slane %v2797_v3, 7  ;;  %v2807_v17 = vshll.u32 %v19547_v0, 16  ;;  %3755 = vmatpush1.bf16.msra.mxu1 %v16864_v62  ;;  %6977 = vmatprep.subr.bf16.mxu0 %v23924_v1  ;;  %v19665_v44 = vcombine.high %v19649_v36, %v19649_v36 }
 0x349   :  { %v15548_v2 = vpack.c.bf16 %v2329_v48, %v2328_v27  ;;  %v2794_v49 = vor.u32 %v2793_v7, %v2789_v11  ;;  %v2803_v51 = vrot.slane %v2801_v47, 6  ;;  %3756 = vmatprep.subr.bf16.mxu1 %v23924_v1  ;;  %v23663_v22 = vshrl.u32 %v19547_v0, 16  ;;  %v16866_v48 = vld [vmem:[#allocation6 + $0x188] ss:$12 sps:$4 sm:$0xff]   ;;  %v16871_v7 = vld [vmem:[#allocation6 + $0x4b8] ss:$12 sps:$4 sm:$0xff]  }
 0x34a   :  { %24059 = vst [vmem:[#allocation44_spill] sm:$0xff] %v19665_v44  ;;  %v2790_v10 = vsel %vm19509_vm7, %v2785_v21, %v2789_v11  ;;  %v19670_v23 = vrot.slane %v2807_v17, 7  ;;  %v5448_v63 = vshrl.u32 %v19620_v54, 16  ;;  %v5447_v43 = vrot.slane %v19568_v60, 2  ;;  %v16876_v54 = vld [vmem:[#allocation6 + $0x1e8] ss:$12 sps:$4 sm:$0xff]  }
 0x34b   :  { %v19675_v62 = vrot.slane %v15548_v2, %v19457_v24  ;;  %v2795_v42 = vrot.slane %v2794_v49, 2  ;;  %v2804_v41 = vor.u32 %v2803_v51, %v2799_v45  ;;  %v3222_v61 = vcombine.low %v2776_v56, %v2790_v10  ;;  %v2141_v27 = vpop.f32.mrb[24].mxu0  ;;  %6978 = vmatpush1.bf16.msra.mxu0 %v16869_v33 }
 0x34c   :  { %v5450_v34 = vrot.slane %v5448_v63, 7  ;;  %v5455_v11 = vrot.slane %v2791_v35, 7  ;;  %v5459_v21 = vrot.slane %v2801_v47, 7  ;;  %v2143_v29 = vpop.f32.mrb[25].mxu0  ;;  %3757 = vmatpush1.bf16.msra.mxu1 %v16865_v20  ;;  %6979 = vmatprep.subr.bf16.mxu0 %v23924_v1  ;;  %v14906_v33 = vrot.slane %v2778_v4, 9 }
 0x34d   :  { %24060 = vst [vmem:[#allocation45_spill] sm:$0xff] %v19675_v62  ;;  %v19681_v2 = vcombine.high %v19675_v62, %v19675_v62  ;;  %v2800_v56 = vsel %vm19509_vm7, %v2795_v42, %v2799_v45  ;;  %v2805_v49 = vrot.slane %v2804_v41, 2  ;;  %v19687_v51 = vpop.f32.mrb[26].mxu0  ;;  %3758 = vmatprep.subr.bf16.mxu1 %v23924_v1  ;;  %v3230_v60 = vrot.slane %v3222_v61, %v19457_v24  ;;  %v16872_v41 = vld [vmem:[#allocation6 + $0x4d0] ss:$12 sps:$4 sm:$0xff]  }
 0x34e   :  { %v5451_v35 = vor.u32 %v5450_v34, %v2773_v12  ;;  %v5456_v47 = vor.u32 %v5455_v11, %v2787_v5  ;;  %v5460_v20 = vor.u32 %v5459_v21, %v2797_v3  ;;  %v19695_v10 = vpop.f32.mrb[27].mxu0  ;;  %v5458_v4 = vrot.slane %v5455_v11, 2  ;;  %v16868_v61 = vld [vmem:[#allocation6 + $0x1a0] ss:$12 sps:$4 sm:$0xff]  }
 0x34f   :  { %v2810_v45 = vsel %vm19509_vm7, %v2805_v49, %v19670_v23  ;;  %v19702_v63 = vrot.slane %v23663_v22, 7  ;;  %v2282_v42 = vadd.f32 %v19447_v57, %v2135_v46  ;;  %6980 = vmatpush1.bf16.msra.mxu0 %v16871_v7  ;;  %v5462_v3 = vrot.slane %v5459_v21, 2 }
 0x350   :  { %v3223_v34 = vcombine.low %v2800_v56, %v2810_v45  ;;  %v5452_v5 = vsel %vm19571_vm12, %v5447_v43, %v5451_v35  ;;  %v5457_v12 = vsel %vm19571_vm12, %v14906_v33, %v5456_v47  ;;  %3759 = vmatpush1.bf16.msra.mxu1 %v16866_v48  ;;  %v2283_v22 = vadd.f32 %v19451_v9, %v19652_v58  ;;  %v16874_v35 = vld [vmem:[#allocation6 + $0x4e8] ss:$12 sps:$4 sm:$0xff]  }
 0x351   :  { %v5464_v11 = vor.u32 %v19702_v63, %v2807_v17  ;;  %v5681_v49 = vcombine.low %v5452_v5, %v5457_v12  ;;  %v2330_v15 = vmax.f32 %v2282_v42, 0.0  ;;  %3760 = vmatprep.subr.bf16.mxu1 %v23924_v1  ;;  %6981 = vmatprep.subr.bf16.mxu0 %v23924_v1  ;;  %v5461_v43 = vsel %vm19571_vm12, %v5458_v4, %v5460_v20 }
 0x352   :  { %v3237_v46 = vrot.slane %v3223_v34, %v19457_v24  ;;  %v2284_v7 = vadd.f32 %v19447_v57, %v2141_v27  ;;  %v2285_v48 = vadd.f32 %v19451_v9, %v2143_v29  ;;  %v2331_v21 = vmax.f32 %v2283_v22, 0.0  ;;  %v16870_v29 = vld [vmem:[#allocation6 + $0x1b8] ss:$12 sps:$4 sm:$0xff]  }
 0x353   :  { %v5465_v17 = vsel %vm19571_vm12, %v5462_v3, %v5464_v11  ;;  %v23665_v56 = vshll.u32 %v19550_v19, 16  ;;  %v23664_v58 = vshrl.u32 %v19550_v19, 16  ;;  %v19723_v33 = vpop.f32.mrb[28].mxu0  ;;  %6982 = vmatpush1.bf16.msra.mxu0 %v16872_v41  ;;  %v5689_v22 = vrot.slane %v5681_v49, %v19457_v24 }
 0x354   :  { %v19725_v47 = vcombine.high %v3230_v60, %v3237_v46  ;;  %v5682_v45 = vcombine.low %v5461_v43, %v5465_v17  ;;  %v19727_v20 = vcombine.low %v3230_v60, %v3237_v46  ;;  %v2332_v27 = vmax.f32 %v2284_v7, 0.0  ;;  %v19729_v4 = vpop.f32.mrb[29].mxu0  ;;  %3761 = vmatpush1.bf16.msra.mxu1 %v16868_v61  ;;  %6983 = vmatprep.subr.bf16.mxu0 %v23924_v1 }
 0x355   :  { %v15549_v42 = vpack.c.bf16 %v2331_v21, %v2330_v15  ;;  %v2333_v34 = vmax.f32 %v2285_v48, 0.0  ;;  %v19734_v41 = vpop.f32.mrb[30].mxu0  ;;  %3762 = vmatprep.subr.bf16.mxu1 %v23924_v1  ;;  %v2841_v12 = vshll.u32 %v19596_v31, 16  ;;  %v23666_v3 = vshrl.u32 %v19596_v31, 16 }
 0x356   :  { %24061 = vst [vmem:[#allocation46_spill] sm:$0xff] %v19725_v47  ;;  %24062 = vst [vmem:[#allocation47_spill] sm:$0xff] %v19727_v20  ;;  %14766 = vmatprep.mubr.msk.bf16.mxu1 %vm3586_vm10, %v19725_v47  ;;  %v5696_v60 = vrot.slane %v5682_v45, %v19457_v24  ;;  %v23667_v61 = vshrl.u32 %v19611_v32, 16  ;;  %v19743_v11 = vpop.f32.mrb[31].mxu0  ;;  %v5467_v43 = vrot.slane %v23664_v58, 7  ;;  %v5466_v17 = vrot.slane %v19702_v63, 2 }
 0x357   :  { %3660 = vmatmul.mubr.bf16.gmra.mrb[4].mxu1 %v19727_v20  ;;  %v19747_v15 = vrot.slane %v15549_v42, %v19457_v24  ;;  %v15550_v49 = vpack.c.bf16 %v2333_v34, %v2332_v27  ;;  %6984 = vmatpush1.bf16.msra.mxu0 %v16874_v35  ;;  %v5471_v21 = vshrl.u32 %v19563_v6, 16  ;;  %v16873_v45 = vld [vmem:[#allocation6 + $0x1d0] ss:$12 sps:$4 sm:$0xff]   ;;  %v16875_v42 = vld [vmem:[#allocation6 + $0x500] ss:$12 sps:$4 sm:$0xff]   ;;  %v2287_v38 = vadd.f32 %v19451_v9, %v19695_v10 }
 0x358   :  { %v19752_v7 = vcombine.high %v5689_v22, %v5696_v60  ;;  %v19754_v48 = vcombine.low %v5689_v22, %v5696_v60  ;;  %3763 = vmatpush1.bf16.msra.mxu1 %v16870_v29  ;;  %6985 = vmatprep.subr.bf16.mxu0 %v23924_v1  ;;  %v5468_v35 = vor.u32 %v5467_v43, %v23665_v56  ;;  %v24066_v22 = vshrl.u32 %v19582_v28, 16  ;;  %v16877_v56 = vld [vmem:[#allocation6 + $0x518] ss:$12 sps:$4 sm:$0xff]  }
 0x359   :  { %v19761_v27 = vcombine.high %v19747_v15, %v19747_v15  ;;  %v19764_v34 = vrot.slane %v15550_v49, %v19457_v24  ;;  %3764 = vmatprep.subr.bf16.mxu1 %v23924_v1  ;;  %v5473_v29 = vrot.slane %v5471_v21, 7  ;;  %v5478_v60 = vrot.slane %v23666_v3, 7 }
 0x35a   :  { %24063 = vst [vmem:[#allocation48_spill] sm:$0xff] %v19752_v7  ;;  %24064 = vst [vmem:[#allocation49_spill] sm:$0xff] %v19754_v48  ;;  %v14907_v63 = vrot.slane %v24066_v22, 9  ;;  %14960 = vmatprep.mubr.msk.bf16.mxu0 %vm3586_vm10, %v19752_v7  ;;  %v19777_v58 = vrot.slane %v23667_v61, 7  ;;  %v2286_v49 = vadd.f32 %v19447_v57, %v19687_v51  ;;  %v5470_v46 = vrot.slane %v5467_v43, 2 }
 0x35b   :  { %24065 = vst [vmem:[#allocation50_spill] sm:$0xff] %v19764_v34  ;;  %6249 = vmatmul.mubr.bf16.gmra.mrb[52].mxu0 %v19754_v48  ;;  %v19784_v22 = vcombine.high %v19764_v34, %v19764_v34  ;;  %v2943_v21 = vshll.u32 %v19764_v34, 16  ;;  %v19788_v5 = vpop.f32.mrb[32].mxu0  ;;  %v24068_v3 = vshll.u32 %v19563_v6, 16  ;;  %v5479_v7 = vor.u32 %v5478_v60, %v2841_v12 }
 0x35c   :  { %v5481_v26 = vrot.slane %v5478_v60, 2  ;;  %v24069_v51 = vshll.u32 %v19611_v32, 16  ;;  %v19795_v16 = vpop.f32.mrb[33].mxu0  ;;  %3765 = vmatpush1.bf16.msra.mxu1 %v16873_v45  ;;  %6986 = vmatpush1.bf16.msra.mxu0 %v16875_v42  ;;  %v5469_v43 = vsel %vm19571_vm12, %v5466_v17, %v5468_v35  ;;  %v2334_v40 = vmax.f32 %v2286_v49, 0.0 }
 0x35d   :  { %24067 = vst [vmem:[#allocation51_spill] sm:$0xff] %v19784_v22  ;;  %v5474_v61 = vor.u32 %v5473_v29, %v24068_v3  ;;  %v24070_v3 = vshrl.u32 %v19547_v0, 16  ;;  %v19803_v60 = vpop.f32.mrb[34].mxu0  ;;  %3766 = vmatprep.subr.bf16.mxu1 %v23924_v1  ;;  %6987 = vmatprep.subr.bf16.mxu0 %v23924_v1  ;;  %v5480_v42 = vsel %vm19571_vm12, %v14907_v63, %v5479_v7  ;;  %v24071_v10 = vshll.u32 %v19550_v19, 16 }
 0x35e   :  { %v5483_v48 = vor.u32 %v19777_v58, %v24069_v51  ;;  %v19815_v49 = vpop.f32.mrb[35].mxu0  ;;  %v2335_v20 = vmax.f32 %v2287_v38, 0.0  ;;  %v19818_v30 = vrot.slane %v2943_v21, 7  ;;  %v24073_v7 = vshrl.u32 %v19582_v28, 16 }
 0x35f   :  { %v2813_v29 = vrot.slane %v24070_v3, 6  ;;  %v5475_v45 = vsel %vm19571_vm12, %v5470_v46, %v5474_v61  ;;  %v2819_v35 = vrot.slane %v24071_v10, 7  ;;  %v24072_v61 = vshrl.u32 %v19550_v19, 16 }
 0x360   :  { %v5484_v17 = vsel %vm19571_vm12, %v5481_v26, %v5483_v48  ;;  %v5699_v51 = vcombine.low %v5469_v43, %v5475_v45  ;;  %v2834_v63 = vrot.slane %v24073_v7, 6  ;;  %v2843_v26 = vrot.slane %v2841_v12, 7  ;;  %3767 = vmatpush1.bf16.msra.mxu1 %v16876_v54  ;;  %6988 = vmatpush1.bf16.msra.mxu0 %v16877_v56  ;;  %v16879_v48 = vld [vmem:[#allocation6 + $0x530] ss:$12 sps:$4 sm:$0xff]  }
 0x361   :  { %v5700_v3 = vcombine.low %v5480_v42, %v5484_v17  ;;  %v2814_v47 = vor.u32 %v2813_v29, %v19670_v23  ;;  %v2823_v46 = vrot.slane %v24072_v61, 6  ;;  %v15551_v38 = vpack.c.bf16 %v2335_v20, %v2334_v40  ;;  %3768 = vmatprep.subr.bf16.mxu1 %v23924_v1  ;;  %6989 = vmatprep.subr.bf16.mxu0 %v23924_v1 }
 0x362   :  { %v5707_v10 = vrot.slane %v5699_v51, %v19457_v24  ;;  %v24074_v21 = vshll.u32 %v19563_v6, 16  ;;  %v2838_v42 = vor.u32 %v19608_v39, %v2834_v63  ;;  %v24075_v54 = vshrl.u32 %v19596_v31, 16  ;;  %v16885_v31 = vld [vmem:[#allocation6 + $0x590] ss:$12 sps:$4 sm:$0xff]  }
 0x363   :  { %v5714_v43 = vrot.slane %v5700_v3, %v19457_v24  ;;  %v2815_v45 = vrot.slane %v2814_v47, 2  ;;  %v2824_v23 = vor.u32 %v2823_v46, %v2819_v35  ;;  %v24078_v47 = vshll.u32 %v19611_v32, 16  ;;  %v19841_v51 = vpop.f32.mrb[36].mxu0  ;;  %v16880_v3 = vld [vmem:[#allocation6 + $0x548] ss:$12 sps:$4 sm:$0xff]  }
 0x364   :  { %v2829_v29 = vrot.slane %v24074_v21, 7  ;;  %v2847_v56 = vrot.slane %v24075_v54, 6  ;;  %v2839_v46 = vrot.slane %v2838_v42, 2  ;;  %v2288_v39 = vadd.f32 %v19447_v57, %v19723_v33  ;;  %v19845_v63 = vpop.f32.mrb[37].mxu0  ;;  %3769 = vmatpush1.bf16.msra.mxu1 %v16878_v13  ;;  %6990 = vmatpush1.bf16.msra.mxu0 %v16879_v48 }
 0x365   :  { %v19833_v12 = vcombine.high %v5707_v10, %v5714_v43  ;;  %v19835_v17 = vcombine.low %v5707_v10, %v5714_v43  ;;  %v2820_v40 = vsel %vm19509_vm7, %v2815_v45, %v2819_v35  ;;  %v2853_v20 = vrot.slane %v24078_v47, 7  ;;  %v16881_v10 = vld [vmem:[#allocation6 + $0x218] ss:$12 sps:$4 sm:$0xff]   ;;  %6991 = vmatprep.subr.bf16.mxu0 %v23924_v1  ;;  %3770 = vmatprep.subr.bf16.mxu1 %v23924_v1 }
 0x366   :  { %v2825_v61 = vrot.slane %v2824_v23, 2  ;;  %v2848_v7 = vor.u32 %v2847_v56, %v2843_v26  ;;  %v19850_v35 = vrot.slane %v15551_v38, %v19457_v24  ;;  %v2289_v43 = vadd.f32 %v19451_v9, %v19729_v4  ;;  %v19858_v23 = vpop.f32.mrb[38].mxu0 }
 0x367   :  { %24076 = vst [vmem:[#allocation52_spill] sm:$0xff] %v19833_v12  ;;  %24077 = vst [vmem:[#allocation53_spill] sm:$0xff] %v19835_v17  ;;  %14961 = vmatprep.mubr.msk.bf16.mxu0 %vm3586_vm10, %v19833_v12  ;;  %v2290_v45 = vadd.f32 %v19447_v57, %v19734_v41  ;;  %v2291_v33 = vadd.f32 %v19451_v9, %v19743_v11  ;;  %v2844_v48 = vsel %vm19509_vm7, %v2839_v46, %v2843_v26  ;;  %v19865_v42 = vpop.f32.mrb[39].mxu0  ;;  %v16884_v46 = vld [vmem:[#allocation6 + $0x230] ss:$12 sps:$4 sm:$0xff]  }
 0x368   :  { %24079 = vst [vmem:[#allocation54_spill] sm:$0xff] %v19850_v35  ;;  %6257 = vmatmul.mubr.bf16.gmra.mrb[56].mxu0 %v19835_v17  ;;  %v2830_v13 = vsel %vm19509_vm7, %v2825_v61, %v2829_v29  ;;  %v2849_v38 = vrot.slane %v2848_v7, 2  ;;  %v2336_v21 = vmax.f32 %v2288_v39, 0.0  ;;  %v2337_v41 = vmax.f32 %v2289_v43, 0.0  ;;  %3771 = vmatpush1.bf16.msra.mxu1 %v16881_v10 }
 0x369   :  { %v3240_v4 = vcombine.low %v2820_v40, %v2830_v13  ;;  %v2338_v54 = vmax.f32 %v2290_v45, 0.0  ;;  %v2339_v11 = vmax.f32 %v2291_v33, 0.0  ;;  %v19873_v29 = vcombine.high %v19655_v14, %v19655_v14  ;;  %6992 = vmatpush1.bf16.msra.mxu0 %v16880_v3  ;;  %v16882_v40 = vld [vmem:[#allocation6 + $0x560] ss:$12 sps:$4 sm:$0xff]   ;;  %v16888_v33 = vld [vmem:[#allocation6 + $0x4] ss:$12 sps:$4 sm:$0xff]   ;;  %3772 = vmatprep.subr.bf16.mxu1 %v23924_v1 }
 0x36a   :  { %v2854_v56 = vsel %vm19509_vm7, %v2849_v38, %v2853_v20  ;;  %v24081_v26 = vshrl.u32 %v19611_v32, 16  ;;  %v2861_v61 = vshll.u32 %v19635_v25, 16  ;;  %v19880_v7 = vcombine.high %v19850_v35, %v19850_v35  ;;  %6993 = vmatprep.subr.bf16.mxu0 %v23924_v1 }
 0x36b   :  { %24080 = vst [vmem:[#allocation55_spill] sm:$0xff] %v19873_v29  ;;  %v3241_v39 = vcombine.low %v2844_v48, %v2854_v56  ;;  %v15552_v43 = vpack.c.bf16 %v2337_v41, %v2336_v21  ;;  %v15553_v45 = vpack.c.bf16 %v2339_v11, %v2338_v54  ;;  %v2871_v17 = vshll.u32 %v19655_v14, 16  ;;  %v19892_v21 = vpop.f32.mrb[40].mxu0  ;;  %v16883_v41 = vld [vmem:[#allocation6 + $0x578] ss:$12 sps:$4 sm:$0xff]  }
 0x36c   :  { %v2857_v47 = vrot.slane %v24081_v26, 6  ;;  %v2863_v38 = vrot.slane %v2861_v61, 7  ;;  %v2865_v26 = vshrl.u32 %v19635_v25, 16  ;;  %v3248_v3 = vrot.slane %v3240_v4, %v19457_v24  ;;  %3773 = vmatpush1.bf16.msra.mxu1 %v16884_v46 }
 0x36d   :  { %v3255_v10 = vrot.slane %v3241_v39, %v19457_v24  ;;  %v19889_v12 = vrot.slane %v15552_v43, %v19457_v24  ;;  %v2875_v48 = vshrl.u32 %v19655_v14, 16  ;;  %v2873_v11 = vrot.slane %v2871_v17, 7  ;;  %6994 = vmatpush1.bf16.msra.mxu0 %v16882_v40  ;;  %4275 = vmatprep.subr.bf16.mxu1 %v16888_v33 }
 0x36e   :  { %v2858_v13 = vor.u32 %v2857_v47, %v2853_v20  ;;  %v2867_v54 = vrot.slane %v2865_v26, 6  ;;  %v2881_v56 = vshll.u32 %v19873_v29, 16  ;;  %v19895_v47 = vpop.f32.mrb[41].mxu0  ;;  %v19902_v43 = vrot.slane %v15553_v45, %v19457_v24  ;;  %6995 = vmatprep.subr.bf16.mxu0 %v23924_v1 }
 0x36f   :  { %v19897_v4 = vcombine.high %v3248_v3, %v3255_v10  ;;  %v19899_v39 = vcombine.low %v3248_v3, %v3255_v10  ;;  %v2877_v28 = vrot.slane %v2875_v48, 6  ;;  %v19904_v25 = vpop.f32.mrb[42].mxu0  ;;  %v2886_v40 = vshrl.u32 %v19649_v36, 16 }
 0x370   :  { %v2859_v20 = vrot.slane %v2858_v13, 2  ;;  %24084 = vst [vmem:[#allocation58_spill] sm:$0xff] %v19902_v43  ;;  %v2868_v14 = vor.u32 %v2867_v54, %v2863_v38  ;;  %v2883_v19 = vrot.slane %v2881_v56, 7  ;;  %v19910_v46 = vpop.f32.mrb[43].mxu0  ;;  %v2889_v3 = vshll.u32 %v19649_v36, 16 }
 0x371   :  { %24082 = vst [vmem:[#allocation56_spill] sm:$0xff] %v19897_v4  ;;  %24083 = vst [vmem:[#allocation57_spill] sm:$0xff] %v19899_v39  ;;  %14767 = vmatprep.mubr.msk.bf16.mxu1 %vm3586_vm10, %v19897_v4  ;;  %v2878_v45 = vor.u32 %v2877_v28, %v2873_v11  ;;  %v2895_v10 = vshll.u32 %v19665_v44, 16  ;;  %v2899_v6 = vshrl.u32 %v19665_v44, 16  ;;  %v5486_v54 = vrot.slane %v2865_v26, 7  ;;  %6996 = vmatpush1.bf16.msra.mxu0 %v16883_v41 }
 0x372   :  { %v2864_v13 = vsel %vm19509_vm7, %v2859_v20, %v2863_v38  ;;  %3670 = vmatmul.mubr.bf16.gmra.mrb[8].mxu1 %v19899_v39  ;;  %v2869_v33 = vrot.slane %v2868_v14, 2  ;;  %v2888_v20 = vrot.slane %v2886_v40, 6  ;;  %v5485_v38 = vrot.slane %v19777_v58, 2  ;;  %6997 = vmatprep.subr.bf16.mxu0 %v23924_v1 }
 0x373   :  { %v2879_v32 = vrot.slane %v2878_v45, 2  ;;  %v2891_v55 = vrot.slane %v2889_v3, 7  ;;  %v2897_v0 = vrot.slane %v2895_v10, 7  ;;  %v5490_v4 = vrot.slane %v2875_v48, 7  ;;  %v19925_v18 = vpop.f32.mrb[44].mxu0 }
 0x374   :  { %v2874_v28 = vsel %vm19509_vm7, %v2869_v33, %v2873_v11  ;;  %v5487_v36 = vor.u32 %v5486_v54, %v2861_v61  ;;  %v5489_v44 = vrot.slane %v5486_v54, 2  ;;  %v5494_v39 = vshrl.u32 %v19873_v29, 16  ;;  %v19929_v37 = vpop.f32.mrb[45].mxu0 }
 0x375   :  { %v2884_v14 = vsel %vm19509_vm7, %v2879_v32, %v2883_v19  ;;  %v2892_v58 = vor.u32 %v2891_v55, %v2888_v20  ;;  %v3258_v26 = vcombine.low %v2864_v13, %v2874_v28  ;;  %v5491_v41 = vor.u32 %v5490_v4, %v2871_v17  ;;  %6998 = vmatpush1.bf16.msra.mxu0 %v16885_v31  ;;  %v19936_v32 = vpop.f32.mrb[46].mxu0 }
 0x376   :  { %v5488_v48 = vsel %vm19571_vm12, %v5485_v38, %v5487_v36  ;;  %v5493_v45 = vrot.slane %v5490_v4, 2  ;;  %v5496_v3 = vrot.slane %v5494_v39, 7  ;;  %v14908_v1 = vrot.slane %v2886_v40, 9  ;;  %v19942_v39 = vpop.f32.mrb[47].mxu0 }
 0x377   :  { %v2893_v61 = vrot.slane %v2892_v58, 2  ;;  %v3266_v11 = vrot.slane %v3258_v26, %v19457_v24  ;;  %v5492_v19 = vsel %vm19571_vm12, %v5489_v44, %v5491_v41  ;;  %v19934_v55 = vrot.slane %v2899_v6, 7 }
 0x378   :  { %v5497_v17 = vor.u32 %v5496_v3, %v2881_v56  ;;  %v5717_v13 = vcombine.low %v5488_v48, %v5492_v19  ;;  %v2292_v36 = vadd.f32 %v19447_v57, %v19788_v5  ;;  %v2293_v4 = vadd.f32 %v19451_v9, %v19795_v16 }
 0x379   :  { %v2898_v31 = vsel %vm19509_vm7, %v2893_v61, %v2897_v0  ;;  %v5502_v40 = vor.u32 %v19934_v55, %v2895_v10  ;;  %v2294_v44 = vadd.f32 %v19447_v57, %v19803_v60  ;;  %v2295_v56 = vadd.f32 %v19451_v9, %v19815_v49 }
 0x37a   :  { %v3259_v33 = vcombine.low %v2884_v14, %v2898_v31  ;;  %v5498_v5 = vsel %vm19571_vm12, %v5493_v45, %v5497_v17  ;;  %v5725_v20 = vrot.slane %v5717_v13, %v19457_v24  ;;  %v2340_v16 = vmax.f32 %v2292_v36, 0.0 }
 0x37b   :  { %v5503_v38 = vsel %vm19571_vm12, %v14908_v1, %v5502_v40  ;;  %v2341_v54 = vmax.f32 %v2293_v4, 0.0  ;;  %v2342_v28 = vmax.f32 %v2294_v44, 0.0  ;;  %v2343_v58 = vmax.f32 %v2295_v56, 0.0 }
 0x37c   :  { %v3273_v10 = vrot.slane %v3259_v33, %v19457_v24  ;;  %v5718_v26 = vcombine.low %v5498_v5, %v5503_v38  ;;  %v2901_v60 = vrot.slane %v2899_v6, 6  ;;  %v2905_v41 = vshll.u32 %v19675_v62, 16 }
 0x37d   :  { %v15554_v49 = vpack.c.bf16 %v2341_v54, %v2340_v16  ;;  %v15555_v14 = vpack.c.bf16 %v2343_v58, %v2342_v28  ;;  %v2909_v48 = vshrl.u32 %v19675_v62, 16  ;;  %v2915_v45 = vshll.u32 %v19681_v2, 16 }
 0x37e   :  { %v19960_v3 = vcombine.high %v3266_v11, %v3273_v10  ;;  %v5732_v61 = vrot.slane %v5718_v26, %v19457_v24  ;;  %v19963_v1 = vcombine.low %v3266_v11, %v3273_v10  ;;  %v2902_v19 = vor.u32 %v2901_v60, %v2897_v0 }
 0x37f   :  { %v19967_v17 = vcombine.high %v19902_v43, %v19902_v43  ;;  %v19970_v6 = vrot.slane %v15554_v49, %v19457_v24  ;;  %v2907_v13 = vrot.slane %v2905_v41, 7  ;;  %v2911_v36 = vrot.slane %v2909_v48, 6 }
 0x380   :  { %24085 = vst [vmem:[#allocation59_spill] sm:$0xff] %v19963_v1  ;;  %14768 = vmatprep.mubr.msk.bf16.mxu1 %vm3586_vm10, %v19960_v3  ;;  %v19974_v4 = vcombine.high %v5725_v20, %v5732_v61  ;;  %v19976_v31 = vcombine.low %v5725_v20, %v5732_v61  ;;  %v19979_v11 = vrot.slane %v15555_v14, %v19457_v24  ;;  %v2903_v0 = vrot.slane %v2902_v19, 2 }
 0x381   :  { %24086 = vst [vmem:[#allocation60_spill] sm:$0xff] %v19967_v17  ;;  %24087 = vst [vmem:[#allocation61_spill] sm:$0xff] %v19970_v6  ;;  %3680 = vmatmul.mubr.bf16.gmra.mrb[12].mxu1 %v19963_v1  ;;  %v19984_v40 = vcombine.high %v19970_v6, %v19970_v6  ;;  %v2912_v44 = vor.u32 %v2911_v36, %v2907_v13  ;;  %v2917_v56 = vrot.slane %v2915_v45, 7  ;;  %v2919_v33 = vshrl.u32 %v19681_v2, 16 }
 0x382   :  { %24088 = vst [vmem:[#allocation62_spill] sm:$0xff] %v19974_v4  ;;  %24089 = vst [vmem:[#allocation63_spill] sm:$0xff] %v19976_v31  ;;  %14962 = vmatprep.mubr.msk.bf16.mxu0 %vm3586_vm10, %v19974_v4  ;;  %v2908_v5 = vsel %vm19509_vm7, %v2903_v0, %v2907_v13  ;;  %v2925_v20 = vshll.u32 %v19747_v15, 16  ;;  %v2929_v16 = vshrl.u32 %v19747_v15, 16  ;;  %v2935_v38 = vshll.u32 %v19761_v27, 16 }
 0x383   :  { %24090 = vst [vmem:[#allocation64_spill] sm:$0xff] %v19979_v11  ;;  %6265 = vmatmul.mubr.bf16.gmra.mrb[60].mxu0 %v19976_v31  ;;  %v2913_v54 = vrot.slane %v2912_v44, 2  ;;  %v2921_v28 = vrot.slane %v2919_v33, 6  ;;  %v5504_v58 = vrot.slane %v19934_v55, 2  ;;  %v5505_v10 = vrot.slane %v2909_v48, 7 }
 0x384   :  { %v2927_v26 = vrot.slane %v2925_v20, 7  ;;  %v2931_v60 = vrot.slane %v2929_v16, 6  ;;  %v2937_v49 = vrot.slane %v2935_v38, 7  ;;  %v5509_v14 = vrot.slane %v2919_v33, 7 }
 0x385   :  { %v2918_v61 = vsel %vm19509_vm7, %v2913_v54, %v2917_v56  ;;  %v2922_v19 = vor.u32 %v2921_v28, %v2917_v56  ;;  %v5506_v13 = vor.u32 %v5505_v10, %v2905_v41  ;;  %v5508_v36 = vrot.slane %v5505_v10, 2 }
 0x386   :  { %v2932_v0 = vor.u32 %v2931_v60, %v2927_v26  ;;  %v3276_v4 = vcombine.low %v2908_v5, %v2918_v61  ;;  %v5510_v29 = vor.u32 %v5509_v14, %v2915_v45  ;;  %v5512_v1 = vrot.slane %v5509_v14, 2 }
 0x387   :  { %v2923_v31 = vrot.slane %v2922_v19, 2  ;;  %v5507_v44 = vsel %vm19571_vm12, %v5504_v58, %v5506_v13  ;;  %v5513_v55 = vrot.slane %v2929_v16, 7  ;;  %v5517_v48 = vshrl.u32 %v19761_v27, 16 }
 0x388   :  { %v2933_v62 = vrot.slane %v2932_v0, 2  ;;  %v3284_v33 = vrot.slane %v3276_v4, %v19457_v24  ;;  %v5511_v54 = vsel %vm19571_vm12, %v5508_v36, %v5510_v29  ;;  %v2296_v41 = vadd.f32 %v19447_v57, %v19841_v51 }
 0x389   :  { %v2928_v45 = vsel %vm19509_vm7, %v2923_v31, %v2927_v26  ;;  %v5514_v56 = vor.u32 %v5513_v55, %v2925_v20  ;;  %v5516_v5 = vrot.slane %v5513_v55, 2  ;;  %v5519_v28 = vrot.slane %v5517_v48, 7 }
 0x38a   :  { %v2938_v16 = vsel %vm19509_vm7, %v2933_v62, %v2937_v49  ;;  %v5735_v58 = vcombine.low %v5507_v44, %v5511_v54  ;;  %v2344_v10 = vmax.f32 %v2296_v41, 0.0  ;;  %v2297_v4 = vadd.f32 %v19451_v9, %v19845_v63 }
 0x38b   :  { %v3277_v60 = vcombine.low %v2928_v45, %v2938_v16  ;;  %v5515_v29 = vsel %vm19571_vm12, %v5512_v1, %v5514_v56  ;;  %v5520_v14 = vor.u32 %v5519_v28, %v2935_v38  ;;  %v2298_v51 = vadd.f32 %v19447_v57, %v19858_v23 }
 0x38c   :  { %v5743_v31 = vrot.slane %v5735_v58, %v19457_v24  ;;  %v2345_v20 = vmax.f32 %v2297_v4, 0.0  ;;  %v2299_v26 = vadd.f32 %v19451_v9, %v19865_v42  ;;  %v24091_v62 = vshrl.u32 %v19764_v34, 16 }
 0x38d   :  { %v3291_v61 = vrot.slane %v3277_v60, %v19457_v24  ;;  %v5521_v63 = vsel %vm19571_vm12, %v5516_v5, %v5520_v14  ;;  %v2346_v19 = vmax.f32 %v2298_v51, 0.0  ;;  %v2949_v1 = vshll.u32 %v19784_v22, 16 }
 0x38e   :  { %v2942_v49 = vrot.slane %v24091_v62, 6  ;;  %v5736_v38 = vcombine.low %v5515_v29, %v5521_v63  ;;  %v15556_v13 = vpack.c.bf16 %v2345_v20, %v2344_v10  ;;  %v2347_v23 = vmax.f32 %v2299_v26, 0.0 }
 0x38f   :  { %v20026_v0 = vcombine.high %v3284_v33, %v3291_v61  ;;  %v20028_v44 = vcombine.low %v3284_v33, %v3291_v61  ;;  %v2951_v42 = vrot.slane %v2949_v1, 7  ;;  %v2953_v55 = vshrl.u32 %v19784_v22, 16 }
 0x390   :  { %v2946_v36 = vor.u32 %v19818_v30, %v2942_v49  ;;  %v5750_v48 = vrot.slane %v5736_v38, %v19457_v24  ;;  %v20033_v54 = vrot.slane %v15556_v13, %v19457_v24  ;;  %v15557_v41 = vpack.c.bf16 %v2347_v23, %v2346_v19 }
 0x391   :  { %24092 = vst [vmem:[#allocation65_spill] sm:$0xff] %v20028_v44  ;;  %14769 = vmatprep.mubr.msk.bf16.mxu1 %vm3586_vm10, %v20026_v0  ;;  %v2955_v56 = vrot.slane %v2953_v55, 6  ;;  %v2959_v30 = vshll.u32 %v19850_v35, 16  ;;  %v2963_v5 = vshrl.u32 %v19850_v35, 16  ;;  %v2969_v33 = vshll.u32 %v19880_v7, 16 }
 0x392   :  { %24093 = vst [vmem:[#allocation66_spill] sm:$0xff] %v20033_v54  ;;  %v2947_v45 = vrot.slane %v2946_v36, 2  ;;  %v20042_v28 = vcombine.high %v19979_v11, %v19979_v11  ;;  %v20044_v16 = vcombine.high %v5743_v31, %v5750_v48  ;;  %3690 = vmatmul.mubr.bf16.gmra.mrb[16].mxu1 %v20028_v44  ;;  %v20047_v58 = vcombine.low %v5743_v31, %v5750_v48 }
 0x393   :  { %v20051_v10 = vcombine.high %v20033_v54, %v20033_v54  ;;  %v3051_v60 = vshll.u32 %v20033_v54, 16  ;;  %v20056_v29 = vrot.slane %v15557_v41, %v19457_v24  ;;  %v2956_v14 = vor.u32 %v2955_v56, %v2951_v42 }
 0x394   :  { %24094 = vst [vmem:[#allocation67_spill] sm:$0xff] %v20042_v28  ;;  %24095 = vst [vmem:[#allocation68_spill] sm:$0xff] %v20044_v16  ;;  %14963 = vmatprep.mubr.msk.bf16.mxu0 %vm3586_vm10, %v20044_v16  ;;  %v2961_v51 = vrot.slane %v2959_v30, 7  ;;  %v2965_v20 = vrot.slane %v2963_v5, 6  ;;  %v2971_v26 = vrot.slane %v2969_v33, 7  ;;  %v2973_v31 = vshrl.u32 %v19880_v7, 16 }
 0x395   :  { %24096 = vst [vmem:[#allocation69_spill] sm:$0xff] %v20047_v58  ;;  %24097 = vst [vmem:[#allocation70_spill] sm:$0xff] %v20051_v10  ;;  %6273 = vmatmul.mubr.bf16.gmra.mrb[64].mxu0 %v20047_v58  ;;  %v20062_v62 = vrot.slane %v3051_v60, 7  ;;  %v2952_v49 = vsel %vm19509_vm7, %v2947_v45, %v2951_v42  ;;  %v2957_v61 = vrot.slane %v2956_v14, 2  ;;  %v2979_v63 = vshll.u32 %v19889_v12, 16 }
 0x396   :  { %v2966_v19 = vor.u32 %v2965_v20, %v2961_v51  ;;  %v2975_v38 = vrot.slane %v2973_v31, 6  ;;  %v2983_v13 = vshrl.u32 %v19889_v12, 16  ;;  %v24098_v23 = vshrl.u32 %v19764_v34, 16 }
 0x397   :  { %v2962_v48 = vsel %vm19509_vm7, %v2957_v61, %v2961_v51  ;;  %v20072_v41 = vrot.slane %v2979_v63, 7  ;;  %v5524_v56 = vrot.slane %v2953_v55, 7  ;;  %v5528_v60 = vrot.slane %v2963_v5, 7 }
 0x398   :  { %v14909_v36 = vrot.slane %v24098_v23, 9  ;;  %v2967_v4 = vrot.slane %v2966_v19, 2  ;;  %v2976_v58 = vor.u32 %v2975_v38, %v2971_v26  ;;  %v3294_v42 = vcombine.low %v2952_v49, %v2962_v48 }
 0x399   :  { %v5532_v45 = vrot.slane %v2973_v31, 7  ;;  %v5525_v14 = vor.u32 %v5524_v56, %v2949_v1  ;;  %v5527_v16 = vrot.slane %v5524_v56, 2  ;;  %v5529_v20 = vor.u32 %v5528_v60, %v2959_v30 }
 0x39a   :  { %v5531_v44 = vrot.slane %v5528_v60, 2  ;;  %v2972_v22 = vsel %vm19509_vm7, %v2967_v4, %v2971_v26  ;;  %v2977_v34 = vrot.slane %v2976_v58, 2  ;;  %v3302_v23 = vrot.slane %v3294_v42, %v19457_v24 }
 0x39b   :  { %v5533_v35 = vor.u32 %v5532_v45, %v2969_v33  ;;  %v5526_v51 = vsel %vm19571_vm12, %v14909_v36, %v5525_v14  ;;  %v5530_v55 = vsel %vm19571_vm12, %v5527_v16, %v5529_v20  ;;  %v5535_v5 = vrot.slane %v5532_v45, 2 }
 0x39c   :  { %v20081_v49 = vrot.slane %v2983_v13, 7  ;;  %v2982_v1 = vsel %vm19509_vm7, %v2977_v34, %v20072_v41  ;;  %v5753_v58 = vcombine.low %v5526_v51, %v5530_v55  ;;  %v2300_v33 = vadd.f32 %v19447_v57, %v19892_v21 }
 0x39d   :  { %v5534_v30 = vsel %vm19571_vm12, %v5531_v44, %v5533_v35  ;;  %v3295_v4 = vcombine.low %v2972_v22, %v2982_v1  ;;  %v2301_v16 = vadd.f32 %v19451_v9, %v19895_v47  ;;  %v2302_v31 = vadd.f32 %v19447_v57, %v19904_v25 }
 0x39e   :  { %v5537_v26 = vor.u32 %v20081_v49, %v2979_v63  ;;  %v5761_v61 = vrot.slane %v5753_v58, %v19457_v24  ;;  %v2348_v19 = vmax.f32 %v2300_v33, 0.0  ;;  %v2303_v34 = vadd.f32 %v19451_v9, %v19910_v46 }
 0x39f   :  { %v2304_v35 = vadd.f32 %v19447_v57, %v19925_v18  ;;  %v3309_v21 = vrot.slane %v3295_v4, %v19457_v24  ;;  %v2349_v44 = vmax.f32 %v2301_v16, 0.0  ;;  %v2350_v63 = vmax.f32 %v2302_v31, 0.0 }
 0x3a0   :  { %v5538_v22 = vsel %vm19571_vm12, %v5535_v5, %v5537_v26  ;;  %v2351_v38 = vmax.f32 %v2303_v34, 0.0  ;;  %v2305_v25 = vadd.f32 %v19451_v9, %v19929_v37  ;;  %v20111_v18 = vcombine.high %v19889_v12, %v19889_v12 }
 0x3a1   :  { %v5754_v47 = vcombine.low %v5534_v30, %v5538_v22  ;;  %v2352_v36 = vmax.f32 %v2304_v35, 0.0  ;;  %v20105_v48 = vcombine.high %v3302_v23, %v3309_v21  ;;  %v20107_v56 = vcombine.low %v3302_v23, %v3309_v21 }
 0x3a2   :  { %v15558_v46 = vpack.c.bf16 %v2349_v44, %v2348_v19  ;;  %24099 = vst [vmem:[#allocation71_spill] sm:$0xff] %v20111_v18  ;;  %v15559_v42 = vpack.c.bf16 %v2351_v38, %v2350_v63  ;;  %v2353_v45 = vmax.f32 %v2305_v25, 0.0  ;;  %v2985_v14 = vrot.slane %v2983_v13, 6 }
 0x3a3   :  { %v5768_v60 = vrot.slane %v5754_v47, %v19457_v24  ;;  %v20116_v20 = vcombine.high %v20056_v29, %v20056_v29  ;;  %14770 = vmatprep.mubr.msk.bf16.mxu1 %vm3586_vm10, %v20105_v48  ;;  %v2989_v37 = vshll.u32 %v20111_v18, 16  ;;  %v2994_v23 = vshrl.u32 %v19902_v43, 16 }
 0x3a4   :  { %v2997_v51 = vshll.u32 %v19902_v43, 16  ;;  %3700 = vmatmul.mubr.bf16.gmra.mrb[20].mxu1 %v20107_v56  ;;  %v20129_v13 = vrot.slane %v15559_v42, %v19457_v24  ;;  %v15560_v1 = vpack.c.bf16 %v2353_v45, %v2352_v36  ;;  %v20132_v30 = vrot.slane %v15558_v46, %v19457_v24 }
 0x3a5   :  { %v20124_v55 = vcombine.high %v5761_v61, %v5768_v60  ;;  %v20126_v5 = vcombine.low %v5761_v61, %v5768_v60  ;;  %v2986_v58 = vor.u32 %v2985_v14, %v20072_v41  ;;  %v2996_v33 = vrot.slane %v2994_v23, 6 }
 0x3a6   :  { %v2999_v4 = vrot.slane %v2997_v51, 7  ;;  %v20138_v26 = vrot.slane %v15560_v1, %v19457_v24  ;;  %v2991_v16 = vrot.slane %v2989_v37, 7  ;;  %v3003_v31 = vshll.u32 %v19967_v17, 16 }
 0x3a7   :  { %24100 = vst [vmem:[#allocation72_spill] sm:$0xff] %v20124_v55  ;;  %24101 = vst [vmem:[#allocation73_spill] sm:$0xff] %v20126_v5  ;;  %14964 = vmatprep.mubr.msk.bf16.mxu0 %vm3586_vm10, %v20124_v55  ;;  %v3007_v61 = vshrl.u32 %v19967_v17, 16  ;;  %v2987_v19 = vrot.slane %v2986_v58, 2  ;;  %v3013_v35 = vshll.u32 %v19970_v6, 16  ;;  %v3017_v41 = vshrl.u32 %v19970_v6, 16 }
 0x3a8   :  { %24102 = vst [vmem:[#allocation74_spill] sm:$0xff] %v20138_v26  ;;  %6281 = vmatmul.mubr.bf16.gmra.mrb[68].mxu0 %v20126_v5  ;;  %v3000_v34 = vor.u32 %v2999_v4, %v2996_v33  ;;  %v20147_v21 = vcombine.high %v20129_v13, %v20129_v13  ;;  %v3005_v22 = vrot.slane %v3003_v31, 7  ;;  %v3023_v63 = vshll.u32 %v19984_v40, 16 }
 0x3a9   :  { %v3009_v44 = vrot.slane %v3007_v61, 6  ;;  %v20152_v47 = vcombine.high %v20138_v26, %v20138_v26  ;;  %v3015_v36 = vrot.slane %v3013_v35, 7  ;;  %v3019_v25 = vrot.slane %v3017_v41, 6 }
 0x3aa   :  { %24103 = vst [vmem:[#allocation75_spill] sm:$0xff] %v20147_v21  ;;  %v3001_v38 = vrot.slane %v3000_v34, 2  ;;  %v2992_v46 = vsel %vm19509_vm7, %v2987_v19, %v2991_v16  ;;  %v20156_v42 = vrot.slane %v3023_v63, 7  ;;  %v3027_v45 = vshrl.u32 %v19984_v40, 16 }
 0x3ab   :  { %24104 = vst [vmem:[#allocation76_spill] sm:$0xff] %v20152_v47  ;;  %v3010_v60 = vor.u32 %v3009_v44, %v3005_v22  ;;  %v3020_v51 = vor.u32 %v3019_v25, %v3015_v36  ;;  %v5539_v1 = vrot.slane %v20081_v49, 2  ;;  %v5540_v58 = vshrl.u32 %v20111_v18, 16 }
 0x3ac   :  { %v3006_v14 = vsel %vm19509_vm7, %v3001_v38, %v3005_v22  ;;  %v5547_v34 = vrot.slane %v3007_v61, 7  ;;  %v5551_v5 = vrot.slane %v3017_v41, 7  ;;  %v5555_v16 = vrot.slane %v3027_v45, 7 }
 0x3ad   :  { %v3011_v33 = vrot.slane %v3010_v60, 2  ;;  %v3312_v4 = vcombine.low %v2992_v46, %v3006_v14  ;;  %v3021_v55 = vrot.slane %v3020_v51, 2  ;;  %v5542_v17 = vrot.slane %v5540_v58, 7 }
 0x3ae   :  { %v2306_v19 = vadd.f32 %v19447_v57, %v19936_v32  ;;  %v14910_v38 = vrot.slane %v2994_v23, 9  ;;  %v5548_v25 = vor.u32 %v5547_v34, %v3003_v31  ;;  %v5550_v61 = vrot.slane %v5547_v34, 2 }
 0x3af   :  { %v3016_v44 = vsel %vm19509_vm7, %v3011_v33, %v3015_v36  ;;  %v3320_v22 = vrot.slane %v3312_v4, %v19457_v24  ;;  %v3026_v49 = vsel %vm19509_vm7, %v3021_v55, %v20156_v42  ;;  %v5543_v46 = vor.u32 %v5542_v17, %v2989_v37 }
 0x3b0   :  { %v5552_v41 = vor.u32 %v5551_v5, %v3013_v35  ;;  %v3313_v60 = vcombine.low %v3016_v44, %v3026_v49  ;;  %v5549_v14 = vsel %vm19571_vm12, %v14910_v38, %v5548_v25  ;;  %v5554_v51 = vrot.slane %v5551_v5, 2 }
 0x3b1   :  { %v5556_v57 = vor.u32 %v5555_v16, %v3023_v63  ;;  %v5544_v32 = vsel %vm19571_vm12, %v5539_v1, %v5543_v46  ;;  %v2354_v31 = vmax.f32 %v2306_v19, 0.0  ;;  %v2307_v36 = vadd.f32 %v19451_v9, %v19942_v39 }
 0x3b2   :  { %v5553_v23 = vsel %vm19571_vm12, %v5550_v61, %v5552_v41  ;;  %v3327_v17 = vrot.slane %v3313_v60, %v19457_v24  ;;  %v5771_v55 = vcombine.low %v5544_v32, %v5549_v14  ;;  %v3037_v35 = vshrl.u32 %v19979_v11, 16 }
 0x3b3   :  { %v5557_v37 = vsel %vm19571_vm12, %v5554_v51, %v5556_v57  ;;  %v2355_v63 = vmax.f32 %v2307_v36, 0.0  ;;  %v3033_v58 = vshll.u32 %v19979_v11, 16  ;;  %v3043_v1 = vshll.u32 %v20042_v28, 16 }
 0x3b4   :  { %v5772_v5 = vcombine.low %v5553_v23, %v5557_v37  ;;  %v20185_v33 = vcombine.high %v3320_v22, %v3327_v17  ;;  %v20187_v4 = vcombine.low %v3320_v22, %v3327_v17  ;;  %v3057_v9 = vshll.u32 %v20051_v10, 16 }
 0x3b5   :  { %v3061_v39 = vshrl.u32 %v20051_v10, 16  ;;  %v5779_v34 = vrot.slane %v5771_v55, %v19457_v24  ;;  %v15561_v44 = vpack.c.bf16 %v2355_v63, %v2354_v31  ;;  %v3071_v38 = vshrl.u32 %v20056_v29, 16 }
 0x3b6   :  { %v5786_v19 = vrot.slane %v5772_v5, %v19457_v24  ;;  %14771 = vmatprep.mubr.msk.bf16.mxu1 %vm3586_vm10, %v20185_v33  ;;  %v3067_v25 = vshll.u32 %v20056_v29, 16  ;;  %v5558_v49 = vrot.slane %v5555_v16, 2  ;;  %v5559_v46 = vrot.slane %v3037_v35, 7 }
 0x3b7   :  { %v5563_v22 = vshrl.u32 %v20042_v28, 16  ;;  %3710 = vmatmul.mubr.bf16.gmra.mrb[24].mxu1 %v20187_v4  ;;  %v24107_v60 = vshrl.u32 %v20033_v54, 16  ;;  %v5570_v51 = vrot.slane %v3061_v39, 7  ;;  %v20206_v57 = vrot.slane %v15561_v44, %v19457_v24 }
 0x3b8   :  { %v20198_v61 = vcombine.high %v5779_v34, %v5786_v19  ;;  %v20201_v41 = vcombine.low %v5779_v34, %v5786_v19  ;;  %v5560_v32 = vor.u32 %v5559_v46, %v3033_v58  ;;  %v20208_v31 = vrot.slane %v3071_v38, 7 }
 0x3b9   :  { %v14911_v14 = vrot.slane %v24107_v60, 9  ;;  %24108 = vst [vmem:[#allocation79_spill] sm:$0xff] %v20206_v57  ;;  %v5565_v23 = vrot.slane %v5563_v22, 7  ;;  %v5562_v16 = vrot.slane %v5559_v46, 2  ;;  %v5571_v36 = vor.u32 %v5570_v51, %v3057_v9 }
 0x3ba   :  { %24105 = vst [vmem:[#allocation77_spill] sm:$0xff] %v20198_v61  ;;  %24106 = vst [vmem:[#allocation78_spill] sm:$0xff] %v20201_v41  ;;  %14965 = vmatprep.mubr.msk.bf16.mxu0 %vm3586_vm10, %v20198_v61  ;;  %v5573_v17 = vrot.slane %v5570_v51, 2  ;;  %v3029_v37 = vrot.slane %v3027_v45, 6  ;;  %v5561_v55 = vsel %vm19571_vm12, %v5558_v49, %v5560_v32  ;;  %v5575_v63 = vor.u32 %v20208_v31, %v3067_v25 }
 0x3bb   :  { %6289 = vmatmul.mubr.bf16.gmra.mrb[72].mxu0 %v20201_v41  ;;  %v5566_v5 = vor.u32 %v5565_v23, %v3043_v1  ;;  %v3035_v34 = vrot.slane %v3033_v58, 7  ;;  %v5572_v19 = vsel %vm19571_vm12, %v14911_v14, %v5571_v36  ;;  %v3039_v22 = vrot.slane %v3037_v35, 6 }
 0x3bc   :  { %v3030_v44 = vor.u32 %v3029_v37, %v20156_v42  ;;  %v3045_v60 = vrot.slane %v3043_v1, 7  ;;  %v5576_v45 = vsel %vm19571_vm12, %v5573_v17, %v5575_v63  ;;  %v24109_v51 = vshrl.u32 %v20033_v54, 16 }
 0x3bd   :  { %v5567_v46 = vsel %vm19571_vm12, %v5562_v16, %v5566_v5  ;;  %v3059_v32 = vrot.slane %v3057_v9, 7  ;;  %v5790_v41 = vcombine.low %v5572_v19, %v5576_v45  ;;  %v3040_v61 = vor.u32 %v3039_v22, %v3035_v34 }
 0x3be   :  { %v3050_v49 = vrot.slane %v24109_v51, 6  ;;  %v5789_v23 = vcombine.low %v5561_v55, %v5567_v46  ;;  %v3031_v58 = vrot.slane %v3030_v44, 2  ;;  %v3063_v36 = vrot.slane %v3061_v39, 6 }
 0x3bf   :  { %v3069_v42 = vrot.slane %v3067_v25, 7  ;;  %v20228_v35 = vcombine.high %v20132_v30, %v20132_v30  ;;  %v5804_v16 = vrot.slane %v5790_v41, %v19457_v24  ;;  %v3041_v9 = vrot.slane %v3040_v61, 2 }
 0x3c0   :  { %v3054_v14 = vor.u32 %v20062_v62, %v3050_v49  ;;  %v5797_v1 = vrot.slane %v5789_v23, %v19457_v24  ;;  %v3036_v17 = vsel %vm19509_vm7, %v3031_v58, %v3035_v34  ;;  %v3064_v55 = vor.u32 %v3063_v36, %v3059_v32 }
 0x3c1   :  { %24110 = vst [vmem:[#allocation80_spill] sm:$0xff] %v20228_v35  ;;  %v3073_v5 = vrot.slane %v3071_v38, 6  ;;  %v3077_v63 = vshll.u32 %v20116_v20, 16  ;;  %v3046_v25 = vsel %vm19509_vm7, %v3041_v9, %v3045_v60  ;;  %v3081_v19 = vshrl.u32 %v20116_v20, 16 }
 0x3c2   :  { %v3055_v37 = vrot.slane %v3054_v14, 2  ;;  %v20235_v62 = vcombine.high %v5797_v1, %v5804_v16  ;;  %v20237_v39 = vcombine.low %v5797_v1, %v5804_v16  ;;  %v3065_v44 = vrot.slane %v3064_v55, 2 }
 0x3c3   :  { %v3330_v34 = vcombine.low %v3036_v17, %v3046_v25  ;;  %v3074_v61 = vor.u32 %v3073_v5, %v3069_v42  ;;  %v3079_v38 = vrot.slane %v3077_v63, 7  ;;  %v3083_v22 = vrot.slane %v3081_v19, 6 }
 0x3c4   :  { %24111 = vst [vmem:[#allocation81_spill] sm:$0xff] %v20235_v62  ;;  %24112 = vst [vmem:[#allocation82_spill] sm:$0xff] %v20237_v39  ;;  %v3060_v41 = vsel %vm19509_vm7, %v3055_v37, %v3059_v32  ;;  %14966 = vmatprep.mubr.msk.bf16.mxu0 %vm3586_vm10, %v20235_v62  ;;  %v3087_v46 = vshll.u32 %v20132_v30, 16  ;;  %v3091_v45 = vshrl.u32 %v20132_v30, 16  ;;  %v3070_v60 = vsel %vm19509_vm7, %v3065_v44, %v3069_v42 }
 0x3c5   :  { %6297 = vmatmul.mubr.bf16.gmra.mrb[76].mxu0 %v20237_v39  ;;  %v3338_v51 = vrot.slane %v3330_v34, %v19457_v24  ;;  %v3075_v49 = vrot.slane %v3074_v61, 2  ;;  %v3097_v32 = vshll.u32 %v20228_v35, 16  ;;  %v3331_v23 = vcombine.low %v3060_v41, %v3070_v60 }
 0x3c6   :  { %v3084_v58 = vor.u32 %v3083_v22, %v3079_v38  ;;  %v3089_v14 = vrot.slane %v3087_v46, 7  ;;  %v3093_v36 = vrot.slane %v3091_v45, 6  ;;  %v3102_v17 = vshrl.u32 %v20129_v13, 16 }
 0x3c7   :  { %v3080_v1 = vsel %vm19509_vm7, %v3075_v49, %v3079_v38  ;;  %v3099_v16 = vrot.slane %v3097_v32, 7  ;;  %v3105_v9 = vshll.u32 %v20129_v13, 16  ;;  %v3345_v37 = vrot.slane %v3331_v23, %v19457_v24 }
 0x3c8   :  { %v3085_v42 = vrot.slane %v3084_v58, 2  ;;  %v3094_v55 = vor.u32 %v3093_v36, %v3089_v14  ;;  %v3111_v5 = vshll.u32 %v20147_v21, 16  ;;  %v3104_v25 = vrot.slane %v3102_v17, 6 }
 0x3c9   :  { %v3107_v44 = vrot.slane %v3105_v9, 7  ;;  %v3115_v41 = vshrl.u32 %v20147_v21, 16  ;;  %v5577_v34 = vrot.slane %v20208_v31, 2  ;;  %v20261_v61 = vcombine.high %v3338_v51, %v3345_v37 }
 0x3ca   :  { %v20263_v38 = vcombine.low %v3338_v51, %v3345_v37  ;;  %v3090_v22 = vsel %vm19509_vm7, %v3085_v42, %v3089_v14  ;;  %v3095_v60 = vrot.slane %v3094_v55, 2  ;;  %v3113_v23 = vrot.slane %v3111_v5, 7 }
 0x3cb   :  { %v3108_v49 = vor.u32 %v3107_v44, %v3104_v25  ;;  %v3348_v58 = vcombine.low %v3080_v1, %v3090_v22  ;;  %v5578_v36 = vrot.slane %v3081_v19, 7  ;;  %14772 = vmatprep.mubr.msk.bf16.mxu1 %vm3586_vm10, %v20261_v61  ;;  %v5582_v39 = vrot.slane %v3091_v45, 7 }
 0x3cc   :  { %v3100_v9 = vsel %vm19509_vm7, %v3095_v60, %v3099_v16  ;;  %v5586_v31 = vshrl.u32 %v20228_v35, 16  ;;  %v14912_v62 = vrot.slane %v3102_v17, 9  ;;  %3720 = vmatmul.mubr.bf16.gmra.mrb[28].mxu1 %v20263_v38  ;;  %v20274_v25 = vrot.slane %v3115_v41, 7 }
 0x3cd   :  { %v3109_v51 = vrot.slane %v3108_v49, 2  ;;  %v3356_v14 = vrot.slane %v3348_v58, %v19457_v24  ;;  %v5579_v37 = vor.u32 %v5578_v36, %v3077_v63  ;;  %v5581_v42 = vrot.slane %v5578_v36, 2 }
 0x3ce   :  { %v5583_v55 = vor.u32 %v5582_v39, %v3087_v46  ;;  %v5585_v1 = vrot.slane %v5582_v39, 2  ;;  %v5588_v19 = vrot.slane %v5586_v31, 7  ;;  %v3117_v16 = vrot.slane %v3115_v41, 6 }
 0x3cf   :  { %v3114_v44 = vsel %vm19509_vm7, %v3109_v51, %v3113_v23  ;;  %v5580_v45 = vsel %vm19571_vm12, %v5577_v34, %v5579_v37  ;;  %v3121_v17 = vshll.u32 %v20138_v26, 16  ;;  %v5594_v46 = vor.u32 %v20274_v25, %v3111_v5 }
 0x3d0   :  { %v3349_v22 = vcombine.low %v3100_v9, %v3114_v44  ;;  %v5584_v60 = vsel %vm19571_vm12, %v5581_v42, %v5583_v55  ;;  %v5589_v63 = vor.u32 %v5588_v19, %v3097_v32  ;;  %v3118_v49 = vor.u32 %v3117_v16, %v3113_v23 }
 0x3d1   :  { %v5807_v39 = vcombine.low %v5580_v45, %v5584_v60  ;;  %v3123_v58 = vrot.slane %v3121_v17, 7  ;;  %v3125_v36 = vshrl.u32 %v20138_v26, 16  ;;  %v5595_v41 = vsel %vm19571_vm12, %v14912_v62, %v5594_v46 }
 0x3d2   :  { %v3363_v31 = vrot.slane %v3349_v22, %v19457_v24  ;;  %v5590_v34 = vsel %vm19571_vm12, %v5585_v1, %v5589_v63  ;;  %v3131_v9 = vshll.u32 %v20152_v47, 16  ;;  %v20293_v32 = vcombine.high %v20206_v57, %v20206_v57 }
 0x3d3   :  { %v5808_v5 = vcombine.low %v5590_v34, %v5595_v41  ;;  %v3127_v51 = vrot.slane %v3125_v36, 6  ;;  %v3135_v55 = vshrl.u32 %v20152_v47, 16  ;;  %v5815_v1 = vrot.slane %v5807_v39, %v19457_v24 }
 0x3d4   :  { %24113 = vst [vmem:[#allocation83_spill] sm:$0xff] %v20293_v32  ;;  %v20295_v23 = vcombine.high %v3356_v14, %v3363_v31  ;;  %v20297_v37 = vcombine.low %v3356_v14, %v3363_v31  ;;  %v3133_v42 = vrot.slane %v3131_v9, 7  ;;  %v3141_v44 = vshll.u32 %v20206_v57, 16 }
 0x3d5   :  { %v5822_v19 = vrot.slane %v5808_v5, %v19457_v24  ;;  %v3128_v62 = vor.u32 %v3127_v51, %v3123_v58  ;;  %v3119_v45 = vrot.slane %v3118_v49, 2  ;;  %v3137_v16 = vrot.slane %v3135_v55, 6 }
 0x3d6   :  { %24114 = vst [vmem:[#allocation84_spill] sm:$0xff] %v20297_v37  ;;  %14773 = vmatprep.mubr.msk.bf16.mxu1 %vm3586_vm10, %v20295_v23  ;;  %v3145_v22 = vshrl.u32 %v20206_v57, 16  ;;  %v3143_v46 = vrot.slane %v3141_v44, 7  ;;  %v3151_v34 = vshll.u32 %v20293_v32, 16  ;;  %v5597_v41 = vrot.slane %v3125_v36, 7 }
 0x3d7   :  { %v20306_v60 = vcombine.high %v5815_v1, %v5822_v19  ;;  %3730 = vmatmul.mubr.bf16.gmra.mrb[32].mxu1 %v20297_v37  ;;  %v20309_v14 = vcombine.low %v5815_v1, %v5822_v19  ;;  %v3129_v63 = vrot.slane %v3128_v62, 2  ;;  %v3138_v39 = vor.u32 %v3137_v16, %v3133_v42 }
 0x3d8   :  { %v3147_v31 = vrot.slane %v3145_v22, 6  ;;  %v5601_v5 = vrot.slane %v3135_v55, 7  ;;  %v5605_v51 = vrot.slane %v3145_v22, 7  ;;  %v5609_v35 = vshrl.u32 %v20293_v32, 16 }
 0x3d9   :  { %24115 = vst [vmem:[#allocation85_spill] sm:$0xff] %v20306_v60  ;;  %24116 = vst [vmem:[#allocation86_spill] sm:$0xff] %v20309_v14  ;;  %14967 = vmatprep.mubr.msk.bf16.mxu0 %vm3586_vm10, %v20306_v60  ;;  %v3134_v49 = vsel %vm19509_vm7, %v3129_v63, %v3133_v42  ;;  %v3124_v1 = vsel %vm19509_vm7, %v3119_v45, %v3123_v58  ;;  %v3139_v19 = vrot.slane %v3138_v39, 2  ;;  %v5596_v16 = vrot.slane %v20274_v25, 2 }
 0x3da   :  { %6305 = vmatmul.mubr.bf16.gmra.mrb[80].mxu0 %v20309_v14  ;;  %v3148_v62 = vor.u32 %v3147_v31, %v3143_v46  ;;  %v5598_v36 = vor.u32 %v5597_v41, %v3121_v17  ;;  %v5600_v18 = vrot.slane %v5597_v41, 2  ;;  %v5602_v21 = vor.u32 %v5601_v5, %v3131_v9 }
 0x3db   :  { %v3144_v60 = vsel %vm19509_vm7, %v3139_v19, %v3143_v46  ;;  %v3153_v55 = vrot.slane %v3151_v34, 7  ;;  %v3366_v22 = vcombine.low %v3124_v1, %v3134_v49  ;;  %v5604_v14 = vrot.slane %v5601_v5, 2  ;;  %v24122_v19 = vld [vmem:[#allocation38_spill] sm:$0xff] }
 0x3dc   :  { %v3149_v42 = vrot.slane %v3148_v62, 2  ;;  %v5603_v63 = vsel %vm19571_vm12, %v5600_v18, %v5602_v21  ;;  %v5606_v54 = vor.u32 %v5605_v51, %v3141_v44  ;;  %v5611_v37 = vrot.slane %v5609_v35, 7  ;;  %v24117_v44 = vld [vmem:[#allocation27_spill] sm:$0xff]  ;;  %v24123_v62 = vld [vmem:[#allocation41_spill] sm:$0xff] }
 0x3dd   :  { %v5599_v25 = vsel %vm19571_vm12, %v5596_v16, %v5598_v36  ;;  %v5608_v17 = vrot.slane %v5605_v51, 2  ;;  %v6431_v46 = vcombine.low %v19481_v50, %v19503_v59  ;;  %v3374_v31 = vrot.slane %v3366_v22, %v19457_v24  ;;  %v24120_v51 = vld [vmem:[#allocation30_spill] sm:$0xff]  ;;  %v24124_v36 = vld [vmem:[#allocation25_spill] sm:$0xff] }
 0x3de   :  { %v3154_v58 = vsel %vm19509_vm7, %v3149_v42, %v3153_v55  ;;  %v5612_v9 = vor.u32 %v5611_v37, %v3151_v34  ;;  %v5825_v39 = vcombine.low %v5599_v25, %v5603_v63  ;;  %v5607_v21 = vsel %vm19571_vm12, %v5604_v14, %v5606_v54  ;;  %v16886_v55 = vld [vmem:[#allocation6] ss:$12 sps:$4 sm:$0xff]   ;;  %v16891_v63 = vld [vmem:[#allocation6 + $0x1c] ss:$12 sps:$4 sm:$0xff]  }
 0x3df   :  { %v3367_v45 = vcombine.low %v3144_v60, %v3154_v58  ;;  %v6430_v60 = vcombine.low %v24117_v44, %v19469_v52  ;;  %v6445_v5 = vrot.slane %v6431_v46, %v19457_v24  ;;  %v6449_v16 = vcombine.low %v24123_v62, %v24122_v19  ;;  %v24125_v58 = vld [vmem:[#allocation28_spill] sm:$0xff] }
 0x3e0   :  { %v5613_v8 = vsel %vm19571_vm12, %v5608_v17, %v5612_v9  ;;  %v5833_v34 = vrot.slane %v5825_v39, %v19457_v24  ;;  %v14969_v42 = vcombine.high %v19503_v59, %v24124_v36  ;;  %v24127_v17 = vld [vmem:[#allocation46_spill] sm:$0xff]  ;;  %v24129_v46 = vld [vmem:[#allocation32_spill] sm:$0xff]  ;;  %vm7947_vm7 = vcmask 1047559  }
 0x3e1   :  { %v3381_v18 = vrot.slane %v3367_v45, %v19457_v24  ;;  %v5826_v35 = vcombine.low %v5607_v21, %v5613_v8  ;;  %v6438_v14 = vrot.slane %v6430_v60, %v19457_v24  ;;  %v6463_v22 = vrot.slane %v6449_v16, %v19457_v24  ;;  %v16889_v9 = vld [vmem:[#allocation6 + $0x18] ss:$12 sps:$4 sm:$0xff]   ;;  %v16894_v21 = vld [vmem:[#allocation6 + $0x34] ss:$12 sps:$4 sm:$0xff]  }
 0x3e2   :  { %v6456_v45 = vrot.slane %v14969_v42, %v19457_v24  ;;  %v24131_v8 = vld [vmem:[#allocation37_spill] sm:$0xff]  ;;  %v24135_v42 = vld [vmem:[#allocation56_spill] sm:$0xff] }
 0x3e3   :  { %v20339_v41 = vcombine.high %v3374_v31, %v3381_v18  ;;  %v20341_v37 = vcombine.low %v3374_v31, %v3381_v18  ;;  %v5840_v49 = vrot.slane %v5826_v35, %v19457_v24  ;;  %v20358_v1 = vcombine.high %v6438_v14, %v6445_v5  ;;  %v24130_v31 = vld [vmem:[#allocation31_spill] sm:$0xff]  ;;  %v24132_v35 = vld [vmem:[#allocation24_spill] sm:$0xff] }
 0x3e4   :  { %v20370_v25 = vcombine.low %v6438_v14, %v6445_v5  ;;  %v20374_v39 = vcombine.high %v6456_v45, %v6463_v22  ;;  %v6467_v18 = vcombine.low %v24130_v31, %v24129_v46  ;;  %v6466_v60 = vcombine.low %v24132_v35, %v24131_v8  ;;  %v16897_v5 = vld [vmem:[#allocation6 + $0x4c] ss:$12 sps:$4 sm:$0xff]   ;;  %v24133_v14 = vld [vmem:[#allocation47_spill] sm:$0xff] }
 0x3e5   :  { %14774 = vmatprep.mubr.msk.bf16.mxu1 %vm3586_vm10, %v20339_v41  ;;  %v20348_v54 = vcombine.high %v5833_v34, %v5840_v49  ;;  %v20351_v53 = vcombine.low %v5833_v34, %v5840_v49  ;;  %24121 = vst [vmem:[#allocation30_spill] sm:$0xff] %v20358_v1  ;;  %v16892_v34 = vld [vmem:[#allocation6 + $0x30] ss:$12 sps:$4 sm:$0xff]   ;;  %v20386_v16 = vcombine.low %v6456_v45, %v6463_v22 }
 0x3e6   :  { %3740 = vmatmul.mubr.bf16.gmra.mrb[36].mxu1 %v20341_v37  ;;  %24126 = vst [vmem:[#allocation38_spill] sm:$0xff] %v20370_v25  ;;  %24128 = vst [vmem:[#allocation41_spill] sm:$0xff] %v20374_v39  ;;  %v6481_v49 = vrot.slane %v6467_v18, %v19457_v24  ;;  %v16900_v18 = vld [vmem:[#allocation6 + $0x64] ss:$12 sps:$4 sm:$0xff]  }
 0x3e7   :  { %24118 = vst [vmem:[#allocation27_spill] sm:$0xff] %v20348_v54  ;;  %24119 = vst [vmem:[#allocation87_spill] sm:$0xff] %v20351_v53  ;;  %14775 = vmatprep.mubr.msk.bf16.mxu1 %vm3586_vm10, %v24120_v51  ;;  %14968 = vmatprep.mubr.msk.bf16.mxu0 %vm3586_vm10, %v20348_v54  ;;  %v6474_v51 = vrot.slane %v6466_v60, %v19457_v24  ;;  %v24139_v22 = vld [vmem:[#allocation36_spill] sm:$0xff] }
 0x3e8   :  { %6313 = vmatmul.mubr.bf16.gmra.mrb[84].mxu0 %v20351_v53  ;;  %24134 = vst [vmem:[#allocation25_spill] sm:$0xff] %v20386_v16 }
 0x3e9   :  { %15019 = vmatprep.mubr.msk.bf16.mxu0 %vm3586_vm10, %v20358_v1 }
 0x3ee   :  { %3783 = vmatmul.mubr.bf16.vlgmr.msra.gmra.mrb[40].mxu1 %v24125_v58  ;;  %v24137_v58 = vld [vmem:[#allocation42_spill] sm:$0xff] }
 0x3ef   :  { %4276 = vmatpush1.bf16.msra.mxu1 %v16886_v55  ;;  %14776 = vmatprep.mubr.msk.bf16.mxu1 %vm3586_vm10, %v24127_v17  ;;  %v16895_v55 = vld [vmem:[#allocation6 + $0x48] ss:$12 sps:$4 sm:$0xff]  }
 0x3f0   :  { %4277 = vmatprep.subr.bf16.mxu1 %v16891_v63  ;;  %7008 = vmatmul.mubr.bf16.vlgmr.msra.gmra.mrb[88].mxu0 %v20370_v25  ;;  %v20390_v63 = vcombine.high %v6474_v51, %v6481_v49  ;;  %v24138_v17 = vld [vmem:[#allocation43_spill] sm:$0xff] }
 0x3f1   :  { %15020 = vmatprep.mubr.msk.bf16.mxu0 %vm3586_vm10, %v20374_v39  ;;  %v6484_v45 = vcombine.low %v24139_v22, %v24138_v17 }
 0x3f2   :  { %24136 = vst [vmem:[#allocation28_spill] sm:$0xff] %v20390_v63 }
 0x3f3   :  { %4278 = vmatpush1.bf16.msra.mxu1 %v16889_v9  ;;  %v14970_v9 = vcombine.high %v24138_v17, %v24137_v58 }
 0x3f4   :  { %4279 = vmatprep.subr.bf16.mxu1 %v16894_v21  ;;  %v16898_v21 = vld [vmem:[#allocation6 + $0x60] ss:$12 sps:$4 sm:$0xff]  }
 0x3f5   :  { %v6499_v60 = vrot.slane %v14970_v9, %v19457_v24  ;;  %v16906_v9 = vld [vmem:[#allocation6 + $0x94] ss:$12 sps:$4 sm:$0xff]  }
 0x3f6   :  { %3791 = vmatmul.mubr.bf16.gmra.mrb[44].mxu1 %v24133_v14  ;;  %v24140_v14 = vld [vmem:[#allocation57_spill] sm:$0xff] }
 0x3f7   :  { %14777 = vmatprep.mubr.msk.bf16.mxu1 %vm3586_vm10, %v24135_v42  ;;  %4280 = vmatpush1.bf16.msra.mxu1 %v16892_v34  ;;  %v16903_v34 = vld [vmem:[#allocation6 + $0x7c] ss:$12 sps:$4 sm:$0xff]   ;;  %v6492_v42 = vrot.slane %v6484_v45, %v19457_v24  ;;  %v16909_v45 = vld [vmem:[#allocation6 + $0xac] ss:$12 sps:$4 sm:$0xff]  }
 0x3f8   :  { %4281 = vmatprep.subr.bf16.mxu1 %v16897_v5  ;;  %7016 = vmatmul.mubr.bf16.gmra.mrb[92].mxu0 %v20386_v16  ;;  %v20402_v5 = vcombine.low %v6474_v51, %v6481_v49  ;;  %v24143_v49 = vld [vmem:[#allocation45_spill] sm:$0xff] }
 0x3f9   :  { %15021 = vmatprep.mubr.msk.bf16.mxu0 %vm3586_vm10, %v20390_v63  ;;  %v16901_v63 = vld [vmem:[#allocation6 + $0x78] ss:$12 sps:$4 sm:$0xff]   ;;  %v20406_v16 = vcombine.high %v6492_v42, %v6499_v60  ;;  %v6502_v51 = vcombine.low %v24143_v49, %v19681_v2 }
 0x3fa   :  { %24141 = vst [vmem:[#allocation46_spill] sm:$0xff] %v20402_v5 }
 0x3fb   :  { %4282 = vmatpush1.bf16.msra.mxu1 %v16895_v55  ;;  %24142 = vst [vmem:[#allocation32_spill] sm:$0xff] %v20406_v16  ;;  %v6503_v55 = vcombine.low %v19747_v15, %v19761_v27 }
 0x3fc   :  { %4283 = vmatprep.subr.bf16.mxu1 %v16900_v18  ;;  %v16904_v18 = vld [vmem:[#allocation6 + $0x90] ss:$12 sps:$4 sm:$0xff]  }
 0x3fe   :  { %3799 = vmatmul.mubr.bf16.gmra.mrb[48].mxu1 %v24140_v14  ;;  %v6510_v14 = vrot.slane %v6502_v51, %v19457_v24  ;;  %v16910_v51 = vld [vmem:[#allocation6 + $0xc0] ss:$12 sps:$4 sm:$0xff]  }
 0x3ff   :  { %14778 = vmatprep.mubr.msk.bf16.mxu1 %vm3586_vm10, %v19960_v3  ;;  %4284 = vmatpush1.bf16.msra.mxu1 %v16898_v21  ;;  %v6517_v3 = vrot.slane %v6503_v55, %v19457_v24  ;;  %v24144_v21 = vld [vmem:[#allocation59_spill] sm:$0xff] }
 0x400   :  { %4285 = vmatprep.subr.bf16.mxu1 %v16903_v34  ;;  %7024 = vmatmul.mubr.bf16.gmra.mrb[96].mxu0 %v20402_v5  ;;  %v20418_v34 = vcombine.low %v6492_v42, %v6499_v60  ;;  %v16912_v55 = vld [vmem:[#allocation6 + $0xc4] ss:$12 sps:$4 sm:$0xff]  }
 0x401   :  { %15022 = vmatprep.mubr.msk.bf16.mxu0 %vm3586_vm10, %v20406_v16  ;;  %v16907_v16 = vld [vmem:[#allocation6 + $0xa8] ss:$12 sps:$4 sm:$0xff]   ;;  %v20422_v5 = vcombine.high %v6510_v14, %v6517_v3 }
 0x402   :  { %24145 = vst [vmem:[#allocation31_spill] sm:$0xff] %v20418_v34  ;;  %v24148_v60 = vld [vmem:[#allocation51_spill] sm:$0xff] }
 0x403   :  { %4286 = vmatpush1.bf16.msra.mxu1 %v16901_v63  ;;  %24146 = vst [vmem:[#allocation37_spill] sm:$0xff] %v20422_v5  ;;  %v6521_v63 = vcombine.low %v19880_v7, %v19889_v12 }
 0x404   :  { %4287 = vmatprep.subr.bf16.mxu1 %v16906_v9  ;;  %v24147_v9 = vld [vmem:[#allocation54_spill] sm:$0xff] }
 0x405   :  { %v6520_v42 = vcombine.low %v24148_v60, %v24147_v9  ;;  %v3954_v25 = vcombine.low %v24147_v9, %v19880_v7 }
 0x406   :  { %3807 = vmatmul.mubr.bf16.gmra.mrb[52].mxu1 %v24144_v21  ;;  %v24149_v21 = vld [vmem:[#allocation65_spill] sm:$0xff] }
 0x407   :  { %14779 = vmatprep.mubr.msk.bf16.mxu1 %vm3586_vm10, %v20026_v0  ;;  %4288 = vmatpush1.bf16.msra.mxu1 %v16904_v18  ;;  %v6535_v0 = vrot.slane %v6521_v63, %v19457_v24  ;;  %v16915_v18 = vld [vmem:[#allocation6 + $0xdc] ss:$12 sps:$4 sm:$0xff]   ;;  %v6528_v39 = vrot.slane %v6520_v42, %v19457_v24  ;;  %v16918_v63 = vld [vmem:[#allocation6 + $0xf4] ss:$12 sps:$4 sm:$0xff]  }
 0x408   :  { %4289 = vmatprep.subr.bf16.mxu1 %v16909_v45  ;;  %7032 = vmatmul.mubr.bf16.gmra.mrb[100].mxu0 %v20418_v34  ;;  %v20434_v45 = vcombine.low %v6510_v14, %v6517_v3  ;;  %v14971_v3 = vcombine.high %v19889_v12, %v19902_v43  ;;  %v16916_v14 = vld [vmem:[#allocation6 + $0xf0] ss:$12 sps:$4 sm:$0xff]  }
 0x409   :  { %15023 = vmatprep.mubr.msk.bf16.mxu0 %vm3586_vm10, %v20422_v5  ;;  %v16913_v5 = vld [vmem:[#allocation6 + $0xd8] ss:$12 sps:$4 sm:$0xff]   ;;  %v20438_v34 = vcombine.high %v6528_v39, %v6535_v0 }
 0x40a   :  { %24150 = vst [vmem:[#allocation24_spill] sm:$0xff] %v20434_v45  ;;  %v6546_v42 = vrot.slane %v14971_v3, %v19457_v24 }
 0x40b   :  { %4290 = vmatpush1.bf16.msra.mxu1 %v16907_v16  ;;  %24151 = vst [vmem:[#allocation47_spill] sm:$0xff] %v20438_v34  ;;  %v6539_v16 = vcombine.low %v19970_v6, %v19984_v40 }
 0x40c   :  { %4291 = vmatprep.subr.bf16.mxu1 %v16912_v55  ;;  %v16921_v55 = vld [vmem:[#allocation6 + $0x10c] ss:$12 sps:$4 sm:$0xff]  }
 0x40e   :  { %3815 = vmatmul.mubr.bf16.gmra.mrb[56].mxu1 %v24149_v21 }
 0x40f   :  { %14780 = vmatprep.mubr.msk.bf16.mxu1 %vm3586_vm10, %v20105_v48  ;;  %4292 = vmatpush1.bf16.msra.mxu1 %v16910_v51  ;;  %v6553_v48 = vrot.slane %v6539_v16, %v19457_v24  ;;  %v20450_v51 = vcombine.low %v6528_v39, %v6535_v0 }
 0x410   :  { %4293 = vmatprep.subr.bf16.mxu1 %v16915_v18  ;;  %7040 = vmatmul.mubr.bf16.gmra.mrb[104].mxu0 %v20434_v45  ;;  %v16919_v18 = vld [vmem:[#allocation6 + $0x108] ss:$12 sps:$4 sm:$0xff]  }
 0x411   :  { %15024 = vmatprep.mubr.msk.bf16.mxu0 %vm3586_vm10, %v20438_v34  ;;  %24152 = vst [vmem:[#allocation56_spill] sm:$0xff] %v20450_v51  ;;  %v20454_v21 = vcombine.high %v6546_v42, %v6553_v48 }
 0x413   :  { %4294 = vmatpush1.bf16.msra.mxu1 %v16913_v5  ;;  %24153 = vst [vmem:[#allocation42_spill] sm:$0xff] %v20454_v21  ;;  %v6557_v5 = vcombine.low %v20051_v10, %v20056_v29 }
 0x414   :  { %4295 = vmatprep.subr.bf16.mxu1 %v16918_v63 }
 0x415   :  { %v6571_v39 = vrot.slane %v6557_v5, %v19457_v24  ;;  %v14972_v5 = vcombine.high %v20132_v30, %v20129_v13 }
 0x416   :  { %3823 = vmatmul.mubr.bf16.gmra.mrb[60].mxu1 %v20107_v56  ;;  %v6556_v56 = vcombine.low %v19979_v11, %v20042_v28 }
 0x417   :  { %14781 = vmatprep.mubr.msk.bf16.mxu1 %vm3586_vm10, %v20185_v33  ;;  %4296 = vmatpush1.bf16.msra.mxu1 %v16916_v14  ;;  %v24154_v33 = vmov 0   ;;  %v20471_v14 = vcombine.low %v6546_v42, %v6553_v48  ;;  %v6589_v48 = vrot.slane %v14972_v5, %v19457_v24 }
 0x418   :  { %4297 = vmatprep.subr.bf16.mxu1 %v16921_v55  ;;  %7048 = vmatmul.mubr.bf16.gmra.mrb[108].mxu0 %v20450_v51  ;;  %v6564_v63 = vrot.slane %v6556_v56, %v19457_v24 }
 0x419   :  { %15025 = vmatprep.mubr.msk.bf16.mxu0 %vm3586_vm10, %v20454_v21  ;;  %v20465_v0 = vpop.f32.mrb[48].mxu0  ;;  %24157 = vst [vmem:[#allocation57_spill] sm:$0xff] %v20471_v14 }
 0x41a   :  { %24155 = vst [vmem:[#allocation43_spill] sm:$0xff] %v20465_v0  ;;  %v6244_v16 = vpop.f32.mrb[49].mxu0  ;;  %v20487_v42 = vcombine.low %v6564_v63, %v6571_v39  ;;  %v24167_v0 = vld [vmem:[#allocation26_spill] sm:$0xff] }
 0x41b   :  { %4298 = vmatpush1.bf16.msra.mxu1 %v16919_v18  ;;  %v20469_v3 = vpop.f32.mrb[50].mxu0  ;;  %v20475_v18 = vcombine.high %v6564_v63, %v6571_v39  ;;  %v6593_v16 = vcombine.low %v20206_v57, %v20293_v32  ;;  %v3864_v39 = vcombine.low %v19469_v52, %v19481_v50  ;;  %v24161_v63 = vld [vmem:[#allocation84_spill] sm:$0xff] }
 0x41c   :  { %4408 = vmatprep.subr.bf16.mxu1 %v24154_v33  ;;  %24156 = vst [vmem:[#allocation36_spill] sm:$0xff] %v20469_v3  ;;  %v6247_v55 = vpop.f32.mrb[51].mxu0  ;;  %24159 = vst [vmem:[#allocation59_spill] sm:$0xff] %v20487_v42  ;;  %v16930_v32 = vld [vmem:[#allocation6 + $0xc8] ss:$12 sps:$4 sm:$0xff]  }
 0x41d   :  { %24158 = vst [vmem:[#allocation45_spill] sm:$0xff] %v20475_v18  ;;  %v6607_v55 = vrot.slane %v6593_v16, %v19457_v24  ;;  %v3878_v16 = vrot.slane %v3864_v39, %v19457_v24  ;;  %v3881_v39 = vcombine.low %v19503_v59, %v24124_v36 }
 0x41e   :  { %3831 = vmatmul.mubr.bf16.gmra.mrb[64].mxu1 %v20187_v4  ;;  %v6574_v4 = vcombine.low %v20116_v20, %v20132_v30 }
 0x41f   :  { %14782 = vmatprep.mubr.msk.bf16.mxu1 %vm3586_vm10, %v20261_v61 }
 0x420   :  { %7056 = vmatmul.mubr.bf16.gmra.mrb[112].mxu0 %v20471_v14  ;;  %v6582_v61 = vrot.slane %v6574_v4, %v19457_v24  ;;  %v24163_v4 = vld [vmem:[#allocation39_spill] sm:$0xff] }
 0x421   :  { %15026 = vmatprep.mubr.msk.bf16.mxu0 %vm3586_vm10, %v20475_v18  ;;  %v3882_v18 = vcombine.low %v24167_v0, %v24123_v62 }
 0x422   :  { %v20491_v56 = vcombine.high %v6582_v61, %v6589_v48  ;;  %v20505_v5 = vcombine.low %v6582_v61, %v6589_v48 }
 0x424   :  { %24160 = vst [vmem:[#allocation54_spill] sm:$0xff] %v20491_v56  ;;  %24162 = vst [vmem:[#allocation51_spill] sm:$0xff] %v20505_v5 }
 0x426   :  { %3839 = vmatmul.mubr.bf16.gmra.mrb[68].mxu1 %v20263_v38  ;;  %v6592_v38 = vcombine.low %v20138_v26, %v20152_v47 }
 0x427   :  { %14783 = vmatprep.mubr.msk.bf16.mxu1 %vm3586_vm10, %v20295_v23 }
 0x428   :  { %7064 = vmatmul.mubr.bf16.gmra.mrb[116].mxu0 %v20487_v42  ;;  %v6600_v23 = vrot.slane %v6592_v38, %v19457_v24 }
 0x429   :  { %15027 = vmatprep.mubr.msk.bf16.mxu0 %vm3586_vm10, %v20491_v56  ;;  %v3863_v56 = vcombine.low %v24163_v4, %v24117_v44 }
 0x42a   :  { %v20511_v42 = vcombine.high %v6600_v23, %v6607_v55 }
 0x42b   :  { %v3871_v48 = vrot.slane %v3863_v56, %v19457_v24  ;;  %v3896_v56 = vrot.slane %v3882_v18, %v19457_v24  ;;  %v16923_v18 = vld [vmem:[#allocation6 + $0x20] ss:$12 sps:$4 sm:$0xff]  }
 0x42c   :  { %24164 = vst [vmem:[#allocation65_spill] sm:$0xff] %v20511_v42 }
 0x42e   :  { %3847 = vmatmul.mubr.bf16.gmra.mrb[72].mxu1 %v24161_v63  ;;  %v20515_v3 = vpop.f32.mrb[52].mxu0  ;;  %v20522_v63 = vcombine.high %v3871_v48, %v3878_v16 }
 0x42f   :  { %14784 = vmatprep.mubr.msk.bf16.mxu1 %vm3586_vm10, %v20339_v41  ;;  %24165 = vst [vmem:[#allocation84_spill] sm:$0xff] %v20515_v3  ;;  %v6252_v38 = vpop.f32.mrb[53].mxu0 }
 0x430   :  { %7072 = vmatmul.mubr.bf16.gmra.mrb[120].mxu0 %v20505_v5  ;;  %v20520_v61 = vpop.f32.mrb[54].mxu0  ;;  %v20527_v5 = vcombine.low %v6600_v23, %v6607_v55  ;;  %v16922_v38 = vld [vmem:[#allocation6 + $0x8] ss:$12 sps:$4 sm:$0xff]  }
 0x431   :  { %15028 = vmatprep.mubr.msk.bf16.mxu0 %vm3586_vm10, %v20511_v42  ;;  %24166 = vst [vmem:[#allocation39_spill] sm:$0xff] %v20520_v61  ;;  %v6255_v41 = vpop.f32.mrb[55].mxu0  ;;  %v20536_v42 = vcombine.low %v3871_v48, %v3878_v16  ;;  %v24170_v55 = vld [vmem:[#allocation29_spill] sm:$0xff]  ;;  %v3899_v16 = vcombine.low %v24122_v19, %v24132_v35 }
 0x432   :  { %24168 = vst [vmem:[#allocation26_spill] sm:$0xff] %v20527_v5  ;;  %v3889_v41 = vrot.slane %v3881_v39, %v19457_v24  ;;  %v3900_v23 = vcombine.low %v24170_v55, %v24130_v31 }
 0x434   :  { %v3914_v39 = vrot.slane %v3900_v23, %v19457_v24  ;;  %v3917_v23 = vcombine.low %v24129_v46, %v24139_v22 }
 0x436   :  { %3855 = vmatmul.mubr.bf16.gmra.mrb[76].mxu1 %v20341_v37  ;;  %v20540_v37 = vcombine.high %v3889_v41, %v3896_v56 }
 0x437   :  { %14821 = vmatprep.mubr.msk.bf16.mxu1 %vm3586_vm10, %v20522_v63 }
 0x438   :  { %7080 = vmatmul.mubr.bf16.gmra.mrb[124].mxu0 %v20527_v5  ;;  %v16924_v5 = vld [vmem:[#allocation6 + $0x38] ss:$12 sps:$4 sm:$0xff]  }
 0x43b   :  { %v20538_v61 = vpop.f32.mrb[56].mxu0 }
 0x43c   :  { %24169 = vst [vmem:[#allocation88_spill] sm:$0xff] %v20538_v61  ;;  %v6260_v3 = vpop.f32.mrb[57].mxu0  ;;  %v20554_v61 = vcombine.low %v3889_v41, %v3896_v56  ;;  %v3925_v41 = vrot.slane %v3917_v23, %v19457_v24  ;;  %v16927_v23 = vld [vmem:[#allocation6 + $0x80] ss:$12 sps:$4 sm:$0xff]  }
 0x43d   :  { %v20545_v14 = vpop.f32.mrb[58].mxu0  ;;  %v3907_v3 = vrot.slane %v3899_v16, %v19457_v24  ;;  %v16926_v16 = vld [vmem:[#allocation6 + $0x68] ss:$12 sps:$4 sm:$0xff]  }
 0x43e   :  { %4308 = vmatmul.mubr.bf16.vlgmr.msra.gmra.mrb[0].mxu1 %v20536_v42  ;;  %24171 = vst [vmem:[#allocation29_spill] sm:$0xff] %v20545_v14  ;;  %v6263_v48 = vpop.f32.mrb[59].mxu0  ;;  %v3918_v14 = vcombine.low %v24138_v17, %v24137_v58 }
 0x43f   :  { %4409 = vmatpush1.bf16.msra.mxu1 %v16922_v38  ;;  %14822 = vmatprep.mubr.msk.bf16.mxu1 %vm3586_vm10, %v20540_v37  ;;  %v20557_v38 = vcombine.high %v3907_v3, %v3914_v39  ;;  %v20569_v48 = vcombine.low %v3907_v3, %v3914_v39 }
 0x440   :  { %4410 = vmatprep.subr.bf16.mxu1 %v24154_v33  ;;  %v3932_v56 = vrot.slane %v3918_v14, %v19457_v24  ;;  %v24172_v14 = vld [vmem:[#allocation44_spill] sm:$0xff] }
 0x441   :  { %v3935_v51 = vcombine.low %v24172_v14, %v24143_v49 }
 0x442   :  { %v20572_v21 = vcombine.high %v3925_v41, %v3932_v56  ;;  %v20584_v34 = vcombine.low %v3925_v41, %v3932_v56  ;;  %v3968_v41 = vrot.slane %v3954_v25, %v19457_v24  ;;  %v16931_v25 = vld [vmem:[#allocation6 + $0xe0] ss:$12 sps:$4 sm:$0xff]  }
 0x443   :  { %4411 = vmatpush1.bf16.msra.mxu1 %v16923_v18  ;;  %v16925_v18 = vld [vmem:[#allocation6 + $0x50] ss:$12 sps:$4 sm:$0xff]   ;;  %v3943_v3 = vrot.slane %v3935_v51, %v19457_v24 }
 0x444   :  { %4412 = vmatprep.subr.bf16.mxu1 %v24154_v33  ;;  %v16929_v51 = vld [vmem:[#allocation6 + $0xb0] ss:$12 sps:$4 sm:$0xff]  }
 0x446   :  { %4318 = vmatmul.mubr.bf16.gmra.mrb[4].mxu1 %v20554_v61 }
 0x447   :  { %14823 = vmatprep.mubr.msk.bf16.mxu1 %vm3586_vm10, %v20557_v38  ;;  %4413 = vmatpush1.bf16.msra.mxu1 %v16924_v5  ;;  %v3936_v5 = vcombine.low %v19681_v2, %v19747_v15 }
 0x448   :  { %4414 = vmatprep.subr.bf16.mxu1 %v24154_v33 }
 0x449   :  { %v3950_v39 = vrot.slane %v3936_v5, %v19457_v24 }
 0x44b   :  { %4415 = vmatpush1.bf16.msra.mxu1 %v16925_v18  ;;  %v16928_v18 = vld [vmem:[#allocation6 + $0x98] ss:$12 sps:$4 sm:$0xff]   ;;  %v20587_v45 = vcombine.high %v3943_v3, %v3950_v39  ;;  %v20603_v28 = vcombine.low %v3943_v3, %v3950_v39 }
 0x44c   :  { %4416 = vmatprep.subr.bf16.mxu1 %v24154_v33 }
 0x44e   :  { %4328 = vmatmul.mubr.bf16.gmra.mrb[8].mxu1 %v20569_v48 }
 0x44f   :  { %14824 = vmatprep.mubr.msk.bf16.mxu1 %vm3586_vm10, %v20572_v21  ;;  %4417 = vmatpush1.bf16.msra.mxu1 %v16926_v16  ;;  %v24173_v16 = vld [vmem:[#allocation50_spill] sm:$0xff] }
 0x450   :  { %4418 = vmatprep.subr.bf16.mxu1 %v24154_v33  ;;  %v3953_v5 = vcombine.low %v24173_v16, %v24148_v60 }
 0x452   :  { %v3961_v54 = vrot.slane %v3953_v5, %v19457_v24  ;;  %v16932_v5 = vld [vmem:[#allocation6 + $0xf8] ss:$12 sps:$4 sm:$0xff]  }
 0x453   :  { %4419 = vmatpush1.bf16.msra.mxu1 %v16927_v23 }
 0x454   :  { %4420 = vmatprep.subr.bf16.mxu1 %v24154_v33 }
 0x456   :  { %4338 = vmatmul.mubr.bf16.gmra.mrb[12].mxu1 %v20584_v34  ;;  %v20596_v23 = vpop.f32.mrb[60].mxu0 }
 0x457   :  { %14825 = vmatprep.mubr.msk.bf16.mxu1 %vm3586_vm10, %v20587_v45  ;;  %4421 = vmatpush1.bf16.msra.mxu1 %v16928_v18  ;;  %24174 = vst [vmem:[#allocation44_spill] sm:$0xff] %v20596_v23  ;;  %v6268_v56 = vpop.f32.mrb[61].mxu0  ;;  %v20606_v18 = vcombine.high %v3961_v54, %v3968_v41  ;;  %v24176_v23 = vld [vmem:[#allocation60_spill] sm:$0xff] }
 0x458   :  { %4422 = vmatprep.subr.bf16.mxu1 %v24154_v33  ;;  %v20600_v1 = vpop.f32.mrb[62].mxu0  ;;  %v3972_v16 = vcombine.low %v24176_v23, %v19970_v6 }
 0x459   :  { %24175 = vst [vmem:[#allocation89_spill] sm:$0xff] %v20600_v1  ;;  %v6271_v53 = vpop.f32.mrb[63].mxu0  ;;  %v24177_v1 = vld [vmem:[#allocation66_spill] sm:$0xff] }
 0x45a   :  { %v3971_v53 = vcombine.low %v19889_v12, %v19902_v43  ;;  %v3986_v39 = vrot.slane %v3972_v16, %v19457_v24  ;;  %v3990_v23 = vcombine.low %v24177_v1, %v20051_v10  ;;  %v16933_v16 = vld [vmem:[#allocation6 + $0x110] ss:$12 sps:$4 sm:$0xff]  }
 0x45b   :  { %4423 = vmatpush1.bf16.msra.mxu1 %v16929_v51  ;;  %v20618_v51 = vcombine.low %v3961_v54, %v3968_v41  ;;  %v16936_v54 = vld [vmem:[#allocation6 + $0x244] ss:$12 sps:$4 sm:$0xff]  }
 0x45c   :  { %4424 = vmatprep.subr.bf16.mxu1 %v24154_v33  ;;  %v3979_v3 = vrot.slane %v3971_v53, %v19457_v24  ;;  %v4004_v41 = vrot.slane %v3990_v23, %v19457_v24  ;;  %v4007_v23 = vcombine.low %v20056_v29, %v20116_v20 }
 0x45e   :  { %4348 = vmatmul.mubr.bf16.gmra.mrb[16].mxu1 %v20603_v28  ;;  %v20621_v56 = vcombine.high %v3979_v3, %v3986_v39  ;;  %v20637_v43 = vcombine.low %v3979_v3, %v3986_v39  ;;  %v4015_v39 = vrot.slane %v4007_v23, %v19457_v24 }
 0x45f   :  { %14826 = vmatprep.mubr.msk.bf16.mxu1 %vm3586_vm10, %v20606_v18  ;;  %4425 = vmatpush1.bf16.msra.mxu1 %v16930_v32  ;;  %v3989_v32 = vcombine.low %v19984_v40, %v19979_v11 }
 0x460   :  { %4426 = vmatprep.subr.bf16.mxu1 %v24154_v33 }
 0x461   :  { %v3997_v1 = vrot.slane %v3989_v32, %v19457_v24 }
 0x463   :  { %4427 = vmatpush1.bf16.msra.mxu1 %v16931_v25  ;;  %v20639_v11 = vcombine.high %v3997_v1, %v4004_v41  ;;  %v20650_v3 = vcombine.low %v3997_v1, %v4004_v41 }
 0x464   :  { %4428 = vmatprep.subr.bf16.mxu1 %v24154_v33 }
 0x466   :  { %4358 = vmatmul.mubr.bf16.gmra.mrb[20].mxu1 %v20618_v51 }
 0x467   :  { %14827 = vmatprep.mubr.msk.bf16.mxu1 %vm3586_vm10, %v20621_v56  ;;  %4429 = vmatpush1.bf16.msra.mxu1 %v16932_v5  ;;  %v4008_v5 = vcombine.low %v20132_v30, %v20129_v13 }
 0x468   :  { %4430 = vmatprep.subr.bf16.mxu1 %v24154_v33  ;;  %v20632_v53 = vpop.f32.mrb[64].mxu0 }
 0x469   :  { %24178 = vst [vmem:[#allocation90_spill] sm:$0xff] %v20632_v53  ;;  %v6276_v25 = vpop.f32.mrb[65].mxu0  ;;  %v4022_v32 = vrot.slane %v4008_v5, %v19457_v24 }
 0x46a   :  { %v20635_v10 = vpop.f32.mrb[66].mxu0 }
 0x46b   :  { %4431 = vmatpush1.bf16.msra.mxu1 %v16933_v16  ;;  %24179 = vst [vmem:[#allocation91_spill] sm:$0xff] %v20635_v10  ;;  %v6279_v6 = vpop.f32.mrb[67].mxu0  ;;  %v4026_v16 = vcombine.low %v20152_v47, %v20206_v57  ;;  %v20665_v1 = vcombine.low %v4015_v39, %v4022_v32 }
 0x46c   :  { %5117 = vmatprep.subr.bf16.mxu1 %v16936_v54  ;;  %v20652_v6 = vcombine.high %v4015_v39, %v4022_v32  ;;  %v24180_v54 = vld [vmem:[#allocation75_spill] sm:$0xff] }
 0x46d   :  { %v4025_v25 = vcombine.low %v24180_v54, %v20138_v26  ;;  %v4040_v10 = vrot.slane %v4026_v16, %v19457_v24  ;;  %v16934_v32 = vld [vmem:[#allocation6 + $0x240] ss:$12 sps:$4 sm:$0xff]   ;;  %v16939_v39 = vld [vmem:[#allocation6 + $0x25c] ss:$12 sps:$4 sm:$0xff]  }
 0x46e   :  { %4368 = vmatmul.mubr.bf16.gmra.mrb[24].mxu1 %v20637_v43 }
 0x46f   :  { %14828 = vmatprep.mubr.msk.bf16.mxu1 %vm3586_vm10, %v20639_v11  ;;  %v4033_v5 = vrot.slane %v4025_v25, %v19457_v24 }
 0x471   :  { %v20667_v53 = vcombine.high %v4033_v5, %v4040_v10  ;;  %v20674_v26 = vcombine.low %v4033_v5, %v4040_v10  ;;  %v16942_v10 = vld [vmem:[#allocation6 + $0x274] ss:$12 sps:$4 sm:$0xff]  }
 0x476   :  { %4378 = vmatmul.mubr.bf16.gmra.mrb[28].mxu1 %v20650_v3 }
 0x477   :  { %14829 = vmatprep.mubr.msk.bf16.mxu1 %vm3586_vm10, %v20652_v6 }
 0x47b   :  { %v20663_v23 = vpop.f32.mrb[68].mxu0 }
 0x47c   :  { %24181 = vst [vmem:[#allocation75_spill] sm:$0xff] %v20663_v23  ;;  %v6284_v41 = vpop.f32.mrb[69].mxu0 }
 0x47d   :  { %v20669_v57 = vpop.f32.mrb[70].mxu0 }
 0x47e   :  { %24182 = vst [vmem:[#allocation92_spill] sm:$0xff] %v20669_v57  ;;  %4388 = vmatmul.mubr.bf16.gmra.mrb[32].mxu1 %v20665_v1  ;;  %v6287_v47 = vpop.f32.mrb[71].mxu0  ;;  %v16940_v57 = vld [vmem:[#allocation6 + $0x270] ss:$12 sps:$4 sm:$0xff]  }
 0x47f   :  { %14830 = vmatprep.mubr.msk.bf16.mxu1 %vm3586_vm10, %v20667_v53  ;;  %v16937_v47 = vld [vmem:[#allocation6 + $0x258] ss:$12 sps:$4 sm:$0xff]  }
 0x486   :  { %4398 = vmatmul.mubr.bf16.gmra.mrb[36].mxu1 %v20674_v26 }
 0x487   :  { %14831 = vmatprep.mubr.msk.bf16.mxu1 %vm3586_vm10, %v20522_v63  ;;  %v16945_v63 = vld [vmem:[#allocation6 + $0x28c] ss:$12 sps:$4 sm:$0xff]  }
 0x48e   :  { %4441 = vmatmul.mubr.bf16.vlgmr.msra.gmra.mrb[80].mxu1 %v20536_v42  ;;  %v20680_v16 = vpop.f32.mrb[72].mxu0  ;;  %v16943_v42 = vld [vmem:[#allocation6 + $0x288] ss:$12 sps:$4 sm:$0xff]  }
 0x48f   :  { %24183 = vst [vmem:[#allocation93_spill] sm:$0xff] %v20680_v16  ;;  %5118 = vmatpush1.bf16.msra.mxu1 %v16934_v32  ;;  %14832 = vmatprep.mubr.msk.bf16.mxu1 %vm3586_vm10, %v20540_v37  ;;  %v6292_v25 = vpop.f32.mrb[73].mxu0  ;;  %v16948_v32 = vld [vmem:[#allocation6 + $0x2a4] ss:$12 sps:$4 sm:$0xff]  }
 0x490   :  { %5119 = vmatprep.subr.bf16.mxu1 %v16939_v39  ;;  %v20684_v5 = vpop.f32.mrb[74].mxu0 }
 0x491   :  { %24184 = vst [vmem:[#allocation94_spill] sm:$0xff] %v20684_v5  ;;  %v6295_v41 = vpop.f32.mrb[75].mxu0 }
 0x492   :  { %v16946_v41 = vld [vmem:[#allocation6 + $0x2a0] ss:$12 sps:$4 sm:$0xff]  }
 0x493   :  { %5120 = vmatpush1.bf16.msra.mxu1 %v16937_v47 }
 0x494   :  { %5121 = vmatprep.subr.bf16.mxu1 %v16942_v10  ;;  %v16951_v10 = vld [vmem:[#allocation6 + $0x2bc] ss:$12 sps:$4 sm:$0xff]  }
 0x496   :  { %4449 = vmatmul.mubr.bf16.gmra.mrb[84].mxu1 %v20554_v61  ;;  %v16954_v61 = vld [vmem:[#allocation6 + $0x2d4] ss:$12 sps:$4 sm:$0xff]  }
 0x497   :  { %14833 = vmatprep.mubr.msk.bf16.mxu1 %vm3586_vm10, %v20557_v38  ;;  %5122 = vmatpush1.bf16.msra.mxu1 %v16940_v57  ;;  %v16949_v57 = vld [vmem:[#allocation6 + $0x2b8] ss:$12 sps:$4 sm:$0xff]   ;;  %v16952_v38 = vld [vmem:[#allocation6 + $0x2d0] ss:$12 sps:$4 sm:$0xff]  }
 0x498   :  { %5123 = vmatprep.subr.bf16.mxu1 %v16945_v63  ;;  %v20689_v37 = vpop.f32.mrb[76].mxu0  ;;  %v16957_v63 = vld [vmem:[#allocation6 + $0x2ec] ss:$12 sps:$4 sm:$0xff]  }
 0x499   :  { %24185 = vst [vmem:[#allocation95_spill] sm:$0xff] %v20689_v37  ;;  %v6300_v39 = vpop.f32.mrb[77].mxu0 }
 0x49a   :  { %v20691_v25 = vpop.f32.mrb[78].mxu0 }
 0x49b   :  { %24186 = vst [vmem:[#allocation96_spill] sm:$0xff] %v20691_v25  ;;  %5124 = vmatpush1.bf16.msra.mxu1 %v16943_v42  ;;  %v6303_v47 = vpop.f32.mrb[79].mxu0  ;;  %v16955_v42 = vld [vmem:[#allocation6 + $0x2e8] ss:$12 sps:$4 sm:$0xff]  }
 0x49c   :  { %5125 = vmatprep.subr.bf16.mxu1 %v16948_v32  ;;  %v16958_v32 = vld [vmem:[#allocation6 + $0x300] ss:$12 sps:$4 sm:$0xff]  }
 0x49e   :  { %4457 = vmatmul.mubr.bf16.gmra.mrb[88].mxu1 %v20569_v48  ;;  %v16960_v48 = vld [vmem:[#allocation6 + $0x304] ss:$12 sps:$4 sm:$0xff]  }
 0x49f   :  { %14834 = vmatprep.mubr.msk.bf16.mxu1 %vm3586_vm10, %v20572_v21  ;;  %5126 = vmatpush1.bf16.msra.mxu1 %v16946_v41  ;;  %v16963_v21 = vld [vmem:[#allocation6 + $0x31c] ss:$12 sps:$4 sm:$0xff]  }
 0x4a0   :  { %5127 = vmatprep.subr.bf16.mxu1 %v16951_v10  ;;  %v16966_v10 = vld [vmem:[#allocation6 + $0x334] ss:$12 sps:$4 sm:$0xff]  }
 0x4a3   :  { %5128 = vmatpush1.bf16.msra.mxu1 %v16949_v57  ;;  %v16964_v57 = vld [vmem:[#allocation6 + $0x330] ss:$12 sps:$4 sm:$0xff]  }
 0x4a4   :  { %5129 = vmatprep.subr.bf16.mxu1 %v16954_v61  ;;  %v16969_v61 = vld [vmem:[#allocation6 + $0x34c] ss:$12 sps:$4 sm:$0xff]  }
 0x4a6   :  { %4465 = vmatmul.mubr.bf16.gmra.mrb[92].mxu1 %v20584_v34 }
 0x4a7   :  { %14835 = vmatprep.mubr.msk.bf16.mxu1 %vm3586_vm10, %v20587_v45  ;;  %5130 = vmatpush1.bf16.msra.mxu1 %v16952_v38  ;;  %v16961_v45 = vld [vmem:[#allocation6 + $0x318] ss:$12 sps:$4 sm:$0xff]  }
 0x4a8   :  { %5131 = vmatprep.subr.bf16.mxu1 %v16957_v63 }
 0x4ab   :  { %5132 = vmatpush1.bf16.msra.mxu1 %v16955_v42 }
 0x4ac   :  { %5133 = vmatprep.subr.bf16.mxu1 %v16960_v48 }
 0x4ad   :  { %v20699_v39 = vpop.f32.mrb[80].mxu0 }
 0x4ae   :  { %24187 = vst [vmem:[#allocation97_spill] sm:$0xff] %v20699_v39  ;;  %4473 = vmatmul.mubr.bf16.gmra.mrb[96].mxu1 %v20603_v28  ;;  %v6308_v41 = vpop.f32.mrb[81].mxu0  ;;  %v16967_v28 = vld [vmem:[#allocation6 + $0x348] ss:$12 sps:$4 sm:$0xff]  }
 0x4af   :  { %14836 = vmatprep.mubr.msk.bf16.mxu1 %vm3586_vm10, %v20606_v18  ;;  %v20704_v34 = vpop.f32.mrb[82].mxu0  ;;  %5134 = vmatpush1.bf16.msra.mxu1 %v16958_v32  ;;  %v4530_v41 = vrot.slane %v24117_v44, 7 }
 0x4b0   :  { %24188 = vst [vmem:[#allocation98_spill] sm:$0xff] %v20704_v34  ;;  %v6311_v47 = vpop.f32.mrb[83].mxu0  ;;  %5135 = vmatprep.subr.bf16.mxu1 %v16963_v21 }
 0x4b3   :  { %5136 = vmatpush1.bf16.msra.mxu1 %v16961_v45  ;;  %v4536_v45 = vrot.slane %v19481_v50, 7  ;;  %v16982_v50 = vld [vmem:[#allocation6 + $0x360] ss:$12 sps:$4 sm:$0xff]  }
 0x4b4   :  { %5137 = vmatprep.subr.bf16.mxu1 %v16966_v10  ;;  %v4539_v10 = vrot.slane %v19503_v59, 7  ;;  %v4549_v59 = vrot.slane %v24123_v62, 7 }
 0x4b6   :  { %4481 = vmatmul.mubr.bf16.gmra.mrb[100].mxu1 %v20618_v51 }
 0x4b7   :  { %14837 = vmatprep.mubr.msk.bf16.mxu1 %vm3586_vm10, %v20621_v56  ;;  %5138 = vmatpush1.bf16.msra.mxu1 %v16964_v57 }
 0x4b8   :  { %5139 = vmatprep.subr.bf16.mxu1 %v16969_v61  ;;  %v4532_v61 = vrot.slane %v4530_v41, 2 }
 0x4bb   :  { %5140 = vmatpush1.bf16.msra.mxu1 %v16967_v28  ;;  %v20709_v18 = vpop.f32.mrb[84].mxu0  ;;  %v4538_v28 = vrot.slane %v4536_v45, 2 }
 0x4bc   :  { %24189 = vst [vmem:[#allocation99_spill] sm:$0xff] %v20709_v18  ;;  %5250 = vmatprep.subr.bf16.mxu1 %v24154_v33  ;;  %v6316_v38 = vpop.f32.mrb[85].mxu0 }
 0x4bd   :  { %v20712_v63 = vpop.f32.mrb[86].mxu0  ;;  %v4540_v38 = vsel %vm20737_vm3, %v4538_v28, %v4539_v10  ;;  %v4546_v28 = vrot.slane %v24167_v0, 7 }
 0x4be   :  { %24190 = vst [vmem:[#allocation100_spill] sm:$0xff] %v20712_v63  ;;  %4489 = vmatmul.mubr.bf16.gmra.mrb[104].mxu1 %v20637_v43  ;;  %v6319_v42 = vpop.f32.mrb[87].mxu0  ;;  %v4533_v43 = vrot.slane %v19469_v52, 7 }
 0x4bf   :  { %14838 = vmatprep.mubr.msk.bf16.mxu1 %vm3586_vm10, %v20639_v11 }
 0x4c0   :  { %v4535_v44 = vrot.slane %v4533_v43, 2 }
 0x4c1   :  { %v20717_v51 = vpop.f32.mrb[40].mxu1 }
 0x4c2   :  { %v3786_v56 = vpop.f32.mrb[41].mxu1 }
 0x4c3   :  { %v20719_v48 = vpop.f32.mrb[42].mxu1  ;;  %v20722_v32 = vpop.f32.mrb[88].mxu0 }
 0x4c4   :  { %v3789_v21 = vpop.f32.mrb[43].mxu1  ;;  %v7011_v11 = vpop.f32.mrb[89].mxu0 }
 0x4c5   :  { %v20727_v47 = vpop.f32.mrb[90].mxu0  ;;  %v14841_v21 = vrot.slane %v24163_v4, 9  ;;  %v4534_v11 = vsel %vm20737_vm3, %v4532_v61, %v4533_v43  ;;  %v4552_v4 = vrot.slane %v24122_v19, 7  ;;  %v24195_v61 = vld [vmem:[#allocation33_spill] sm:$0xff]  ;;  %v4562_v19 = vrot.slane %v24130_v31, 7 }
 0x4c6   :  { %4497 = vmatmul.mubr.bf16.gmra.mrb[108].mxu1 %v20650_v3  ;;  %v7014_v57 = vpop.f32.mrb[91].mxu0 }
 0x4c7   :  { %14839 = vmatprep.mubr.msk.bf16.mxu1 %vm3586_vm10, %v20652_v6  ;;  %v4537_v57 = vsel %vm20737_vm3, %v4535_v44, %v4536_v45  ;;  %v4531_v62 = vsel %vm20737_vm3, %v14841_v21, %v4530_v41  ;;  %v4542_v44 = vrot.slane %v24195_v61, 7  ;;  %v4541_v41 = vrot.slane %v4539_v10, 2 }
 0x4c8   :  { %v4705_v43 = vcombine.low %v4531_v62, %v4534_v11  ;;  %v4548_v21 = vrot.slane %v4546_v28, 2  ;;  %v4555_v10 = vrot.slane %v24132_v35, 7  ;;  %v4558_v35 = vrot.slane %v24131_v8, 7 }
 0x4c9   :  { %v20734_v52 = vpop.f32.mrb[44].mxu1 }
 0x4ca   :  { %v3794_v3 = vpop.f32.mrb[45].mxu1 }
 0x4cb   :  { %v20744_v42 = vpop.f32.mrb[46].mxu1  ;;  %v20746_v56 = vpop.f32.mrb[92].mxu0  ;;  %v4706_v3 = vcombine.low %v4537_v57, %v4540_v38 }
 0x4cc   :  { %24193 = vst [vmem:[#allocation101_spill] sm:$0xff] %v20746_v56  ;;  %v3797_v6 = vpop.f32.mrb[47].mxu1  ;;  %v7019_v63 = vpop.f32.mrb[93].mxu0 }
 0x4cd   :  { %v20753_v18 = vpop.f32.mrb[94].mxu0  ;;  %v4551_v6 = vrot.slane %v4549_v59, 2  ;;  %v4720_v63 = vrot.slane %v4706_v3, %v19457_v24 }
 0x4ce   :  { %24194 = vst [vmem:[#allocation102_spill] sm:$0xff] %v20753_v18  ;;  %4505 = vmatmul.mubr.bf16.gmra.mrb[112].mxu1 %v20665_v1  ;;  %v7022_v34 = vpop.f32.mrb[95].mxu0  ;;  %v14842_v1 = vrot.slane %v24124_v36, 9  ;;  %v4550_v36 = vsel %vm20737_vm3, %v4548_v21, %v4549_v59  ;;  %v4554_v59 = vrot.slane %v4552_v4, 2  ;;  %v4565_v21 = vrot.slane %v24129_v46, 7 }
 0x4cf   :  { %14840 = vmatprep.mubr.msk.bf16.mxu1 %vm3586_vm10, %v20667_v53  ;;  %v4553_v0 = vsel %vm20737_vm3, %v4551_v6, %v4552_v4  ;;  %v4713_v53 = vrot.slane %v4705_v43, %v19457_v24  ;;  %v4543_v43 = vsel %vm20737_vm3, %v4541_v41, %v4542_v44 }
 0x4d0   :  { %v4547_v3 = vsel %vm20737_vm3, %v14842_v1, %v4546_v28  ;;  %v4724_v6 = vcombine.low %v4550_v36, %v4553_v0  ;;  %v4557_v1 = vrot.slane %v4555_v10, 2  ;;  %v4556_v8 = vsel %vm20737_vm3, %v4554_v59, %v4555_v10 }
 0x4d1   :  { %v20762_v45 = vpop.f32.mrb[48].mxu1  ;;  %v20780_v61 = vcombine.high %v4713_v53, %v4720_v63  ;;  %v4723_v28 = vcombine.low %v4543_v43, %v4547_v3  ;;  %v20802_v3 = vcombine.low %v4713_v53, %v4720_v63  ;;  %v4568_v63 = vrot.slane %v24139_v22, 7 }
 0x4d2   :  { %v3802_v38 = vpop.f32.mrb[49].mxu1  ;;  %v4738_v36 = vrot.slane %v4724_v6, %v19457_v24  ;;  %v4559_v6 = vsel %vm20737_vm3, %v4557_v1, %v4558_v35  ;;  %v4578_v53 = vrot.slane %v24172_v14, 7  ;;  %v24200_v1 = vld [vmem:[#allocation55_spill] sm:$0xff] }
 0x4d3   :  { %v20770_v34 = vpop.f32.mrb[50].mxu1  ;;  %v20773_v11 = vpop.f32.mrb[96].mxu0  ;;  %v4564_v38 = vrot.slane %v4562_v19, 2  ;;  %v4731_v4 = vrot.slane %v4723_v28, %v19457_v24  ;;  %v4741_v59 = vcombine.low %v4556_v8, %v4559_v6  ;;  %v4574_v35 = vrot.slane %v24200_v1, 7 }
 0x4d4   :  { %24196 = vst [vmem:[#allocation33_spill] sm:$0xff] %v20773_v11  ;;  %v3805_v57 = vpop.f32.mrb[51].mxu1  ;;  %v7027_v62 = vpop.f32.mrb[97].mxu0  ;;  %v4587_v8 = vrot.slane %v19747_v15, 7  ;;  %v4581_v15 = vrot.slane %v24143_v49, 7 }
 0x4d5   :  { %v20782_v31 = vpop.f32.mrb[98].mxu0  ;;  %v14843_v62 = vrot.slane %v24170_v55, 9  ;;  %v4566_v44 = vsel %vm20737_vm3, %v4564_v38, %v4565_v21  ;;  %v4571_v38 = vrot.slane %v24138_v17, 7  ;;  %v20811_v39 = vcombine.high %v4731_v4, %v4738_v36 }
 0x4d6   :  { %24197 = vst [vmem:[#allocation103_spill] sm:$0xff] %v20782_v31  ;;  %4513 = vmatmul.mubr.bf16.gmra.mrb[116].mxu1 %v20674_v26  ;;  %v7030_v57 = vpop.f32.mrb[99].mxu0 }
 0x4d7   :  { %14885 = vmatprep.mubr.msk.bf16.mxu1 %vm3586_vm10, %v20780_v61  ;;  %v16970_v57 = vld [vmem:[#allocation6 + $0x248] ss:$12 sps:$4 sm:$0xff]   ;;  %v4563_v55 = vsel %vm20737_vm3, %v14843_v62, %v4562_v19  ;;  %v16971_v19 = vld [vmem:[#allocation6 + $0x260] ss:$12 sps:$4 sm:$0xff]   ;;  %v4573_v17 = vrot.slane %v4571_v38, 2  ;;  %v14844_v62 = vrot.slane %v24137_v58, 9 }
 0x4d8   :  { %v4742_v28 = vcombine.low %v4563_v55, %v4566_v44  ;;  %v4570_v55 = vrot.slane %v4568_v63, 2  ;;  %v16972_v58 = vld [vmem:[#allocation6 + $0x278] ss:$12 sps:$4 sm:$0xff]  }
 0x4d9   :  { %v20791_v0 = vpop.f32.mrb[52].mxu1 }
 0x4da   :  { %v3810_v26 = vpop.f32.mrb[53].mxu1  ;;  %v4756_v22 = vrot.slane %v4742_v28, %v19457_v24  ;;  %v20835_v28 = vcombine.low %v4731_v4, %v4738_v36  ;;  %v4589_v4 = vrot.slane %v4587_v8, 2 }
 0x4db   :  { %v20797_v41 = vpop.f32.mrb[54].mxu1  ;;  %v20804_v46 = vpop.f32.mrb[100].mxu0 }
 0x4dc   :  { %24198 = vst [vmem:[#allocation104_spill] sm:$0xff] %v20804_v46  ;;  %v3813_v43 = vpop.f32.mrb[55].mxu1  ;;  %v7035_v26 = vpop.f32.mrb[101].mxu0 }
 0x4dd   :  { %v20813_v25 = vpop.f32.mrb[102].mxu0  ;;  %v4567_v43 = vrot.slane %v4565_v21, 2  ;;  %v4584_v26 = vrot.slane %v19681_v2, 7  ;;  %v4572_v21 = vsel %vm20737_vm3, %v4570_v55, %v4571_v38  ;;  %v4575_v2 = vsel %vm20737_vm3, %v4573_v17, %v4574_v35  ;;  %v16973_v17 = vld [vmem:[#allocation6 + $0x290] ss:$12 sps:$4 sm:$0xff]  }
 0x4de   :  { %24199 = vst [vmem:[#allocation105_spill] sm:$0xff] %v20813_v25  ;;  %5150 = vmatmul.mubr.bf16.vlgmr.msra.gmra.mrb[0].mxu1 %v20802_v3  ;;  %v7038_v10 = vpop.f32.mrb[103].mxu0  ;;  %v4590_v38 = vrot.slane %v19761_v27, 7  ;;  %v4583_v35 = vrot.slane %v4581_v15, 2 }
 0x4df   :  { %5251 = vmatpush1.bf16.msra.mxu1 %v16970_v57  ;;  %14886 = vmatprep.mubr.msk.bf16.mxu1 %vm3586_vm10, %v20811_v39  ;;  %v4579_v57 = vsel %vm20737_vm3, %v14844_v62, %v4578_v53  ;;  %v4749_v10 = vrot.slane %v4741_v59, %v19457_v24  ;;  %v4586_v36 = vrot.slane %v4584_v26, 2 }
 0x4e0   :  { %5252 = vmatprep.subr.bf16.mxu1 %v24154_v33  ;;  %v4760_v59 = vcombine.low %v4575_v2, %v4579_v57  ;;  %v4591_v27 = vsel %vm20737_vm3, %v4589_v4, %v4590_v38 }
 0x4e1   :  { %v20823_v44 = vpop.f32.mrb[56].mxu1 }
 0x4e2   :  { %v3818_v14 = vpop.f32.mrb[57].mxu1  ;;  %v4774_v2 = vrot.slane %v4760_v59, %v19457_v24  ;;  %v4585_v59 = vsel %vm20737_vm3, %v4583_v35, %v4584_v26  ;;  %v4603_v26 = vrot.slane %v19889_v12, 7 }
 0x4e3   :  { %v20830_v6 = vpop.f32.mrb[58].mxu1  ;;  %5253 = vmatpush1.bf16.msra.mxu1 %v16971_v19  ;;  %v20833_v1 = vpop.f32.mrb[104].mxu0  ;;  %v20843_v19 = vcombine.high %v4749_v10, %v4756_v22 }
 0x4e4   :  { %24201 = vst [vmem:[#allocation55_spill] sm:$0xff] %v20833_v1  ;;  %v3821_v37 = vpop.f32.mrb[59].mxu1  ;;  %5254 = vmatprep.subr.bf16.mxu1 %v24154_v33  ;;  %v7043_v62 = vpop.f32.mrb[105].mxu0  ;;  %v16978_v1 = vld [vmem:[#allocation6 + $0x308] ss:$12 sps:$4 sm:$0xff]  }
 0x4e5   :  { %v20845_v14 = vpop.f32.mrb[106].mxu0  ;;  %v4569_v37 = vsel %vm20737_vm3, %v4567_v43, %v4568_v63  ;;  %v4588_v63 = vsel %vm20737_vm3, %v4586_v36, %v4587_v8  ;;  %v4594_v8 = vrot.slane %v24148_v60, 7  ;;  %v4597_v36 = vrot.slane %v24147_v9, 7 }
 0x4e6   :  { %24202 = vst [vmem:[#allocation106_spill] sm:$0xff] %v20845_v14  ;;  %5160 = vmatmul.mubr.bf16.gmra.mrb[4].mxu1 %v20835_v28  ;;  %v7046_v55 = vpop.f32.mrb[107].mxu0  ;;  %v4759_v49 = vcombine.low %v4569_v37, %v4572_v21  ;;  %v4580_v21 = vrot.slane %v4578_v53, 2  ;;  %v16974_v37 = vld [vmem:[#allocation6 + $0x2a8] ss:$12 sps:$4 sm:$0xff]   ;;  %v4778_v38 = vcombine.low %v4588_v63, %v4591_v27  ;;  %v24212_v14 = vld [vmem:[#allocation70_spill] sm:$0xff] }
 0x4e7   :  { %14887 = vmatprep.mubr.msk.bf16.mxu1 %vm3586_vm10, %v20843_v19  ;;  %5255 = vmatpush1.bf16.msra.mxu1 %v16972_v58  ;;  %v20863_v55 = vcombine.low %v4749_v10, %v4756_v22  ;;  %v4600_v22 = vrot.slane %v19880_v7, 7  ;;  %v16975_v7 = vld [vmem:[#allocation6 + $0x2c0] ss:$12 sps:$4 sm:$0xff]   ;;  %v4596_v60 = vrot.slane %v4594_v8, 2 }
 0x4e8   :  { %5256 = vmatprep.subr.bf16.mxu1 %v24154_v33  ;;  %v4767_v58 = vrot.slane %v4759_v49, %v19457_v24  ;;  %v4792_v63 = vrot.slane %v4778_v38, %v19457_v24 }
 0x4e9   :  { %v20854_v57 = vpop.f32.mrb[60].mxu1  ;;  %v4602_v35 = vrot.slane %v4600_v22, 2  ;;  %v4598_v38 = vsel %vm20737_vm3, %v4596_v60, %v4597_v36 }
 0x4ea   :  { %v3826_v62 = vpop.f32.mrb[61].mxu1  ;;  %v20874_v4 = vcombine.high %v4767_v58, %v4774_v2 }
 0x4eb   :  { %v20861_v43 = vpop.f32.mrb[62].mxu1  ;;  %5257 = vmatpush1.bf16.msra.mxu1 %v16973_v17  ;;  %v20866_v5 = vpop.f32.mrb[108].mxu0  ;;  %v4599_v17 = vrot.slane %v4597_v36, 2  ;;  %v4604_v12 = vsel %vm20737_vm3, %v4602_v35, %v4603_v26  ;;  %v4616_v36 = vrot.slane %v19984_v40, 7 }
 0x4ec   :  { %24203 = vst [vmem:[#allocation107_spill] sm:$0xff] %v20866_v5  ;;  %v3829_v16 = vpop.f32.mrb[63].mxu1  ;;  %5258 = vmatprep.subr.bf16.mxu1 %v24154_v33  ;;  %v7051_v10 = vpop.f32.mrb[109].mxu0  ;;  %v24207_v5 = vld [vmem:[#allocation50_spill] sm:$0xff] }
 0x4ed   :  { %v20876_v53 = vpop.f32.mrb[110].mxu0  ;;  %v4582_v16 = vsel %vm20737_vm3, %v4580_v21, %v4581_v15  ;;  %v24205_v15 = vld [vmem:[#allocation61_spill] sm:$0xff]  ;;  %v14845_v23 = vrot.slane %v24207_v5, 9  ;;  %v4601_v35 = vsel %vm20737_vm3, %v4599_v17, %v4600_v22  ;;  %v24209_v5 = vld [vmem:[#allocation60_spill] sm:$0xff] }
 0x4ee   :  { %24204 = vst [vmem:[#allocation108_spill] sm:$0xff] %v20876_v53  ;;  %5170 = vmatmul.mubr.bf16.gmra.mrb[8].mxu1 %v20863_v55  ;;  %v7054_v49 = vpop.f32.mrb[111].mxu0  ;;  %v4777_v9 = vcombine.low %v4582_v16, %v4585_v59  ;;  %v4613_v21 = vrot.slane %v24205_v15, 7  ;;  %v16976_v59 = vld [vmem:[#allocation6 + $0x2d8] ss:$12 sps:$4 sm:$0xff]   ;;  %v20896_v53 = vcombine.low %v4767_v58, %v4774_v2  ;;  %v4610_v58 = vrot.slane %v24209_v5, 7 }
 0x4ef   :  { %14888 = vmatprep.mubr.msk.bf16.mxu1 %vm3586_vm10, %v20874_v4  ;;  %5259 = vmatpush1.bf16.msra.mxu1 %v16974_v37  ;;  %v4595_v2 = vsel %vm20737_vm3, %v14845_v23, %v4594_v8  ;;  %v16977_v17 = vld [vmem:[#allocation6 + $0x2f0] ss:$12 sps:$4 sm:$0xff]  }
 0x4f0   :  { %5260 = vmatprep.subr.bf16.mxu1 %v24154_v33  ;;  %v4785_v37 = vrot.slane %v4777_v9, %v19457_v24  ;;  %v4796_v9 = vcombine.low %v4601_v35, %v4604_v12  ;;  %v4795_v22 = vcombine.low %v4595_v2, %v4598_v38  ;;  %v24211_v8 = vld [vmem:[#allocation58_spill] sm:$0xff]  ;;  %v4612_v40 = vrot.slane %v4610_v58, 2 }
 0x4f1   :  { %v20885_v62 = vpop.f32.mrb[64].mxu1  ;;  %v14846_v5 = vrot.slane %v24211_v8, 9  ;;  %v4626_v38 = vrot.slane %v24212_v14, 7 }
 0x4f2   :  { %v3834_v27 = vpop.f32.mrb[65].mxu1  ;;  %v20904_v15 = vcombine.high %v4785_v37, %v4792_v63  ;;  %v4810_v35 = vrot.slane %v4796_v9, %v19457_v24  ;;  %v4803_v2 = vrot.slane %v4795_v22, %v19457_v24 }
 0x4f3   :  { %v20891_v10 = vpop.f32.mrb[66].mxu1  ;;  %5261 = vmatpush1.bf16.msra.mxu1 %v16975_v7  ;;  %v20894_v16 = vpop.f32.mrb[112].mxu0 }
 0x4f4   :  { %24206 = vst [vmem:[#allocation61_spill] sm:$0xff] %v20894_v16  ;;  %v3837_v49 = vpop.f32.mrb[67].mxu1  ;;  %5262 = vmatprep.subr.bf16.mxu1 %v24154_v33  ;;  %v7059_v27 = vpop.f32.mrb[113].mxu0  ;;  %v4605_v16 = vrot.slane %v4603_v26, 2  ;;  %v4611_v26 = vsel %vm20737_vm3, %v14846_v5, %v4610_v58  ;;  %v20937_v46 = vcombine.high %v4803_v2, %v4810_v35  ;;  %v16979_v5 = vld [vmem:[#allocation6 + $0x320] ss:$12 sps:$4 sm:$0xff]  }
 0x4f5   :  { %v20906_v7 = vpop.f32.mrb[114].mxu0  ;;  %v4615_v49 = vrot.slane %v4613_v21, 2  ;;  %v24210_v27 = vld [vmem:[#allocation71_spill] sm:$0xff] }
 0x4f6   :  { %24208 = vst [vmem:[#allocation50_spill] sm:$0xff] %v20906_v7  ;;  %5180 = vmatmul.mubr.bf16.gmra.mrb[12].mxu1 %v20896_v53  ;;  %v7062_v60 = vpop.f32.mrb[115].mxu0  ;;  %v4606_v23 = vrot.slane %v24210_v27, 7  ;;  %v20929_v27 = vcombine.low %v4785_v37, %v4792_v63  ;;  %v4628_v37 = vrot.slane %v4626_v38, 2 }
 0x4f7   :  { %14889 = vmatprep.mubr.msk.bf16.mxu1 %vm3586_vm10, %v20904_v15  ;;  %5263 = vmatpush1.bf16.msra.mxu1 %v16976_v59  ;;  %v4617_v60 = vsel %vm20737_vm3, %v4615_v49, %v4616_v36  ;;  %v24214_v49 = vld [vmem:[#allocation64_spill] sm:$0xff] }
 0x4f8   :  { %5264 = vmatprep.subr.bf16.mxu1 %v24154_v33  ;;  %v4619_v8 = vrot.slane %v24214_v49, 7  ;;  %v4607_v63 = vsel %vm20737_vm3, %v4605_v16, %v4606_v23  ;;  %v24216_v49 = vld [vmem:[#allocation67_spill] sm:$0xff] }
 0x4f9   :  { %v20916_v12 = vpop.f32.mrb[68].mxu1 }
 0x4fa   :  { %v3842_v7 = vpop.f32.mrb[69].mxu1 }
 0x4fb   :  { %v20924_v59 = vpop.f32.mrb[70].mxu1  ;;  %5265 = vmatpush1.bf16.msra.mxu1 %v16977_v17  ;;  %v20927_v25 = vpop.f32.mrb[116].mxu0  ;;  %v4614_v7 = vsel %vm20737_vm3, %v4612_v40, %v4613_v21  ;;  %v4813_v21 = vcombine.low %v4607_v63, %v4611_v26  ;;  %v4618_v40 = vrot.slane %v4616_v36, 2  ;;  %v20957_v36 = vcombine.low %v4803_v2, %v4810_v35 }
 0x4fc   :  { %24213 = vst [vmem:[#allocation60_spill] sm:$0xff] %v20927_v25  ;;  %v3845_v9 = vpop.f32.mrb[71].mxu1  ;;  %5266 = vmatprep.subr.bf16.mxu1 %v24154_v33  ;;  %v7067_v14 = vpop.f32.mrb[117].mxu0  ;;  %v4814_v22 = vcombine.low %v4614_v7, %v4617_v60  ;;  %v4629_v60 = vrot.slane %v20056_v29, 7  ;;  %v16980_v29 = vld [vmem:[#allocation6 + $0x338] ss:$12 sps:$4 sm:$0xff]  }
 0x4fd   :  { %v20939_v17 = vpop.f32.mrb[118].mxu0  ;;  %v4621_v9 = vrot.slane %v4619_v8, 2  ;;  %v4622_v14 = vrot.slane %v24216_v49, 7  ;;  %v4821_v63 = vrot.slane %v4813_v21, %v19457_v24 }
 0x4fe   :  { %24215 = vst [vmem:[#allocation71_spill] sm:$0xff] %v20939_v17  ;;  %5190 = vmatmul.mubr.bf16.gmra.mrb[16].mxu1 %v20929_v27  ;;  %v7070_v58 = vpop.f32.mrb[119].mxu0  ;;  %v4828_v16 = vrot.slane %v4814_v22, %v19457_v24  ;;  %v4630_v26 = vsel %vm20737_vm3, %v4628_v37, %v4629_v60  ;;  %v4620_v22 = vsel %vm20737_vm3, %v4618_v40, %v4619_v8  ;;  %v4642_v8 = vrot.slane %v24180_v54, 7 }
 0x4ff   :  { %14890 = vmatprep.mubr.msk.bf16.mxu1 %vm3586_vm10, %v20937_v46  ;;  %5267 = vmatpush1.bf16.msra.mxu1 %v16978_v1  ;;  %v24217_v58 = vld [vmem:[#allocation66_spill] sm:$0xff]  ;;  %v4631_v54 = vrot.slane %v4629_v60, 2 }
 0x500   :  { %5268 = vmatprep.subr.bf16.mxu1 %v24154_v33  ;;  %v14847_v17 = vrot.slane %v24217_v58, 9  ;;  %v4635_v58 = vrot.slane %v20132_v30, 7  ;;  %v20970_v2 = vcombine.high %v4821_v63, %v4828_v16  ;;  %v16981_v30 = vld [vmem:[#allocation6 + $0x350] ss:$12 sps:$4 sm:$0xff]   ;;  %v20994_v18 = vcombine.low %v4821_v63, %v4828_v16 }
 0x501   :  { %v20949_v7 = vpop.f32.mrb[72].mxu1 }
 0x502   :  { %v3850_v23 = vpop.f32.mrb[73].mxu1  ;;  %v4627_v37 = vsel %vm20737_vm3, %v14847_v17, %v4626_v38  ;;  %v4637_v17 = vrot.slane %v4635_v58, 2 }
 0x503   :  { %v20955_v1 = vpop.f32.mrb[74].mxu1  ;;  %5269 = vmatpush1.bf16.msra.mxu1 %v16979_v5  ;;  %v20960_v49 = vpop.f32.mrb[120].mxu0  ;;  %v4623_v23 = vsel %vm20737_vm3, %v4621_v9, %v4622_v14  ;;  %v4832_v21 = vcombine.low %v4627_v37, %v4630_v26  ;;  %v24220_v9 = vld [vmem:[#allocation80_spill] sm:$0xff]  ;;  %v14848_v26 = vrot.slane %v20129_v13, 9 }
 0x504   :  { %24218 = vst [vmem:[#allocation58_spill] sm:$0xff] %v20960_v49  ;;  %v3853_v25 = vpop.f32.mrb[75].mxu1  ;;  %5270 = vmatprep.subr.bf16.mxu1 %v24154_v33  ;;  %v7075_v35 = vpop.f32.mrb[121].mxu0  ;;  %v4831_v38 = vcombine.low %v4620_v22, %v4623_v23  ;;  %v4638_v14 = vrot.slane %v24220_v9, 7  ;;  %v16984_v37 = vld [vmem:[#allocation6 + $0x364] ss:$12 sps:$4 sm:$0xff]  }
 0x505   :  { %v20972_v5 = vpop.f32.mrb[122].mxu0  ;;  %v4632_v25 = vrot.slane %v20116_v20, 7  ;;  %v4846_v20 = vrot.slane %v4832_v21, %v19457_v24  ;;  %v4643_v22 = vsel %vm20737_vm3, %v14848_v26, %v4642_v8  ;;  %v24222_v49 = vld [vmem:[#allocation79_spill] sm:$0xff]  ;;  %v24223_v26 = vld [vmem:[#allocation74_spill] sm:$0xff] }
 0x506   :  { %24219 = vst [vmem:[#allocation70_spill] sm:$0xff] %v20972_v5  ;;  %5200 = vmatmul.mubr.bf16.gmra.mrb[20].mxu1 %v20957_v36  ;;  %v7078_v40 = vpop.f32.mrb[123].mxu0  ;;  %v4651_v31 = vrot.slane %v24222_v49, 7  ;;  %v4839_v13 = vrot.slane %v4831_v38, %v19457_v24  ;;  %v4639_v21 = vsel %vm20737_vm3, %v4637_v17, %v4638_v14 }
 0x507   :  { %14891 = vmatprep.mubr.msk.bf16.mxu1 %vm3586_vm10, %v20970_v2  ;;  %5271 = vmatpush1.bf16.msra.mxu1 %v16980_v29  ;;  %v4634_v5 = vrot.slane %v4632_v25, 2  ;;  %v24221_v29 = vld [vmem:[#allocation76_spill] sm:$0xff]  ;;  %v4850_v56 = vcombine.low %v4639_v21, %v4643_v22 }
 0x508   :  { %5272 = vmatprep.subr.bf16.mxu1 %v24154_v33  ;;  %v4648_v23 = vrot.slane %v24221_v29, 7  ;;  %v21001_v29 = vcombine.high %v4839_v13, %v4846_v20  ;;  %v4653_v63 = vrot.slane %v4651_v31, 2 }
 0x509   :  { %v20982_v35 = vpop.f32.mrb[76].mxu1  ;;  %v4636_v60 = vsel %vm20737_vm3, %v4634_v5, %v4635_v58  ;;  %v24224_v58 = vld [vmem:[#allocation83_spill] sm:$0xff] }
 0x50a   :  { %v3858_v40 = vpop.f32.mrb[77].mxu1  ;;  %v4650_v16 = vrot.slane %v4648_v23, 2  ;;  %v4654_v5 = vrot.slane %v24224_v58, 7 }
 0x50b   :  { %v20989_v9 = vpop.f32.mrb[78].mxu1  ;;  %5273 = vmatpush1.bf16.msra.mxu1 %v16981_v30  ;;  %v20992_v33 = vpop.f32.mrb[124].mxu0  ;;  %v4645_v40 = vrot.slane %v24223_v26, 7  ;;  %v4644_v26 = vrot.slane %v4642_v8, 2 }
 0x50c   :  { %v3861_v11 = vpop.f32.mrb[79].mxu1  ;;  %6075 = vmatprep.subr.bf16.mxu1 %v16984_v37  ;;  %v7083_v49 = vpop.f32.mrb[125].mxu0  ;;  %v4864_v37 = vrot.slane %v4850_v56, %v19457_v24  ;;  %v4652_v22 = vsel %vm20737_vm3, %v4650_v16, %v4651_v31  ;;  %v4655_v21 = vsel %vm20737_vm3, %v4653_v63, %v4654_v5  ;;  %v16985_v16 = vld [vmem:[#allocation6 + $0x378] ss:$12 sps:$4 sm:$0xff]   ;;  %v16990_v63 = vld [vmem:[#allocation6 + $0x394] ss:$12 sps:$4 sm:$0xff]  }
 0x50d   :  { %v21003_v38 = vpop.f32.mrb[126].mxu0  ;;  %v4633_v11 = vsel %vm20737_vm3, %v4631_v54, %v4632_v25  ;;  %v4647_v14 = vrot.slane %v4645_v40, 2  ;;  %v21017_v54 = vcombine.low %v4839_v13, %v4846_v20  ;;  %v4646_v56 = vsel %vm20737_vm3, %v4644_v26, %v4645_v40  ;;  %v16987_v40 = vld [vmem:[#allocation6 + $0x37c] ss:$12 sps:$4 sm:$0xff]  }
 0x50e   :  { %5210 = vmatmul.mubr.bf16.gmra.mrb[24].mxu1 %v20994_v18  ;;  %v7086_v30 = vpop.f32.mrb[127].mxu0  ;;  %v4849_v17 = vcombine.low %v4633_v11, %v4636_v60  ;;  %v4868_v60 = vcombine.low %v4652_v22, %v4655_v21  ;;  %v16988_v5 = vld [vmem:[#allocation6 + $0x390] ss:$12 sps:$4 sm:$0xff]   ;;  %v17003_v22 = vld [vmem:[#allocation6 + $0x408] ss:$12 sps:$4 sm:$0xff]  }
 0x50f   :  { %14892 = vmatprep.mubr.msk.bf16.mxu1 %vm3586_vm10, %v21001_v29  ;;  %v4649_v49 = vsel %vm20737_vm3, %v4647_v14, %v4648_v23  ;;  %v16993_v30 = vld [vmem:[#allocation6 + $0x3ac] ss:$12 sps:$4 sm:$0xff]   ;;  %v17012_v26 = vld [vmem:[#allocation6 + $0x450] ss:$12 sps:$4 sm:$0xff]  }
 0x510   :  { %v4857_v25 = vrot.slane %v4849_v17, %v19457_v24  ;;  %v4867_v31 = vcombine.low %v4646_v56, %v4649_v49  ;;  %v4882_v11 = vrot.slane %v4868_v60, %v19457_v24  ;;  %v16994_v17 = vld [vmem:[#allocation6 + $0x3c0] ss:$12 sps:$4 sm:$0xff]   ;;  %v16997_v14 = vld [vmem:[#allocation6 + $0x3d8] ss:$12 sps:$4 sm:$0xff]   ;;  %v17015_v49 = vld [vmem:[#allocation6 + $0x468] ss:$12 sps:$4 sm:$0xff]  }
 0x511   :  { %v17006_v21 = vld [vmem:[#allocation6 + $0x420] ss:$12 sps:$4 sm:$0xff]  }
 0x512   :  { %v21021_v58 = vcombine.high %v4857_v25, %v4864_v37  ;;  %v4875_v20 = vrot.slane %v4867_v31, %v19457_v24  ;;  %v21030_v8 = vcombine.low %v4857_v25, %v4864_v37  ;;  %v17000_v37 = vld [vmem:[#allocation6 + $0x3f0] ss:$12 sps:$4 sm:$0xff]   ;;  %v17009_v25 = vld [vmem:[#allocation6 + $0x438] ss:$12 sps:$4 sm:$0xff]  }
 0x514   :  { %v21032_v13 = vcombine.high %v4875_v20, %v4882_v11  ;;  %v21037_v23 = vcombine.low %v4875_v20, %v4882_v11 }
 0x516   :  { %5220 = vmatmul.mubr.bf16.gmra.mrb[28].mxu1 %v21017_v54 }
 0x517   :  { %14893 = vmatprep.mubr.msk.bf16.mxu1 %vm3586_vm10, %v21021_v58 }
 0x51e   :  { %5230 = vmatmul.mubr.bf16.gmra.mrb[32].mxu1 %v21030_v8 }
 0x51f   :  { %14894 = vmatprep.mubr.msk.bf16.mxu1 %vm3586_vm10, %v21032_v13 }
 0x526   :  { %5240 = vmatmul.mubr.bf16.gmra.mrb[36].mxu1 %v21037_v23 }
 0x527   :  { %14895 = vmatprep.mubr.msk.bf16.mxu1 %vm3586_vm10, %v20780_v61  ;;  %v16991_v61 = vld [vmem:[#allocation6 + $0x3a8] ss:$12 sps:$4 sm:$0xff]  }
 0x52e   :  { %5283 = vmatmul.mubr.bf16.vlgmr.msra.gmra.mrb[120].mxu1 %v20802_v3  ;;  %v16996_v3 = vld [vmem:[#allocation6 + $0x3c4] ss:$12 sps:$4 sm:$0xff]  }
 0x52f   :  { %6076 = vmatpush1.bf16.msra.mxu1 %v16982_v50  ;;  %14896 = vmatprep.mubr.msk.bf16.mxu1 %vm3586_vm10, %v20811_v39  ;;  %v16999_v39 = vld [vmem:[#allocation6 + $0x3dc] ss:$12 sps:$4 sm:$0xff]  }
 0x530   :  { %6077 = vmatprep.subr.bf16.mxu1 %v16987_v40 }
 0x533   :  { %6078 = vmatpush1.bf16.msra.mxu1 %v16985_v16 }
 0x534   :  { %6079 = vmatprep.subr.bf16.mxu1 %v16990_v63 }
 0x536   :  { %5291 = vmatmul.mubr.bf16.gmra.mrb[124].mxu1 %v20835_v28  ;;  %v17002_v28 = vld [vmem:[#allocation6 + $0x3f4] ss:$12 sps:$4 sm:$0xff]  }
 0x537   :  { %14897 = vmatprep.mubr.msk.bf16.mxu1 %vm3586_vm10, %v20843_v19  ;;  %6080 = vmatpush1.bf16.msra.mxu1 %v16988_v5  ;;  %v17005_v19 = vld [vmem:[#allocation6 + $0x40c] ss:$12 sps:$4 sm:$0xff]  }
 0x538   :  { %6081 = vmatprep.subr.bf16.mxu1 %v16993_v30  ;;  %v17018_v30 = vld [vmem:[#allocation6 + $0x480] ss:$12 sps:$4 sm:$0xff]  }
 0x53b   :  { %6082 = vmatpush1.bf16.msra.mxu1 %v16991_v61 }
 0x53c   :  { %6083 = vmatprep.subr.bf16.mxu1 %v16996_v3  ;;  %v17023_v3 = vld [vmem:[#allocation6 + $0x49c] ss:$12 sps:$4 sm:$0xff]  }
 0x53e   :  { %5299 = vmatmul.mubr.bf16.gmra.mrb[128].mxu1 %v20863_v55  ;;  %v17008_v55 = vld [vmem:[#allocation6 + $0x424] ss:$12 sps:$4 sm:$0xff]  }
 0x53f   :  { %14898 = vmatprep.mubr.msk.bf16.mxu1 %vm3586_vm10, %v20874_v4  ;;  %6084 = vmatpush1.bf16.msra.mxu1 %v16994_v17  ;;  %v17011_v4 = vld [vmem:[#allocation6 + $0x43c] ss:$12 sps:$4 sm:$0xff]  }
 0x540   :  { %6085 = vmatprep.subr.bf16.mxu1 %v16999_v39  ;;  %v24227_v17 = vld [vmem:[#allocation48_spill] sm:$0xff]  ;;  %v17026_v39 = vld [vmem:[#allocation6 + $0x4b4] ss:$12 sps:$4 sm:$0xff]  }
 0x543   :  { %6086 = vmatpush1.bf16.msra.mxu1 %v16997_v14 }
 0x544   :  { %6087 = vmatprep.subr.bf16.mxu1 %v17002_v28 }
 0x546   :  { %5307 = vmatmul.mubr.bf16.gmra.mrb[132].mxu1 %v20896_v53  ;;  %v17014_v53 = vld [vmem:[#allocation6 + $0x454] ss:$12 sps:$4 sm:$0xff]  }
 0x547   :  { %14899 = vmatprep.mubr.msk.bf16.mxu1 %vm3586_vm10, %v20904_v15  ;;  %6088 = vmatpush1.bf16.msra.mxu1 %v17000_v37  ;;  %v17017_v15 = vld [vmem:[#allocation6 + $0x46c] ss:$12 sps:$4 sm:$0xff]  }
 0x548   :  { %6089 = vmatprep.subr.bf16.mxu1 %v17005_v19 }
 0x54b   :  { %6090 = vmatpush1.bf16.msra.mxu1 %v17003_v22 }
 0x54c   :  { %6091 = vmatprep.subr.bf16.mxu1 %v17008_v55  ;;  %v17029_v55 = vld [vmem:[#allocation6 + $0x4cc] ss:$12 sps:$4 sm:$0xff]  }
 0x54e   :  { %5315 = vmatmul.mubr.bf16.gmra.mrb[136].mxu1 %v20929_v27  ;;  %v17020_v27 = vld [vmem:[#allocation6 + $0x484] ss:$12 sps:$4 sm:$0xff]  }
 0x54f   :  { %14900 = vmatprep.mubr.msk.bf16.mxu1 %vm3586_vm10, %v20937_v46  ;;  %6092 = vmatpush1.bf16.msra.mxu1 %v17006_v21  ;;  %v24228_v21 = vld [vmem:[#allocation49_spill] sm:$0xff] }
 0x550   :  { %6093 = vmatprep.subr.bf16.mxu1 %v17011_v4  ;;  %v24229_v4 = vld [vmem:[#allocation52_spill] sm:$0xff] }
 0x553   :  { %6094 = vmatpush1.bf16.msra.mxu1 %v17009_v25  ;;  %v17027_v25 = vld [vmem:[#allocation6 + $0x4c8] ss:$12 sps:$4 sm:$0xff]  }
 0x554   :  { %6095 = vmatprep.subr.bf16.mxu1 %v17014_v53 }
 0x556   :  { %5323 = vmatmul.mubr.bf16.gmra.mrb[140].mxu1 %v20957_v36 }
 0x557   :  { %14901 = vmatprep.mubr.msk.bf16.mxu1 %vm3586_vm10, %v20970_v2  ;;  %6096 = vmatpush1.bf16.msra.mxu1 %v17012_v26 }
 0x558   :  { %6097 = vmatprep.subr.bf16.mxu1 %v17017_v15 }
 0x55b   :  { %6098 = vmatpush1.bf16.msra.mxu1 %v17015_v49 }
 0x55c   :  { %6842 = vmatprep.subr.bf16.mxu1 %v17020_v27 }
 0x55e   :  { %5331 = vmatmul.mubr.bf16.gmra.mrb[144].mxu1 %v20994_v18 }
 0x55f   :  { %14902 = vmatprep.mubr.msk.bf16.mxu1 %vm3586_vm10, %v21001_v29 }
 0x561   :  { %v4442_v46 = vpop.f32.mrb[80].mxu1 }
 0x562   :  { %v21064_v60 = vadd.f32 %v4442_v46, %v20717_v51  ;;  %v4444_v56 = vpop.f32.mrb[81].mxu1 }
 0x563   :  { %v4445_v36 = vpop.f32.mrb[82].mxu1  ;;  %v17035_v56 = vld [vmem:[#allocation6 + $0x4fc] ss:$12 sps:$4 sm:$0xff]  }
 0x564   :  { %v21067_v31 = vadd.f32 %v4445_v36, %v20719_v48  ;;  %v4447_v2 = vpop.f32.mrb[83].mxu1  ;;  %v24230_v36 = vld [vmem:[#allocation53_spill] sm:$0xff] }
 0x565   :  { %v24231_v2 = vld [vmem:[#allocation62_spill] sm:$0xff] }
 0x566   :  { %5339 = vmatmul.mubr.bf16.gmra.mrb[148].mxu1 %v21017_v54 }
 0x567   :  { %14903 = vmatprep.mubr.msk.bf16.mxu1 %vm3586_vm10, %v21021_v58 }
 0x569   :  { %v4450_v11 = vpop.f32.mrb[84].mxu1 }
 0x56a   :  { %v21073_v18 = vadd.f32 %v4450_v11, %v20734_v52  ;;  %v4452_v29 = vpop.f32.mrb[85].mxu1  ;;  %v17033_v11 = vld [vmem:[#allocation6 + $0x4f8] ss:$12 sps:$4 sm:$0xff]  }
 0x56b   :  { %v4453_v20 = vpop.f32.mrb[86].mxu1 }
 0x56c   :  { %v21076_v51 = vadd.f32 %v4453_v20, %v20744_v42  ;;  %v4455_v50 = vpop.f32.mrb[87].mxu1  ;;  %v24225_v42 = vld [vmem:[#allocation35_spill] sm:$0xff] }
 0x56e   :  { %5347 = vmatmul.mubr.bf16.gmra.mrb[152].mxu1 %v21030_v8 }
 0x56f   :  { %14904 = vmatprep.mubr.msk.bf16.mxu1 %vm3586_vm10, %v21032_v13 }
 0x571   :  { %v4458_v48 = vpop.f32.mrb[88].mxu1 }
 0x572   :  { %v21082_v54 = vadd.f32 %v4458_v48, %v20762_v45  ;;  %v4460_v58 = vpop.f32.mrb[89].mxu1 }
 0x573   :  { %v4461_v40 = vpop.f32.mrb[90].mxu1 }
 0x574   :  { %v21085_v52 = vadd.f32 %v4461_v40, %v20770_v34  ;;  %v4463_v16 = vpop.f32.mrb[91].mxu1  ;;  %v24226_v34 = vld [vmem:[#allocation34_spill] sm:$0xff] }
 0x575   :  { %v17041_v16 = vld [vmem:[#allocation6 + $0x52c] ss:$12 sps:$4 sm:$0xff]  }
 0x576   :  { %5355 = vmatmul.mubr.bf16.gmra.mrb[156].mxu1 %v21037_v23  ;;  %v17021_v23 = vld [vmem:[#allocation6 + $0x498] ss:$12 sps:$4 sm:$0xff]  }
 0x577   :  { %14949 = vmatprep.mubr.msk.bf16.mxu1 %vm3586_vm10, %v24225_v42  ;;  %v24232_v42 = vld [vmem:[#allocation63_spill] sm:$0xff] }
 0x579   :  { %v4466_v63 = vpop.f32.mrb[92].mxu1 }
 0x57a   :  { %v21091_v8 = vadd.f32 %v4466_v63, %v20791_v0  ;;  %v4468_v13 = vpop.f32.mrb[93].mxu1  ;;  %v24233_v63 = vld [vmem:[#allocation68_spill] sm:$0xff] }
 0x57b   :  { %v4469_v5 = vpop.f32.mrb[94].mxu1  ;;  %v17039_v13 = vld [vmem:[#allocation6 + $0x528] ss:$12 sps:$4 sm:$0xff]  }
 0x57c   :  { %v21094_v45 = vadd.f32 %v4469_v5, %v20797_v41  ;;  %v4471_v61 = vpop.f32.mrb[95].mxu1  ;;  %v17024_v41 = vld [vmem:[#allocation6 + $0x4b0] ss:$12 sps:$4 sm:$0xff]  }
 0x57e   :  { %6108 = vmatmul.mubr.bf16.vlgmr.msra.gmra.mrb[0].mxu1 %v24226_v34 }
 0x57f   :  { %6843 = vmatpush1.bf16.msra.mxu1 %v17018_v30  ;;  %14950 = vmatprep.mubr.msk.bf16.mxu1 %vm3586_vm10, %v24227_v17 }
 0x580   :  { %6844 = vmatprep.subr.bf16.mxu1 %v17023_v3 }
 0x581   :  { %v4474_v14 = vpop.f32.mrb[96].mxu1 }
 0x582   :  { %v21100_v0 = vadd.f32 %v4474_v14, %v20823_v44  ;;  %v4476_v28 = vpop.f32.mrb[97].mxu1  ;;  %v17032_v44 = vld [vmem:[#allocation6 + $0x4e4] ss:$12 sps:$4 sm:$0xff]  }
 0x583   :  { %v4477_v37 = vpop.f32.mrb[98].mxu1  ;;  %6845 = vmatpush1.bf16.msra.mxu1 %v17021_v23  ;;  %v17047_v23 = vld [vmem:[#allocation6 + $0x55c] ss:$12 sps:$4 sm:$0xff]   ;;  %v17045_v28 = vld [vmem:[#allocation6 + $0x558] ss:$12 sps:$4 sm:$0xff]  }
 0x584   :  { %v21103_v19 = vadd.f32 %v4477_v37, %v20830_v6  ;;  %v4479_v22 = vpop.f32.mrb[99].mxu1  ;;  %6846 = vmatprep.subr.bf16.mxu1 %v17026_v39  ;;  %v17030_v6 = vld [vmem:[#allocation6 + $0x4e0] ss:$12 sps:$4 sm:$0xff]   ;;  %v24234_v39 = vld [vmem:[#allocation69_spill] sm:$0xff] }
 0x585   :  { %v24235_v14 = vld [vmem:[#allocation72_spill] sm:$0xff] }
 0x586   :  { %6118 = vmatmul.mubr.bf16.gmra.mrb[4].mxu1 %v24228_v21 }
 0x587   :  { %14951 = vmatprep.mubr.msk.bf16.mxu1 %vm3586_vm10, %v24229_v4  ;;  %6847 = vmatpush1.bf16.msra.mxu1 %v17024_v41 }
 0x588   :  { %6848 = vmatprep.subr.bf16.mxu1 %v17029_v55 }
 0x589   :  { %v4482_v53 = vpop.f32.mrb[100].mxu1 }
 0x58a   :  { %v21109_v26 = vadd.f32 %v4482_v53, %v20854_v57  ;;  %v4484_v15 = vpop.f32.mrb[101].mxu1  ;;  %v17038_v57 = vld [vmem:[#allocation6 + $0x514] ss:$12 sps:$4 sm:$0xff]  }
 0x58b   :  { %v4485_v49 = vpop.f32.mrb[102].mxu1  ;;  %6849 = vmatpush1.bf16.msra.mxu1 %v17027_v25  ;;  %v17053_v25 = vld [vmem:[#allocation6 + $0x58c] ss:$12 sps:$4 sm:$0xff]   ;;  %v17051_v15 = vld [vmem:[#allocation6 + $0x588] ss:$12 sps:$4 sm:$0xff]  }
 0x58c   :  { %v21112_v27 = vadd.f32 %v4485_v49, %v20861_v43  ;;  %v4487_v46 = vpop.f32.mrb[103].mxu1  ;;  %6850 = vmatprep.subr.bf16.mxu1 %v17032_v44  ;;  %v17036_v43 = vld [vmem:[#allocation6 + $0x510] ss:$12 sps:$4 sm:$0xff]  }
 0x58d   :  { %v24236_v44 = vld [vmem:[#allocation73_spill] sm:$0xff] }
 0x58e   :  { %6128 = vmatmul.mubr.bf16.gmra.mrb[8].mxu1 %v24230_v36  ;;  %v24237_v53 = vld [vmem:[#allocation77_spill] sm:$0xff]  ;;  %v24238_v36 = vld [vmem:[#allocation78_spill] sm:$0xff] }
 0x58f   :  { %14952 = vmatprep.mubr.msk.bf16.mxu1 %vm3586_vm10, %v24231_v2  ;;  %6851 = vmatpush1.bf16.msra.mxu1 %v17030_v6  ;;  %v24239_v2 = vld [vmem:[#allocation81_spill] sm:$0xff] }
 0x590   :  { %6852 = vmatprep.subr.bf16.mxu1 %v17035_v56 }
 0x591   :  { %v4490_v29 = vpop.f32.mrb[104].mxu1 }
 0x592   :  { %v21118_v20 = vadd.f32 %v4490_v29, %v20885_v62  ;;  %v4492_v50 = vpop.f32.mrb[105].mxu1  ;;  %v17044_v62 = vld [vmem:[#allocation6 + $0x544] ss:$12 sps:$4 sm:$0xff]   ;;  %v24242_v29 = vld [vmem:[#allocation86_spill] sm:$0xff] }
 0x593   :  { %v4493_v48 = vpop.f32.mrb[106].mxu1  ;;  %6853 = vmatpush1.bf16.msra.mxu1 %v17033_v11  ;;  %v24240_v11 = vld [vmem:[#allocation82_spill] sm:$0xff]  ;;  %v24244_v50 = vld [vmem:[#allocation87_spill] sm:$0xff] }
 0x594   :  { %v21121_v58 = vadd.f32 %v4493_v48, %v20891_v10  ;;  %v4495_v40 = vpop.f32.mrb[107].mxu1  ;;  %6854 = vmatprep.subr.bf16.mxu1 %v17038_v57  ;;  %v17042_v10 = vld [vmem:[#allocation6 + $0x540] ss:$12 sps:$4 sm:$0xff]   ;;  %v24241_v57 = vld [vmem:[#allocation85_spill] sm:$0xff] }
 0x595   :  { %v24246_v48 = vld [vmem:[#allocation38_spill] sm:$0xff]  ;;  %v24248_v40 = vld [vmem:[#allocation25_spill] sm:$0xff] }
 0x596   :  { %6138 = vmatmul.mubr.bf16.gmra.mrb[12].mxu1 %v24232_v42  ;;  %v24250_v42 = vld [vmem:[#allocation46_spill] sm:$0xff] }
 0x597   :  { %14953 = vmatprep.mubr.msk.bf16.mxu1 %vm3586_vm10, %v24233_v63  ;;  %6855 = vmatpush1.bf16.msra.mxu1 %v17036_v43  ;;  %v24247_v43 = vld [vmem:[#allocation41_spill] sm:$0xff]  ;;  %v24251_v63 = vld [vmem:[#allocation32_spill] sm:$0xff] }
 0x598   :  { %6856 = vmatprep.subr.bf16.mxu1 %v17041_v16  ;;  %v24249_v16 = vld [vmem:[#allocation28_spill] sm:$0xff] }
 0x599   :  { %v4498_v5 = vpop.f32.mrb[108].mxu1 }
 0x59a   :  { %v21127_v30 = vadd.f32 %v4498_v5, %v20916_v12  ;;  %v4500_v61 = vpop.f32.mrb[109].mxu1  ;;  %v17050_v12 = vld [vmem:[#allocation6 + $0x574] ss:$12 sps:$4 sm:$0xff]   ;;  %v24254_v5 = vld [vmem:[#allocation24_spill] sm:$0xff] }
 0x59b   :  { %v4501_v3 = vpop.f32.mrb[110].mxu1  ;;  %6857 = vmatpush1.bf16.msra.mxu1 %v17039_v13  ;;  %v24252_v13 = vld [vmem:[#allocation31_spill] sm:$0xff] }
 0x59c   :  { %v21130_v34 = vadd.f32 %v4501_v3, %v20924_v59  ;;  %v4503_v17 = vpop.f32.mrb[111].mxu1  ;;  %6858 = vmatprep.subr.bf16.mxu1 %v17044_v62  ;;  %v17048_v59 = vld [vmem:[#allocation6 + $0x570] ss:$12 sps:$4 sm:$0xff]   ;;  %v24255_v61 = vld [vmem:[#allocation47_spill] sm:$0xff] }
 0x59d   :  { %v24253_v62 = vld [vmem:[#allocation37_spill] sm:$0xff]  ;;  %v24256_v3 = vld [vmem:[#allocation56_spill] sm:$0xff] }
 0x59e   :  { %6148 = vmatmul.mubr.bf16.gmra.mrb[16].mxu1 %v24234_v39  ;;  %v24258_v17 = vld [vmem:[#allocation57_spill] sm:$0xff]  ;;  %v24260_v39 = vld [vmem:[#allocation40_spill] sm:$0xff] }
 0x59f   :  { %14954 = vmatprep.mubr.msk.bf16.mxu1 %vm3586_vm10, %v24235_v14  ;;  %6859 = vmatpush1.bf16.msra.mxu1 %v17042_v10  ;;  %v24257_v10 = vld [vmem:[#allocation42_spill] sm:$0xff]  ;;  %v7160_v14 = vsub.s32 2, %v24260_v39 }
 0x5a0   :  { %6860 = vmatprep.subr.bf16.mxu1 %v17047_v23  ;;  %v24259_v23 = vld [vmem:[#allocation45_spill] sm:$0xff] }
 0x5a1   :  { %v4506_v37 = vpop.f32.mrb[112].mxu1 }
 0x5a2   :  { %v21136_v41 = vadd.f32 %v4506_v37, %v20949_v7  ;;  %v4508_v22 = vpop.f32.mrb[113].mxu1 }
 0x5a3   :  { %v4509_v55 = vpop.f32.mrb[114].mxu1  ;;  %6861 = vmatpush1.bf16.msra.mxu1 %v17045_v28 }
 0x5a4   :  { %v21139_v21 = vadd.f32 %v4509_v55, %v20955_v1  ;;  %v4511_v4 = vpop.f32.mrb[115].mxu1  ;;  %6862 = vmatprep.subr.bf16.mxu1 %v17050_v12  ;;  %v21184_v12 = vld [vmem:[#allocation7] sm:$0x7] }
 0x5a6   :  { %6158 = vmatmul.mubr.bf16.gmra.mrb[20].mxu1 %v24236_v44 }
 0x5a7   :  { %14955 = vmatprep.mubr.msk.bf16.mxu1 %vm3586_vm10, %v24237_v53  ;;  %6863 = vmatpush1.bf16.msra.mxu1 %v17048_v59  ;;  %v24261_v59 = vld [vmem:[#allocation43_spill] sm:$0xff] }
 0x5a8   :  { %6864 = vmatprep.subr.bf16.mxu1 %v17053_v25  ;;  %v21189_v25 = vrot.slane %v21184_v12, %v7160_v14 }
 0x5a9   :  { %v4514_v7 = vpop.f32.mrb[116].mxu1 }
 0x5aa   :  { %v21145_v49 = vadd.f32 %v4514_v7, %v20982_v35  ;;  %v4516_v6 = vpop.f32.mrb[117].mxu1  ;;  %v24243_v35 = vld [vmem:[#allocation27_spill] sm:$0xff]  ;;  %v24262_v7 = vld [vmem:[#allocation36_spill] sm:$0xff] }
 0x5ab   :  { %v4517_v46 = vpop.f32.mrb[118].mxu1  ;;  %6865 = vmatpush1.bf16.msra.mxu1 %v17051_v15 }
 0x5ac   :  { %v21148_v1 = vadd.f32 %v4517_v46, %v20989_v9  ;;  %v4519_v56 = vpop.f32.mrb[119].mxu1  ;;  %v24245_v9 = vld [vmem:[#allocation30_spill] sm:$0xff]  ;;  %v24263_v46 = vld [vmem:[#allocation59_spill] sm:$0xff] }
 0x5ad   :  { %v24264_v56 = vld [vmem:[#allocation54_spill] sm:$0xff] }
 0x5ae   :  { %6168 = vmatmul.mubr.bf16.gmra.mrb[24].mxu1 %v24238_v36 }
 0x5af   :  { %14956 = vmatprep.mubr.msk.bf16.mxu1 %vm3586_vm10, %v24239_v2 }
 0x5b6   :  { %6178 = vmatmul.mubr.bf16.gmra.mrb[28].mxu1 %v24240_v11 }
 0x5b7   :  { %14957 = vmatprep.mubr.msk.bf16.mxu1 %vm3586_vm10, %v24241_v57 }
 0x5be   :  { %6188 = vmatmul.mubr.bf16.gmra.mrb[32].mxu1 %v24242_v29 }
 0x5bf   :  { %14958 = vmatprep.mubr.msk.bf16.mxu1 %vm3586_vm10, %v24243_v35 }
 0x5c6   :  { %6198 = vmatmul.mubr.bf16.gmra.mrb[36].mxu1 %v24244_v50  ;;  %v24265_v50 = vld [vmem:[#allocation84_spill] sm:$0xff] }
 0x5c7   :  { %15009 = vmatprep.mubr.msk.bf16.mxu1 %vm3586_vm10, %v24245_v9 }
 0x5ce   :  { %6875 = vmatmul.mubr.bf16.vlgmr.msra.gmra.mrb[0].mxu1 %v24246_v48 }
 0x5cf   :  { %15010 = vmatprep.mubr.msk.bf16.mxu1 %vm3586_vm10, %v24247_v43 }
 0x5d6   :  { %6885 = vmatmul.mubr.bf16.gmra.mrb[4].mxu1 %v24248_v40 }
 0x5d7   :  { %15011 = vmatprep.mubr.msk.bf16.mxu1 %vm3586_vm10, %v24249_v16  ;;  %v24266_v16 = vld [vmem:[#allocation101_spill] sm:$0xff] }
 0x5de   :  { %6895 = vmatmul.mubr.bf16.gmra.mrb[8].mxu1 %v24250_v42  ;;  %v24267_v42 = vld [vmem:[#allocation39_spill] sm:$0xff] }
 0x5df   :  { %15012 = vmatprep.mubr.msk.bf16.mxu1 %vm3586_vm10, %v24251_v63 }
 0x5e6   :  { %6905 = vmatmul.mubr.bf16.gmra.mrb[12].mxu1 %v24252_v13  ;;  %v24268_v13 = vld [vmem:[#allocation51_spill] sm:$0xff] }
 0x5e7   :  { %15013 = vmatprep.mubr.msk.bf16.mxu1 %vm3586_vm10, %v24253_v62  ;;  %v24270_v62 = vld [vmem:[#allocation102_spill] sm:$0xff] }
 0x5ee   :  { %6915 = vmatmul.mubr.bf16.gmra.mrb[16].mxu1 %v24254_v5 }
 0x5ef   :  { %15014 = vmatprep.mubr.msk.bf16.mxu1 %vm3586_vm10, %v24255_v61 }
 0x5f6   :  { %6925 = vmatmul.mubr.bf16.gmra.mrb[20].mxu1 %v24256_v3 }
 0x5f7   :  { %15015 = vmatprep.mubr.msk.bf16.mxu1 %vm3586_vm10, %v24257_v10 }
 0x5fe   :  { %6935 = vmatmul.mubr.bf16.gmra.mrb[24].mxu1 %v24258_v17 }
 0x5ff   :  { %15016 = vmatprep.mubr.msk.bf16.mxu1 %vm3586_vm10, %v24259_v23 }
 0x601   :  { %v5284_v28 = vpop.f32.mrb[120].mxu1 }
 0x602   :  { %v5365_v37 = vadd.f32 %v5284_v28, %v21064_v60  ;;  %v5286_v22 = vpop.f32.mrb[121].mxu1 }
 0x603   :  { %v5287_v55 = vpop.f32.mrb[122].mxu1  ;;  %v24271_v22 = vld [vmem:[#allocation88_spill] sm:$0xff] }
 0x604   :  { %v6323_v4 = vadd.f32 %v24261_v59, %v5365_v37  ;;  %v5368_v44 = vadd.f32 %v5287_v55, %v21067_v31  ;;  %v5289_v53 = vpop.f32.mrb[123].mxu1 }
 0x605   :  { %v24273_v53 = vld [vmem:[#allocation33_spill] sm:$0xff] }
 0x606   :  { %v7090_v15 = vadd.f32 %v20722_v32, %v6323_v4  ;;  %v6326_v6 = vadd.f32 %v24262_v7, %v5368_v44  ;;  %6945 = vmatmul.mubr.bf16.gmra.mrb[28].mxu1 %v24263_v46  ;;  %v24272_v4 = vld [vmem:[#allocation26_spill] sm:$0xff]  ;;  %v24274_v7 = vld [vmem:[#allocation29_spill] sm:$0xff] }
 0x607   :  { %15017 = vmatprep.mubr.msk.bf16.mxu1 %vm3586_vm10, %v24264_v56  ;;  %v24275_v56 = vld [vmem:[#allocation103_spill] sm:$0xff] }
 0x608   :  { %v7167_v60 = vadd.f32 %v21189_v25, %v7090_v15  ;;  %v7093_v36 = vadd.f32 %v20727_v47, %v6326_v6 }
 0x609   :  { %v5292_v2 = vpop.f32.mrb[124].mxu1 }
 0x60a   :  { %v7170_v11 = vadd.f32 %v21189_v25, %v7093_v36  ;;  %v5371_v57 = vadd.f32 %v5292_v2, %v21073_v18  ;;  %v5294_v31 = vpop.f32.mrb[125].mxu1  ;;  %v7227_v35 = vmax.f32 %v7167_v60, 0.0  ;;  %v24269_v18 = vld [vmem:[#allocation65_spill] sm:$0xff] }
 0x60b   :  { %v5295_v29 = vpop.f32.mrb[126].mxu1 }
 0x60c   :  { %v21201_v32 = vmax.f32 %v7170_v11, 0.0  ;;  %v6329_v9 = vadd.f32 %v24265_v50, %v5371_v57  ;;  %v5374_v48 = vadd.f32 %v5295_v29, %v21076_v51  ;;  %v5297_v43 = vpop.f32.mrb[127].mxu1  ;;  %v24276_v29 = vld [vmem:[#allocation44_spill] sm:$0xff]  ;;  %v24277_v50 = vld [vmem:[#allocation89_spill] sm:$0xff] }
 0x60e   :  { %v21206_v40 = vpack.c.bf16 %v21201_v32, %v7227_v35  ;;  %v7096_v47 = vadd.f32 %v24266_v16, %v6329_v9  ;;  %v6332_v63 = vadd.f32 %v24267_v42, %v5374_v48  ;;  %6955 = vmatmul.mubr.bf16.gmra.mrb[32].mxu1 %v24268_v13  ;;  %v24278_v16 = vld [vmem:[#allocation104_spill] sm:$0xff]  ;;  %v24279_v42 = vld [vmem:[#allocation105_spill] sm:$0xff] }
 0x60f   :  { %15018 = vmatprep.mubr.msk.bf16.mxu1 %vm3586_vm10, %v24269_v18 }
 0x610   :  { %v7099_v5 = vadd.f32 %v24270_v62, %v6332_v63  ;;  %v7173_v61 = vadd.f32 %v21189_v25, %v7096_v47 }
 0x611   :  { %v5300_v3 = vpop.f32.mrb[128].mxu1 }
 0x612   :  { %v5302_v10 = vpop.f32.mrb[129].mxu1  ;;  %v7176_v51 = vadd.f32 %v21189_v25, %v7099_v5  ;;  %v5377_v17 = vadd.f32 %v5300_v3, %v21082_v54  ;;  %v7233_v28 = vmax.f32 %v7173_v61, 0.0 }
 0x613   :  { %v5303_v23 = vpop.f32.mrb[130].mxu1 }
 0x614   :  { %v5305_v14 = vpop.f32.mrb[131].mxu1  ;;  %v21217_v37 = vmax.f32 %v7176_v51, 0.0  ;;  %v6335_v55 = vadd.f32 %v24271_v22, %v5377_v17  ;;  %v5380_v59 = vadd.f32 %v5303_v23, %v21085_v52  ;;  %v24281_v22 = vld [vmem:[#allocation91_spill] sm:$0xff] }
 0x615   :  { %v24280_v14 = vld [vmem:[#allocation90_spill] sm:$0xff] }
 0x616   :  { %6965 = vmatmul.mubr.bf16.gmra.mrb[36].mxu1 %v24272_v4  ;;  %v21223_v44 = vpack.c.bf16 %v21217_v37, %v7233_v28  ;;  %v7102_v15 = vadd.f32 %v24273_v53, %v6335_v55  ;;  %v6338_v6 = vadd.f32 %v24274_v7, %v5380_v59  ;;  %v24282_v53 = vld [vmem:[#allocation55_spill] sm:$0xff]  ;;  %v24283_v7 = vld [vmem:[#allocation106_spill] sm:$0xff] }
 0x618   :  { %v7105_v60 = vadd.f32 %v24275_v56, %v6338_v6  ;;  %v7179_v2 = vadd.f32 %v21189_v25, %v7102_v15 }
 0x619   :  { %v5308_v46 = vpop.f32.mrb[132].mxu1 }
 0x61a   :  { %v5310_v54 = vpop.f32.mrb[133].mxu1  ;;  %v5383_v11 = vadd.f32 %v5308_v46, %v21091_v8  ;;  %v7182_v31 = vadd.f32 %v21189_v25, %v7105_v60  ;;  %v7239_v48 = vmax.f32 %v7179_v2, 0.0 }
 0x61b   :  { %v5311_v36 = vpop.f32.mrb[134].mxu1 }
 0x61c   :  { %v5386_v52 = vadd.f32 %v5311_v36, %v21094_v45  ;;  %v5313_v57 = vpop.f32.mrb[135].mxu1  ;;  %v6341_v35 = vadd.f32 %v24276_v29, %v5383_v11  ;;  %v21234_v43 = vmax.f32 %v7182_v31, 0.0  ;;  %v24285_v29 = vld [vmem:[#allocation92_spill] sm:$0xff] }
 0x61d   :  { %v24284_v57 = vld [vmem:[#allocation75_spill] sm:$0xff] }
 0x61e   :  { %v6344_v9 = vadd.f32 %v24277_v50, %v5386_v52  ;;  %v7108_v47 = vadd.f32 %v24278_v16, %v6341_v35  ;;  %v21239_v18 = vpack.c.bf16 %v21234_v43, %v7239_v48 }
 0x620   :  { %v7111_v63 = vadd.f32 %v24279_v42, %v6344_v9  ;;  %v7185_v62 = vadd.f32 %v21189_v25, %v7108_v47  ;;  %v24286_v47 = vld [vmem:[#allocation107_spill] sm:$0xff]  ;;  %v24287_v42 = vld [vmem:[#allocation108_spill] sm:$0xff] }
 0x621   :  { %v5316_v13 = vpop.f32.mrb[136].mxu1 }
 0x622   :  { %v7188_v8 = vadd.f32 %v21189_v25, %v7111_v63  ;;  %v5318_v45 = vpop.f32.mrb[137].mxu1  ;;  %v7245_v10 = vmax.f32 %v7185_v62, 0.0  ;;  %v5389_v51 = vadd.f32 %v5316_v13, %v21100_v0  ;;  %v24288_v13 = vld [vmem:[#allocation93_spill] sm:$0xff] }
 0x623   :  { %v5319_v5 = vpop.f32.mrb[138].mxu1  ;;  %v24289_v45 = vld [vmem:[#allocation94_spill] sm:$0xff] }
 0x624   :  { %v5321_v61 = vpop.f32.mrb[139].mxu1  ;;  %v21243_v3 = vmax.f32 %v7188_v8, 0.0  ;;  %v5392_v17 = vadd.f32 %v5319_v5, %v21103_v19  ;;  %v6347_v28 = vadd.f32 %v24280_v14, %v5389_v51  ;;  %v24291_v14 = vld [vmem:[#allocation50_spill] sm:$0xff] }
 0x626   :  { %v21248_v23 = vpack.c.bf16 %v21243_v3, %v7245_v10  ;;  %v6350_v55 = vadd.f32 %v24281_v22, %v5392_v17  ;;  %v7114_v15 = vadd.f32 %v24282_v53, %v6347_v28 }
 0x628   :  { %v7117_v6 = vadd.f32 %v24283_v7, %v6350_v55  ;;  %v7191_v56 = vadd.f32 %v21189_v25, %v7114_v15 }
 0x629   :  { %v5324_v59 = vpop.f32.mrb[140].mxu1 }
 0x62a   :  { %v5326_v4 = vpop.f32.mrb[141].mxu1  ;;  %v7194_v0 = vadd.f32 %v21189_v25, %v7117_v6  ;;  %v5395_v19 = vadd.f32 %v5324_v59, %v21109_v26  ;;  %v7251_v2 = vmax.f32 %v7191_v56, 0.0 }
 0x62b   :  { %v5327_v46 = vpop.f32.mrb[142].mxu1 }
 0x62c   :  { %v5329_v54 = vpop.f32.mrb[143].mxu1  ;;  %v5398_v60 = vadd.f32 %v5327_v46, %v21112_v27  ;;  %v21258_v11 = vmax.f32 %v7194_v0, 0.0  ;;  %v6353_v31 = vadd.f32 %v24284_v57, %v5395_v19  ;;  %v24292_v0 = vld [vmem:[#allocation95_spill] sm:$0xff] }
 0x62d   :  { %v17055_v57 = vld [vmem:[#allocation9 + $0xa0] sm:$0xff]  }
 0x62e   :  { %v6356_v35 = vadd.f32 %v24285_v29, %v5398_v60  ;;  %v21264_v48 = vpack.c.bf16 %v21258_v11, %v7251_v2  ;;  %v7120_v27 = vadd.f32 %v24286_v47, %v6353_v31  ;;  %v24293_v60 = vld [vmem:[#allocation96_spill] sm:$0xff] }
 0x62f   :  { %v24294_v31 = vld [vmem:[#allocation60_spill] sm:$0xff] }
 0x630   :  { %v7123_v63 = vadd.f32 %v24287_v42, %v6356_v35  ;;  %v7197_v5 = vadd.f32 %v21189_v25, %v7120_v27  ;;  %v24295_v35 = vld [vmem:[#allocation71_spill] sm:$0xff] }
 0x631   :  { %v5332_v36 = vpop.f32.mrb[144].mxu1 }
 0x632   :  { %v5334_v52 = vpop.f32.mrb[145].mxu1  ;;  %v5401_v50 = vadd.f32 %v5332_v36, %v21118_v20  ;;  %v7200_v61 = vadd.f32 %v21189_v25, %v7123_v63  ;;  %v24290_v20 = vld [vmem:[#allocation61_spill] sm:$0xff]  ;;  %v7257_v51 = vmax.f32 %v7197_v5, 0.0 }
 0x633   :  { %v5335_v9 = vpop.f32.mrb[146].mxu1  ;;  %v17054_v52 = vld [vmem:[#allocation9 + $0xe0] sm:$0xff]  }
 0x634   :  { %v5404_v16 = vadd.f32 %v5335_v9, %v21121_v58  ;;  %v5337_v26 = vpop.f32.mrb[147].mxu1  ;;  %v6359_v8 = vadd.f32 %v24288_v13, %v5401_v50  ;;  %v21274_v17 = vmax.f32 %v7200_v61, 0.0  ;;  %15562 = vmatprep.subr.bf16.mxu0 %v17054_v52  ;;  %v24296_v13 = vld [vmem:[#allocation97_spill] sm:$0xff]  ;;  %v24298_v61 = vld [vmem:[#allocation58_spill] sm:$0xff]  ;;  %v21318_v52 = vrot.slane %v21206_v40, %v19457_v24 }
 0x635   :  { %15563 = vmatpush3.bf16.msra.mxu0 %v17055_v57 }
 0x636   :  { %v6362_v62 = vadd.f32 %v24289_v45, %v5404_v16  ;;  %v7126_v10 = vadd.f32 %v24290_v20, %v6359_v8  ;;  %v7302_v59 = vpack.c.bf16 %v21274_v17, %v7257_v51  ;;  %v24297_v45 = vld [vmem:[#allocation98_spill] sm:$0xff] }
 0x638   :  { %v7129_v58 = vadd.f32 %v24291_v14, %v6362_v62  ;;  %v7203_v22 = vadd.f32 %v21189_v25, %v7126_v10  ;;  %v24299_v10 = vld [vmem:[#allocation70_spill] sm:$0xff] }
 0x639   :  { %v5340_v28 = vpop.f32.mrb[148].mxu1 }
 0x63a   :  { %v5342_v55 = vpop.f32.mrb[149].mxu1  ;;  %v7206_v4 = vadd.f32 %v21189_v25, %v7129_v58  ;;  %v5407_v6 = vadd.f32 %v5340_v28, %v21127_v30  ;;  %v7263_v46 = vmax.f32 %v7203_v22, 0.0 }
 0x63b   :  { %v5343_v53 = vpop.f32.mrb[150].mxu1  ;;  %v24300_v55 = vld [vmem:[#allocation99_spill] sm:$0xff] }
 0x63c   :  { %v5345_v15 = vpop.f32.mrb[151].mxu1  ;;  %v21280_v7 = vmax.f32 %v7206_v4, 0.0  ;;  %v5410_v54 = vadd.f32 %v5343_v53, %v21130_v34  ;;  %v6365_v19 = vadd.f32 %v24292_v0, %v5407_v6  ;;  %v24301_v0 = vld [vmem:[#allocation100_spill] sm:$0xff] }
 0x63e   :  { %v7305_v56 = vpack.c.bf16 %v21280_v7, %v7263_v46  ;;  %v6368_v36 = vadd.f32 %v24293_v60, %v5410_v54  ;;  %v7132_v29 = vadd.f32 %v24294_v31, %v6365_v19 }
 0x640   :  { %v7135_v50 = vadd.f32 %v24295_v35, %v6368_v36  ;;  %v7209_v34 = vadd.f32 %v21189_v25, %v7132_v29  ;;  %v21332_v35 = vrot.slane %v7305_v56, %v19457_v24 }
 0x641   :  { %v5348_v2 = vpop.f32.mrb[152].mxu1 }
 0x642   :  { %v5350_v9 = vpop.f32.mrb[153].mxu1  ;;  %v7212_v26 = vadd.f32 %v21189_v25, %v7135_v50  ;;  %v5413_v47 = vadd.f32 %v5348_v2, %v21136_v41  ;;  %v7269_v42 = vmax.f32 %v7209_v34, 0.0  ;;  %v21313_v2 = vrot.slane %v21223_v44, %v19457_v24 }
 0x643   :  { %v5351_v16 = vpop.f32.mrb[154].mxu1 }
 0x644   :  { %v5353_v30 = vpop.f32.mrb[155].mxu1  ;;  %v5416_v27 = vadd.f32 %v5351_v16, %v21139_v21  ;;  %v7272_v63 = vmax.f32 %v7212_v26, 0.0  ;;  %v6371_v8 = vadd.f32 %v24296_v13, %v5413_v47  ;;  %v15060_v44 = vcombine.high %v21313_v2, %v21313_v2  ;;  %v17056_v47 = vld [vmem:[#allocation9 + $0xe8] sm:$0xff]  }
 0x645   :  { %15564 = vmatprep.subr.bf16.mxu0 %v17056_v47 }
 0x646   :  { %v6374_v62 = vadd.f32 %v24297_v45, %v5416_v27  ;;  %v21295_v5 = vpack.c.bf16 %v7272_v63, %v7269_v42  ;;  %v7138_v20 = vadd.f32 %v24298_v61, %v6371_v8  ;;  %v7806_v26 = vrot.slane %v15060_v44, %v19457_v24  ;;  %v17057_v27 = vld [vmem:[#allocation9 + $0xa8] sm:$0xff]   ;;  %v17059_v44 = vld [vmem:[#allocation9 + $0xb0] sm:$0xff]  }
 0x647   :  { %15565 = vmatpush3.bf16.msra.mxu0 %v17057_v27 }
 0x648   :  { %v7141_v51 = vadd.f32 %v24299_v10, %v6374_v62  ;;  %v7215_v41 = vadd.f32 %v21189_v25, %v7138_v20  ;;  %v21369_v20 = vunpack.c.l.b16 %v7806_v26 }
 0x649   :  { %v5356_v14 = vpop.f32.mrb[156].mxu1 }
 0x64a   :  { %v5419_v58 = vadd.f32 %v5356_v14, %v21145_v49  ;;  %v5358_v28 = vpop.f32.mrb[157].mxu1  ;;  %v7218_v21 = vadd.f32 %v21189_v25, %v7141_v51  ;;  %v7275_v6 = vmax.f32 %v7215_v41, 0.0  ;;  %v15037_v49 = vpack.c.bf16 %v21234_v43, %v21234_v43 }
 0x64b   :  { %v5359_v22 = vpop.f32.mrb[158].mxu1  ;;  %v15040_v43 = vpack.c.bf16 %v21243_v3, %v21243_v3  ;;  %v15034_v3 = vpack.c.bf16 %v21217_v37, %v21217_v37  ;;  %v15064_v37 = vcombine.high %v21332_v35, %v21332_v35 }
 0x64c   :  { %v6377_v4 = vadd.f32 %v24300_v55, %v5419_v58  ;;  %v5422_v53 = vadd.f32 %v5359_v22, %v21148_v1  ;;  %v5361_v15 = vpop.f32.mrb[159].mxu1  ;;  %v7278_v46 = vmax.f32 %v7218_v21, 0.0  ;;  %v21324_v29 = vrot.slane %v15037_v49, %v19457_v24 }
 0x64d   :  { %v7870_v10 = vrot.slane %v15064_v37, %v19457_v24  ;;  %v15049_v58 = vpack.c.bf16 %v21280_v7, %v21280_v7  ;;  %v21403_v49 = vrot.slane %v21264_v48, %v19457_v24 }
 0x64e   :  { %v7144_v54 = vadd.f32 %v20992_v33, %v6377_v4  ;;  %v6380_v19 = vadd.f32 %v24301_v0, %v5422_v53  ;;  %v21308_v60 = vpack.c.bf16 %v7278_v46, %v7275_v6  ;;  %v15052_v33 = vpack.c.bf16 %v7272_v63, %v7272_v63 }
 0x64f   :  { %v15055_v31 = vpack.c.bf16 %v7278_v46, %v7278_v46  ;;  %v15061_v30 = vcombine.low %v21324_v29, %v21324_v29  ;;  %v21359_v63 = vrot.slane %v15034_v3, %v19457_v24  ;;  %v15151_v4 = vcombine.high %v21318_v52, %v21318_v52 }
 0x650   :  { %v7147_v36 = vadd.f32 %v21003_v38, %v6380_v19  ;;  %v7221_v1 = vadd.f32 %v21189_v25, %v7144_v54  ;;  %v21327_v38 = vrot.slane %v7302_v59, %v19457_v24  ;;  %v21341_v9 = vrot.slane %v15052_v33, %v19457_v24 }
 0x651   :  { %v21344_v59 = vrot.slane %v15040_v43, %v19457_v24  ;;  %v21347_v16 = vrot.slane %v15055_v31, %v19457_v24  ;;  %v7822_v62 = vrot.slane %v15061_v30, %v19457_v24  ;;  %v15152_v14 = vcombine.low %v21359_v63, %v21359_v63  ;;  %v17058_v31 = vld [vmem:[#allocation9 + $0xf0] sm:$0xff]  }
 0x652   :  { %v7224_v57 = vadd.f32 %v21189_v25, %v7147_v36  ;;  %v7281_v40 = vmax.f32 %v7221_v1, 0.0  ;;  %v15059_v25 = vcombine.low %v21318_v52, %v21318_v52  ;;  %v15063_v34 = vcombine.low %v21327_v38, %v21327_v38  ;;  %15566 = vmatprep.subr.bf16.mxu0 %v17058_v31 }
 0x653   :  { %v15065_v13 = vcombine.low %v21341_v9, %v21341_v9  ;;  %v15062_v8 = vcombine.high %v21344_v59, %v21344_v59  ;;  %v15066_v45 = vcombine.high %v21347_v16, %v21347_v16  ;;  %v21381_v22 = vunpack.c.l.b16 %v7822_v62  ;;  %15567 = vmatpush3.bf16.msra.mxu0 %v17059_v44 }
 0x654   :  { %v21334_v50 = vmax.f32 %v7224_v57, 0.0  ;;  %v7790_v42 = vrot.slane %v15059_v25, %v19457_v24  ;;  %v7854_v61 = vrot.slane %v15063_v34, %v19457_v24  ;;  %v8797_v53 = vrot.slane %v21369_v20, 2 }
 0x655   :  { %v7886_v28 = vrot.slane %v15065_v13, %v19457_v24  ;;  %v7838_v41 = vrot.slane %v15062_v8, %v19457_v24  ;;  %v7902_v21 = vrot.slane %v15066_v45, %v19457_v24  ;;  %v21388_v15 = vunpack.c.l.b16 %v7870_v10 }
 0x656   :  { %v7314_v56 = vpack.c.bf16 %v21334_v50, %v7281_v40  ;;  %v21372_v51 = vunpack.c.l.b16 %v7790_v42  ;;  %v21383_v55 = vunpack.c.l.b16 %v7854_v61  ;;  %v9090_v7 = vrot.slane %v15152_v14, %v19457_v24 }
 0x657   :  { %v21393_v46 = vrot.slane %v15049_v58, %v19457_v24  ;;  %v21395_v54 = vunpack.c.l.b16 %v7886_v28  ;;  %v21397_v0 = vunpack.c.l.b16 %v7838_v41  ;;  %v21399_v19 = vunpack.c.l.b16 %v7902_v21 }
 0x658   :  { %v8796_v6 = vrot.slane %v21372_v51, 3  ;;  %v21406_v36 = vrot.slane %v7314_v56, %v19457_v24  ;;  %v8799_v1 = vrot.slane %v21381_v22, 1  ;;  %v8802_v33 = vrot.slane %v21383_v55, 7 }
 0x659   :  { %v15153_v57 = vcombine.high %v21324_v29, %v21324_v29  ;;  %v15155_v43 = vcombine.high %v21327_v38, %v21327_v38  ;;  %v8804_v48 = vrot.slane %v21388_v15, 6  ;;  %v15156_v25 = vcombine.low %v21393_v46, %v21393_v46 }
 0x65a   :  { %v8798_v40 = vsel %vm7929_vm4, %v8797_v53, %v8796_v6  ;;  %v8806_v56 = vrot.slane %v21395_v54, 5  ;;  %v9074_v30 = vrot.slane %v15151_v4, %v19457_v24  ;;  %v15157_v34 = vcombine.high %v21341_v9, %v21341_v9 }
 0x65b   :  { %v8800_v3 = vsel %vm4522_vm14, %v8799_v1, %v8798_v40  ;;  %v8808_v37 = vrot.slane %v21399_v19, 4  ;;  %v15154_v47 = vcombine.low %v21403_v49, %v21403_v49  ;;  %v15158_v27 = vcombine.low %v21406_v36, %v21406_v36 }
 0x65c   :  { %v8801_v26 = vsel %vm7935_vm5, %v21397_v0, %v8800_v3  ;;  %v15031_v13 = vpack.c.bf16 %v21201_v32, %v21201_v32  ;;  %v9106_v8 = vrot.slane %v15153_v57, %v19457_v24  ;;  %v21435_v62 = vunpack.c.l.b16 %v9090_v7 }
 0x65d   :  { %v8803_v42 = vsel %vm4524_vm0, %v8802_v33, %v8801_v26  ;;  %v9138_v61 = vrot.slane %v15155_v43, %v19457_v24  ;;  %v9154_v10 = vrot.slane %v15156_v25, %v19457_v24  ;;  %v15046_v58 = vpack.c.bf16 %v21274_v17, %v21274_v17 }
 0x65e   :  { %v8805_v45 = vsel %vm7941_vm6, %v8804_v48, %v8803_v42  ;;  %24302 = vst [vmem:[#allocation64_spill] sm:$0xff] %v21435_v62  ;;  %v9170_v28 = vrot.slane %v15157_v34, %v19457_v24  ;;  %v21446_v32 = vunpack.c.l.b16 %v9074_v30  ;;  %v9122_v21 = vrot.slane %v15154_v47, %v19457_v24  ;;  %v17061_v30 = vld [vmem:[#allocation9 + $0xf8] sm:$0xff]   ;;  %v17062_v34 = vld [vmem:[#allocation9] sm:$0xff]  }
 0x65f   :  { %v8807_v14 = vsel %vm4526_vm2, %v8806_v56, %v8805_v45  ;;  %v9186_v4 = vrot.slane %v15158_v27, %v19457_v24  ;;  %v21450_v53 = vunpack.c.l.b16 %v9106_v8  ;;  %v21453_v6 = vrot.slane %v15031_v13, %v19457_v24  ;;  %v17060_v56 = vld [vmem:[#allocation9 + $0x40] sm:$0xff]   ;;  %v17063_v42 = vld [vmem:[#allocation9 + $0xb8] sm:$0xff]   ;;  %15568 = vmatprep.subr.bf16.mxu0 %v17061_v30 }
 0x660   :  { %v21444_v41 = vsel %vm7947_vm7, %v8808_v37, %v8807_v14  ;;  %24304 = vst [vmem:[#allocation66_spill] sm:$0xff] %v21446_v32  ;;  %v10117_v7 = vrot.slane %v21435_v62, 2  ;;  %v21456_v1 = vunpack.c.l.b16 %v9138_v61  ;;  %v21458_v17 = vunpack.c.l.b16 %v9154_v10  ;;  %15589 = vmatprep.subr.bf16.mxu1 %v17060_v56  ;;  %15569 = vmatpush3.bf16.msra.mxu0 %v17063_v42 }
 0x661   :  { %24303 = vst [vmem:[#allocation67_spill] sm:$0xff] %v21444_v41  ;;  %24305 = vst [vmem:[#allocation80_spill] sm:$0xff] %v21450_v53  ;;  %v21462_v33 = vrot.slane %v21248_v23, %v19457_v24  ;;  %v21465_v57 = vrot.slane %v15046_v58, %v19457_v24  ;;  %v21467_v43 = vunpack.c.l.b16 %v9170_v28  ;;  %v10116_v31 = vrot.slane %v21446_v32, 3  ;;  %15590 = vmatpush3.bf16.msra.mxu1 %v17062_v34 }
 0x662   :  { %24306 = vst [vmem:[#allocation76_spill] sm:$0xff] %v21456_v1  ;;  %24307 = vst [vmem:[#allocation79_spill] sm:$0xff] %v21458_v17  ;;  %v15244_v44 = vcombine.high %v21359_v63, %v21359_v63  ;;  %v21472_v40 = vunpack.c.l.b16 %v9122_v21  ;;  %v21474_v48 = vunpack.c.l.b16 %v9186_v4  ;;  %v21478_v25 = vrot.slane %v21308_v60, %v19457_v24 }
 0x663   :  { %24308 = vst [vmem:[#allocation74_spill] sm:$0xff] %v21467_v43  ;;  %v10119_v23 = vrot.slane %v21450_v53, 1  ;;  %v15243_v3 = vcombine.low %v21453_v6, %v21453_v6  ;;  %v10118_v26 = vsel %vm7929_vm4, %v10117_v7, %v10116_v31  ;;  %v10122_v37 = vrot.slane %v21456_v1, 7 }
 0x664   :  { %24309 = vst [vmem:[#allocation83_spill] sm:$0xff] %v21472_v40  ;;  %24310 = vst [vmem:[#allocation35_spill] sm:$0xff] %v21474_v48  ;;  %v10124_v47 = vrot.slane %v21458_v17, 6  ;;  %v15245_v27 = vcombine.low %v21462_v33, %v21462_v33  ;;  %v15247_v60 = vcombine.low %v21465_v57, %v21465_v57  ;;  %v10126_v8 = vrot.slane %v21467_v43, 5 }
 0x665   :  { %v10120_v13 = vsel %vm4522_vm14, %v10119_v23, %v10118_v26  ;;  %v10410_v45 = vrot.slane %v15244_v44, %v19457_v24  ;;  %v15248_v61 = vcombine.high %v21393_v46, %v21393_v46  ;;  %v10128_v14 = vrot.slane %v21474_v48, 4  ;;  %v17064_v26 = vld [vmem:[#allocation9 + $0x48] sm:$0xff]  }
 0x666   :  { %v10121_v10 = vsel %vm7935_vm5, %v21472_v40, %v10120_v13  ;;  %v15249_v58 = vcombine.low %v21478_v25, %v21478_v25  ;;  %v10394_v21 = vrot.slane %v15243_v3, %v19457_v24  ;;  %v15246_v4 = vcombine.high %v21403_v49, %v21403_v49  ;;  %15591 = vmatprep.subr.bf16.mxu1 %v17064_v26 }
 0x667   :  { %v10123_v28 = vsel %vm4524_vm0, %v10122_v37, %v10121_v10  ;;  %v15250_v7 = vcombine.high %v21406_v36, %v21406_v36  ;;  %v10426_v44 = vrot.slane %v15245_v27, %v19457_v24  ;;  %v10458_v23 = vrot.slane %v15247_v60, %v19457_v24 }
 0x668   :  { %v10125_v31 = vsel %vm7941_vm6, %v10124_v47, %v10123_v28  ;;  %v21510_v30 = vunpack.c.l.b16 %v10410_v45  ;;  %v10474_v34 = vrot.slane %v15248_v61, %v19457_v24  ;;  %v21518_v37 = vrot.slane %v21239_v18, %v19457_v24 }
 0x669   :  { %v10127_v56 = vsel %vm4526_vm2, %v10126_v8, %v10125_v31  ;;  %v10490_v47 = vrot.slane %v15249_v58, %v19457_v24  ;;  %v21521_v42 = vunpack.c.l.b16 %v10394_v21  ;;  %v10442_v27 = vrot.slane %v15246_v4, %v19457_v24 }
 0x66a   :  { %24311 = vst [vmem:[#allocation34_spill] sm:$0xff] %v21510_v30  ;;  %v21514_v3 = vsel %vm7947_vm7, %v10128_v14, %v10127_v56  ;;  %v10506_v60 = vrot.slane %v15250_v7, %v19457_v24  ;;  %v21525_v13 = vunpack.c.l.b16 %v10426_v44  ;;  %v15043_v8 = vpack.c.bf16 %v21258_v11, %v21258_v11  ;;  %v17065_v44 = vld [vmem:[#allocation9 + $0x100] sm:$0xff]  }
 0x66b   :  { %24312 = vst [vmem:[#allocation48_spill] sm:$0xff] %v21514_v3  ;;  %24313 = vst [vmem:[#allocation49_spill] sm:$0xff] %v21521_v42  ;;  %v21529_v45 = vunpack.c.l.b16 %v10458_v23  ;;  %v11437_v61 = vrot.slane %v21510_v30, 2  ;;  %v21532_v18 = vunpack.c.l.b16 %v10474_v34  ;;  %v15336_v10 = vcombine.low %v21518_v37, %v21518_v37  ;;  %v17067_v23 = vld [vmem:[#allocation9 + $0xc0] sm:$0xff]   ;;  %15570 = vmatprep.subr.bf16.mxu0 %v17065_v44 }
 0x66c   :  { %24314 = vst [vmem:[#allocation52_spill] sm:$0xff] %v21525_v13  ;;  %v21538_v14 = vrot.slane %v21295_v5, %v19457_v24  ;;  %v21540_v58 = vunpack.c.l.b16 %v10490_v47  ;;  %v11436_v28 = vrot.slane %v21521_v42, 3  ;;  %v21543_v21 = vunpack.c.l.b16 %v10442_v27  ;;  %v17066_v5 = vld [vmem:[#allocation9 + $0x8] sm:$0xff]   ;;  %15571 = vmatpush3.bf16.msra.mxu0 %v17067_v23 }
 0x66d   :  { %24315 = vst [vmem:[#allocation53_spill] sm:$0xff] %v21529_v45  ;;  %24316 = vst [vmem:[#allocation62_spill] sm:$0xff] %v21532_v18  ;;  %v15058_v11 = vpack.c.bf16 %v21334_v50, %v21334_v50  ;;  %v21547_v4 = vunpack.c.l.b16 %v10506_v60  ;;  %v15335_v7 = vcombine.high %v21453_v6, %v21453_v6  ;;  %v21552_v31 = vrot.slane %v15043_v8, %v19457_v24 }
 0x66e   :  { %24317 = vst [vmem:[#allocation63_spill] sm:$0xff] %v21540_v58  ;;  %24318 = vst [vmem:[#allocation68_spill] sm:$0xff] %v21543_v21  ;;  %v11439_v56 = vrot.slane %v21525_v13, 1  ;;  %v11442_v34 = vrot.slane %v21529_v45, 7  ;;  %v15337_v26 = vcombine.high %v21462_v33, %v21462_v33  ;;  %v15339_v50 = vcombine.high %v21465_v57, %v21465_v57  ;;  %15592 = vmatpush3.bf16.msra.mxu1 %v17066_v5 }
 0x66f   :  { %24319 = vst [vmem:[#allocation69_spill] sm:$0xff] %v21547_v4  ;;  %v11438_v47 = vsel %vm7929_vm4, %v11437_v61, %v11436_v28  ;;  %v11444_v27 = vrot.slane %v21532_v18, 6  ;;  %v11730_v60 = vrot.slane %v15336_v10, %v19457_v24  ;;  %v15340_v8 = vcombine.low %v21538_v14, %v21538_v14 }
 0x670   :  { %v11440_v3 = vsel %vm4522_vm14, %v11439_v56, %v11438_v47  ;;  %v11446_v42 = vrot.slane %v21540_v58, 5  ;;  %v15341_v45 = vcombine.high %v21478_v25, %v21478_v25  ;;  %v21570_v13 = vrot.slane %v15058_v11, %v19457_v24 }
 0x671   :  { %v11441_v61 = vsel %vm7935_vm5, %v21543_v21, %v11440_v3  ;;  %v11448_v10 = vrot.slane %v21547_v4, 4  ;;  %v11714_v28 = vrot.slane %v15335_v7, %v19457_v24  ;;  %v15338_v44 = vcombine.low %v21552_v31, %v21552_v31 }
 0x672   :  { %24320 = vst [vmem:[#allocation72_spill] sm:$0xff] %v21570_v13  ;;  %v11443_v5 = vsel %vm4524_vm0, %v11442_v34, %v11441_v61  ;;  %v11746_v56 = vrot.slane %v15337_v26, %v19457_v24  ;;  %v11778_v47 = vrot.slane %v15339_v50, %v19457_v24  ;;  %v21582_v58 = vunpack.c.l.b16 %v11730_v60 }
 0x673   :  { %v11445_v11 = vsel %vm7941_vm6, %v11444_v27, %v11443_v5  ;;  %v11794_v23 = vrot.slane %v15340_v8, %v19457_v24  ;;  %v11810_v4 = vrot.slane %v15341_v45, %v19457_v24  ;;  %v15342_v7 = vcombine.low %v21570_v13, %v21570_v13  ;;  %v17068_v45 = vld [vmem:[#allocation9 + $0x50] sm:$0xff]  }
 0x674   :  { %24321 = vst [vmem:[#allocation73_spill] sm:$0xff] %v21582_v58  ;;  %v11447_v3 = vsel %vm4526_vm2, %v11446_v42, %v11445_v11  ;;  %v21592_v34 = vunpack.c.l.b16 %v11714_v28  ;;  %v15428_v26 = vcombine.high %v21518_v37, %v21518_v37  ;;  %v11762_v50 = vrot.slane %v15338_v44, %v19457_v24  ;;  %v17069_v28 = vld [vmem:[#allocation9 + $0x108] sm:$0xff]   ;;  %v17070_v5 = vld [vmem:[#allocation9 + $0x10] sm:$0xff]   ;;  %15593 = vmatprep.subr.bf16.mxu1 %v17068_v45 }
 0x675   :  { %v21590_v18 = vsel %vm7947_vm7, %v11448_v10, %v11447_v3  ;;  %v15427_v27 = vcombine.low %v21313_v2, %v21313_v2  ;;  %v21599_v60 = vunpack.c.l.b16 %v11746_v56  ;;  %v21601_v42 = vunpack.c.l.b16 %v11778_v47  ;;  %v17071_v11 = vld [vmem:[#allocation9 + $0xc8] sm:$0xff]   ;;  %15572 = vmatprep.subr.bf16.mxu0 %v17069_v28  ;;  %15594 = vmatpush3.bf16.msra.mxu1 %v17070_v5 }
 0x676   :  { %24322 = vst [vmem:[#allocation77_spill] sm:$0xff] %v21590_v18  ;;  %24323 = vst [vmem:[#allocation78_spill] sm:$0xff] %v21592_v34  ;;  %v12757_v8 = vrot.slane %v21582_v58, 2  ;;  %v15429_v61 = vcombine.low %v21344_v59, %v21344_v59  ;;  %v21606_v10 = vunpack.c.l.b16 %v11794_v23  ;;  %v15431_v44 = vcombine.low %v21332_v35, %v21332_v35  ;;  %15573 = vmatpush3.bf16.msra.mxu0 %v17071_v11 }
 0x677   :  { %24324 = vst [vmem:[#allocation81_spill] sm:$0xff] %v21599_v60  ;;  %24325 = vst [vmem:[#allocation82_spill] sm:$0xff] %v21601_v42  ;;  %v21610_v3 = vunpack.c.l.b16 %v11810_v4  ;;  %v11826_v56 = vrot.slane %v15342_v7, %v19457_v24  ;;  %v12756_v47 = vrot.slane %v21592_v34, 3  ;;  %v13050_v18 = vrot.slane %v15428_v26, %v19457_v24 }
 0x678   :  { %24326 = vst [vmem:[#allocation85_spill] sm:$0xff] %v21606_v10  ;;  %v21615_v58 = vunpack.c.l.b16 %v11762_v50  ;;  %v15432_v23 = vcombine.high %v21538_v14, %v21538_v14  ;;  %v13034_v21 = vrot.slane %v15427_v27, %v19457_v24  ;;  %v12759_v4 = vrot.slane %v21599_v60, 1 }
 0x679   :  { %24327 = vst [vmem:[#allocation86_spill] sm:$0xff] %v21610_v3  ;;  %v12762_v30 = vrot.slane %v21601_v42, 7  ;;  %v13066_v7 = vrot.slane %v15429_v61, %v19457_v24  ;;  %v15430_v45 = vcombine.high %v21552_v31, %v21552_v31  ;;  %v12758_v26 = vsel %vm7929_vm4, %v12757_v8, %v12756_v47 }
 0x67a   :  { %24328 = vst [vmem:[#allocation27_spill] sm:$0xff] %v21615_v58  ;;  %v12764_v50 = vrot.slane %v21606_v10, 6  ;;  %v13098_v34 = vrot.slane %v15431_v44, %v19457_v24  ;;  %v21628_v28 = vunpack.c.l.b16 %v11826_v56  ;;  %v12760_v27 = vsel %vm4522_vm14, %v12759_v4, %v12758_v26  ;;  %v17072_v44 = vld [vmem:[#allocation9 + $0x58] sm:$0xff]   ;;  %v17073_v56 = vld [vmem:[#allocation9 + $0x110] sm:$0xff]  }
 0x67b   :  { %v12766_v5 = vrot.slane %v21610_v3, 5  ;;  %v21632_v11 = vunpack.c.l.b16 %v13050_v18  ;;  %v13114_v42 = vrot.slane %v15432_v23, %v19457_v24  ;;  %v12761_v61 = vsel %vm7935_vm5, %v21615_v58, %v12760_v27  ;;  %v17074_v10 = vld [vmem:[#allocation9 + $0x18] sm:$0xff]   ;;  %v17075_v3 = vld [vmem:[#allocation9 + $0xd0] sm:$0xff]   ;;  %15595 = vmatprep.subr.bf16.mxu1 %v17072_v44  ;;  %15574 = vmatprep.subr.bf16.mxu0 %v17073_v56 }
 0x67c   :  { %24329 = vst [vmem:[#allocation87_spill] sm:$0xff] %v21628_v28  ;;  %v12763_v60 = vsel %vm4524_vm0, %v12762_v30, %v12761_v61  ;;  %v21638_v8 = vunpack.c.l.b16 %v13034_v21  ;;  %v13082_v47 = vrot.slane %v15430_v45, %v19457_v24  ;;  %v21642_v26 = vunpack.c.l.b16 %v13066_v7  ;;  %15596 = vmatpush3.bf16.msra.mxu1 %v17074_v10  ;;  %15575 = vmatpush3.bf16.msra.mxu0 %v17075_v3 }
 0x67d   :  { %24330 = vst [vmem:[#allocation30_spill] sm:$0xff] %v21632_v11  ;;  %v12765_v4 = vsel %vm7941_vm6, %v12764_v50, %v12763_v60  ;;  %v21644_v18 = vunpack.c.l.b16 %v13098_v34  ;;  %v12768_v27 = vrot.slane %v21628_v28, 4  ;;  %v14077_v30 = vrot.slane %v21632_v11, 2  ;;  %v17076_v50 = vld [vmem:[#allocation9 + $0x60] sm:$0xff]  }
 0x67e   :  { %24331 = vst [vmem:[#allocation38_spill] sm:$0xff] %v21638_v8  ;;  %24332 = vst [vmem:[#allocation41_spill] sm:$0xff] %v21642_v26  ;;  %v12767_v23 = vsel %vm4526_vm2, %v12766_v5, %v12765_v4  ;;  %v21649_v21 = vunpack.c.l.b16 %v13114_v42  ;;  %v15433_v45 = vcombine.low %v21347_v16, %v21347_v16  ;;  %v14076_v34 = vrot.slane %v21638_v8, 3  ;;  %v17077_v5 = vld [vmem:[#allocation9 + $0x20] sm:$0xff]   ;;  %15597 = vmatprep.subr.bf16.mxu1 %v17076_v50  ;;  %v17079_v50 = vld [vmem:[#allocation9 + $0x28] sm:$0xff]  }
 0x67f   :  { %24333 = vst [vmem:[#allocation25_spill] sm:$0xff] %v21644_v18  ;;  %v21654_v60 = vsel %vm7947_vm7, %v12768_v27, %v12767_v23  ;;  %v21657_v7 = vunpack.c.l.b16 %v13082_v47  ;;  %v14079_v61 = vrot.slane %v21642_v26, 1  ;;  %v14082_v42 = vrot.slane %v21644_v18, 7  ;;  %v17082_v8 = vld [vmem:[#allocation9 + $0x70] sm:$0xff]  }
 0x680   :  { %24334 = vst [vmem:[#allocation28_spill] sm:$0xff] %v21649_v21  ;;  %24335 = vst [vmem:[#allocation46_spill] sm:$0xff] %v21654_v60  ;;  %v13130_v4 = vrot.slane %v15433_v45, %v19457_v24  ;;  %v14078_v44 = vsel %vm7929_vm4, %v14077_v30, %v14076_v34  ;;  %v14084_v10 = vrot.slane %v21649_v21, 6  ;;  %15598 = vmatpush3.bf16.msra.mxu1 %v17077_v5  ;;  %v7963_v56 = vrot.slane %v21372_v51, 1  ;;  %v17078_v34 = vld [vmem:[#allocation9 + $0x68] sm:$0xff]   ;;  %v17081_v21 = vld [vmem:[#allocation9 + $0xd8] sm:$0xff]  }
 0x681   :  { %24336 = vst [vmem:[#allocation32_spill] sm:$0xff] %v21657_v7  ;;  %v14080_v3 = vsel %vm4522_vm14, %v14079_v61, %v14078_v44  ;;  %v8505_v23 = vrot.slane %v21369_v20, 1  ;;  %v7965_v27 = vrot.slane %v21381_v22, 7  ;;  %v15434_v30 = vcombine.high %v21570_v13, %v21570_v13  ;;  %v17080_v61 = vld [vmem:[#allocation9 + $0x118] sm:$0xff]   ;;  %15599 = vmatprep.subr.bf16.mxu1 %v17078_v34 }
 0x682   :  { %v14081_v47 = vsel %vm7935_vm5, %v21657_v7, %v14080_v3  ;;  %v21671_v45 = vunpack.c.l.b16 %v13130_v4  ;;  %v7967_v5 = vrot.slane %v21397_v0, 6  ;;  %v8504_v3 = vrot.slane %v21372_v51, 2  ;;  %15576 = vmatprep.subr.bf16.mxu0 %v17080_v61 }
 0x683   :  { %v14083_v60 = vsel %vm4524_vm0, %v14082_v42, %v14081_v47  ;;  %v7969_v18 = vrot.slane %v21383_v55, 5  ;;  %v24338_v4 = vsub.s32 0, %v24260_v39  ;;  %v7964_v7 = vsel %vm7929_vm4, %v21369_v20, %v7963_v56  ;;  %15577 = vmatpush3.bf16.msra.mxu0 %v17081_v21  ;;  %v17083_v42 = vld [vmem:[#allocation9 + $0x30] sm:$0xff]   ;;  %v17084_v56 = vld [vmem:[#allocation9 + $0x78] sm:$0xff]  }
 0x684   :  { %24337 = vst [vmem:[#allocation31_spill] sm:$0xff] %v21671_v45  ;;  %v14085_v44 = vsel %vm7941_vm6, %v14084_v10, %v14083_v60  ;;  %v8508_v60 = vrot.slane %v21397_v0, 7  ;;  %v24339_v10 = vsub.s32 1, %v24260_v39  ;;  %15600 = vmatpush3.bf16.msra.mxu1 %v17079_v50  ;;  %v7966_v11 = vsel %vm4522_vm14, %v7965_v27, %v7964_v7  ;;  %v17085_v7 = vld [vmem:[#allocation9 + $0x38] sm:$0xff]  }
 0x685   :  { %v21683_v47 = vrot.slane %v21184_v12, %v24338_v4  ;;  %v7971_v4 = vrot.slane %v21388_v15, 4  ;;  %v8510_v34 = vrot.slane %v21383_v55, 6  ;;  %v13146_v61 = vrot.slane %v15434_v30, %v19457_v24  ;;  %15601 = vmatprep.subr.bf16.mxu1 %v17082_v8 }
 0x686   :  { %v21691_v26 = vrot.slane %v21184_v12, %v24339_v10  ;;  %v23817_v28 = vmov 0.0   ;;  %v7968_v39 = vsel %vm7935_vm5, %v7967_v5, %v7966_v11  ;;  %v8506_v12 = vsel %vm7929_vm4, %v8505_v23, %v8504_v3 }
 0x687   :  { %16120 = vmatprep.subr.bf16.mxu0 %v23817_v28  ;;  %v14086_v21 = vrot.slane %v21671_v45, 5  ;;  %v8213_v50 = vrot.slane %v21369_v20, 7  ;;  %v7970_v27 = vsel %vm4524_vm0, %v7969_v18, %v7968_v39  ;;  %v8507_v30 = vsel %vm4522_vm14, %v21381_v22, %v8506_v12 }
 0x688   :  { %v7973_v10 = vrot.slane %v21395_v54, 3  ;;  %v8509_v28 = vsel %vm7935_vm5, %v8508_v60, %v8507_v30  ;;  %v8512_v11 = vrot.slane %v21388_v15, 5  ;;  %15602 = vmatpush3.bf16.msra.mxu1 %v17083_v42  ;;  %v7972_v18 = vsel %vm7941_vm6, %v7971_v4, %v7970_v27 }
 0x689   :  { %v14087_v23 = vsel %vm4526_vm2, %v14086_v21, %v14085_v44  ;;  %v8511_v39 = vsel %vm4524_vm0, %v8510_v34, %v8509_v28  ;;  %v21714_v12 = vunpack.c.l.b16 %v13146_v61  ;;  %15603 = vmatprep.subr.bf16.mxu1 %v17084_v56  ;;  %v8514_v30 = vrot.slane %v21395_v54, 4 }
 0x68a   :  { %v8215_v44 = vrot.slane %v21381_v22, 6  ;;  %v7975_v42 = vrot.slane %v21399_v19, 2  ;;  %v8516_v4 = vrot.slane %v21399_v19, 3  ;;  %v7974_v34 = vsel %vm4526_vm2, %v7973_v10, %v7972_v18 }
 0x68b   :  { %24340 = vst [vmem:[#allocation37_spill] sm:$0xff] %v21714_v12  ;;  %v8513_v61 = vsel %vm7941_vm6, %v8512_v11, %v8511_v39  ;;  %v8214_v22 = vsel %vm7929_vm4, %v8213_v50, %v21372_v51  ;;  %v24341_v13 = vmov 0.0   ;;  %v8223_v18 = vrot.slane %v21395_v54, 2 }
 0x68c   :  { %15604 = vmatpush3.bf16.msra.mxu1 %v17085_v7  ;;  %v21733_v10 = vsel %vm7947_vm7, %v7975_v42, %v7974_v34  ;;  %v8216_v51 = vsel %vm4522_vm14, %v8215_v44, %v8214_v22  ;;  %v8225_v42 = vrot.slane %v21399_v19, 1  ;;  %v9242_v44 = vrot.slane %v21450_v53, 6 }
 0x68d   :  { %16144 = vmatprep.subr.bf16.mxu1 %v24341_v13  ;;  %24342 = vst [vmem:[#allocation24_spill] sm:$0xff] %v21733_v10  ;;  %v9244_v54 = vrot.slane %v21472_v40, 5 }
 0x6a1   :  { %v6876_v8 = vpop.f32.mrb[0].mxu1 }
 0x6a2   :  { %v7165_v20 = vadd.f32 %v21683_v47, %v6876_v8  ;;  %v6878_v3 = vpop.f32.mrb[1].mxu1 }
 0x6a3   :  { %v7166_v45 = vadd.f32 %v21691_v26, %v6878_v3  ;;  %v6880_v60 = vpop.f32.mrb[2].mxu1  ;;  %v8219_v3 = vrot.slane %v21383_v55, 4 }
 0x6a4   :  { %v7225_v21 = vmax.f32 %v7165_v20, 0.0  ;;  %v7168_v8 = vadd.f32 %v21683_v47, %v6880_v60  ;;  %v6882_v5 = vpop.f32.mrb[3].mxu1  ;;  %v8217_v20 = vrot.slane %v21397_v0, 5  ;;  %v8221_v0 = vrot.slane %v21388_v15, 3 }
 0x6a5   :  { %v7226_v27 = vmax.f32 %v7166_v45, 0.0  ;;  %v7169_v28 = vadd.f32 %v21691_v26, %v6882_v5  ;;  %v8515_v45 = vsel %vm4526_vm2, %v8514_v30, %v8513_v61  ;;  %v14088_v5 = vrot.slane %v21714_v12, 4 }
 0x6a6   :  { %v7228_v56 = vmax.f32 %v7168_v8, 0.0  ;;  %v21736_v7 = vsel %vm7947_vm7, %v8516_v4, %v8515_v45  ;;  %v8218_v8 = vsel %vm7935_vm5, %v8217_v20, %v8216_v51  ;;  %v24345_v61 = vrot.slane %v21435_v62, 7 }
 0x6a7   :  { %v15029_v60 = vpack.c.bf16 %v7226_v27, %v7225_v21  ;;  %v7229_v58 = vmax.f32 %v7169_v28, 0.0  ;;  %24343 = vst [vmem:[#allocation47_spill] sm:$0xff] %v21736_v7  ;;  %v21743_v39 = vsel %vm7947_vm7, %v14088_v5, %v14087_v23  ;;  %v8220_v27 = vsel %vm4524_vm0, %v8219_v3, %v8218_v8 }
 0x6a8   :  { %24344 = vst [vmem:[#allocation56_spill] sm:$0xff] %v21743_v39  ;;  %v9241_v19 = vsel %vm7929_vm4, %v24345_v61, %v21446_v32  ;;  %v8222_v20 = vsel %vm7941_vm6, %v8221_v0, %v8220_v27  ;;  %v9250_v3 = vrot.slane %v21467_v43, 2 }
 0x6a9   :  { %v7354_v55 = vrot.slane %v15029_v60, %v19457_v24  ;;  %v15030_v50 = vpack.c.bf16 %v7229_v58, %v7228_v56  ;;  %v6886_v11 = vpop.f32.mrb[4].mxu1  ;;  %v9246_v56 = vrot.slane %v21456_v1, 4  ;;  %v9248_v60 = vrot.slane %v21458_v17, 3 }
 0x6aa   :  { %v7171_v30 = vadd.f32 %v21683_v47, %v6886_v11  ;;  %v6888_v21 = vpop.f32.mrb[5].mxu1  ;;  %v9243_v51 = vsel %vm4522_vm14, %v9242_v44, %v9241_v19  ;;  %v8224_v11 = vsel %vm4526_vm2, %v8223_v18, %v8222_v20 }
 0x6ab   :  { %v7376_v15 = vcombine.low %v7354_v55, %v21318_v52  ;;  %v7172_v4 = vadd.f32 %v21691_v26, %v6888_v21  ;;  %v6890_v58 = vpop.f32.mrb[6].mxu1  ;;  %v7377_v23 = vcombine.high %v7354_v55, %v21318_v52  ;;  %v7361_v22 = vrot.slane %v15030_v50, %v19457_v24 }
 0x6ac   :  { %v7231_v28 = vmax.f32 %v7171_v30, 0.0  ;;  %v6892_v34 = vpop.f32.mrb[7].mxu1  ;;  %v7174_v52 = vadd.f32 %v21683_v47, %v6890_v58  ;;  %v9245_v30 = vsel %vm7935_vm5, %v9244_v54, %v9243_v51  ;;  %v9252_v50 = vrot.slane %v21474_v48, 1 }
 0x6ad   :  { %v7232_v45 = vmax.f32 %v7172_v4, 0.0  ;;  %v7175_v5 = vadd.f32 %v21691_v26, %v6892_v34  ;;  %v7783_v55 = vrot.slane %v7376_v15, %v19457_v24  ;;  %v9067_v0 = vrot.slane %v7377_v23, %v19457_v24 }
 0x6ae   :  { %v21772_v8 = vsel %vm7947_vm7, %v8225_v42, %v8224_v11  ;;  %v9247_v4 = vsel %vm4524_vm0, %v9246_v56, %v9245_v30  ;;  %v7378_v58 = vcombine.low %v7361_v22, %v21453_v6  ;;  %v7234_v54 = vmax.f32 %v7174_v52, 0.0 }
 0x6af   :  { %v15032_v21 = vpack.c.bf16 %v7232_v45, %v7231_v28  ;;  %24346 = vst [vmem:[#allocation42_spill] sm:$0xff] %v21772_v8  ;;  %v9249_v15 = vsel %vm7941_vm6, %v9248_v60, %v9247_v4  ;;  %v7235_v34 = vmax.f32 %v7175_v5, 0.0  ;;  %v9828_v42 = vrot.slane %v21472_v40, 7 }
 0x6b0   :  { %v9251_v28 = vsel %vm4526_vm2, %v9250_v3, %v9249_v15  ;;  %v7791_v61 = vcombine.high %v7783_v55, %v7783_v55  ;;  %v9830_v45 = vrot.slane %v21456_v1, 6  ;;  %v21789_v51 = vunpack.c.l.b16 %v7783_v55 }
 0x6b1   :  { %v6896_v27 = vpop.f32.mrb[8].mxu1  ;;  %v21786_v20 = vsel %vm7947_vm7, %v9252_v50, %v9251_v28  ;;  %v9075_v60 = vcombine.high %v9067_v0, %v9067_v0  ;;  %v7379_v52 = vcombine.high %v7361_v22, %v21453_v6  ;;  %v24348_v3 = vrot.slane %v21446_v32, 2 }
 0x6b2   :  { %v6898_v23 = vpop.f32.mrb[9].mxu1  ;;  %24347 = vst [vmem:[#allocation57_spill] sm:$0xff] %v21786_v20  ;;  %v24349_v11 = vrot.slane %v21435_v62, 1  ;;  %v21797_v4 = vunpack.c.l.b16 %v9067_v0  ;;  %v10387_v15 = vrot.slane %v7378_v58, %v19457_v24  ;;  %v7389_v50 = vrot.slane %v15032_v21, %v19457_v24 }
 0x6b3   :  { %v6900_v19 = vpop.f32.mrb[10].mxu1  ;;  %v15033_v28 = vpack.c.bf16 %v7235_v34, %v7234_v54  ;;  %v21807_v18 = vunpack.c.l.b16 %v7791_v61  ;;  %v21817_v34 = vunpack.c.l.b16 %v9075_v60  ;;  %v7177_v21 = vadd.f32 %v21683_v47, %v6896_v27 }
 0x6b4   :  { %v6902_v5 = vpop.f32.mrb[11].mxu1  ;;  %v9826_v30 = vsel %vm7929_vm4, %v24349_v11, %v24348_v3  ;;  %24350 = vst [vmem:[#allocation45_spill] sm:$0xff] %v21797_v4  ;;  %v7928_v3 = vrot.slane %v21789_v51, 1  ;;  %v9504_v61 = vrot.slane %v21797_v4, 1  ;;  %v7178_v0 = vadd.f32 %v21691_v26, %v6898_v23 }
 0x6b5   :  { %v9827_v55 = vsel %vm4522_vm14, %v21450_v53, %v9826_v30  ;;  %v10395_v30 = vcombine.high %v10387_v15, %v10387_v15  ;;  %v7411_v44 = vcombine.low %v7389_v50, %v21313_v2  ;;  %v21836_v27 = vunpack.c.l.b16 %v10387_v15 }
 0x6b6   :  { %v9829_v22 = vsel %vm7935_vm5, %v9828_v42, %v9827_v55  ;;  %v11707_v42 = vrot.slane %v7379_v52, %v19457_v24  ;;  %v7412_v55 = vcombine.high %v7389_v50, %v21313_v2  ;;  %v7180_v2 = vadd.f32 %v21683_v47, %v6900_v19 }
 0x6b7   :  { %v21812_v58 = vsel %vm4524_vm0, %v9830_v45, %v9829_v22  ;;  %v7396_v22 = vrot.slane %v15033_v28, %v19457_v24  ;;  %24352 = vst [vmem:[#allocation43_spill] sm:$0xff] %v21836_v27  ;;  %v21841_v12 = vunpack.c.l.b16 %v10395_v30  ;;  %v7237_v39 = vmax.f32 %v7177_v21, 0.0 }
 0x6b8   :  { %24351 = vst [vmem:[#allocation40_spill] sm:$0xff] %v21812_v58  ;;  %v7799_v54 = vrot.slane %v7412_v55, %v19457_v24  ;;  %v7238_v45 = vmax.f32 %v7178_v0, 0.0  ;;  %v13027_v6 = vrot.slane %v7411_v44, %v19457_v24  ;;  %v7181_v30 = vadd.f32 %v21691_v26, %v6902_v5 }
 0x6b9   :  { %v6906_v56 = vpop.f32.mrb[12].mxu1  ;;  %24353 = vst [vmem:[#allocation36_spill] sm:$0xff] %v21841_v12  ;;  %v7413_v50 = vcombine.low %v7396_v22, %v21359_v63  ;;  %v7414_v55 = vcombine.high %v7396_v22, %v21359_v63  ;;  %v10824_v19 = vrot.slane %v21836_v27, 1  ;;  %v11715_v1 = vcombine.high %v11707_v42, %v11707_v42 }
 0x6ba   :  { %v6908_v60 = vpop.f32.mrb[13].mxu1  ;;  %v21843_v52 = vunpack.c.l.b16 %v7799_v54  ;;  %v21857_v40 = vunpack.c.l.b16 %v11707_v42  ;;  %v15035_v62 = vpack.c.bf16 %v7238_v45, %v7237_v39  ;;  %v7240_v42 = vmax.f32 %v7180_v2, 0.0 }
 0x6bb   :  { %v21831_v11 = vpop.f32.mrb[14].mxu1  ;;  %v21867_v5 = vrot.slane %v7413_v50, %v19457_v24  ;;  %v21870_v22 = vrot.slane %v7414_v55, %v19457_v24  ;;  %v13035_v53 = vcombine.high %v13027_v6, %v13027_v6  ;;  %v7241_v0 = vmax.f32 %v7181_v30, 0.0 }
 0x6bc   :  { %v21838_v23 = vpop.f32.mrb[15].mxu1  ;;  %v21850_v15 = vsel %vm7929_vm4, %v21843_v52, %v7928_v3  ;;  %v8185_v28 = vrot.slane %v21843_v52, 7  ;;  %24354 = vst [vmem:[#allocation59_spill] sm:$0xff] %v21857_v40  ;;  %v7183_v3 = vadd.f32 %v21683_v47, %v6906_v56  ;;  %v7184_v43 = vadd.f32 %v21691_v26, %v6908_v60 }
 0x6bd   :  { %v21877_v17 = vunpack.c.l.b16 %v11715_v1  ;;  %v21880_v50 = vunpack.c.l.b16 %v21867_v5  ;;  %v21883_v55 = vunpack.c.l.b16 %v21870_v22  ;;  %v7807_v2 = vcombine.high %v7799_v54, %v7799_v54 }
 0x6be   :  { %v21863_v21 = vsel %vm7929_vm4, %v8185_v28, %v21789_v51  ;;  %v21888_v30 = vunpack.c.l.b16 %v13027_v6  ;;  %v15036_v60 = vpack.c.bf16 %v7241_v0, %v7240_v42  ;;  %v7424_v1 = vrot.slane %v15035_v62, %v19457_v24 }
 0x6bf   :  { %24355 = vst [vmem:[#allocation54_spill] sm:$0xff] %v21877_v17  ;;  %24356 = vst [vmem:[#allocation84_spill] sm:$0xff] %v21880_v50  ;;  %v21892_v63 = vsel %vm7929_vm4, %v21880_v50, %v9504_v61  ;;  %v7243_v56 = vmax.f32 %v7183_v3, 0.0  ;;  %v7244_v58 = vmax.f32 %v7184_v43, 0.0  ;;  %v12144_v48 = vrot.slane %v21857_v40, 1 }
 0x6c0   :  { %24357 = vst [vmem:[#allocation101_spill] sm:$0xff] %v21883_v55  ;;  %24358 = vst [vmem:[#allocation39_spill] sm:$0xff] %v21888_v30  ;;  %v21897_v20 = vunpack.c.l.b16 %v13035_v53  ;;  %v21901_v54 = vsel %vm7929_vm4, %v21883_v55, %v10824_v19  ;;  %v21907_v3 = vunpack.c.l.b16 %v7807_v2  ;;  %v13464_v43 = vrot.slane %v21888_v30, 1 }
 0x6c1   :  { %v6916_v44 = vpop.f32.mrb[16].mxu1  ;;  %24359 = vst [vmem:[#allocation51_spill] sm:$0xff] %v21892_v63  ;;  %24361 = vst [vmem:[#allocation102_spill] sm:$0xff] %v21901_v54  ;;  %v7446_v19 = vcombine.low %v7424_v1, %v21518_v37  ;;  %v7447_v6 = vcombine.high %v7424_v1, %v21518_v37  ;;  %v7431_v0 = vrot.slane %v15036_v60, %v19457_v24 }
 0x6c2   :  { %v6918_v32 = vpop.f32.mrb[17].mxu1  ;;  %24360 = vst [vmem:[#allocation65_spill] sm:$0xff] %v21897_v20  ;;  %v15038_v45 = vpack.c.bf16 %v7244_v58, %v7243_v56  ;;  %v7186_v42 = vadd.f32 %v21683_v47, %v21831_v11  ;;  %v9091_v37 = vcombine.high %v21867_v5, %v21867_v5  ;;  %v7187_v40 = vadd.f32 %v21691_v26, %v21838_v23 }
 0x6c3   :  { %v21874_v28 = vpop.f32.mrb[18].mxu1  ;;  %v11723_v58 = vrot.slane %v7446_v19, %v19457_v24  ;;  %v13043_v56 = vrot.slane %v7447_v6, %v19457_v24  ;;  %v7189_v11 = vadd.f32 %v21683_v47, %v6916_v44  ;;  %v7190_v2 = vadd.f32 %v21691_v26, %v6918_v32 }
 0x6c4   :  { %v21885_v39 = vpop.f32.mrb[19].mxu1  ;;  %v10411_v30 = vcombine.high %v21870_v22, %v21870_v22  ;;  %v7448_v6 = vcombine.low %v7431_v0, %v21324_v29  ;;  %v7246_v23 = vmax.f32 %v7186_v42, 0.0  ;;  %v21948_v17 = vunpack.c.l.b16 %v9091_v37 }
 0x6c5   :  { %v21940_v62 = vunpack.c.l.b16 %v11723_v58  ;;  %v21942_v5 = vunpack.c.l.b16 %v13043_v56  ;;  %v7449_v44 = vcombine.high %v7431_v0, %v21324_v29  ;;  %v7459_v22 = vrot.slane %v15038_v45, %v19457_v24 }
 0x6c6   :  { %v7247_v19 = vmax.f32 %v7187_v40, 0.0  ;;  %v7249_v54 = vmax.f32 %v7189_v11, 0.0  ;;  %v7250_v1 = vmax.f32 %v7190_v2, 0.0  ;;  %v21963_v37 = vunpack.c.l.b16 %v10411_v30 }
 0x6c7   :  { %24362 = vst [vmem:[#allocation88_spill] sm:$0xff] %v21940_v62  ;;  %24363 = vst [vmem:[#allocation26_spill] sm:$0xff] %v21942_v5  ;;  %v21952_v32 = vsel %vm7929_vm4, %v21940_v62, %v12144_v48  ;;  %v21958_v27 = vsel %vm7929_vm4, %v21942_v5, %v13464_v43  ;;  %v11731_v20 = vcombine.high %v11723_v58, %v11723_v58 }
 0x6c8   :  { %24364 = vst [vmem:[#allocation33_spill] sm:$0xff] %v21952_v32  ;;  %24365 = vst [vmem:[#allocation29_spill] sm:$0xff] %v21958_v27  ;;  %v7815_v48 = vrot.slane %v7448_v6, %v19457_v24  ;;  %v13051_v40 = vcombine.high %v13043_v56, %v13043_v56  ;;  %v9099_v30 = vrot.slane %v7449_v44, %v19457_v24 }
 0x6c9   :  { %v21912_v41 = vpop.f32.mrb[20].mxu1  ;;  %24366 = vst [vmem:[#allocation103_spill] sm:$0xff] %v21963_v37  ;;  %v7481_v58 = vcombine.low %v7459_v22, %v21462_v33  ;;  %v15039_v45 = vpack.c.bf16 %v7247_v19, %v7246_v23  ;;  %v15041_v27 = vpack.c.bf16 %v7250_v1, %v7249_v54  ;;  %v21983_v8 = vunpack.c.l.b16 %v11731_v20 }
 0x6ca   :  { %v21917_v61 = vpop.f32.mrb[21].mxu1  ;;  %v7823_v2 = vcombine.high %v7815_v48, %v7815_v48  ;;  %v21987_v50 = vunpack.c.l.b16 %v13051_v40  ;;  %v21991_v42 = vadd.f32 %v21683_v47, %v21874_v28  ;;  %v9107_v54 = vcombine.high %v9099_v30, %v9099_v30 }
 0x6cb   :  { %v21924_v53 = vpop.f32.mrb[22].mxu1  ;;  %24367 = vst [vmem:[#allocation44_spill] sm:$0xff] %v21983_v8  ;;  %v7482_v1 = vcombine.high %v7459_v22, %v21462_v33  ;;  %v10419_v23 = vrot.slane %v7481_v58, %v19457_v24  ;;  %v21999_v0 = vunpack.c.l.b16 %v7815_v48  ;;  %v22007_v56 = vunpack.c.l.b16 %v9099_v30 }
 0x6cc   :  { %v21931_v60 = vpop.f32.mrb[23].mxu1  ;;  %24368 = vst [vmem:[#allocation89_spill] sm:$0xff] %v21987_v50  ;;  %v22005_v19 = vunpack.c.l.b16 %v7823_v2  ;;  %v7466_v48 = vrot.slane %v15039_v45, %v19457_v24  ;;  %v22018_v28 = vunpack.c.l.b16 %v9107_v54  ;;  %v7193_v8 = vadd.f32 %v21691_v26, %v21885_v39 }
 0x6cd   :  { %24369 = vst [vmem:[#allocation104_spill] sm:$0xff] %v22007_v56  ;;  %v10427_v2 = vcombine.high %v10419_v23, %v10419_v23  ;;  %v11739_v30 = vrot.slane %v7482_v1, %v19457_v24  ;;  %v22033_v55 = vunpack.c.l.b16 %v10419_v23  ;;  %v7494_v5 = vrot.slane %v15041_v27, %v19457_v24 }
 0x6ce   :  { %v7483_v62 = vcombine.low %v7466_v48, %v21344_v59  ;;  %v7484_v29 = vcombine.high %v7466_v48, %v21344_v59  ;;  %v7252_v58 = vmax.f32 %v21991_v42, 0.0  ;;  %v7195_v50 = vadd.f32 %v21683_v47, %v21912_v41 }
 0x6cf   :  { %24370 = vst [vmem:[#allocation105_spill] sm:$0xff] %v22033_v55  ;;  %v22037_v22 = vunpack.c.l.b16 %v10427_v2  ;;  %v11747_v11 = vcombine.high %v11739_v30, %v11739_v30  ;;  %v22042_v45 = vunpack.c.l.b16 %v11739_v30  ;;  %v7253_v2 = vmax.f32 %v7193_v8, 0.0 }
 0x6d0   :  { %v13059_v59 = vrot.slane %v7483_v62, %v19457_v24  ;;  %v7196_v27 = vadd.f32 %v21691_v26, %v21917_v61  ;;  %v7831_v62 = vrot.slane %v7484_v29, %v19457_v24  ;;  %v7516_v61 = vcombine.low %v7494_v5, %v21403_v49 }
 0x6d1   :  { %v21960_v12 = vpop.f32.mrb[24].mxu1  ;;  %24371 = vst [vmem:[#allocation90_spill] sm:$0xff] %v22037_v22  ;;  %24372 = vst [vmem:[#allocation91_spill] sm:$0xff] %v22042_v45  ;;  %v22064_v41 = vunpack.c.l.b16 %v11747_v11  ;;  %v7517_v1 = vcombine.high %v7494_v5, %v21403_v49  ;;  %v15042_v7 = vpack.c.bf16 %v7253_v2, %v7252_v58  ;;  %v7255_v8 = vmax.f32 %v7195_v50, 0.0 }
 0x6d2   :  { %v21966_v32 = vpop.f32.mrb[25].mxu1  ;;  %v13067_v10 = vcombine.high %v13059_v59, %v13059_v59  ;;  %v7256_v42 = vmax.f32 %v7196_v27, 0.0  ;;  %v7198_v11 = vadd.f32 %v21683_v47, %v21924_v53  ;;  %v7199_v39 = vadd.f32 %v21691_v26, %v21931_v60 }
 0x6d3   :  { %v21971_v43 = vpop.f32.mrb[26].mxu1  ;;  %24373 = vst [vmem:[#allocation55_spill] sm:$0xff] %v22064_v41  ;;  %v7839_v22 = vcombine.high %v7831_v62, %v7831_v62  ;;  %v22082_v49 = vunpack.c.l.b16 %v13059_v59  ;;  %v9115_v50 = vrot.slane %v7516_v61, %v19457_v24  ;;  %v7501_v5 = vrot.slane %v15042_v7, %v19457_v24 }
 0x6d4   :  { %v21977_v6 = vpop.f32.mrb[27].mxu1  ;;  %v22088_v53 = vunpack.c.l.b16 %v7831_v62  ;;  %v15044_v60 = vpack.c.bf16 %v7256_v42, %v7255_v8  ;;  %v7258_v2 = vmax.f32 %v7198_v11, 0.0  ;;  %v7259_v27 = vmax.f32 %v7199_v39, 0.0 }
 0x6d5   :  { %24374 = vst [vmem:[#allocation106_spill] sm:$0xff] %v22082_v49  ;;  %v22092_v29 = vunpack.c.l.b16 %v13067_v10  ;;  %v10435_v55 = vrot.slane %v7517_v1, %v19457_v24  ;;  %v7518_v59 = vcombine.low %v7501_v5, %v21552_v31  ;;  %v7201_v61 = vadd.f32 %v21683_v47, %v21960_v12 }
 0x6d6   :  { %v15045_v7 = vpack.c.bf16 %v7259_v27, %v7258_v2  ;;  %v7202_v62 = vadd.f32 %v21691_v26, %v21966_v32  ;;  %v7204_v39 = vadd.f32 %v21683_v47, %v21971_v43  ;;  %v7205_v10 = vadd.f32 %v21691_v26, %v21977_v6 }
 0x6d7   :  { %24375 = vst [vmem:[#allocation75_spill] sm:$0xff] %v22092_v29  ;;  %v22108_v1 = vunpack.c.l.b16 %v7839_v22  ;;  %v7529_v11 = vrot.slane %v15044_v60, %v19457_v24  ;;  %v9123_v27 = vcombine.high %v9115_v50, %v9115_v50  ;;  %v7519_v43 = vcombine.high %v7501_v5, %v21552_v31 }
 0x6d8   :  { %v22117_v6 = vunpack.c.l.b16 %v9115_v50  ;;  %v10443_v41 = vcombine.high %v10435_v55, %v10435_v55  ;;  %v7261_v22 = vmax.f32 %v7201_v61, 0.0  ;;  %v11755_v56 = vrot.slane %v7518_v59, %v19457_v24 }
 0x6d9   :  { %v22001_v40 = vpop.f32.mrb[28].mxu1  ;;  %v7262_v42 = vmax.f32 %v7202_v62, 0.0  ;;  %v7264_v63 = vmax.f32 %v7204_v39, 0.0  ;;  %v7265_v12 = vmax.f32 %v7205_v10, 0.0  ;;  %v22122_v49 = vunpack.c.l.b16 %v10435_v55 }
 0x6da   :  { %v22009_v33 = vpop.f32.mrb[29].mxu1  ;;  %v7551_v32 = vcombine.low %v7529_v11, %v21327_v38  ;;  %v22126_v5 = vunpack.c.l.b16 %v9123_v27  ;;  %v13075_v50 = vrot.slane %v7519_v43, %v19457_v24  ;;  %v7552_v61 = vcombine.high %v7529_v11, %v21327_v38 }
 0x6db   :  { %v22015_v20 = vpop.f32.mrb[30].mxu1  ;;  %v7536_v10 = vrot.slane %v15045_v7, %v19457_v24  ;;  %v22134_v55 = vunpack.c.l.b16 %v10443_v41  ;;  %v11763_v60 = vcombine.high %v11755_v56, %v11755_v56  ;;  %v15047_v2 = vpack.c.bf16 %v7262_v42, %v7261_v22 }
 0x6dc   :  { %v22021_v44 = vpop.f32.mrb[31].mxu1  ;;  %v15048_v45 = vpack.c.bf16 %v7265_v12, %v7264_v63  ;;  %v22138_v43 = vunpack.c.l.b16 %v11755_v56  ;;  %v7847_v38 = vrot.slane %v7551_v32, %v19457_v24  ;;  %v13083_v59 = vcombine.high %v13075_v50, %v13075_v50 }
 0x6dd   :  { %v22142_v62 = vunpack.c.l.b16 %v13075_v50  ;;  %v9131_v7 = vrot.slane %v7552_v61, %v19457_v24  ;;  %v7553_v41 = vcombine.low %v7536_v10, %v21465_v57  ;;  %v7554_v42 = vcombine.high %v7536_v10, %v21465_v57 }
 0x6de   :  { %v7207_v63 = vadd.f32 %v21683_v47, %v22001_v40  ;;  %v7208_v56 = vadd.f32 %v21691_v26, %v22009_v33  ;;  %v22151_v12 = vunpack.c.l.b16 %v11763_v60  ;;  %v7564_v32 = vrot.slane %v15047_v2, %v19457_v24 }
 0x6df   :  { %24376 = vst [vmem:[#allocation92_spill] sm:$0xff] %v22142_v62  ;;  %v7210_v22 = vadd.f32 %v21683_v47, %v22015_v20  ;;  %v7211_v50 = vadd.f32 %v21691_v26, %v22021_v44  ;;  %v7855_v10 = vcombine.high %v7847_v38, %v7847_v38  ;;  %v7571_v40 = vrot.slane %v15048_v45, %v19457_v24 }
 0x6e0   :  { %24377 = vst [vmem:[#allocation107_spill] sm:$0xff] %v22151_v12  ;;  %v7267_v11 = vmax.f32 %v7207_v63, 0.0  ;;  %v7268_v27 = vmax.f32 %v7208_v56, 0.0  ;;  %v22162_v2 = vunpack.c.l.b16 %v7847_v38  ;;  %v9139_v39 = vcombine.high %v9131_v7, %v9131_v7 }
 0x6e1   :  { %v22046_v23 = vpop.f32.mrb[32].mxu1  ;;  %v7270_v33 = vmax.f32 %v7210_v22, 0.0  ;;  %v7271_v60 = vmax.f32 %v7211_v50, 0.0  ;;  %v10451_v20 = vrot.slane %v7553_v41, %v19457_v24  ;;  %v11771_v44 = vrot.slane %v7554_v42, %v19457_v24 }
 0x6e2   :  { %v22052_v37 = vpop.f32.mrb[33].mxu1  ;;  %v7587_v61 = vcombine.high %v7564_v32, %v21332_v35  ;;  %v15050_v29 = vpack.c.bf16 %v7268_v27, %v7267_v11  ;;  %v22167_v12 = vunpack.c.l.b16 %v13083_v59  ;;  %v7213_v63 = vadd.f32 %v21683_v47, %v22046_v23 }
 0x6e3   :  { %v22059_v48 = vpop.f32.mrb[34].mxu1  ;;  %v15051_v57 = vpack.c.bf16 %v7271_v60, %v7270_v33  ;;  %v7214_v38 = vadd.f32 %v21691_v26, %v22052_v37  ;;  %v22174_v56 = vunpack.c.l.b16 %v7855_v10  ;;  %v22176_v22 = vunpack.c.l.b16 %v9131_v7 }
 0x6e4   :  { %v22066_v54 = vpop.f32.mrb[35].mxu1  ;;  %24378 = vst [vmem:[#allocation108_spill] sm:$0xff] %v22167_v12  ;;  %v7586_v41 = vcombine.low %v7564_v32, %v21332_v35  ;;  %v7588_v42 = vcombine.low %v7571_v40, %v21393_v46  ;;  %v22182_v11 = vunpack.c.l.b16 %v9139_v39  ;;  %v10459_v50 = vcombine.high %v10451_v20, %v10451_v20 }
 0x6e5   :  { %v11779_v33 = vcombine.high %v11771_v44, %v11771_v44  ;;  %v7863_v23 = vrot.slane %v7587_v61, %v19457_v24  ;;  %v7589_v37 = vcombine.high %v7571_v40, %v21393_v46  ;;  %v7606_v10 = vrot.slane %v15051_v57, %v19457_v24 }
 0x6e6   :  { %v7273_v7 = vmax.f32 %v7213_v63, 0.0  ;;  %v7274_v60 = vmax.f32 %v7214_v38, 0.0  ;;  %v7216_v35 = vadd.f32 %v21683_v47, %v22059_v48  ;;  %v7217_v32 = vadd.f32 %v21691_v26, %v22066_v54 }
 0x6e7   :  { %v13091_v45 = vrot.slane %v7586_v41, %v19457_v24  ;;  %v9147_v39 = vrot.slane %v7588_v42, %v19457_v24  ;;  %v7599_v31 = vrot.slane %v15050_v29, %v19457_v24  ;;  %v7623_v61 = vcombine.low %v7606_v10, %v21341_v9 }
 0x6e8   :  { %v15053_v59 = vpack.c.bf16 %v7274_v60, %v7273_v7  ;;  %v7276_v46 = vmax.f32 %v7216_v35, 0.0  ;;  %v7277_v40 = vmax.f32 %v7217_v32, 0.0  ;;  %v22197_v63 = vunpack.c.l.b16 %v10451_v20 }
 0x6e9   :  { %v22086_v58 = vpop.f32.mrb[36].mxu1  ;;  %v22199_v48 = vunpack.c.l.b16 %v11771_v44  ;;  %v7871_v38 = vcombine.high %v7863_v23, %v7863_v23  ;;  %v10467_v54 = vrot.slane %v7589_v37, %v19457_v24  ;;  %v22202_v41 = vunpack.c.l.b16 %v10459_v50 }
 0x6ea   :  { %v22090_v30 = vpop.f32.mrb[37].mxu1  ;;  %v7219_v57 = vadd.f32 %v21683_v47, %v22086_v58  ;;  %v22204_v42 = vunpack.c.l.b16 %v7863_v23  ;;  %v15054_v29 = vpack.c.bf16 %v7277_v40, %v7276_v46  ;;  %v22208_v60 = vunpack.c.l.b16 %v11779_v33 }
 0x6eb   :  { %v22098_v4 = vpop.f32.mrb[38].mxu1  ;;  %24379 = vst [vmem:[#allocation93_spill] sm:$0xff] %v22199_v48  ;;  %v7220_v7 = vadd.f32 %v21691_v26, %v22090_v30  ;;  %v13099_v35 = vcombine.high %v13091_v45, %v13091_v45  ;;  %v22210_v32 = vunpack.c.l.b16 %v13091_v45  ;;  %v7621_v58 = vcombine.low %v7599_v31, %v21538_v14 }
 0x6ec   :  { %v22106_v8 = vpop.f32.mrb[39].mxu1  ;;  %v9155_v20 = vcombine.high %v9147_v39, %v9147_v39  ;;  %v22213_v44 = vunpack.c.l.b16 %v9147_v39  ;;  %v7879_v37 = vrot.slane %v7623_v61, %v19457_v24  ;;  %v7279_v50 = vmax.f32 %v7219_v57, 0.0 }
 0x6ed   :  { %24380 = vst [vmem:[#allocation94_spill] sm:$0xff] %v22210_v32  ;;  %v22216_v27 = vunpack.c.l.b16 %v7871_v38  ;;  %v10475_v23 = vcombine.high %v10467_v54, %v10467_v54  ;;  %v22218_v46 = vunpack.c.l.b16 %v10467_v54  ;;  %v7622_v30 = vcombine.high %v7599_v31, %v21538_v14 }
 0x6ee   :  { %v7634_v45 = vrot.slane %v15053_v59, %v19457_v24  ;;  %v22224_v40 = vrot.slane %v15054_v29, %v19457_v24  ;;  %v7280_v32 = vmax.f32 %v7220_v7, 0.0  ;;  %v11787_v39 = vrot.slane %v7621_v58, %v19457_v24 }
 0x6ef   :  { %v7624_v61 = vcombine.high %v7606_v10, %v21341_v9  ;;  %v7222_v57 = vadd.f32 %v21683_v47, %v22098_v4  ;;  %v7223_v38 = vadd.f32 %v21691_v26, %v22106_v8  ;;  %v7887_v54 = vcombine.high %v7879_v37, %v7879_v37 }
 0x6f0   :  { %v7659_v14 = vcombine.high %v22224_v40, %v21347_v16  ;;  %v15056_v31 = vpack.c.bf16 %v7280_v32, %v7279_v50  ;;  %v24381_v59 = vrot.slane %v21807_v18, 1  ;;  %v22239_v58 = vunpack.c.l.b16 %v13099_v35 }
 0x6f1   :  { %v22241_v9 = vunpack.c.l.b16 %v9155_v20  ;;  %v13107_v47 = vrot.slane %v7622_v30, %v19457_v24  ;;  %v22244_v4 = vunpack.c.l.b16 %v10475_v23  ;;  %v7656_v26 = vcombine.low %v7634_v45, %v21478_v25 }
 0x6f2   :  { %v7950_v29 = vsel %vm7929_vm4, %v21907_v3, %v24381_v59  ;;  %24382 = vst [vmem:[#allocation61_spill] sm:$0xff] %v22239_v58  ;;  %v7895_v8 = vrot.slane %v7659_v14, %v19457_v24  ;;  %v7282_v10 = vmax.f32 %v7222_v57, 0.0  ;;  %v9163_v32 = vrot.slane %v7624_v61, %v19457_v24 }
 0x6f3   :  { %v7657_v50 = vcombine.high %v7634_v45, %v21478_v25  ;;  %v7283_v59 = vmax.f32 %v7223_v38, 0.0  ;;  %v24383_v7 = vrot.slane %v22005_v19, 7  ;;  %v11795_v20 = vcombine.high %v11787_v39, %v11787_v39 }
 0x6f4   :  { %v22253_v33 = vunpack.c.l.b16 %v11787_v39  ;;  %v22255_v30 = vunpack.c.l.b16 %v7887_v54  ;;  %v7903_v23 = vcombine.high %v7895_v8, %v7895_v8  ;;  %v13115_v62 = vcombine.high %v13107_v47, %v13107_v47 }
 0x6f5   :  { %v7952_v35 = vsel %vm4522_vm14, %v24383_v7, %v7950_v29  ;;  %v22257_v58 = vunpack.c.l.b16 %v13107_v47  ;;  %v22259_v14 = vpack.c.bf16 %v7283_v59, %v7282_v10  ;;  %v7953_v61 = vrot.slane %v22108_v1, 6 }
 0x6f6   :  { %24384 = vst [vmem:[#allocation50_spill] sm:$0xff] %v22253_v33  ;;  %v10483_v25 = vrot.slane %v7656_v26, %v19457_v24  ;;  %v22263_v45 = vunpack.c.l.b16 %v7903_v23  ;;  %v7955_v57 = vrot.slane %v22174_v56, 5  ;;  %v7957_v38 = vrot.slane %v22216_v27, 4 }
 0x6f7   :  { %24385 = vst [vmem:[#allocation95_spill] sm:$0xff] %v22257_v58  ;;  %v9171_v39 = vcombine.high %v9163_v32, %v9163_v32  ;;  %v11803_v54 = vrot.slane %v7657_v50, %v19457_v24  ;;  %v22269_v29 = vrot.slane %v15056_v31, %v19457_v24  ;;  %v7954_v7 = vsel %vm7935_vm5, %v7953_v61, %v7952_v35 }
 0x6f8   :  { %v7956_v47 = vsel %vm4524_vm0, %v7955_v57, %v7954_v7  ;;  %v7959_v10 = vrot.slane %v22255_v30, 3  ;;  %v7961_v26 = vrot.slane %v22263_v45, 2  ;;  %v24386_v59 = vrot.slane %v21907_v3, 7 }
 0x6f9   :  { %v22279_v58 = vunpack.c.l.b16 %v11795_v20  ;;  %v22281_v12 = vunpack.c.l.b16 %v13115_v62  ;;  %v22283_v50 = vunpack.c.l.b16 %v7879_v37  ;;  %v22285_v31 = vunpack.c.l.b16 %v9163_v32 }
 0x6fa   :  { %v8200_v23 = vsel %vm7929_vm4, %v24386_v59, %v21807_v18  ;;  %v10491_v35 = vcombine.high %v10483_v25, %v10483_v25  ;;  %v7658_v61 = vcombine.low %v22224_v40, %v21347_v16  ;;  %v7958_v57 = vsel %vm7941_vm6, %v7957_v38, %v7956_v47 }
 0x6fb   :  { %24387 = vst [vmem:[#allocation96_spill] sm:$0xff] %v22281_v12  ;;  %v24388_v7 = vrot.slane %v22005_v19, 6  ;;  %v22293_v48 = vunpack.c.l.b16 %v9171_v39  ;;  %v11811_v20 = vcombine.high %v11803_v54, %v11803_v54  ;;  %v7960_v62 = vsel %vm4526_vm2, %v7959_v10, %v7958_v57 }
 0x6fc   :  { %v8203_v37 = vrot.slane %v22108_v1, 5  ;;  %v22297_v59 = vunpack.c.l.b16 %v7895_v8  ;;  %v7691_v32 = vcombine.low %v22269_v29, %v21406_v36  ;;  %v7962_v16 = vsel %vm7947_vm7, %v7961_v26, %v7960_v62 }
 0x6fd   :  { %v8202_v33 = vsel %vm4522_vm14, %v24388_v7, %v8200_v23  ;;  %v8205_v40 = vrot.slane %v22174_v56, 4  ;;  %v7978_v38 = vpack.c.b16 %v7962_v16, %v7962_v16  ;;  %v8207_v39 = vrot.slane %v22216_v27, 3 }
 0x6fe   :  { %v8204_v47 = vsel %vm7935_vm5, %v8203_v37, %v8202_v33  ;;  %v8209_v23 = vrot.slane %v22255_v30, 2  ;;  %v22306_v7 = vunpack.c.l.b16 %v10483_v25  ;;  %v22308_v10 = vunpack.c.l.b16 %v10491_v35 }
 0x6ff   :  { %v22310_v8 = vunpack.c.l.b16 %v11803_v54  ;;  %v22313_v57 = vrot.slane %v7658_v61, %v19457_v24  ;;  %8137 = vmatprep.mubr.bf16.mxu0 %v7978_v38  ;;  %v8206_v26 = vsel %vm4524_vm0, %v8205_v40, %v8204_v47  ;;  %v8211_v62 = vrot.slane %v22263_v45, 1 }
 0x700   :  { %v24390_v33 = vrot.slane %v21999_v0, 7  ;;  %v7943_v25 = vrot.slane %v22283_v50, 3  ;;  %v22322_v16 = vunpack.c.l.b16 %v11811_v20  ;;  %v22325_v54 = vrot.slane %v7691_v32, %v19457_v24 }
 0x701   :  { %24389 = vst [vmem:[#allocation60_spill] sm:$0xff] %v22310_v8  ;;  %v8208_v35 = vsel %vm7941_vm6, %v8207_v39, %v8206_v26  ;;  %v24391_v61 = vrot.slane %v22088_v53, 6  ;;  %v24392_v47 = vrot.slane %v22162_v2, 5  ;;  %v24393_v20 = vrot.slane %v21999_v0, 6 }
 0x702   :  { %v7933_v37 = vsel %vm4522_vm14, %v24390_v33, %v21850_v15  ;;  %v8210_v38 = vsel %vm4526_vm2, %v8209_v23, %v8208_v35  ;;  %v7946_v15 = vrot.slane %v22297_v59, 2  ;;  %v24394_v39 = vrot.slane %v22204_v42, 4 }
 0x703   :  { %v7936_v40 = vsel %vm7935_vm5, %v24391_v61, %v7933_v37  ;;  %v8188_v32 = vsel %vm4522_vm14, %v24393_v20, %v21863_v21  ;;  %v8212_v33 = vsel %vm7947_vm7, %v8211_v62, %v8210_v38  ;;  %v24395_v37 = vrot.slane %v22088_v53, 5  ;;  %v17086_v38 = vld [vmem:[#allocation9 + $0x120] sm:$0xff]  }
 0x704   :  { %v7939_v12 = vsel %vm4524_vm0, %v24392_v47, %v7936_v40  ;;  %v8195_v35 = vrot.slane %v22283_v50, 2  ;;  %v8228_v61 = vpack.c.b16 %v8212_v33, %v8212_v33  ;;  %v24396_v47 = vrot.slane %v22162_v2, 4 }
 0x705   :  { %v7942_v26 = vsel %vm7941_vm6, %v24394_v39, %v7939_v12  ;;  %v8190_v23 = vsel %vm7935_vm5, %v24395_v37, %v8188_v32  ;;  %v8197_v21 = vrot.slane %v22297_v59, 1  ;;  %v24397_v12 = vrot.slane %v22204_v42, 3 }
 0x706   :  { %v7945_v40 = vsel %vm4526_vm2, %v7943_v25, %v7942_v26  ;;  %v8192_v8 = vsel %vm4524_vm0, %v24396_v47, %v8190_v23  ;;  %v24398_v32 = vrot.slane %v21807_v18, 3  ;;  %v24399_v39 = vrot.slane %v21907_v3, 2  ;;  %8387 = vmatprep.mubr.bf16.mxu1 %v8228_v61  ;;  %v17087_v47 = vld [vmem:[#allocation9 + $0x1c0] sm:$0xff]  }
 0x707   :  { %v7948_v62 = vsel %vm7947_vm7, %v7946_v15, %v7945_v40  ;;  %v8194_v20 = vsel %vm7941_vm6, %v24397_v12, %v8192_v8  ;;  %v24400_v37 = vrot.slane %v22005_v19, 1  ;;  %v8788_v15 = vrot.slane %v22174_v56, 7 }
 0x708   :  { %v8784_v33 = vsel %vm7929_vm4, %v24399_v39, %v24398_v32  ;;  %v7977_v25 = vpack.c.b16 %v7948_v62, %v7948_v62  ;;  %v8196_v26 = vsel %vm4526_vm2, %v8195_v35, %v8194_v20  ;;  %v8790_v12 = vrot.slane %v22216_v27, 6 }
 0x709   :  { %v8786_v23 = vsel %vm4522_vm14, %v24400_v37, %v8784_v33  ;;  %v8198_v40 = vsel %vm7947_vm7, %v8197_v21, %v8196_v26  ;;  %v8792_v32 = vrot.slane %v22255_v30, 5  ;;  %v8794_v62 = vrot.slane %v22263_v45, 4  ;;  %v17088_v33 = vld [vmem:[#allocation9 + $0x128] sm:$0xff]  }
 0x70a   :  { %v8787_v8 = vsel %vm7935_vm5, %v22108_v1, %v8786_v23  ;;  %8138 = vmatmul.mubr.bf16.vlgmr.msra.gmra.mrb[128].mxu0 %v7977_v25  ;;  %v8227_v61 = vpack.c.b16 %v8198_v40, %v8198_v40  ;;  %v24401_v20 = vrot.slane %v21807_v18, 2  ;;  %v24402_v39 = vrot.slane %v21907_v3, 1  ;;  %v17089_v40 = vld [vmem:[#allocation9 + $0x1c8] sm:$0xff]  }
 0x70b   :  { %v8789_v35 = vsel %vm4524_vm0, %v8788_v15, %v8787_v8  ;;  %16121 = vmatpush3.bf16.msra.mxu0 %v17086_v38  ;;  %16128 = vmatprep.mubr.msk.bf16.mxu0 %vm17785_vm8, %v24341_v13  ;;  %v8494_v37 = vrot.slane %v22108_v1, 7  ;;  %v8496_v23 = vrot.slane %v22174_v56, 6  ;;  %v8498_v3 = vrot.slane %v22216_v27, 5 }
 0x70c   :  { %v8492_v21 = vsel %vm7929_vm4, %v24402_v39, %v24401_v20  ;;  %v8791_v26 = vsel %vm7941_vm6, %v8790_v12, %v8789_v35  ;;  %8388 = vmatmul.mubr.bf16.vlgmr.msra.gmra.mrb[160].mxu1 %v8227_v61  ;;  %16122 = vmatprep.subr.bf16.mxu0 %v24341_v13  ;;  %v8500_v38 = vrot.slane %v22255_v30, 4  ;;  %v8502_v15 = vrot.slane %v22263_v45, 3  ;;  %v17090_v35 = vld [vmem:[#allocation9 + $0x130] sm:$0xff]  }
 0x70d   :  { %v8493_v25 = vsel %vm4522_vm14, %v22005_v19, %v8492_v21  ;;  %v8793_v18 = vsel %vm4526_vm2, %v8792_v32, %v8791_v26  ;;  %16145 = vmatpush3.bf16.msra.mxu1 %v17087_v47  ;;  %16152 = vmatprep.mubr.msk.bf16.mxu1 %vm17785_vm8, %v24341_v13  ;;  %v24403_v56 = vrot.slane %v21789_v51, 3  ;;  %v24404_v8 = vrot.slane %v21843_v52, 2 }
 0x70e   :  { %v22394_v19 = vsel %vm7947_vm7, %v8794_v62, %v8793_v18  ;;  %v8495_v1 = vsel %vm7935_vm5, %v8494_v37, %v8493_v25  ;;  %v8774_v30 = vrot.slane %v22162_v2, 7  ;;  %v9187_v45 = vcombine.high %v22325_v54, %v22325_v54  ;;  %16146 = vmatprep.subr.bf16.mxu1 %v24341_v13 }
 0x70f   :  { %v8770_v27 = vsel %vm7929_vm4, %v24404_v8, %v24403_v56  ;;  %v8497_v47 = vsel %vm4524_vm0, %v8496_v23, %v8495_v1  ;;  %v24405_v12 = vrot.slane %v21999_v0, 1  ;;  %v8776_v61 = vrot.slane %v22204_v42, 6  ;;  %16123 = vmatpush3.bf16.msra.mxu0 %v17088_v33 }
 0x710   :  { %v8499_v62 = vsel %vm7941_vm6, %v8498_v3, %v8497_v47  ;;  %v8778_v39 = vrot.slane %v22283_v50, 5  ;;  %v8780_v21 = vrot.slane %v22297_v59, 4  ;;  %16124 = vmatprep.subr.bf16.mxu0 %v24341_v13  ;;  %v24406_v37 = vrot.slane %v21789_v51, 2  ;;  %v17091_v3 = vld [vmem:[#allocation9 + $0x1d0] sm:$0xff]  }
 0x711   :  { %v8772_v32 = vsel %vm4522_vm14, %v24405_v12, %v8770_v27  ;;  %v8501_v26 = vsel %vm4526_vm2, %v8500_v38, %v8499_v62  ;;  %v24407_v33 = vrot.slane %v21843_v52, 1  ;;  %v8482_v18 = vrot.slane %v22162_v2, 6  ;;  %16147 = vmatpush3.bf16.msra.mxu1 %v17089_v40  ;;  %v17092_v40 = vld [vmem:[#allocation9 + $0x138] sm:$0xff]  }
 0x712   :  { %v8773_v20 = vsel %vm7935_vm5, %v22088_v53, %v8772_v32  ;;  %v22426_v1 = vsel %vm7947_vm7, %v8502_v15, %v8501_v26  ;;  %v8484_v8 = vrot.slane %v22204_v42, 5  ;;  %v22432_v27 = vunpack.c.l.b16 %v9187_v45  ;;  %16148 = vmatprep.subr.bf16.mxu1 %v24341_v13 }
 0x713   :  { %v8775_v25 = vsel %vm4524_vm0, %v8774_v30, %v8773_v20  ;;  %v8478_v23 = vsel %vm7929_vm4, %v24407_v33, %v24406_v37  ;;  %v24408_v52 = vrot.slane %v22088_v53, 7  ;;  %v8486_v15 = vrot.slane %v22283_v50, 4  ;;  %16125 = vmatpush3.bf16.msra.mxu0 %v17090_v35 }
 0x714   :  { %v8777_v56 = vsel %vm7941_vm6, %v8776_v61, %v8775_v25  ;;  %v8479_v38 = vsel %vm4522_vm14, %v21999_v0, %v8478_v23  ;;  %v8488_v42 = vrot.slane %v22297_v59, 3  ;;  %v24409_v45 = vrot.slane %v21817_v34, 1  ;;  %16126 = vmatprep.subr.bf16.mxu0 %v24341_v13  ;;  %v17093_v59 = vld [vmem:[#allocation9 + $0x1d8] sm:$0xff]   ;;  %v17095_v23 = vld [vmem:[#allocation9 + $0x80] sm:$0xff]  }
 0x715   :  { %v8779_v51 = vsel %vm4526_vm2, %v8778_v39, %v8777_v56  ;;  %v8481_v2 = vsel %vm7935_vm5, %v24408_v52, %v8479_v38  ;;  %v7692_v53 = vcombine.high %v22269_v29, %v21406_v36  ;;  %v24410_v12 = vrot.slane %v22018_v28, 7  ;;  %16149 = vmatpush3.bf16.msra.mxu1 %v17091_v3  ;;  %v17094_v29 = vld [vmem:[#allocation9 + $0x220] sm:$0xff]  }
 0x716   :  { %v22441_v30 = vsel %vm7947_vm7, %v8780_v21, %v8779_v51  ;;  %v8483_v0 = vsel %vm4524_vm0, %v8482_v18, %v8481_v2  ;;  %v9519_v47 = vsel %vm7929_vm4, %v21948_v17, %v24409_v45  ;;  %v9522_v61 = vrot.slane %v22126_v5, 6  ;;  %16150 = vmatprep.subr.bf16.mxu1 %v24341_v13  ;;  %v17096_v2 = vld [vmem:[#allocation9 + $0x1e0] sm:$0xff]  }
 0x717   :  { %v8485_v50 = vsel %vm7941_vm6, %v8484_v8, %v8483_v0  ;;  %v9521_v32 = vsel %vm4522_vm14, %v24410_v12, %v9519_v47  ;;  %v9524_v62 = vrot.slane %v22182_v11, 5  ;;  %v9526_v20 = vrot.slane %v22241_v9, 4  ;;  %16127 = vmatpush3.bf16.msra.mxu0 %v17092_v40  ;;  %v24414_v45 = vld [vmem:[#allocation104_spill] sm:$0xff] }
 0x718   :  { %v8487_v35 = vsel %vm4526_vm2, %v8486_v15, %v8485_v50  ;;  %v9528_v36 = vrot.slane %v22293_v48, 3  ;;  %v9523_v21 = vsel %vm7935_vm5, %v9522_v61, %v9521_v32  ;;  %v9530_v26 = vrot.slane %v22432_v27, 2  ;;  %16132 = vmatprep.subr.bf16.mxu0 %v24341_v13  ;;  %v24416_v12 = vld [vmem:[#allocation24_spill] sm:$0xff] }
 0x719   :  { %v22463_v39 = vsel %vm7947_vm7, %v8488_v42, %v8487_v35  ;;  %v24411_v25 = vrot.slane %v21948_v17, 7  ;;  %v22472_v33 = vunpack.c.l.b16 %v22325_v54  ;;  %v9525_v18 = vsel %vm4524_vm0, %v9524_v62, %v9523_v21  ;;  %16151 = vmatpush3.bf16.msra.mxu1 %v17093_v59  ;;  %v24413_v42 = vld [vmem:[#allocation51_spill] sm:$0xff]  ;;  %v17097_v61 = vld [vmem:[#allocation9 + $0x228] sm:$0xff]  }
 0x71a   :  { %v24412_v3 = vrot.slane %v22018_v28, 6  ;;  %v9230_v38 = vrot.slane %v22126_v5, 5  ;;  %v9527_v8 = vsel %vm7941_vm6, %v9526_v20, %v9525_v18  ;;  %v9232_v51 = vrot.slane %v22182_v11, 4  ;;  %15643 = vmatprep.subr.bf16.mxu1 %v17094_v29  ;;  %v24419_v18 = vld [vmem:[#allocation47_spill] sm:$0xff] }
 0x71b   :  { %v9227_v37 = vsel %vm7929_vm4, %v24411_v25, %v21817_v34  ;;  %v9234_v52 = vrot.slane %v22241_v9, 3  ;;  %v9236_v54 = vrot.slane %v22293_v48, 2  ;;  %v9529_v15 = vsel %vm4526_vm2, %v9528_v36, %v9527_v8  ;;  %v17098_v25 = vld [vmem:[#allocation9 + $0x88] sm:$0xff]  }
 0x71c   :  { %v9229_v56 = vsel %vm4522_vm14, %v24412_v3, %v9227_v37  ;;  %v9238_v0 = vrot.slane %v22432_v27, 1  ;;  %v24415_v47 = vrot.slane %v24414_v45, 7  ;;  %v24417_v32 = vpack.c.b16 %v24416_v12, %v24416_v12  ;;  %v24422_v8 = vld [vmem:[#allocation84_spill] sm:$0xff] }
 0x71d   :  { %v9231_v40 = vsel %vm7935_vm5, %v9230_v38, %v9229_v56  ;;  %v22496_v59 = vsel %vm7947_vm7, %v9530_v26, %v9529_v15  ;;  %v24418_v62 = vrot.slane %v22117_v6, 6  ;;  %v9510_v36 = vrot.slane %v22176_v22, 5  ;;  %v24421_v38 = vld [vmem:[#allocation45_spill] sm:$0xff] }
 0x71e   :  { %v9507_v50 = vsel %vm4522_vm14, %v24415_v47, %v24413_v42  ;;  %16129 = vmatmul.mubr.msk.bf16.vlgmr.msra.gmra.mrb[132].mxu0 %vm3586_vm10, %v24417_v32  ;;  %v9233_v35 = vsel %vm4524_vm0, %v9232_v51, %v9231_v40  ;;  %v8811_v21 = vpack.c.b16 %v22394_v19, %v22394_v19  ;;  %v9512_v26 = vrot.slane %v22213_v44, 4  ;;  %v17099_v15 = vld [vmem:[#allocation9 + $0x1e8] sm:$0xff]   ;;  %v17100_v32 = vld [vmem:[#allocation9 + $0x230] sm:$0xff]  }
 0x71f   :  { %v9509_v20 = vsel %vm7935_vm5, %v24418_v62, %v9507_v50  ;;  %16133 = vmatpush3.bf16.msra.mxu0 %v17095_v23  ;;  %16140 = vmatprep.mubr.msk.bf16.mxu0 %vm17785_vm8, %v24341_v13  ;;  %v9235_v29 = vsel %vm7941_vm6, %v9234_v52, %v9233_v35  ;;  %v9514_v37 = vrot.slane %v22285_v31, 3  ;;  %v24420_v3 = vpack.c.b16 %v24419_v18, %v24419_v18 }
 0x720   :  { %16134 = vmatprep.subr.bf16.mxu0 %v24341_v13  ;;  %v9237_v23 = vsel %vm4526_vm2, %v9236_v54, %v9235_v29  ;;  %v9511_v19 = vsel %vm4524_vm0, %v9510_v36, %v9509_v20  ;;  %v9516_v56 = vrot.slane %v22472_v33, 2  ;;  %v24423_v51 = vrot.slane %v24422_v8, 7  ;;  %v17101_v20 = vld [vmem:[#allocation9 + $0x90] sm:$0xff]  }
 0x721   :  { %16153 = vmatmul.mubr.msk.bf16.vlgmr.msra.gmra.mrb[164].mxu1 %vm3586_vm10, %v24420_v3  ;;  %v22523_v40 = vsel %vm7947_vm7, %v9238_v0, %v9237_v23  ;;  %v9513_v42 = vsel %vm7941_vm6, %v9512_v26, %v9511_v19  ;;  %v24424_v47 = vrot.slane %v24414_v45, 6  ;;  %v9218_v50 = vrot.slane %v22176_v22, 4  ;;  %v17102_v23 = vld [vmem:[#allocation9 + $0x1f0] sm:$0xff]  }
 0x722   :  { %v9213_v52 = vsel %vm7929_vm4, %v24423_v51, %v24421_v38  ;;  %15644 = vmatpush3.bf16.msra.mxu1 %v17096_v2  ;;  %8970 = vmatprep.mubr.bf16.mxu1 %v8811_v21  ;;  %v22531_v12 = vrot.slane %v7692_v53, %v19457_v24  ;;  %v9515_v2 = vsel %vm4526_vm2, %v9514_v37, %v9513_v42  ;;  %v24425_v35 = vrot.slane %v22117_v6, 5  ;;  %v17103_v42 = vld [vmem:[#allocation9 + $0x238] sm:$0xff]  }
 0x723   :  { %v9215_v54 = vsel %vm4522_vm14, %v24424_v47, %v9213_v52  ;;  %15645 = vmatprep.subr.bf16.mxu1 %v17097_v61  ;;  %v9220_v62 = vrot.slane %v22213_v44, 3  ;;  %16135 = vmatpush3.bf16.msra.mxu0 %v17098_v25  ;;  %v22539_v36 = vsel %vm7947_vm7, %v9516_v56, %v9515_v2  ;;  %v9222_v53 = vrot.slane %v22285_v31, 2 }
 0x724   :  { %v9217_v0 = vsel %vm7935_vm5, %v24425_v35, %v9215_v54  ;;  %v9224_v61 = vrot.slane %v22472_v33, 1  ;;  %v22546_v29 = vrot.slane %v22259_v14, %v19457_v24  ;;  %16136 = vmatprep.subr.bf16.mxu0 %v24341_v13  ;;  %v24426_v25 = vrot.slane %v21817_v34, 3 }
 0x725   :  { %v9219_v21 = vsel %vm4524_vm0, %v9218_v50, %v9217_v0  ;;  %v24427_v37 = vrot.slane %v21948_v17, 2  ;;  %v10108_v3 = vrot.slane %v22182_v11, 7  ;;  %v24428_v56 = vrot.slane %v22018_v28, 1 }
 0x726   :  { %v9221_v26 = vsel %vm7941_vm6, %v9220_v62, %v9219_v21  ;;  %15646 = vmatpush3.bf16.msra.mxu1 %v17099_v15  ;;  %v10110_v51 = vrot.slane %v22241_v9, 6  ;;  %v10112_v52 = vrot.slane %v22293_v48, 5  ;;  %v10114_v15 = vrot.slane %v22432_v27, 4 }
 0x727   :  { %v10104_v18 = vsel %vm7929_vm4, %v24427_v37, %v24426_v25  ;;  %v9223_v19 = vsel %vm4526_vm2, %v9222_v53, %v9221_v26  ;;  %15647 = vmatprep.subr.bf16.mxu1 %v17100_v32  ;;  %v24429_v50 = vrot.slane %v21817_v34, 2  ;;  %v24430_v2 = vrot.slane %v21948_v17, 1  ;;  %16137 = vmatpush3.bf16.msra.mxu0 %v17101_v20  ;;  %v17104_v32 = vld [vmem:[#allocation9 + $0x98] sm:$0xff]  }
 0x728   :  { %v10106_v14 = vsel %vm4522_vm14, %v24428_v56, %v10104_v18  ;;  %v22563_v47 = vsel %vm7947_vm7, %v9224_v61, %v9223_v19  ;;  %v10507_v0 = vcombine.high %v22531_v12, %v22531_v12  ;;  %v9814_v53 = vrot.slane %v22126_v5, 7  ;;  %16138 = vmatprep.subr.bf16.mxu0 %v24341_v13  ;;  %v17106_v61 = vld [vmem:[#allocation9 + $0x180] sm:$0xff]   ;;  %v17105_v20 = vld [vmem:[#allocation9 + $0x1f8] sm:$0xff]  }
 0x729   :  { %v10107_v54 = vsel %vm7935_vm5, %v22126_v5, %v10106_v14  ;;  %v9812_v35 = vsel %vm7929_vm4, %v24430_v2, %v24429_v50  ;;  %v9816_v17 = vrot.slane %v22182_v11, 6  ;;  %v9818_v26 = vrot.slane %v22241_v9, 5  ;;  %v17107_v11 = vld [vmem:[#allocation9 + $0x240] sm:$0xff]  }
 0x72a   :  { %v10109_v62 = vsel %vm4524_vm0, %v10108_v3, %v10107_v54  ;;  %v9813_v21 = vsel %vm4522_vm14, %v22018_v28, %v9812_v35  ;;  %v9820_v25 = vrot.slane %v22293_v48, 4  ;;  %15648 = vmatpush3.bf16.msra.mxu1 %v17102_v23  ;;  %v9822_v28 = vrot.slane %v22432_v27, 3  ;;  %v17108_v27 = vld [vmem:[#allocation9 + $0x140] sm:$0xff]  }
 0x72b   :  { %v10111_v34 = vsel %vm7941_vm6, %v10110_v51, %v10109_v62  ;;  %v9815_v18 = vsel %vm7935_vm5, %v9814_v53, %v9813_v21  ;;  %v24431_v5 = vrot.slane %v24421_v38, 3  ;;  %v24432_v3 = vrot.slane %v24422_v8, 2  ;;  %15649 = vmatprep.subr.bf16.mxu1 %v17103_v42  ;;  %16139 = vmatpush3.bf16.msra.mxu0 %v17104_v32  ;;  %v17109_v62 = vld [vmem:[#allocation9 + $0x200] sm:$0xff]  }
 0x72c   :  { %v10113_v37 = vsel %vm4526_vm2, %v10112_v52, %v10111_v34  ;;  %v9817_v48 = vsel %vm4524_vm0, %v9816_v17, %v9815_v18  ;;  %v24433_v23 = vrot.slane %v24414_v45, 1  ;;  %v10094_v14 = vrot.slane %v22176_v22, 7  ;;  %15616 = vmatprep.subr.bf16.mxu0 %v17106_v61 }
 0x72d   :  { %v10090_v19 = vsel %vm7929_vm4, %v24432_v3, %v24431_v5  ;;  %v22593_v9 = vsel %vm7947_vm7, %v10114_v15, %v10113_v37  ;;  %v8519_v51 = vpack.c.b16 %v22426_v1, %v22426_v1  ;;  %v9819_v52 = vsel %vm7941_vm6, %v9818_v26, %v9817_v48  ;;  %v17110_v15 = vld [vmem:[#allocation9 + $0x188] sm:$0xff]  }
 0x72e   :  { %v10092_v56 = vsel %vm4522_vm14, %v24433_v23, %v10090_v19  ;;  %v10096_v54 = vrot.slane %v22213_v44, 6  ;;  %v9821_v50 = vsel %vm4526_vm2, %v9820_v25, %v9819_v52  ;;  %v10098_v35 = vrot.slane %v22285_v31, 5  ;;  %15650 = vmatpush3.bf16.msra.mxu1 %v17105_v20  ;;  %v24436_v25 = vld [vmem:[#allocation42_spill] sm:$0xff]  ;;  %v17111_v20 = vld [vmem:[#allocation9 + $0x248] sm:$0xff]  }
 0x72f   :  { %v10093_v42 = vsel %vm7935_vm5, %v22117_v6, %v10092_v56  ;;  %v10100_v32 = vrot.slane %v22472_v33, 4  ;;  %v22611_v1 = vsel %vm7947_vm7, %v9822_v28, %v9821_v50  ;;  %v24434_v53 = vrot.slane %v24421_v38, 2  ;;  %15651 = vmatprep.subr.bf16.mxu1 %v17107_v11  ;;  %v17112_v28 = vld [vmem:[#allocation9 + $0x148] sm:$0xff]   ;;  %v24441_v56 = vld [vmem:[#allocation103_spill] sm:$0xff] }
 0x730   :  { %v10095_v2 = vsel %vm4524_vm0, %v10094_v14, %v10093_v42  ;;  %v24435_v61 = vrot.slane %v24422_v8, 1  ;;  %v9802_v17 = vrot.slane %v22176_v22, 6  ;;  %v22620_v26 = vunpack.c.l.b16 %v10507_v0  ;;  %v24439_v48 = vld [vmem:[#allocation36_spill] sm:$0xff] }
 0x731   :  { %v10097_v21 = vsel %vm7941_vm6, %v10096_v54, %v10095_v2  ;;  %v24437_v37 = vpack.c.b16 %v24436_v25, %v24436_v25  ;;  %v9804_v8 = vrot.slane %v22213_v44, 5  ;;  %v24438_v0 = vrot.slane %v22117_v6, 7  ;;  %v17115_v54 = vld [vmem:[#allocation9 + $0x250] sm:$0xff]  }
 0x732   :  { %v9798_v34 = vsel %vm7929_vm4, %v24435_v61, %v24434_v53  ;;  %v10099_v18 = vsel %vm4526_vm2, %v10098_v35, %v10097_v21  ;;  %v9806_v3 = vrot.slane %v22285_v31, 4  ;;  %v9808_v19 = vrot.slane %v22472_v33, 3  ;;  %15652 = vmatpush3.bf16.msra.mxu1 %v17109_v62 }
 0x733   :  { %16141 = vmatmul.mubr.msk.bf16.vlgmr.msra.gmra.mrb[136].mxu0 %vm3586_vm10, %v24437_v37  ;;  %v9799_v38 = vsel %vm4522_vm14, %v24414_v45, %v9798_v34  ;;  %v22631_v22 = vsel %vm7947_vm7, %v10100_v32, %v10099_v18  ;;  %v22639_v11 = vunpack.c.l.b16 %v22531_v12  ;;  %v17114_v45 = vld [vmem:[#allocation9 + $0x190] sm:$0xff]   ;;  %v24440_v23 = vrot.slane %v24439_v48, 1  ;;  %15653 = vmatprep.subr.bf16.mxu1 %v17111_v20  ;;  %v17118_v37 = vld [vmem:[#allocation9 + $0x198] sm:$0xff]  }
 0x734   :  { %15617 = vmatpush3.bf16.msra.mxu0 %v17108_v27  ;;  %8678 = vmatprep.mubr.bf16.mxu0 %v8519_v51  ;;  %v9801_v5 = vsel %vm7935_vm5, %v24438_v0, %v9799_v38  ;;  %v10842_v6 = vrot.slane %v22134_v55, 6  ;;  %v17113_v27 = vld [vmem:[#allocation9 + $0x208] sm:$0xff]   ;;  %v24442_v51 = vld [vmem:[#allocation90_spill] sm:$0xff]  ;;  %v10844_v52 = vrot.slane %v22202_v41, 5  ;;  %v10846_v42 = vrot.slane %v22244_v4, 4 }
 0x735   :  { %15618 = vmatprep.subr.bf16.mxu0 %v17110_v15  ;;  %v9803_v44 = vsel %vm4524_vm0, %v9802_v17, %v9801_v5  ;;  %v10839_v14 = vsel %vm7929_vm4, %v24441_v56, %v24440_v23  ;;  %v24443_v33 = vrot.slane %v24442_v51, 7  ;;  %v10848_v2 = vrot.slane %v22308_v10, 3  ;;  %v17116_v32 = vld [vmem:[#allocation9 + $0x150] sm:$0xff]   ;;  %v24445_v17 = vld [vmem:[#allocation72_spill] sm:$0xff] }
 0x736   :  { %v9805_v31 = vsel %vm7941_vm6, %v9804_v8, %v9803_v44  ;;  %v10850_v35 = vrot.slane %v22620_v26, 2  ;;  %v24444_v53 = vrot.slane %v24441_v56, 7  ;;  %v10550_v34 = vrot.slane %v22134_v55, 5  ;;  %15654 = vmatpush3.bf16.msra.mxu1 %v17113_v27  ;;  %v24448_v27 = vld [vmem:[#allocation105_spill] sm:$0xff] }
 0x737   :  { %v10841_v12 = vsel %vm4522_vm14, %v24443_v33, %v10839_v14  ;;  %v9807_v15 = vsel %vm4526_vm2, %v9806_v3, %v9805_v31  ;;  %v7693_v25 = vcombine.low %v22546_v29, %v24445_v17  ;;  %v24446_v18 = vrot.slane %v24442_v51, 6  ;;  %15655 = vmatprep.subr.bf16.mxu1 %v17115_v54 }
 0x738   :  { %v10843_v50 = vsel %vm7935_vm5, %v10842_v6, %v10841_v12  ;;  %15619 = vmatpush3.bf16.msra.mxu0 %v17112_v28  ;;  %v22658_v62 = vsel %vm7947_vm7, %v9808_v19, %v9807_v15  ;;  %v10547_v61 = vsel %vm7929_vm4, %v24444_v53, %v24439_v48  ;;  %v10552_v8 = vrot.slane %v22202_v41, 4  ;;  %v17117_v28 = vld [vmem:[#allocation9 + $0x210] sm:$0xff]  }
 0x739   :  { %v10845_v21 = vsel %vm4524_vm0, %v10844_v52, %v10843_v50  ;;  %15620 = vmatprep.subr.bf16.mxu0 %v17114_v45  ;;  %v10549_v38 = vsel %vm4522_vm14, %v24446_v18, %v10547_v61  ;;  %v10554_v3 = vrot.slane %v22244_v4, 3  ;;  %v10556_v19 = vrot.slane %v22308_v10, 2  ;;  %v17119_v45 = vld [vmem:[#allocation9 + $0x258] sm:$0xff]  }
 0x73a   :  { %v10847_v20 = vsel %vm7941_vm6, %v10846_v42, %v10845_v21  ;;  %v10551_v5 = vsel %vm7935_vm5, %v10550_v34, %v10549_v38  ;;  %v10558_v14 = vrot.slane %v22620_v26, 1  ;;  %v24447_v6 = vld [vmem:[#allocation102_spill] sm:$0xff]  ;;  %v24449_v31 = vrot.slane %v24448_v27, 7  ;;  %15656 = vmatpush3.bf16.msra.mxu1 %v17117_v28  ;;  %v24451_v18 = vld [vmem:[#allocation43_spill] sm:$0xff]  ;;  %v24452_v38 = vld [vmem:[#allocation101_spill] sm:$0xff] }
 0x73b   :  { %v10849_v0 = vsel %vm4526_vm2, %v10848_v2, %v10847_v20  ;;  %v10553_v23 = vsel %vm4524_vm0, %v10552_v8, %v10551_v5  ;;  %v7694_v12 = vcombine.high %v22546_v29, %v24445_v17  ;;  %v17120_v52 = vld [vmem:[#allocation9 + $0x158] sm:$0xff]   ;;  %v24450_v54 = vrot.slane %v22122_v49, 6  ;;  %v17122_v2 = vld [vmem:[#allocation9 + $0x1a0] sm:$0xff]   ;;  %15657 = vmatprep.subr.bf16.mxu1 %v17119_v45 }
 0x73c   :  { %v22678_v44 = vsel %vm7947_vm7, %v10850_v35, %v10849_v0  ;;  %v10827_v33 = vsel %vm4522_vm14, %v24449_v31, %v24447_v6  ;;  %15621 = vmatpush3.bf16.msra.mxu0 %v17116_v32  ;;  %v10555_v42 = vsel %vm7941_vm6, %v10554_v3, %v10553_v23  ;;  %v10830_v50 = vrot.slane %v22197_v63, 5  ;;  %v17121_v32 = vld [vmem:[#allocation9 + $0x218] sm:$0xff]  }
 0x73d   :  { %v10829_v15 = vsel %vm7935_vm5, %v24450_v54, %v10827_v33  ;;  %15622 = vmatprep.subr.bf16.mxu0 %v17118_v37  ;;  %v10557_v35 = vsel %vm4526_vm2, %v10556_v19, %v10555_v42  ;;  %v10832_v21 = vrot.slane %v22218_v46, 4  ;;  %v10834_v53 = vrot.slane %v22306_v7, 3  ;;  %v17125_v42 = vld [vmem:[#allocation9 + $0x1a8] sm:$0xff]  }
 0x73e   :  { %v10836_v61 = vrot.slane %v22639_v11, 2  ;;  %v22698_v34 = vsel %vm7947_vm7, %v10558_v14, %v10557_v35  ;;  %v10831_v20 = vsel %vm4524_vm0, %v10830_v50, %v10829_v15  ;;  %v24453_v8 = vrot.slane %v24452_v38, 7  ;;  %v17123_v14 = vld [vmem:[#allocation9 + $0x160] sm:$0xff]   ;;  %15658 = vmatpush3.bf16.msra.mxu1 %v17121_v32 }
 0x73f   :  { %v10538_v0 = vrot.slane %v22197_v63, 4  ;;  %v22707_v5 = vrot.slane %v7693_v25, %v19457_v24  ;;  %v10833_v3 = vsel %vm7941_vm6, %v10832_v21, %v10831_v20  ;;  %v24454_v28 = vrot.slane %v24448_v27, 6  ;;  %v17124_v20 = vld [vmem:[#allocation9 + $0x300] sm:$0xff]   ;;  %16168 = vmatprep.subr.bf16.mxu1 %v24341_v13 }
 0x740   :  { %v10533_v37 = vsel %vm7929_vm4, %v24453_v8, %v24451_v18  ;;  %v10540_v23 = vrot.slane %v22218_v46, 3  ;;  %15623 = vmatpush3.bf16.msra.mxu0 %v17120_v52  ;;  %v10835_v6 = vsel %vm4526_vm2, %v10834_v53, %v10833_v3  ;;  %v24455_v31 = vrot.slane %v22122_v49, 5 }
 0x741   :  { %v10535_v19 = vsel %vm4522_vm14, %v24454_v28, %v10533_v37  ;;  %v10542_v25 = vrot.slane %v22306_v7, 2  ;;  %v10544_v45 = vrot.slane %v22639_v11, 1  ;;  %15624 = vmatprep.subr.bf16.mxu0 %v17122_v2  ;;  %v22721_v54 = vsel %vm7947_vm7, %v10836_v61, %v10835_v6  ;;  %v17126_v28 = vld [vmem:[#allocation9 + $0x168] sm:$0xff]  }
 0x742   :  { %v10537_v33 = vsel %vm7935_vm5, %v24455_v31, %v10535_v19  ;;  %v24456_v52 = vrot.slane %v24439_v48, 3  ;;  %v24457_v50 = vrot.slane %v24441_v56, 2  ;;  %v11428_v21 = vrot.slane %v22202_v41, 7 }
 0x743   :  { %v10539_v15 = vsel %vm4524_vm0, %v10538_v0, %v10537_v33  ;;  %v8810_v53 = vpack.c.b16 %v22441_v30, %v22441_v30  ;;  %v24458_v61 = vrot.slane %v24442_v51, 1  ;;  %v11430_v37 = vrot.slane %v22244_v4, 6 }
 0x744   :  { %v11424_v35 = vsel %vm7929_vm4, %v24457_v50, %v24456_v52  ;;  %v10541_v2 = vsel %vm7941_vm6, %v10540_v23, %v10539_v15  ;;  %v11432_v32 = vrot.slane %v22308_v10, 5  ;;  %v11434_v30 = vrot.slane %v22620_v26, 4  ;;  %15625 = vmatpush3.bf16.msra.mxu0 %v17123_v14  ;;  %v17128_v14 = vld [vmem:[#allocation9 + $0x1b0] sm:$0xff]  }
 0x745   :  { %v11426_v8 = vsel %vm4522_vm14, %v24458_v61, %v11424_v35  ;;  %v10543_v0 = vsel %vm4526_vm2, %v10542_v25, %v10541_v2  ;;  %v24459_v6 = vrot.slane %v24439_v48, 2  ;;  %v24460_v31 = vrot.slane %v24441_v56, 1  ;;  %8971 = vmatmul.mubr.bf16.vlgmr.msra.gmra.mrb[168].mxu1 %v8810_v53  ;;  %15626 = vmatprep.subr.bf16.mxu0 %v17125_v42  ;;  %v17127_v48 = vld [vmem:[#allocation9 + $0x308] sm:$0xff]  }
 0x746   :  { %v11427_v3 = vsel %vm7935_vm5, %v22134_v55, %v11426_v8  ;;  %v22744_v19 = vsel %vm7947_vm7, %v10544_v45, %v10543_v0  ;;  %v11134_v25 = vrot.slane %v22134_v55, 7  ;;  %v11827_v15 = vcombine.high %v22707_v5, %v22707_v5  ;;  %16169 = vmatpush3.bf16.msra.mxu1 %v17124_v20  ;;  %16176 = vmatprep.mubr.msk.bf16.mxu1 %vm17785_vm8, %v24341_v13 }
 0x747   :  { %v11429_v23 = vsel %vm4524_vm0, %v11428_v21, %v11427_v3  ;;  %v11132_v33 = vsel %vm7929_vm4, %v24460_v31, %v24459_v6  ;;  %v11136_v50 = vrot.slane %v22202_v41, 6  ;;  %v11138_v35 = vrot.slane %v22244_v4, 5  ;;  %16170 = vmatprep.subr.bf16.mxu1 %v24341_v13  ;;  %v17129_v4 = vld [vmem:[#allocation9 + $0x170] sm:$0xff]  }
 0x748   :  { %v11431_v52 = vsel %vm7941_vm6, %v11430_v37, %v11429_v23  ;;  %v11133_v45 = vsel %vm4522_vm14, %v24442_v51, %v11132_v33  ;;  %v11140_v42 = vrot.slane %v22308_v10, 4  ;;  %v11142_v51 = vrot.slane %v22620_v26, 3  ;;  %15627 = vmatpush3.bf16.msra.mxu0 %v17126_v28  ;;  %v17131_v26 = vld [vmem:[#allocation9 + $0x1b8] sm:$0xff]   ;;  %v17130_v28 = vld [vmem:[#allocation9 + $0x310] sm:$0xff]  }
 0x749   :  { %v11433_v55 = vsel %vm4526_vm2, %v11432_v32, %v11431_v52  ;;  %v11135_v56 = vsel %vm7935_vm5, %v11134_v25, %v11133_v45  ;;  %v24461_v53 = vrot.slane %v24451_v18, 3  ;;  %v24462_v20 = vrot.slane %v24452_v38, 2  ;;  %15628 = vmatprep.subr.bf16.mxu0 %v17128_v14 }
 0x74a   :  { %v22767_v21 = vsel %vm7947_vm7, %v11434_v30, %v11433_v55  ;;  %v11137_v41 = vsel %vm4524_vm0, %v11136_v50, %v11135_v56  ;;  %v22777_v61 = vunpack.c.l.b16 %v22707_v5  ;;  %v24463_v8 = vrot.slane %v24448_v27, 1  ;;  %16171 = vmatpush3.bf16.msra.mxu1 %v17127_v48  ;;  %v17132_v55 = vld [vmem:[#allocation9 + $0x178] sm:$0xff]  }
 0x74b   :  { %v11410_v2 = vsel %vm7929_vm4, %v24462_v20, %v24461_v53  ;;  %v11139_v10 = vsel %vm7941_vm6, %v11138_v35, %v11137_v41  ;;  %v11414_v0 = vrot.slane %v22197_v63, 7  ;;  %v11416_v5 = vrot.slane %v22218_v46, 6  ;;  %16172 = vmatprep.subr.bf16.mxu1 %v24341_v13  ;;  %v24467_v41 = vld [vmem:[#allocation54_spill] sm:$0xff]  ;;  %v24469_v53 = vld [vmem:[#allocation44_spill] sm:$0xff] }
 0x74c   :  { %v11412_v37 = vsel %vm4522_vm14, %v24463_v8, %v11410_v2  ;;  %v11141_v3 = vsel %vm4526_vm2, %v11140_v42, %v11139_v10  ;;  %v11418_v30 = vrot.slane %v22306_v7, 5  ;;  %v11420_v31 = vrot.slane %v22639_v11, 4  ;;  %15629 = vmatpush3.bf16.msra.mxu0 %v17129_v4  ;;  %v24470_v2 = vld [vmem:[#allocation55_spill] sm:$0xff] }
 0x74d   :  { %v11413_v32 = vsel %vm7935_vm5, %v22122_v49, %v11412_v37  ;;  %v22790_v23 = vsel %vm7947_vm7, %v11142_v51, %v11141_v3  ;;  %v24464_v33 = vrot.slane %v24451_v18, 2  ;;  %v24465_v25 = vrot.slane %v24452_v38, 1  ;;  %15630 = vmatprep.subr.bf16.mxu0 %v17131_v26  ;;  %v24472_v8 = vld [vmem:[#allocation107_spill] sm:$0xff] }
 0x74e   :  { %v11415_v6 = vsel %vm4524_vm0, %v11414_v0, %v11413_v32  ;;  %v22799_v52 = vunpack.c.l.b16 %v11827_v15  ;;  %v11122_v48 = vrot.slane %v22197_v63, 6  ;;  %v24466_v18 = vrot.slane %v22122_v49, 7  ;;  %16173 = vmatpush3.bf16.msra.mxu1 %v17130_v28  ;;  %v17133_v49 = vld [vmem:[#allocation9 + $0x318] sm:$0xff]  }
 0x74f   :  { %v11118_v14 = vsel %vm7929_vm4, %v24465_v25, %v24464_v33  ;;  %v11417_v45 = vsel %vm7941_vm6, %v11416_v5, %v11415_v6  ;;  %v11124_v15 = vrot.slane %v22218_v46, 5  ;;  %v11126_v35 = vrot.slane %v22306_v7, 4  ;;  %16174 = vmatprep.subr.bf16.mxu1 %v24341_v13 }
 0x750   :  { %v11119_v50 = vsel %vm4522_vm14, %v24448_v27, %v11118_v14  ;;  %v11419_v56 = vsel %vm4526_vm2, %v11418_v30, %v11417_v45  ;;  %v11128_v63 = vrot.slane %v22639_v11, 3  ;;  %v24468_v51 = vrot.slane %v24467_v41, 1  ;;  %v17134_v11 = vld [vmem:[#allocation9 + $0x360] sm:$0xff]   ;;  %15631 = vmatpush3.bf16.msra.mxu0 %v17132_v55 }
 0x751   :  { %v11121_v38 = vsel %vm7935_vm5, %v24466_v18, %v11119_v50  ;;  %v22813_v42 = vsel %vm7947_vm7, %v11420_v31, %v11419_v56  ;;  %v8518_v46 = vpack.c.b16 %v22463_v39, %v22463_v39  ;;  %v24471_v4 = vrot.slane %v24470_v2, 7  ;;  %v17135_v39 = vld [vmem:[#allocation9 + $0x260] sm:$0xff]   ;;  %16156 = vmatprep.subr.bf16.mxu0 %v24341_v13 }
 0x752   :  { %v11123_v27 = vsel %vm4524_vm0, %v11122_v48, %v11121_v38  ;;  %v12159_v20 = vsel %vm7929_vm4, %v24469_v53, %v24468_v51  ;;  %v12162_v37 = vrot.slane %v24472_v8, 6  ;;  %v12164_v26 = vrot.slane %v22208_v60, 5  ;;  %16175 = vmatpush3.bf16.msra.mxu1 %v17133_v49  ;;  %v17136_v48 = vld [vmem:[#allocation9 + $0x320] sm:$0xff]  }
 0x753   :  { %v11125_v7 = vsel %vm7941_vm6, %v11124_v15, %v11123_v27  ;;  %v12161_v10 = vsel %vm4522_vm14, %v24471_v4, %v12159_v20  ;;  %v12166_v3 = vrot.slane %v22279_v58, 4  ;;  %v12168_v32 = vrot.slane %v22322_v16, 3  ;;  %8679 = vmatmul.mubr.bf16.vlgmr.msra.gmra.mrb[140].mxu0 %v8518_v46  ;;  %15697 = vmatprep.subr.bf16.mxu1 %v17134_v11  ;;  %v24476_v51 = vld [vmem:[#allocation91_spill] sm:$0xff]  ;;  %v24479_v11 = vld [vmem:[#allocation93_spill] sm:$0xff] }
 0x754   :  { %v11127_v0 = vsel %vm4526_vm2, %v11126_v35, %v11125_v7  ;;  %v12163_v30 = vsel %vm7935_vm5, %v12162_v37, %v12161_v10  ;;  %v12170_v28 = vrot.slane %v22799_v52, 2  ;;  %v24473_v6 = vrot.slane %v24469_v53, 7  ;;  %16157 = vmatpush3.bf16.msra.mxu0 %v17135_v39  ;;  %v17138_v7 = vld [vmem:[#allocation9 + $0x268] sm:$0xff]   ;;  %16164 = vmatprep.mubr.msk.bf16.mxu0 %vm17785_vm8, %v24341_v13 }
 0x755   :  { %v22834_v5 = vsel %vm7947_vm7, %v11128_v63, %v11127_v0  ;;  %v9547_v33 = vpack.c.b16 %v22496_v59, %v22496_v59  ;;  %v12165_v25 = vsel %vm4524_vm0, %v12164_v26, %v12163_v30  ;;  %v24474_v14 = vrot.slane %v24470_v2, 6  ;;  %v17137_v59 = vld [vmem:[#allocation9 + $0x368] sm:$0xff]   ;;  %16158 = vmatprep.subr.bf16.mxu0 %v24341_v13  ;;  %v24482_v30 = vld [vmem:[#allocation50_spill] sm:$0xff] }
 0x756   :  { %v11867_v31 = vsel %vm7929_vm4, %v24473_v6, %v24467_v41  ;;  %v11870_v50 = vrot.slane %v24472_v8, 5  ;;  %v12167_v55 = vsel %vm7941_vm6, %v12166_v3, %v12165_v25  ;;  %v11872_v56 = vrot.slane %v22208_v60, 4  ;;  %v24475_v63 = vld [vmem:[#allocation33_spill] sm:$0xff]  ;;  %v24483_v6 = vld [vmem:[#allocation60_spill] sm:$0xff] }
 0x757   :  { %v11869_v45 = vsel %vm4522_vm14, %v24474_v14, %v11867_v31  ;;  %v11874_v18 = vrot.slane %v22279_v58, 3  ;;  %v11876_v38 = vrot.slane %v22322_v16, 2  ;;  %v12169_v15 = vsel %vm4526_vm2, %v12168_v32, %v12167_v55  ;;  %v24480_v3 = vld [vmem:[#allocation57_spill] sm:$0xff]  ;;  %v24484_v55 = vld [vmem:[#allocation59_spill] sm:$0xff] }
 0x758   :  { %v11871_v35 = vsel %vm7935_vm5, %v11870_v50, %v11869_v45  ;;  %v11878_v27 = vrot.slane %v22799_v52, 1  ;;  %v24477_v20 = vrot.slane %v24476_v51, 7  ;;  %v22864_v46 = vsel %vm7947_vm7, %v12170_v28, %v12169_v15  ;;  %v17139_v25 = vld [vmem:[#allocation9 + $0x328] sm:$0xff]   ;;  %16159 = vmatpush3.bf16.msra.mxu0 %v17138_v7 }
 0x759   :  { %v11873_v4 = vsel %vm4524_vm0, %v11872_v56, %v11871_v35  ;;  %v24478_v10 = vrot.slane %v22138_v43, 6  ;;  %v12150_v0 = vrot.slane %v24479_v11, 5  ;;  %v13131_v26 = vcombine.high %v22313_v57, %v22313_v57  ;;  %v24485_v56 = vld [vmem:[#allocation88_spill] sm:$0xff]  ;;  %16160 = vmatprep.subr.bf16.mxu0 %v24341_v13 }
 0x75a   :  { %v12147_v49 = vsel %vm4522_vm14, %v24477_v20, %v24475_v63  ;;  %v24481_v32 = vpack.c.b16 %v24480_v3, %v24480_v3  ;;  %v11875_v39 = vsel %vm7941_vm6, %v11874_v18, %v11873_v4  ;;  %v12152_v28 = vrot.slane %v24482_v30, 4  ;;  %v17140_v18 = vld [vmem:[#allocation9 + $0x370] sm:$0xff]  }
 0x75b   :  { %v12149_v37 = vsel %vm7935_vm5, %v24478_v10, %v12147_v49  ;;  %v12154_v31 = vrot.slane %v24483_v6, 3  ;;  %v11877_v14 = vsel %vm4526_vm2, %v11876_v38, %v11875_v39  ;;  %v12156_v50 = vrot.slane %v22777_v61, 2 }
 0x75c   :  { %16177 = vmatmul.mubr.msk.bf16.vlgmr.msra.gmra.mrb[172].mxu1 %vm3586_vm10, %v24481_v32  ;;  %v12151_v45 = vsel %vm4524_vm0, %v12150_v0, %v12149_v37  ;;  %v24486_v15 = vrot.slane %v24485_v56, 7  ;;  %v22889_v63 = vsel %vm7947_vm7, %v11878_v27, %v11877_v14  ;;  %v11858_v20 = vrot.slane %v24479_v11, 4  ;;  %v17143_v14 = vld [vmem:[#allocation9 + $0x378] sm:$0xff]  }
 0x75d   :  { %15698 = vmatpush3.bf16.msra.mxu1 %v17136_v48  ;;  %9706 = vmatprep.mubr.bf16.mxu1 %v9547_v33  ;;  %v12153_v48 = vsel %vm7941_vm6, %v12152_v28, %v12151_v45  ;;  %v24487_v33 = vrot.slane %v24476_v51, 6  ;;  %v22900_v49 = vrot.slane %v7694_v12, %v19457_v24  ;;  %v24488_v27 = vrot.slane %v22138_v43, 5  ;;  %v17142_v12 = vld [vmem:[#allocation9 + $0x330] sm:$0xff]  }
 0x75e   :  { %v11853_v35 = vsel %vm7929_vm4, %v24486_v15, %v24484_v55  ;;  %15699 = vmatprep.subr.bf16.mxu1 %v17137_v59  ;;  %v17141_v59 = vld [vmem:[#allocation9 + $0x270] sm:$0xff]   ;;  %v12155_v4 = vsel %vm4526_vm2, %v12154_v31, %v12153_v48  ;;  %v11860_v37 = vrot.slane %v24482_v30, 3  ;;  %v11862_v24 = vrot.slane %v24483_v6, 2 }
 0x75f   :  { %v11855_v38 = vsel %vm4522_vm14, %v24487_v33, %v11853_v35  ;;  %v22909_v0 = vsel %vm7947_vm7, %v12156_v50, %v12155_v4  ;;  %v11864_v29 = vrot.slane %v22777_v61, 1  ;;  %v22914_v17 = vunpack.c.l.b16 %v13131_v26  ;;  %16161 = vmatpush3.bf16.msra.mxu0 %v17141_v59  ;;  %v17144_v35 = vld [vmem:[#allocation9 + $0x278] sm:$0xff]   ;;  %v17146_v59 = vld [vmem:[#allocation9 + $0x2c0] sm:$0xff]  }
 0x760   :  { %v11857_v10 = vsel %vm7935_vm5, %v24488_v27, %v11855_v38  ;;  %v24489_v32 = vrot.slane %v24467_v41, 3  ;;  %v24490_v39 = vrot.slane %v24469_v53, 2  ;;  %v12748_v31 = vrot.slane %v22208_v60, 7  ;;  %16162 = vmatprep.subr.bf16.mxu0 %v24341_v13 }
 0x761   :  { %v11859_v3 = vsel %vm4524_vm0, %v11858_v20, %v11857_v10  ;;  %15700 = vmatpush3.bf16.msra.mxu1 %v17139_v25  ;;  %v24491_v50 = vrot.slane %v24470_v2, 1  ;;  %v12750_v25 = vrot.slane %v22279_v58, 6  ;;  %v12752_v15 = vrot.slane %v22322_v16, 5 }
 0x762   :  { %v11861_v7 = vsel %vm7941_vm6, %v11860_v37, %v11859_v3  ;;  %v12744_v28 = vsel %vm7929_vm4, %v24490_v39, %v24489_v32  ;;  %15701 = vmatprep.subr.bf16.mxu1 %v17140_v18  ;;  %v12754_v18 = vrot.slane %v22799_v52, 4  ;;  %v24492_v38 = vrot.slane %v24467_v41, 2  ;;  %v17147_v32 = vld [vmem:[#allocation9 + $0x380] sm:$0xff]  }
 0x763   :  { %v11863_v45 = vsel %vm4526_vm2, %v11862_v24, %v11861_v7  ;;  %v12746_v26 = vsel %vm4522_vm14, %v24491_v50, %v12744_v28  ;;  %v24493_v20 = vrot.slane %v24469_v53, 1  ;;  %v13147_v27 = vcombine.high %v22900_v49, %v22900_v49  ;;  %v17145_v24 = vld [vmem:[#allocation9 + $0x338] sm:$0xff]   ;;  %16163 = vmatpush3.bf16.msra.mxu0 %v17144_v35 }
 0x764   :  { %v22930_v48 = vsel %vm7947_vm7, %v11864_v29, %v11863_v45  ;;  %v12747_v33 = vsel %vm7935_vm5, %v24472_v8, %v12746_v26  ;;  %v12454_v3 = vrot.slane %v24472_v8, 7  ;;  %v12456_v53 = vrot.slane %v22208_v60, 6  ;;  %v17148_v60 = vld [vmem:[#allocation9 + $0x280] sm:$0xff]   ;;  %15670 = vmatprep.subr.bf16.mxu0 %v17146_v59  ;;  %v17150_v26 = vld [vmem:[#allocation9 + $0x2c8] sm:$0xff]  }
 0x765   :  { %v12452_v4 = vsel %vm7929_vm4, %v24493_v20, %v24492_v38  ;;  %v12749_v10 = vsel %vm4524_vm0, %v12748_v31, %v12747_v33  ;;  %15702 = vmatpush3.bf16.msra.mxu1 %v17142_v12  ;;  %v12458_v29 = vrot.slane %v22279_v58, 5  ;;  %v12460_v7 = vrot.slane %v22322_v16, 4  ;;  %v17149_v33 = vld [vmem:[#allocation9 + $0x340] sm:$0xff]  }
 0x766   :  { %v12453_v37 = vsel %vm4522_vm14, %v24470_v2, %v12452_v4  ;;  %v12751_v41 = vsel %vm7941_vm6, %v12750_v25, %v12749_v10  ;;  %15703 = vmatprep.subr.bf16.mxu1 %v17143_v14  ;;  %v12462_v2 = vrot.slane %v22799_v52, 3  ;;  %v24494_v8 = vrot.slane %v24484_v55, 3  ;;  %v24497_v59 = vld [vmem:[#allocation67_spill] sm:$0xff]  ;;  %v17151_v10 = vld [vmem:[#allocation9 + $0x388] sm:$0xff]  }
 0x767   :  { %v12753_v39 = vsel %vm4526_vm2, %v12752_v15, %v12751_v41  ;;  %v12455_v28 = vsel %vm7935_vm5, %v12454_v3, %v12453_v37  ;;  %v24495_v12 = vrot.slane %v24485_v56, 2  ;;  %v24496_v14 = vrot.slane %v24476_v51, 1 }
 0x768   :  { %v22960_v58 = vsel %vm7947_vm7, %v12754_v18, %v12753_v39  ;;  %v12457_v16 = vsel %vm4524_vm0, %v12456_v53, %v12455_v28  ;;  %v12734_v50 = vrot.slane %v24479_v11, 7  ;;  %v9255_v52 = vpack.c.b16 %v22523_v40, %v22523_v40  ;;  %v17152_v39 = vld [vmem:[#allocation9 + $0x288] sm:$0xff]  }
 0x769   :  { %v12730_v31 = vsel %vm7929_vm4, %v24495_v12, %v24494_v8  ;;  %v12459_v25 = vsel %vm7941_vm6, %v12458_v29, %v12457_v16  ;;  %v12736_v35 = vrot.slane %v24482_v30, 6  ;;  %15704 = vmatpush3.bf16.msra.mxu1 %v17145_v24  ;;  %v12738_v20 = vrot.slane %v24483_v6, 5 }
 0x76a   :  { %v12732_v45 = vsel %vm4522_vm14, %v24496_v14, %v12730_v31  ;;  %v12461_v18 = vsel %vm4526_vm2, %v12460_v7, %v12459_v25  ;;  %v12740_v4 = vrot.slane %v22777_v61, 4  ;;  %v24498_v40 = vpack.c.b16 %v24497_v59, %v24497_v59  ;;  %15705 = vmatprep.subr.bf16.mxu1 %v17147_v32  ;;  %v24504_v14 = vld [vmem:[#allocation89_spill] sm:$0xff] }
 0x76b   :  { %v12733_v15 = vsel %vm7935_vm5, %v22138_v43, %v12732_v45  ;;  %v22982_v37 = vsel %vm7947_vm7, %v12462_v2, %v12461_v18  ;;  %v24499_v24 = vrot.slane %v24484_v55, 2  ;;  %v24500_v41 = vrot.slane %v24485_v56, 1  ;;  %v17154_v55 = vld [vmem:[#allocation9 + $0x2d0] sm:$0xff]  }
 0x76c   :  { %v12735_v38 = vsel %vm4524_vm0, %v12734_v50, %v12733_v15  ;;  %16165 = vmatmul.mubr.msk.bf16.vlgmr.msra.gmra.mrb[144].mxu0 %vm3586_vm10, %v24498_v40  ;;  %v12442_v29 = vrot.slane %v24479_v11, 6  ;;  %v22991_v7 = vunpack.c.l.b16 %v13147_v27  ;;  %v12444_v2 = vrot.slane %v24482_v30, 5  ;;  %v24505_v50 = vld [vmem:[#allocation108_spill] sm:$0xff]  ;;  %v24508_v25 = vld [vmem:[#allocation61_spill] sm:$0xff]  ;;  %v17158_v40 = vld [vmem:[#allocation9 + $0x2d8] sm:$0xff]  }
 0x76d   :  { %v12737_v3 = vsel %vm7941_vm6, %v12736_v35, %v12735_v38  ;;  %v12438_v53 = vsel %vm7929_vm4, %v24500_v41, %v24499_v24  ;;  %15671 = vmatpush3.bf16.msra.mxu0 %v17148_v60  ;;  %9414 = vmatprep.mubr.bf16.mxu0 %v9255_v52  ;;  %v24501_v8 = vrot.slane %v22138_v43, 7  ;;  %v12446_v27 = vrot.slane %v24483_v6, 4  ;;  %v24502_v60 = vld [vmem:[#allocation65_spill] sm:$0xff]  ;;  %v24509_v35 = vld [vmem:[#allocation96_spill] sm:$0xff] }
 0x76e   :  { %v12739_v32 = vsel %vm4526_vm2, %v12738_v20, %v12737_v3  ;;  %v12439_v28 = vsel %vm4522_vm14, %v24476_v51, %v12438_v53  ;;  %15672 = vmatprep.subr.bf16.mxu0 %v17150_v26  ;;  %v12448_v12 = vrot.slane %v22777_v61, 3  ;;  %v23006_v31 = vunpack.c.l.b16 %v22313_v57  ;;  %15706 = vmatpush3.bf16.msra.mxu1 %v17149_v33  ;;  %v17153_v51 = vld [vmem:[#allocation9 + $0x348] sm:$0xff]   ;;  %v17155_v52 = vld [vmem:[#allocation9 + $0x390] sm:$0xff]   ;;  %v24506_v26 = vld [vmem:[#allocation75_spill] sm:$0xff] }
 0x76f   :  { %v22998_v56 = vsel %vm7947_vm7, %v12740_v4, %v12739_v32  ;;  %v12441_v11 = vsel %vm7935_vm5, %v24501_v8, %v12439_v28  ;;  %v24503_v16 = vrot.slane %v24502_v60, 1  ;;  %v13482_v43 = vrot.slane %v24505_v50, 6  ;;  %15707 = vmatprep.subr.bf16.mxu1 %v17151_v10  ;;  %v17156_v18 = vld [vmem:[#allocation9 + $0x290] sm:$0xff]   ;;  %v17159_v8 = vld [vmem:[#allocation9 + $0x398] sm:$0xff]  }
 0x770   :  { %v12443_v30 = vsel %vm4524_vm0, %v12442_v29, %v12441_v11  ;;  %v24507_v61 = vrot.slane %v24506_v26, 7  ;;  %v13484_v15 = vrot.slane %v24508_v25, 5  ;;  %v13486_v33 = vrot.slane %v24509_v35, 4 }
 0x771   :  { %v13479_v45 = vsel %vm7929_vm4, %v24504_v14, %v24503_v16  ;;  %v12445_v6 = vsel %vm7941_vm6, %v12444_v2, %v12443_v30  ;;  %15673 = vmatpush3.bf16.msra.mxu0 %v17152_v39  ;;  %v13488_v4 = vrot.slane %v22914_v17, 3  ;;  %v13490_v59 = vrot.slane %v22991_v7, 2  ;;  %v17157_v39 = vld [vmem:[#allocation9 + $0x350] sm:$0xff]  }
 0x772   :  { %v13481_v57 = vsel %vm4522_vm14, %v24507_v61, %v13479_v45  ;;  %v12447_v38 = vsel %vm4526_vm2, %v12446_v27, %v12445_v6  ;;  %15674 = vmatprep.subr.bf16.mxu0 %v17154_v55  ;;  %v24510_v24 = vrot.slane %v24504_v14, 7  ;;  %v13190_v53 = vrot.slane %v24505_v50, 5  ;;  %15708 = vmatpush3.bf16.msra.mxu1 %v17153_v51  ;;  %v17160_v51 = vld [vmem:[#allocation9 + $0x298] sm:$0xff]  }
 0x773   :  { %v13483_v20 = vsel %vm7935_vm5, %v13482_v43, %v13481_v57  ;;  %v23025_v10 = vsel %vm7947_vm7, %v12448_v12, %v12447_v38  ;;  %v23034_v29 = vunpack.c.l.b16 %v22900_v49  ;;  %v24511_v28 = vrot.slane %v24506_v26, 6  ;;  %15709 = vmatprep.subr.bf16.mxu1 %v17155_v52  ;;  %v24512_v43 = vld [vmem:[#allocation29_spill] sm:$0xff]  ;;  %v24513_v52 = vld [vmem:[#allocation106_spill] sm:$0xff]  ;;  %v24515_v57 = vld [vmem:[#allocation92_spill] sm:$0xff] }
 0x774   :  { %v13485_v3 = vsel %vm4524_vm0, %v13484_v15, %v13483_v20  ;;  %v13187_v41 = vsel %vm7929_vm4, %v24510_v24, %v24502_v60  ;;  %v13192_v55 = vrot.slane %v24508_v25, 4  ;;  %v13194_v12 = vrot.slane %v24509_v35, 3 }
 0x775   :  { %v13487_v32 = vsel %vm7941_vm6, %v13486_v33, %v13485_v3  ;;  %v13189_v2 = vsel %vm4522_vm14, %v24511_v28, %v13187_v41  ;;  %v13196_v49 = vrot.slane %v22914_v17, 2  ;;  %15675 = vmatpush3.bf16.msra.mxu0 %v17156_v18  ;;  %v13198_v45 = vrot.slane %v22991_v7, 1  ;;  %v17162_v33 = vld [vmem:[#allocation9 + $0x2e0] sm:$0xff]   ;;  %v17161_v3 = vld [vmem:[#allocation9 + $0x358] sm:$0xff]  }
 0x776   :  { %v13489_v11 = vsel %vm4526_vm2, %v13488_v4, %v13487_v32  ;;  %v13191_v27 = vsel %vm7935_vm5, %v13190_v53, %v13189_v2  ;;  %v24514_v6 = vrot.slane %v24513_v52, 7  ;;  %v13176_v15 = vrot.slane %v24515_v57, 5  ;;  %15676 = vmatprep.subr.bf16.mxu0 %v17158_v40  ;;  %v24517_v4 = vld [vmem:[#allocation94_spill] sm:$0xff]  ;;  %15710 = vmatpush3.bf16.msra.mxu1 %v17157_v39  ;;  %v24518_v41 = vld [vmem:[#allocation95_spill] sm:$0xff] }
 0x777   :  { %v23046_v30 = vsel %vm7947_vm7, %v13490_v59, %v13489_v11  ;;  %v13193_v16 = vsel %vm4524_vm0, %v13192_v55, %v13191_v27  ;;  %v24516_v18 = vrot.slane %v24515_v57, 6  ;;  %v13470_v59 = vrot.slane %v24517_v4, 5  ;;  %15711 = vmatprep.subr.bf16.mxu1 %v17159_v8  ;;  %v24519_v55 = vld [vmem:[#allocation39_spill] sm:$0xff]  ;;  %v24520_v11 = vld [vmem:[#allocation26_spill] sm:$0xff] }
 0x778   :  { %v13467_v61 = vsel %vm4522_vm14, %v24514_v6, %v24512_v43  ;;  %v13195_v38 = vsel %vm7941_vm6, %v13194_v12, %v13193_v16  ;;  %v13472_v53 = vrot.slane %v24518_v41, 4  ;;  %v13474_v32 = vrot.slane %v23006_v31, 3  ;;  %v17163_v16 = vld [vmem:[#allocation9 + $0x2a0] sm:$0xff]  }
 0x779   :  { %v13469_v20 = vsel %vm7935_vm5, %v24516_v18, %v13467_v61  ;;  %v13197_v24 = vsel %vm4526_vm2, %v13196_v49, %v13195_v38  ;;  %v13476_v28 = vrot.slane %v23034_v29, 2  ;;  %v24521_v27 = vrot.slane %v24520_v11, 7  ;;  %15677 = vmatpush3.bf16.msra.mxu0 %v17160_v51  ;;  %v17165_v61 = vld [vmem:[#allocation9 + $0x2e8] sm:$0xff]   ;;  %v17164_v51 = vld [vmem:[#allocation9 + $0x440] sm:$0xff]  }
 0x77a   :  { %v23065_v40 = vsel %vm7947_vm7, %v13198_v45, %v13197_v24  ;;  %v13471_v2 = vsel %vm4524_vm0, %v13470_v59, %v13469_v20  ;;  %v13178_v12 = vrot.slane %v24517_v4, 4  ;;  %v14051_v49 = vrot.slane %v24513_v52, 1  ;;  %15678 = vmatprep.subr.bf16.mxu0 %v17162_v33  ;;  %15712 = vmatpush3.bf16.msra.mxu1 %v17161_v3 }
 0x77b   :  { %v13173_v39 = vsel %vm7929_vm4, %v24521_v27, %v24519_v55  ;;  %v13473_v43 = vsel %vm7941_vm6, %v13472_v53, %v13471_v2  ;;  %v24522_v8 = vrot.slane %v24513_v52, 6  ;;  %v13180_v6 = vrot.slane %v24518_v41, 3  ;;  %16192 = vmatprep.subr.bf16.mxu1 %v24341_v13 }
 0x77c   :  { %v13475_v38 = vsel %vm4526_vm2, %v13474_v32, %v13473_v43  ;;  %v13182_v20 = vrot.slane %v23006_v31, 2  ;;  %v13184_v59 = vrot.slane %v23034_v29, 1  ;;  %v24523_v2 = vrot.slane %v24502_v60, 3  ;;  %v17166_v43 = vld [vmem:[#allocation9 + $0x2a8] sm:$0xff]  }
 0x77d   :  { %v13175_v45 = vsel %vm4522_vm14, %v24522_v8, %v13173_v39  ;;  %v23084_v24 = vsel %vm7947_vm7, %v13476_v28, %v13475_v38  ;;  %v24524_v33 = vrot.slane %v24504_v14, 2  ;;  %v14068_v32 = vrot.slane %v24508_v25, 7  ;;  %15679 = vmatpush3.bf16.msra.mxu0 %v17163_v16 }
 0x77e   :  { %v13177_v18 = vsel %vm7935_vm5, %v13176_v15, %v13175_v45  ;;  %v9546_v15 = vpack.c.b16 %v22539_v36, %v22539_v36  ;;  %v24525_v28 = vrot.slane %v24506_v26, 1  ;;  %v14072_v38 = vrot.slane %v22914_v17, 5  ;;  %15680 = vmatprep.subr.bf16.mxu0 %v17165_v61 }
 0x77f   :  { %v13179_v53 = vsel %vm4524_vm0, %v13178_v12, %v13177_v18  ;;  %v14064_v27 = vsel %vm7929_vm4, %v24524_v33, %v24523_v2  ;;  %v14070_v12 = vrot.slane %v24509_v35, 6  ;;  %v14074_v36 = vrot.slane %v22991_v7, 4 }
 0x780   :  { %v13181_v3 = vsel %vm7941_vm6, %v13180_v6, %v13179_v53  ;;  %v14066_v39 = vsel %vm4522_vm14, %v24525_v28, %v14064_v27  ;;  %9707 = vmatmul.mubr.bf16.vlgmr.msra.gmra.mrb[176].mxu1 %v9546_v15  ;;  %v17168_v6 = vld [vmem:[#allocation9 + $0x2f0] sm:$0xff]   ;;  %v24526_v16 = vrot.slane %v24502_v60, 2  ;;  %v24527_v2 = vrot.slane %v24504_v14, 1 }
 0x781   :  { %v13183_v8 = vsel %vm4526_vm2, %v13182_v20, %v13181_v3  ;;  %v14067_v45 = vsel %vm7935_vm5, %v24505_v50, %v14066_v39  ;;  %v13774_v33 = vrot.slane %v24505_v50, 7  ;;  %v13757_v27 = vrot.slane %v24520_v11, 1  ;;  %16193 = vmatpush3.bf16.msra.mxu1 %v17164_v51  ;;  %v17167_v3 = vld [vmem:[#allocation9 + $0x448] sm:$0xff]   ;;  %16200 = vmatprep.mubr.msk.bf16.mxu1 %vm17785_vm8, %v24341_v13  ;;  %v17169_v15 = vld [vmem:[#allocation9 + $0x2b0] sm:$0xff]  }
 0x782   :  { %v23107_v18 = vsel %vm7947_vm7, %v13184_v59, %v13183_v8  ;;  %v14069_v53 = vsel %vm4524_vm0, %v14068_v32, %v14067_v45  ;;  %v13772_v20 = vsel %vm7929_vm4, %v24527_v2, %v24526_v16  ;;  %v13776_v60 = vrot.slane %v24508_v25, 6  ;;  %16194 = vmatprep.subr.bf16.mxu1 %v24341_v13  ;;  %15681 = vmatpush3.bf16.msra.mxu0 %v17166_v43 }
 0x783   :  { %v14071_v61 = vsel %vm7941_vm6, %v14070_v12, %v14069_v53  ;;  %v13773_v59 = vsel %vm4522_vm14, %v24506_v26, %v13772_v20  ;;  %v13778_v32 = vrot.slane %v24509_v35, 5  ;;  %v13780_v51 = vrot.slane %v22914_v17, 4  ;;  %15682 = vmatprep.subr.bf16.mxu0 %v17168_v6  ;;  %v17171_v35 = vld [vmem:[#allocation9 + $0x2f8] sm:$0xff]  }
 0x784   :  { %v14073_v14 = vsel %vm4526_vm2, %v14072_v38, %v14071_v61  ;;  %v13775_v50 = vsel %vm7935_vm5, %v13774_v33, %v13773_v59  ;;  %v13782_v26 = vrot.slane %v22991_v7, 3  ;;  %v24528_v25 = vrot.slane %v24519_v55, 3 }
 0x785   :  { %v23129_v28 = vsel %vm7947_vm7, %v14074_v36, %v14073_v14  ;;  %v13777_v39 = vsel %vm4524_vm0, %v13776_v60, %v13775_v50  ;;  %v24529_v12 = vrot.slane %v24520_v11, 2  ;;  %v13760_v45 = vrot.slane %v24515_v57, 7  ;;  %16195 = vmatpush3.bf16.msra.mxu1 %v17167_v3  ;;  %v17170_v36 = vld [vmem:[#allocation9 + $0x450] sm:$0xff]   ;;  %v17172_v3 = vld [vmem:[#allocation9 + $0x2b8] sm:$0xff]  }
 0x786   :  { %v13779_v17 = vsel %vm7941_vm6, %v13778_v32, %v13777_v39  ;;  %v14054_v38 = vrot.slane %v24517_v4, 7  ;;  %v14056_v11 = vrot.slane %v24518_v41, 6  ;;  %v14058_v16 = vrot.slane %v23006_v31, 5  ;;  %16196 = vmatprep.subr.bf16.mxu1 %v24341_v13  ;;  %15683 = vmatpush3.bf16.msra.mxu0 %v17169_v15  ;;  %v24532_v15 = vld [vmem:[#allocation40_spill] sm:$0xff]  ;;  %v24533_v39 = vld [vmem:[#allocation79_spill] sm:$0xff] }
 0x787   :  { %v14050_v8 = vsel %vm7929_vm4, %v24529_v12, %v24528_v25  ;;  %v13781_v7 = vsel %vm4526_vm2, %v13780_v51, %v13779_v17  ;;  %v14060_v2 = vrot.slane %v23034_v29, 4  ;;  %v24530_v20 = vrot.slane %v24519_v55, 2  ;;  %15684 = vmatprep.subr.bf16.mxu0 %v17171_v35  ;;  %v17173_v51 = vld [vmem:[#allocation9 + $0x458] sm:$0xff]  }
 0x788   :  { %v14052_v43 = vsel %vm4522_vm14, %v14051_v49, %v14050_v8  ;;  %v23149_v6 = vsel %vm7947_vm7, %v13782_v26, %v13781_v7  ;;  %v13762_v14 = vrot.slane %v24517_v4, 6  ;;  %v13764_v55 = vrot.slane %v24518_v41, 5  ;;  %v24535_v8 = vld [vmem:[#allocation74_spill] sm:$0xff]  ;;  %v17176_v7 = vld [vmem:[#allocation9 + $0x460] sm:$0xff]  }
 0x789   :  { %v14053_v53 = vsel %vm7935_vm5, %v24515_v57, %v14052_v43  ;;  %v13758_v33 = vsel %vm7929_vm4, %v13757_v27, %v24530_v20  ;;  %v24531_v57 = vld [vmem:[#allocation35_spill] sm:$0xff]  ;;  %v13766_v27 = vrot.slane %v23006_v31, 4  ;;  %16197 = vmatpush3.bf16.msra.mxu1 %v17170_v36  ;;  %v24534_v26 = vrot.slane %v24533_v39, 5  ;;  %v24538_v20 = vld [vmem:[#allocation66_spill] sm:$0xff] }
 0x78a   :  { %v14055_v49 = vsel %vm4524_vm0, %v14054_v38, %v14053_v53  ;;  %v9836_v61 = vrot.slane %v24531_v57, 3  ;;  %v13759_v60 = vsel %vm4522_vm14, %v24513_v52, %v13758_v33  ;;  %v13768_v12 = vrot.slane %v23034_v29, 3  ;;  %16198 = vmatprep.subr.bf16.mxu1 %v24341_v13  ;;  %15685 = vmatpush3.bf16.msra.mxu0 %v17172_v3  ;;  %v17175_v43 = vld [vmem:[#allocation9 + $0x3a0] sm:$0xff]   ;;  %v17179_v3 = vld [vmem:[#allocation9 + $0x468] sm:$0xff]  }
 0x78b   :  { %v14057_v59 = vsel %vm7941_vm6, %v14056_v11, %v14055_v49  ;;  %v13761_v32 = vsel %vm7935_vm5, %v13760_v45, %v13759_v60  ;;  %v9833_v25 = vsel %vm7941_vm6, %v24534_v26, %v24532_v15  ;;  %v24536_v41 = vrot.slane %v24535_v8, 4  ;;  %v17174_v45 = vld [vmem:[#allocation9 + $0x4a0] sm:$0xff]   ;;  %16180 = vmatprep.subr.bf16.mxu0 %v24341_v13  ;;  %v17177_v11 = vld [vmem:[#allocation9 + $0x4a8] sm:$0xff]   ;;  %v17180_v60 = vld [vmem:[#allocation9 + $0x4b0] sm:$0xff]  }
 0x78c   :  { %v14059_v50 = vsel %vm4526_vm2, %v14058_v16, %v14057_v59  ;;  %v13763_v4 = vsel %vm4524_vm0, %v13762_v14, %v13761_v32  ;;  %v9254_v36 = vpack.c.b16 %v22563_v47, %v22563_v47  ;;  %v10131_v16 = vpack.c.b16 %v22593_v9, %v22593_v9  ;;  %v17178_v49 = vld [vmem:[#allocation9 + $0x3a8] sm:$0xff]   ;;  %v17182_v26 = vld [vmem:[#allocation9 + $0x470] sm:$0xff]  }
 0x78d   :  { %v23170_v52 = vsel %vm7947_vm7, %v14060_v2, %v14059_v50  ;;  %v9835_v31 = vsel %vm4526_vm2, %v24536_v41, %v9833_v25  ;;  %v13765_v35 = vsel %vm7941_vm6, %v13764_v55, %v13763_v4  ;;  %16199 = vmatpush3.bf16.msra.mxu1 %v17173_v51  ;;  %v24537_v47 = vld [vmem:[#allocation80_spill] sm:$0xff]  ;;  %v9532_v33 = vrot.slane %v24538_v20, 1  ;;  %v17181_v50 = vld [vmem:[#allocation9 + $0x3b0] sm:$0xff]  }
 0x78e   :  { %v9837_v17 = vsel %vm7947_vm7, %v9836_v61, %v9835_v31  ;;  %v13767_v38 = vsel %vm4526_vm2, %v13766_v27, %v13765_v35  ;;  %9415 = vmatmul.mubr.bf16.vlgmr.msra.gmra.mrb[148].mxu0 %v9254_v36  ;;  %15751 = vmatprep.subr.bf16.mxu1 %v17174_v45  ;;  %v9534_v2 = vrot.slane %v24537_v47, 7  ;;  %v24539_v61 = vld [vmem:[#allocation83_spill] sm:$0xff]  ;;  %v24540_v9 = vld [vmem:[#allocation76_spill] sm:$0xff]  ;;  %v9540_v27 = vrot.slane %v24533_v39, 4  ;;  %v17196_v20 = vld [vmem:[#allocation9 + $0x3d0] sm:$0xff]  }
 0x78f   :  { %v23185_v29 = vsel %vm7947_vm7, %v13768_v12, %v13767_v38  ;;  %v9840_v53 = vpack.c.b16 %v9837_v17, %v9837_v17  ;;  %16181 = vmatpush3.bf16.msra.mxu0 %v17175_v43  ;;  %16188 = vmatprep.mubr.msk.bf16.mxu0 %vm17785_vm8, %v24341_v13  ;;  %v9536_v59 = vrot.slane %v24539_v61, 6  ;;  %v9538_v14 = vrot.slane %v24540_v9, 5  ;;  %v24541_v32 = vld [vmem:[#allocation64_spill] sm:$0xff]  ;;  %v17183_v12 = vld [vmem:[#allocation9 + $0x4b8] sm:$0xff]  }
 0x790   :  { %16182 = vmatprep.subr.bf16.mxu0 %v24341_v13  ;;  %v9533_v55 = vsel %vm7929_vm4, %v24541_v32, %v9532_v33  ;;  %v9542_v15 = vrot.slane %v24535_v8, 3  ;;  %v9544_v4 = vrot.slane %v24531_v57, 2  ;;  %v17184_v31 = vld [vmem:[#allocation9 + $0x3b8] sm:$0xff]   ;;  %v17186_v35 = vld [vmem:[#allocation9 + $0x400] sm:$0xff]   ;;  %v17190_v36 = vld [vmem:[#allocation9 + $0x408] sm:$0xff]   ;;  %v10130_v32 = vpack.c.b16 %v22631_v22, %v22631_v22 }
 0x791   :  { %16201 = vmatmul.mubr.msk.bf16.vlgmr.msra.gmra.mrb[180].mxu1 %vm3586_vm10, %v9840_v53  ;;  %v9535_v51 = vsel %vm4522_vm14, %v9534_v2, %v9533_v55  ;;  %v17185_v8 = vld [vmem:[#allocation9 + $0x478] sm:$0xff]   ;;  %v17187_v43 = vld [vmem:[#allocation9 + $0x4c0] sm:$0xff]   ;;  %v17193_v47 = vld [vmem:[#allocation9 + $0x488] sm:$0xff]  }
 0x792   :  { %15752 = vmatpush3.bf16.msra.mxu1 %v17176_v7  ;;  %10290 = vmatprep.mubr.bf16.mxu1 %v10131_v16  ;;  %v9537_v25 = vsel %vm7935_vm5, %v9536_v59, %v9535_v51  ;;  %v17188_v57 = vld [vmem:[#allocation9 + $0x3c0] sm:$0xff]   ;;  %v9839_v7 = vpack.c.b16 %v22611_v1, %v22611_v1  ;;  %v17192_v16 = vld [vmem:[#allocation9 + $0x3c8] sm:$0xff]   ;;  %v17195_v2 = vld [vmem:[#allocation9 + $0x4d0] sm:$0xff]  }
 0x793   :  { %15753 = vmatprep.subr.bf16.mxu1 %v17177_v11  ;;  %16183 = vmatpush3.bf16.msra.mxu0 %v17178_v49  ;;  %v9539_v41 = vsel %vm4524_vm0, %v9538_v14, %v9537_v25  ;;  %v17189_v53 = vld [vmem:[#allocation9 + $0x480] sm:$0xff]   ;;  %v17191_v11 = vld [vmem:[#allocation9 + $0x4c8] sm:$0xff]   ;;  %v17194_v49 = vld [vmem:[#allocation9 + $0x410] sm:$0xff]  }
 0x794   :  { %16184 = vmatprep.subr.bf16.mxu0 %v24341_v13  ;;  %v9541_v39 = vsel %vm7941_vm6, %v9540_v27, %v9539_v41  ;;  %v17198_v33 = vld [vmem:[#allocation9 + $0x418] sm:$0xff]   ;;  %v17197_v1 = vld [vmem:[#allocation9 + $0x490] sm:$0xff]   ;;  %v17202_v59 = vld [vmem:[#allocation9 + $0x420] sm:$0xff]  }
 0x795   :  { %v9543_v45 = vsel %vm4526_vm2, %v9542_v15, %v9541_v39  ;;  %v17200_v61 = vld [vmem:[#allocation9 + $0x3d8] sm:$0xff]   ;;  %v17203_v9 = vld [vmem:[#allocation9 + $0x3e0] sm:$0xff]   ;;  %v17205_v14 = vld [vmem:[#allocation9 + $0x428] sm:$0xff]  }
 0x796   :  { %15754 = vmatpush3.bf16.msra.mxu1 %v17179_v3  ;;  %v9545_v17 = vsel %vm7947_vm7, %v9544_v4, %v9543_v45  ;;  %v17199_v3 = vld [vmem:[#allocation9 + $0x4d8] sm:$0xff]   ;;  %v17206_v55 = vld [vmem:[#allocation9 + $0x3e8] sm:$0xff]   ;;  %v17208_v27 = vld [vmem:[#allocation9 + $0x430] sm:$0xff]  }
 0x797   :  { %15755 = vmatprep.subr.bf16.mxu1 %v17180_v60  ;;  %16185 = vmatpush3.bf16.msra.mxu0 %v17181_v50  ;;  %v9548_v38 = vpack.c.b16 %v9545_v17, %v9545_v17  ;;  %v17201_v60 = vld [vmem:[#allocation9 + $0x498] sm:$0xff]   ;;  %v17204_v50 = vld [vmem:[#allocation9 + $0x580] sm:$0xff]   ;;  %v17209_v22 = vld [vmem:[#allocation9 + $0x3f0] sm:$0xff]  }
 0x798   :  { %16186 = vmatprep.subr.bf16.mxu0 %v24341_v13  ;;  %v24542_v51 = vld [vmem:[#allocation34_spill] sm:$0xff]  ;;  %v24543_v25 = vld [vmem:[#allocation52_spill] sm:$0xff]  ;;  %v24545_v39 = vld [vmem:[#allocation53_spill] sm:$0xff] }
 0x799   :  { %v10560_v15 = vrot.slane %v24542_v51, 7  ;;  %v10562_v4 = vrot.slane %v24543_v25, 6  ;;  %v10566_v45 = vrot.slane %v24545_v39, 4 }
 0x79a   :  { %15756 = vmatpush3.bf16.msra.mxu1 %v17182_v26  ;;  %v17207_v26 = vld [vmem:[#allocation9 + $0x588] sm:$0xff]  }
 0x79b   :  { %15757 = vmatprep.subr.bf16.mxu1 %v17183_v12  ;;  %16187 = vmatpush3.bf16.msra.mxu0 %v17184_v31  ;;  %v24544_v12 = vld [vmem:[#allocation68_spill] sm:$0xff]  ;;  %v17211_v31 = vld [vmem:[#allocation9 + $0x438] sm:$0xff]  }
 0x79c   :  { %15724 = vmatprep.subr.bf16.mxu0 %v17186_v35  ;;  %v10564_v41 = vrot.slane %v24544_v12, 5  ;;  %v17210_v35 = vld [vmem:[#allocation9 + $0x590] sm:$0xff]  }
 0x79e   :  { %15758 = vmatpush3.bf16.msra.mxu1 %v17185_v8  ;;  %16189 = vmatmul.mubr.msk.bf16.vlgmr.msra.gmra.mrb[152].mxu0 %vm3586_vm10, %v9548_v38  ;;  %v24546_v8 = vld [vmem:[#allocation49_spill] sm:$0xff] }
 0x79f   :  { %15759 = vmatprep.subr.bf16.mxu1 %v17187_v43  ;;  %15725 = vmatpush3.bf16.msra.mxu0 %v17188_v57  ;;  %v10561_v17 = vsel %vm7929_vm4, %v10560_v15, %v24546_v8  ;;  %v24547_v43 = vld [vmem:[#allocation62_spill] sm:$0xff] }
 0x7a0   :  { %9998 = vmatprep.mubr.bf16.mxu0 %v9839_v7  ;;  %15726 = vmatprep.subr.bf16.mxu0 %v17190_v36  ;;  %v10568_v57 = vrot.slane %v24547_v43, 3  ;;  %v10563_v38 = vsel %vm4522_vm14, %v10562_v4, %v10561_v17  ;;  %v24548_v36 = vld [vmem:[#allocation63_spill] sm:$0xff]  ;;  %v17222_v15 = vld [vmem:[#allocation9 + $0x5b0] sm:$0xff]   ;;  %v17230_v17 = vld [vmem:[#allocation9 + $0x548] sm:$0xff]  }
 0x7a1   :  { %v10570_v7 = vrot.slane %v24548_v36, 2  ;;  %v17226_v4 = vld [vmem:[#allocation9 + $0x540] sm:$0xff]  }
 0x7a2   :  { %15760 = vmatpush3.bf16.msra.mxu1 %v17189_v53  ;;  %v17212_v53 = vld [vmem:[#allocation9 + $0x3f8] sm:$0xff]  }
 0x7a3   :  { %15761 = vmatprep.subr.bf16.mxu1 %v17191_v11  ;;  %15727 = vmatpush3.bf16.msra.mxu0 %v17192_v16  ;;  %v10565_v11 = vsel %vm7935_vm5, %v10564_v41, %v10563_v38  ;;  %v24549_v16 = vld [vmem:[#allocation69_spill] sm:$0xff]  ;;  %v17227_v41 = vld [vmem:[#allocation9 + $0x600] sm:$0xff]  }
 0x7a4   :  { %15728 = vmatprep.subr.bf16.mxu0 %v17194_v49  ;;  %v10572_v49 = vrot.slane %v24549_v16, 1  ;;  %v17229_v38 = vld [vmem:[#allocation9 + $0x5c0] sm:$0xff]  }
 0x7a6   :  { %15762 = vmatpush3.bf16.msra.mxu1 %v17193_v47  ;;  %v10567_v47 = vsel %vm4524_vm0, %v10566_v45, %v10565_v11  ;;  %v24550_v45 = vld [vmem:[#allocation48_spill] sm:$0xff]  ;;  %v17234_v11 = vld [vmem:[#allocation9 + $0x550] sm:$0xff]  }
 0x7a7   :  { %15763 = vmatprep.subr.bf16.mxu1 %v17195_v2  ;;  %15729 = vmatpush3.bf16.msra.mxu0 %v17196_v20  ;;  %v17213_v2 = vld [vmem:[#allocation9 + $0x598] sm:$0xff]   ;;  %v10569_v20 = vsel %vm7941_vm6, %v10568_v57, %v10567_v47  ;;  %v10575_v57 = vpack.c.b16 %v22698_v34, %v22698_v34  ;;  %v17235_v47 = vld [vmem:[#allocation9 + $0x610] sm:$0xff]  }
 0x7a8   :  { %15730 = vmatprep.subr.bf16.mxu0 %v17198_v33  ;;  %v10571_v33 = vsel %vm4526_vm2, %v10570_v7, %v10569_v20  ;;  %v17231_v7 = vld [vmem:[#allocation9 + $0x608] sm:$0xff]   ;;  %v17238_v20 = vld [vmem:[#allocation9 + $0x558] sm:$0xff]   ;;  %v17237_v34 = vld [vmem:[#allocation9 + $0x5d0] sm:$0xff]  }
 0x7aa   :  { %15764 = vmatpush3.bf16.msra.mxu1 %v17197_v1  ;;  %v17214_v1 = vld [vmem:[#allocation9 + $0x5e0] sm:$0xff]  }
 0x7ab   :  { %15765 = vmatprep.subr.bf16.mxu1 %v17199_v3  ;;  %15731 = vmatpush3.bf16.msra.mxu0 %v17200_v61  ;;  %v10573_v3 = vsel %vm7947_vm7, %v10572_v49, %v10571_v33  ;;  %v17215_v61 = vld [vmem:[#allocation9 + $0x4e0] sm:$0xff]   ;;  %v17233_v49 = vld [vmem:[#allocation9 + $0x5c8] sm:$0xff]   ;;  %v17239_v33 = vld [vmem:[#allocation9 + $0x618] sm:$0xff]  }
 0x7ac   :  { %15732 = vmatprep.subr.bf16.mxu0 %v17202_v59  ;;  %v9838_v59 = vpack.c.b16 %v22658_v62, %v22658_v62  ;;  %v17219_v62 = vld [vmem:[#allocation9 + $0x5a8] sm:$0xff]  }
 0x7ae   :  { %15766 = vmatpush3.bf16.msra.mxu1 %v17201_v60  ;;  %v17216_v60 = vld [vmem:[#allocation9 + $0x5a0] sm:$0xff]  }
 0x7af   :  { %16216 = vmatprep.subr.bf16.mxu1 %v24341_v13  ;;  %15733 = vmatpush3.bf16.msra.mxu0 %v17203_v9  ;;  %v10576_v9 = vpack.c.b16 %v10573_v3, %v10573_v3  ;;  %v17242_v3 = vld [vmem:[#allocation9 + $0x560] sm:$0xff]  }
 0x7b0   :  { %15734 = vmatprep.subr.bf16.mxu0 %v17205_v14  ;;  %v17217_v14 = vld [vmem:[#allocation9 + $0x5e8] sm:$0xff]  }
 0x7b1   :  { %10291 = vmatmul.mubr.bf16.vlgmr.msra.gmra.mrb[184].mxu1 %v10130_v32  ;;  %v17218_v32 = vld [vmem:[#allocation9 + $0x4e8] sm:$0xff]  }
 0x7b2   :  { %16217 = vmatpush3.bf16.msra.mxu1 %v17204_v50  ;;  %16224 = vmatprep.mubr.msk.bf16.mxu1 %vm17785_vm8, %v24341_v13  ;;  %v10867_v50 = vpack.c.b16 %v22678_v44, %v22678_v44  ;;  %v17223_v44 = vld [vmem:[#allocation9 + $0x5f8] sm:$0xff]  }
 0x7b3   :  { %16218 = vmatprep.subr.bf16.mxu1 %v24341_v13  ;;  %15735 = vmatpush3.bf16.msra.mxu0 %v17206_v55  ;;  %v17220_v55 = vld [vmem:[#allocation9 + $0x5f0] sm:$0xff]  }
 0x7b4   :  { %15736 = vmatprep.subr.bf16.mxu0 %v17208_v27  ;;  %v17221_v27 = vld [vmem:[#allocation9 + $0x4f0] sm:$0xff]  }
 0x7b6   :  { %16219 = vmatpush3.bf16.msra.mxu1 %v17207_v26  ;;  %v17224_v26 = vld [vmem:[#allocation9 + $0x4f8] sm:$0xff]  }
 0x7b7   :  { %16220 = vmatprep.subr.bf16.mxu1 %v24341_v13  ;;  %15737 = vmatpush3.bf16.msra.mxu0 %v17209_v22  ;;  %v17225_v22 = vld [vmem:[#allocation9 + $0x5b8] sm:$0xff]  }
 0x7b8   :  { %15738 = vmatprep.subr.bf16.mxu0 %v17211_v31  ;;  %v17228_v31 = vld [vmem:[#allocation9 + $0x500] sm:$0xff]  }
 0x7ba   :  { %16221 = vmatpush3.bf16.msra.mxu1 %v17210_v35  ;;  %v10132_v35 = vpack.c.b16 %v24550_v45, %v24550_v45  ;;  %v11154_v45 = vrot.slane %v24548_v36, 4 }
 0x7bb   :  { %16222 = vmatprep.subr.bf16.mxu1 %v24341_v13  ;;  %15739 = vmatpush3.bf16.msra.mxu0 %v17212_v53  ;;  %v17232_v53 = vld [vmem:[#allocation9 + $0x508] sm:$0xff]  }
 0x7bc   :  { %16204 = vmatprep.subr.bf16.mxu0 %v24341_v13 }
 0x7be   :  { %16223 = vmatpush3.bf16.msra.mxu1 %v17213_v2  ;;  %9999 = vmatmul.mubr.bf16.vlgmr.msra.gmra.mrb[156].mxu0 %v9838_v59  ;;  %v17236_v2 = vld [vmem:[#allocation9 + $0x510] sm:$0xff]   ;;  %v17243_v59 = vld [vmem:[#allocation9 + $0x520] sm:$0xff]  }
 0x7bf   :  { %15805 = vmatprep.subr.bf16.mxu1 %v17214_v1  ;;  %16205 = vmatpush3.bf16.msra.mxu0 %v17215_v61  ;;  %v17240_v1 = vld [vmem:[#allocation9 + $0x518] sm:$0xff]  }
 0x7c0   :  { %16212 = vmatprep.mubr.msk.bf16.mxu0 %vm17785_vm8, %v24341_v13  ;;  %16206 = vmatprep.subr.bf16.mxu0 %v24341_v13  ;;  %v17241_v61 = vld [vmem:[#allocation9 + $0x5d8] sm:$0xff]  }
 0x7c1   :  { %16225 = vmatmul.mubr.msk.bf16.vlgmr.msra.gmra.mrb[188].mxu1 %vm3586_vm10, %v10576_v9  ;;  %v17244_v9 = vld [vmem:[#allocation9 + $0x6c0] sm:$0xff]  }
 0x7c2   :  { %15806 = vmatpush3.bf16.msra.mxu1 %v17216_v60  ;;  %11026 = vmatprep.mubr.bf16.mxu1 %v10867_v50  ;;  %v17245_v60 = vld [vmem:[#allocation9 + $0x568] sm:$0xff]  }
 0x7c3   :  { %15807 = vmatprep.subr.bf16.mxu1 %v17217_v14  ;;  %16207 = vmatpush3.bf16.msra.mxu0 %v17218_v32  ;;  %v10866_v14 = vpack.c.b16 %v22721_v54, %v22721_v54  ;;  %v17246_v50 = vld [vmem:[#allocation9 + $0x528] sm:$0xff]   ;;  %v17248_v32 = vld [vmem:[#allocation9 + $0x570] sm:$0xff]  }
 0x7c4   :  { %16208 = vmatprep.subr.bf16.mxu0 %v24341_v13  ;;  %v17249_v54 = vld [vmem:[#allocation9 + $0x530] sm:$0xff]  }
 0x7c6   :  { %15808 = vmatpush3.bf16.msra.mxu1 %v17219_v62  ;;  %v11145_v62 = vrot.slane %v24542_v51, 1 }
 0x7c7   :  { %15809 = vmatprep.subr.bf16.mxu1 %v17220_v55  ;;  %16209 = vmatpush3.bf16.msra.mxu0 %v17221_v27  ;;  %v17247_v55 = vld [vmem:[#allocation9 + $0x6c8] sm:$0xff]   ;;  %v11144_v27 = vrot.slane %v24546_v8, 2 }
 0x7c8   :  { %16210 = vmatprep.subr.bf16.mxu0 %v24341_v13 }
 0x7ca   :  { %15810 = vmatpush3.bf16.msra.mxu1 %v17222_v15  ;;  %v11148_v15 = vrot.slane %v24544_v12, 7 }
 0x7cb   :  { %15811 = vmatprep.subr.bf16.mxu1 %v17223_v44  ;;  %16211 = vmatpush3.bf16.msra.mxu0 %v17224_v26  ;;  %v17251_v44 = vld [vmem:[#allocation9 + $0x578] sm:$0xff]   ;;  %v11150_v26 = vrot.slane %v24545_v39, 6 }
 0x7cc   :  { %15778 = vmatprep.subr.bf16.mxu0 %v17226_v4  ;;  %v17250_v4 = vld [vmem:[#allocation9 + $0x6d0] sm:$0xff]  }
 0x7ce   :  { %15812 = vmatpush3.bf16.msra.mxu1 %v17225_v22  ;;  %16213 = vmatmul.mubr.msk.bf16.vlgmr.msra.gmra.mrb[160].mxu0 %vm3586_vm10, %v10132_v35  ;;  %v11146_v22 = vsel %vm7929_vm4, %v11145_v62, %v11144_v27  ;;  %v17252_v35 = vld [vmem:[#allocation9 + $0x538] sm:$0xff]  }
 0x7cf   :  { %15813 = vmatprep.subr.bf16.mxu1 %v17227_v41  ;;  %15779 = vmatpush3.bf16.msra.mxu0 %v17228_v31  ;;  %v11152_v41 = vrot.slane %v24547_v43, 5  ;;  %v11147_v31 = vsel %vm4522_vm14, %v24543_v25, %v11146_v22  ;;  %v17262_v22 = vld [vmem:[#allocation9 + $0x6f0] sm:$0xff]  }
 0x7d0   :  { %10734 = vmatprep.mubr.bf16.mxu0 %v10575_v57  ;;  %15780 = vmatprep.subr.bf16.mxu0 %v17230_v17  ;;  %v11149_v17 = vsel %vm7935_vm5, %v11148_v15, %v11147_v31  ;;  %v11156_v57 = vrot.slane %v24549_v16, 3  ;;  %v10864_v31 = vrot.slane %v24549_v16, 2  ;;  %v17267_v16 = vld [vmem:[#allocation9 + $0x740] sm:$0xff]  }
 0x7d2   :  { %15814 = vmatpush3.bf16.msra.mxu1 %v17229_v38  ;;  %v11151_v38 = vsel %vm4524_vm0, %v11150_v26, %v11149_v17  ;;  %v10862_v26 = vrot.slane %v24548_v36, 3 }
 0x7d3   :  { %15815 = vmatprep.subr.bf16.mxu1 %v17231_v7  ;;  %15781 = vmatpush3.bf16.msra.mxu0 %v17232_v53  ;;  %v17253_v7 = vld [vmem:[#allocation9 + $0x6d8] sm:$0xff]   ;;  %v11153_v53 = vsel %vm7941_vm6, %v11152_v41, %v11151_v38 }
 0x7d4   :  { %15782 = vmatprep.subr.bf16.mxu0 %v17234_v11  ;;  %v11155_v11 = vsel %vm4526_vm2, %v11154_v45, %v11153_v53  ;;  %v17265_v38 = vld [vmem:[#allocation9 + $0x6f8] sm:$0xff]   ;;  %v17268_v53 = vld [vmem:[#allocation9 + $0x640] sm:$0xff]  }
 0x7d6   :  { %15816 = vmatpush3.bf16.msra.mxu1 %v17233_v49  ;;  %v17254_v49 = vld [vmem:[#allocation9 + $0x720] sm:$0xff]  }
 0x7d7   :  { %15817 = vmatprep.subr.bf16.mxu1 %v17235_v47  ;;  %15783 = vmatpush3.bf16.msra.mxu0 %v17236_v2  ;;  %v11157_v47 = vsel %vm7947_vm7, %v11156_v57, %v11155_v11  ;;  %v17255_v2 = vld [vmem:[#allocation9 + $0x620] sm:$0xff]  }
 0x7d8   :  { %15784 = vmatprep.subr.bf16.mxu0 %v17238_v20  ;;  %v10574_v20 = vpack.c.b16 %v22744_v19, %v22744_v19  ;;  %v10854_v19 = vrot.slane %v24543_v25, 7  ;;  %v17266_v57 = vld [vmem:[#allocation9 + $0x680] sm:$0xff]  }
 0x7da   :  { %15818 = vmatpush3.bf16.msra.mxu1 %v17237_v34  ;;  %v17256_v34 = vld [vmem:[#allocation9 + $0x6e0] sm:$0xff]  }
 0x7db   :  { %15819 = vmatprep.subr.bf16.mxu1 %v17239_v33  ;;  %15785 = vmatpush3.bf16.msra.mxu0 %v17240_v1  ;;  %v11160_v33 = vpack.c.b16 %v11157_v47, %v11157_v47  ;;  %v17257_v1 = vld [vmem:[#allocation9 + $0x728] sm:$0xff]   ;;  %v11159_v47 = vpack.c.b16 %v22790_v23, %v22790_v23 }
 0x7dc   :  { %15786 = vmatprep.subr.bf16.mxu0 %v17242_v3  ;;  %v11451_v3 = vpack.c.b16 %v22767_v21, %v22767_v21 }
 0x7de   :  { %15820 = vmatpush3.bf16.msra.mxu1 %v17241_v61  ;;  %v17258_v61 = vld [vmem:[#allocation9 + $0x628] sm:$0xff]  }
 0x7df   :  { %16240 = vmatprep.subr.bf16.mxu1 %v24341_v13  ;;  %15787 = vmatpush3.bf16.msra.mxu0 %v17243_v59  ;;  %v10852_v59 = vrot.slane %v24546_v8, 1  ;;  %v15605_v62 = vpop.f32.mrb[160].mxu1  ;;  %v10860_v8 = vrot.slane %v24547_v43, 4 }
 0x7e0   :  { %15788 = vmatprep.subr.bf16.mxu0 %v17245_v60  ;;  %v15578_v60 = vpop.f32.mrb[128].mxu0  ;;  %v15606_v15 = vpop.f32.mrb[161].mxu1 }
 0x7e1   :  { %11027 = vmatmul.mubr.bf16.vlgmr.msra.gmra.mrb[192].mxu1 %v10866_v14  ;;  %v10856_v14 = vrot.slane %v24544_v12, 6  ;;  %v15579_v21 = vpop.f32.mrb[129].mxu0  ;;  %v10853_v25 = vsel %vm7929_vm4, %v24542_v51, %v10852_v59  ;;  %v17263_v51 = vld [vmem:[#allocation9 + $0x738] sm:$0xff]   ;;  %v17275_v59 = vld [vmem:[#allocation9 + $0x750] sm:$0xff]  }
 0x7e2   :  { %16241 = vmatpush3.bf16.msra.mxu1 %v17244_v9  ;;  %16248 = vmatprep.mubr.msk.bf16.mxu1 %vm17785_vm8, %v24341_v13  ;;  %v17259_v9 = vld [vmem:[#allocation9 + $0x6e8] sm:$0xff]   ;;  %v15581_v27 = vpop.f32.mrb[130].mxu0  ;;  %v10855_v12 = vsel %vm4522_vm14, %v10854_v19, %v10853_v25  ;;  %v17279_v25 = vld [vmem:[#allocation9 + $0x758] sm:$0xff]  }
 0x7e3   :  { %16242 = vmatprep.subr.bf16.mxu1 %v24341_v13  ;;  %15789 = vmatpush3.bf16.msra.mxu0 %v17246_v50  ;;  %v17260_v50 = vld [vmem:[#allocation9 + $0x730] sm:$0xff]   ;;  %v10857_v41 = vsel %vm7935_vm5, %v10856_v14, %v10855_v12  ;;  %v17285_v12 = vld [vmem:[#allocation9 + $0x6a8] sm:$0xff]  }
 0x7e4   :  { %15790 = vmatprep.subr.bf16.mxu0 %v17248_v32  ;;  %v10858_v32 = vrot.slane %v24545_v39, 5  ;;  %v15608_v39 = vpop.f32.mrb[162].mxu1  ;;  %v17277_v27 = vld [vmem:[#allocation9 + $0x710] sm:$0xff]  }
 0x7e5   :  { %v15609_v45 = vpop.f32.mrb[163].mxu1  ;;  %v17286_v39 = vld [vmem:[#allocation9 + $0x668] sm:$0xff]  }
 0x7e6   :  { %16243 = vmatpush3.bf16.msra.mxu1 %v17247_v55  ;;  %v15580_v55 = vadd.f32 %v15579_v21, %v15578_v60  ;;  %v10859_v43 = vsel %vm4524_vm0, %v10858_v32, %v10857_v41  ;;  %v24551_v41 = vld [vmem:[#allocation73_spill] sm:$0xff] }
 0x7e7   :  { %16244 = vmatprep.subr.bf16.mxu1 %v24341_v13  ;;  %15791 = vmatpush3.bf16.msra.mxu0 %v17249_v54  ;;  %v17261_v54 = vld [vmem:[#allocation9 + $0x630] sm:$0xff]   ;;  %v10861_v17 = vsel %vm7941_vm6, %v10860_v8, %v10859_v43  ;;  %v17282_v8 = vld [vmem:[#allocation9 + $0x6a0] sm:$0xff]  }
 0x7e8   :  { %15792 = vmatprep.subr.bf16.mxu0 %v17251_v44  ;;  %v15582_v44 = vpop.f32.mrb[131].mxu0  ;;  %v10863_v36 = vsel %vm4526_vm2, %v10862_v26, %v10861_v17  ;;  %v17284_v26 = vld [vmem:[#allocation9 + $0x800] sm:$0xff]  }
 0x7e9   :  { %v17283_v44 = vld [vmem:[#allocation9 + $0x660] sm:$0xff]  }
 0x7ea   :  { %16245 = vmatpush3.bf16.msra.mxu1 %v17250_v4  ;;  %v15607_v4 = vadd.f32 %v15606_v15, %v15605_v62  ;;  %v17281_v15 = vld [vmem:[#allocation9 + $0x718] sm:$0xff]  }
 0x7eb   :  { %16246 = vmatprep.subr.bf16.mxu1 %v24341_v13  ;;  %15793 = vmatpush3.bf16.msra.mxu0 %v17252_v35  ;;  %v17264_v35 = vld [vmem:[#allocation9 + $0x638] sm:$0xff]  }
 0x7ec   :  { %16228 = vmatprep.subr.bf16.mxu0 %v24341_v13 }
 0x7ee   :  { %16247 = vmatpush3.bf16.msra.mxu1 %v17253_v7  ;;  %10735 = vmatmul.mubr.bf16.vlgmr.msra.gmra.mrb[164].mxu0 %v10574_v20  ;;  %v10865_v7 = vsel %vm7947_vm7, %v10864_v31, %v10863_v36  ;;  %v17271_v20 = vld [vmem:[#allocation9 + $0x748] sm:$0xff]   ;;  %v11880_v31 = vrot.slane %v24551_v41, 7 }
 0x7ef   :  { %15859 = vmatprep.subr.bf16.mxu1 %v17254_v49  ;;  %16229 = vmatpush3.bf16.msra.mxu0 %v17255_v2  ;;  %v10868_v11 = vpack.c.b16 %v10865_v7, %v10865_v7  ;;  %v17270_v49 = vld [vmem:[#allocation9 + $0x688] sm:$0xff]   ;;  %v17269_v2 = vld [vmem:[#allocation9 + $0x700] sm:$0xff]  }
 0x7f0   :  { %16236 = vmatprep.mubr.msk.bf16.mxu0 %vm17785_vm8, %v24341_v13  ;;  %16230 = vmatprep.subr.bf16.mxu0 %v24341_v13 }
 0x7f1   :  { %16249 = vmatmul.mubr.msk.bf16.vlgmr.msra.gmra.mrb[196].mxu1 %vm3586_vm10, %v11160_v33  ;;  %v17274_v33 = vld [vmem:[#allocation9 + $0x690] sm:$0xff]  }
 0x7f2   :  { %15860 = vmatpush3.bf16.msra.mxu1 %v17256_v34  ;;  %11610 = vmatprep.mubr.bf16.mxu1 %v11451_v3  ;;  %v17272_v34 = vld [vmem:[#allocation9 + $0x648] sm:$0xff]  }
 0x7f3   :  { %15861 = vmatprep.subr.bf16.mxu1 %v17257_v1  ;;  %16231 = vmatpush3.bf16.msra.mxu0 %v17258_v61  ;;  %v8179_v1 = vpop.f32.mrb[132].mxu0  ;;  %v17273_v3 = vld [vmem:[#allocation9 + $0x708] sm:$0xff]  }
 0x7f4   :  { %16232 = vmatprep.subr.bf16.mxu0 %v24341_v13  ;;  %v8180_v61 = vadd.f32 %v15580_v55, %v8179_v1  ;;  %v16130_v19 = vpop.f32.mrb[133].mxu0  ;;  %v23304_v60 = vpop.f32.mrb[164].mxu1  ;;  %v17280_v55 = vld [vmem:[#allocation9 + $0x658] sm:$0xff]  }
 0x7f5   :  { %v8182_v23 = vpop.f32.mrb[134].mxu0  ;;  %v16154_v14 = vpop.f32.mrb[165].mxu1  ;;  %v17292_v19 = vld [vmem:[#allocation9 + $0x678] sm:$0xff]  }
 0x7f6   :  { %15862 = vmatpush3.bf16.msra.mxu1 %v17259_v9  ;;  %v17276_v9 = vld [vmem:[#allocation9 + $0x650] sm:$0xff]   ;;  %v16131_v21 = vpop.f32.mrb[135].mxu0  ;;  %v8390_v32 = vadd.f32 %v15607_v4, %v8180_v61  ;;  %v8723_v62 = vpop.f32.mrb[166].mxu1  ;;  %v11450_v4 = vpack.c.b16 %v22813_v42, %v22813_v42  ;;  %v24558_v23 = vld [vmem:[#allocation87_spill] sm:$0xff] }
 0x7f7   :  { %15863 = vmatprep.subr.bf16.mxu1 %v17260_v50  ;;  %16233 = vmatpush3.bf16.msra.mxu0 %v17261_v54  ;;  %v17278_v50 = vld [vmem:[#allocation9 + $0x698] sm:$0xff]   ;;  %v16155_v54 = vpop.f32.mrb[167].mxu1  ;;  %v24552_v42 = vld [vmem:[#allocation81_spill] sm:$0xff]  ;;  %v17294_v62 = vld [vmem:[#allocation9 + $0x860] sm:$0xff]  }
 0x7f8   :  { %16234 = vmatprep.subr.bf16.mxu0 %v24341_v13  ;;  %v11882_v17 = vrot.slane %v24552_v42, 6  ;;  %v17293_v21 = vld [vmem:[#allocation9 + $0x818] sm:$0xff]   ;;  %v17295_v54 = vld [vmem:[#allocation9 + $0x760] sm:$0xff]  }
 0x7fa   :  { %15864 = vmatpush3.bf16.msra.mxu1 %v17262_v22  ;;  %v17288_v22 = vld [vmem:[#allocation9 + $0x6b0] sm:$0xff]  }
 0x7fb   :  { %15865 = vmatprep.subr.bf16.mxu1 %v17263_v51  ;;  %16235 = vmatpush3.bf16.msra.mxu0 %v17264_v35  ;;  %v17287_v51 = vld [vmem:[#allocation9 + $0x808] sm:$0xff]  }
 0x7fc   :  { %15832 = vmatprep.subr.bf16.mxu0 %v17266_v57  ;;  %v17289_v57 = vld [vmem:[#allocation9 + $0x670] sm:$0xff]  }
 0x7fe   :  { %15866 = vmatpush3.bf16.msra.mxu1 %v17265_v38  ;;  %16237 = vmatmul.mubr.msk.bf16.vlgmr.msra.gmra.mrb[168].mxu0 %vm3586_vm10, %v10868_v11  ;;  %v24553_v38 = vld [vmem:[#allocation27_spill] sm:$0xff]  ;;  %v24554_v11 = vld [vmem:[#allocation82_spill] sm:$0xff] }
 0x7ff   :  { %15867 = vmatprep.subr.bf16.mxu1 %v17267_v16  ;;  %15833 = vmatpush3.bf16.msra.mxu0 %v17268_v53  ;;  %v11884_v7 = vrot.slane %v24553_v38, 5  ;;  %v17291_v53 = vld [vmem:[#allocation9 + $0x6b8] sm:$0xff]  }
 0x800   :  { %11318 = vmatprep.mubr.bf16.mxu0 %v11159_v47  ;;  %15834 = vmatprep.subr.bf16.mxu0 %v17270_v49  ;;  %v11886_v49 = vrot.slane %v24554_v11, 4  ;;  %v17290_v47 = vld [vmem:[#allocation9 + $0x810] sm:$0xff]  }
 0x802   :  { %15868 = vmatpush3.bf16.msra.mxu1 %v17269_v2  ;;  %v24555_v2 = vld [vmem:[#allocation78_spill] sm:$0xff] }
 0x803   :  { %15869 = vmatprep.subr.bf16.mxu1 %v17271_v20  ;;  %15835 = vmatpush3.bf16.msra.mxu0 %v17272_v34  ;;  %v11881_v20 = vsel %vm7929_vm4, %v11880_v31, %v24555_v2  ;;  %v24556_v34 = vld [vmem:[#allocation85_spill] sm:$0xff] }
 0x804   :  { %15836 = vmatprep.subr.bf16.mxu0 %v17274_v33  ;;  %v11888_v33 = vrot.slane %v24556_v34, 3  ;;  %v11883_v1 = vsel %vm4522_vm14, %v11882_v17, %v11881_v20  ;;  %v17304_v17 = vld [vmem:[#allocation9 + $0x778] sm:$0xff]   ;;  %v11895_v20 = vpack.c.b16 %v22889_v63, %v22889_v63 }
 0x806   :  { %15870 = vmatpush3.bf16.msra.mxu1 %v17273_v3  ;;  %v8429_v45 = vpop.f32.mrb[136].mxu0  ;;  %v24557_v3 = vld [vmem:[#allocation86_spill] sm:$0xff] }
 0x807   :  { %15871 = vmatprep.subr.bf16.mxu1 %v17275_v59  ;;  %15837 = vmatpush3.bf16.msra.mxu0 %v17276_v9  ;;  %v23312_v43 = vadd.f32 %v8429_v45, %v8390_v32  ;;  %v16142_v35 = vpop.f32.mrb[137].mxu0  ;;  %v11890_v61 = vrot.slane %v24557_v3, 2  ;;  %v11885_v59 = vsel %vm7935_vm5, %v11884_v7, %v11883_v1  ;;  %v11892_v9 = vrot.slane %v24558_v23, 1  ;;  %v17302_v45 = vld [vmem:[#allocation9 + $0x830] sm:$0xff]   ;;  %v17307_v7 = vld [vmem:[#allocation9 + $0x880] sm:$0xff]   ;;  %v17311_v1 = vld [vmem:[#allocation9 + $0x888] sm:$0xff]  }
 0x808   :  { %15838 = vmatprep.subr.bf16.mxu0 %v17278_v50  ;;  %v8432_v36 = vpop.f32.mrb[138].mxu0  ;;  %v11887_v14 = vsel %vm4524_vm0, %v11886_v49, %v11885_v59  ;;  %v17303_v35 = vld [vmem:[#allocation9 + $0x878] sm:$0xff]  }
 0x809   :  { %v16143_v16 = vpop.f32.mrb[139].mxu0  ;;  %v11889_v50 = vsel %vm7941_vm6, %v11888_v33, %v11887_v14  ;;  %v17306_v36 = vld [vmem:[#allocation9 + $0x7c0] sm:$0xff]  }
 0x80a   :  { %15872 = vmatpush3.bf16.msra.mxu1 %v17277_v27  ;;  %v11891_v32 = vsel %vm4526_vm2, %v11890_v61, %v11889_v50  ;;  %v17308_v16 = vld [vmem:[#allocation9 + $0x780] sm:$0xff]   ;;  %v17312_v61 = vld [vmem:[#allocation9 + $0x788] sm:$0xff]  }
 0x80b   :  { %15873 = vmatprep.subr.bf16.mxu1 %v17279_v25  ;;  %15839 = vmatpush3.bf16.msra.mxu0 %v17280_v55  ;;  %v11893_v27 = vsel %vm7947_vm7, %v11892_v9, %v11891_v32  ;;  %v11158_v25 = vpack.c.b16 %v22834_v5, %v22834_v5  ;;  %v17296_v55 = vld [vmem:[#allocation9 + $0x820] sm:$0xff]   ;;  %v17299_v5 = vld [vmem:[#allocation9 + $0x828] sm:$0xff]  }
 0x80c   :  { %15840 = vmatprep.subr.bf16.mxu0 %v17282_v8  ;;  %v11896_v8 = vpack.c.b16 %v11893_v27, %v11893_v27  ;;  %v17309_v33 = vld [vmem:[#allocation9 + $0x840] sm:$0xff]   ;;  %v17313_v9 = vld [vmem:[#allocation9 + $0x848] sm:$0xff]  }
 0x80e   :  { %15874 = vmatpush3.bf16.msra.mxu1 %v17281_v15  ;;  %v17297_v15 = vld [vmem:[#allocation9 + $0x868] sm:$0xff]  }
 0x80f   :  { %16264 = vmatprep.subr.bf16.mxu1 %v24341_v13  ;;  %15841 = vmatpush3.bf16.msra.mxu0 %v17283_v44  ;;  %v12187_v44 = vpack.c.b16 %v22864_v46, %v22864_v46 }
 0x810   :  { %15842 = vmatprep.subr.bf16.mxu0 %v17285_v12  ;;  %v17298_v12 = vld [vmem:[#allocation9 + $0x768] sm:$0xff]  }
 0x811   :  { %11611 = vmatmul.mubr.bf16.vlgmr.msra.gmra.mrb[200].mxu1 %v11450_v4 }
 0x812   :  { %16265 = vmatpush3.bf16.msra.mxu1 %v17284_v26  ;;  %16272 = vmatprep.mubr.msk.bf16.mxu1 %vm17785_vm8, %v24341_v13  ;;  %v17300_v26 = vld [vmem:[#allocation9 + $0x870] sm:$0xff]  }
 0x813   :  { %16266 = vmatprep.subr.bf16.mxu1 %v24341_v13  ;;  %15843 = vmatpush3.bf16.msra.mxu0 %v17286_v39  ;;  %v17301_v39 = vld [vmem:[#allocation9 + $0x770] sm:$0xff]  }
 0x814   :  { %15844 = vmatprep.subr.bf16.mxu0 %v17288_v22 }
 0x816   :  { %16267 = vmatpush3.bf16.msra.mxu1 %v17287_v51 }
 0x817   :  { %16268 = vmatprep.subr.bf16.mxu1 %v24341_v13  ;;  %15845 = vmatpush3.bf16.msra.mxu0 %v17289_v57  ;;  %v17305_v57 = vld [vmem:[#allocation9 + $0x838] sm:$0xff]  }
 0x818   :  { %15846 = vmatprep.subr.bf16.mxu0 %v17291_v53  ;;  %v15659_v4 = vpop.f32.mrb[168].mxu1  ;;  %v24559_v53 = vld [vmem:[#allocation77_spill] sm:$0xff] }
 0x819   :  { %v15660_v22 = vpop.f32.mrb[169].mxu1  ;;  %v11452_v49 = vpack.c.b16 %v24559_v53, %v24559_v53  ;;  %v17329_v53 = vld [vmem:[#allocation9 + $0x7b0] sm:$0xff]  }
 0x81a   :  { %16269 = vmatpush3.bf16.msra.mxu1 %v17290_v47  ;;  %v23341_v46 = vadd.f32 %v15660_v22, %v15659_v4  ;;  %v15662_v31 = vpop.f32.mrb[170].mxu1  ;;  %v17310_v47 = vld [vmem:[#allocation9 + $0x7c8] sm:$0xff]   ;;  %v17322_v4 = vld [vmem:[#allocation9 + $0x7e0] sm:$0xff]  }
 0x81b   :  { %16270 = vmatprep.subr.bf16.mxu1 %v24341_v13  ;;  %15847 = vmatpush3.bf16.msra.mxu0 %v17292_v19  ;;  %v15663_v51 = vpop.f32.mrb[171].mxu1  ;;  %v17314_v19 = vld [vmem:[#allocation9 + $0x7d0] sm:$0xff]   ;;  %v17323_v22 = vld [vmem:[#allocation9 + $0x7a0] sm:$0xff]   ;;  %v17325_v31 = vld [vmem:[#allocation9 + $0x7e8] sm:$0xff]  }
 0x81c   :  { %16252 = vmatprep.subr.bf16.mxu0 %v24341_v13  ;;  %v17326_v51 = vld [vmem:[#allocation9 + $0x7a8] sm:$0xff]  }
 0x81e   :  { %16271 = vmatpush3.bf16.msra.mxu1 %v17293_v21  ;;  %11319 = vmatmul.mubr.bf16.vlgmr.msra.gmra.mrb[172].mxu0 %v11158_v25  ;;  %v17315_v21 = vld [vmem:[#allocation9 + $0x890] sm:$0xff]   ;;  %v17318_v25 = vld [vmem:[#allocation9 + $0x7d8] sm:$0xff]  }
 0x81f   :  { %15913 = vmatprep.subr.bf16.mxu1 %v17294_v62  ;;  %16253 = vmatpush3.bf16.msra.mxu0 %v17295_v54  ;;  %v17316_v62 = vld [vmem:[#allocation9 + $0x790] sm:$0xff]  }
 0x820   :  { %16260 = vmatprep.mubr.msk.bf16.mxu0 %vm17785_vm8, %v24341_v13  ;;  %16254 = vmatprep.subr.bf16.mxu0 %v24341_v13 }
 0x821   :  { %16273 = vmatmul.mubr.msk.bf16.vlgmr.msra.gmra.mrb[204].mxu1 %vm3586_vm10, %v11896_v8 }
 0x822   :  { %15914 = vmatpush3.bf16.msra.mxu1 %v17296_v55  ;;  %12346 = vmatprep.mubr.bf16.mxu1 %v12187_v44 }
 0x823   :  { %15915 = vmatprep.subr.bf16.mxu1 %v17297_v15  ;;  %16255 = vmatpush3.bf16.msra.mxu0 %v17298_v12  ;;  %v17317_v15 = vld [vmem:[#allocation9 + $0x850] sm:$0xff]   ;;  %v17319_v12 = vld [vmem:[#allocation9 + $0x898] sm:$0xff]  }
 0x824   :  { %16256 = vmatprep.subr.bf16.mxu0 %v24341_v13 }
 0x826   :  { %15916 = vmatpush3.bf16.msra.mxu1 %v17299_v5  ;;  %v15632_v59 = vpop.f32.mrb[140].mxu0  ;;  %v17320_v5 = vld [vmem:[#allocation9 + $0x798] sm:$0xff]  }
 0x827   :  { %15917 = vmatprep.subr.bf16.mxu1 %v17300_v26  ;;  %16257 = vmatpush3.bf16.msra.mxu0 %v17301_v39  ;;  %v15633_v14 = vpop.f32.mrb[141].mxu0  ;;  %v17321_v39 = vld [vmem:[#allocation9 + $0x858] sm:$0xff]  }
 0x828   :  { %16258 = vmatprep.subr.bf16.mxu0 %v24341_v13  ;;  %v15634_v32 = vadd.f32 %v15633_v14, %v15632_v59  ;;  %v15635_v63 = vpop.f32.mrb[142].mxu0  ;;  %v17332_v14 = vld [vmem:[#allocation9 + $0x7b8] sm:$0xff]  }
 0x829   :  { %v15636_v54 = vpop.f32.mrb[143].mxu0 }
 0x82a   :  { %15918 = vmatpush3.bf16.msra.mxu1 %v17302_v45  ;;  %v8721_v55 = vadd.f32 %v15634_v32, %v23304_v60  ;;  %v17324_v60 = vld [vmem:[#allocation9 + $0x940] sm:$0xff]   ;;  %v12186_v45 = vpack.c.b16 %v22909_v0, %v22909_v0  ;;  %v12464_v0 = vrot.slane %v24555_v2, 2  ;;  %v12476_v32 = vrot.slane %v24558_v23, 3 }
 0x82b   :  { %15919 = vmatprep.subr.bf16.mxu1 %v17303_v35  ;;  %16259 = vmatpush3.bf16.msra.mxu0 %v17304_v17  ;;  %v12465_v35 = vrot.slane %v24551_v41, 1 }
 0x82c   :  { %15886 = vmatprep.subr.bf16.mxu0 %v17306_v36  ;;  %v8726_v26 = vadd.f32 %v8721_v55, %v23312_v43  ;;  %v17328_v43 = vld [vmem:[#allocation9 + $0x7f0] sm:$0xff]   ;;  %v17327_v36 = vld [vmem:[#allocation9 + $0x948] sm:$0xff]  }
 0x82e   :  { %15920 = vmatpush3.bf16.msra.mxu1 %v17305_v57  ;;  %16261 = vmatmul.mubr.msk.bf16.vlgmr.msra.gmra.mrb[176].mxu0 %vm3586_vm10, %v11452_v49  ;;  %v12468_v49 = vrot.slane %v24553_v38, 7 }
 0x82f   :  { %15921 = vmatprep.subr.bf16.mxu1 %v17307_v7  ;;  %15887 = vmatpush3.bf16.msra.mxu0 %v17308_v16  ;;  %v23349_v50 = vpop.f32.mrb[172].mxu1 }
 0x830   :  { %12054 = vmatprep.mubr.bf16.mxu0 %v11895_v20  ;;  %15888 = vmatprep.subr.bf16.mxu0 %v17310_v47  ;;  %v16178_v27 = vpop.f32.mrb[173].mxu1 }
 0x831   :  { %v9459_v8 = vpop.f32.mrb[174].mxu1 }
 0x832   :  { %15922 = vmatpush3.bf16.msra.mxu1 %v17309_v33  ;;  %v16179_v44 = vpop.f32.mrb[175].mxu1  ;;  %v17331_v33 = vld [vmem:[#allocation9 + $0x7f8] sm:$0xff]   ;;  %v17335_v8 = vld [vmem:[#allocation9 + $0x8a0] sm:$0xff]  }
 0x833   :  { %15923 = vmatprep.subr.bf16.mxu1 %v17311_v1  ;;  %15889 = vmatpush3.bf16.msra.mxu0 %v17312_v61  ;;  %v12470_v1 = vrot.slane %v24554_v11, 6  ;;  %v17330_v61 = vld [vmem:[#allocation9 + $0x950] sm:$0xff]   ;;  %v17336_v44 = vld [vmem:[#allocation9 + $0x960] sm:$0xff]  }
 0x834   :  { %15890 = vmatprep.subr.bf16.mxu0 %v17314_v19  ;;  %v12472_v19 = vrot.slane %v24556_v34, 5 }
 0x836   :  { %15924 = vmatpush3.bf16.msra.mxu1 %v17313_v9  ;;  %v12474_v9 = vrot.slane %v24557_v3, 4 }
 0x837   :  { %15925 = vmatprep.subr.bf16.mxu1 %v17315_v21  ;;  %15891 = vmatpush3.bf16.msra.mxu0 %v17316_v62  ;;  %v17333_v62 = vld [vmem:[#allocation9 + $0x958] sm:$0xff]  }
 0x838   :  { %15892 = vmatprep.subr.bf16.mxu0 %v17318_v25  ;;  %v17334_v25 = vld [vmem:[#allocation9 + $0x9a0] sm:$0xff]  }
 0x83a   :  { %15926 = vmatpush3.bf16.msra.mxu1 %v17317_v15  ;;  %v11894_v15 = vpack.c.b16 %v22930_v48, %v22930_v48  ;;  %v12174_v48 = vrot.slane %v24552_v42, 7 }
 0x83b   :  { %15927 = vmatprep.subr.bf16.mxu1 %v17319_v12  ;;  %15893 = vmatpush3.bf16.msra.mxu0 %v17320_v5  ;;  %v17337_v5 = vld [vmem:[#allocation9 + $0x9a8] sm:$0xff]  }
 0x83c   :  { %15894 = vmatprep.subr.bf16.mxu0 %v17322_v4  ;;  %v17338_v4 = vld [vmem:[#allocation9 + $0x8a8] sm:$0xff]  }
 0x83e   :  { %15928 = vmatpush3.bf16.msra.mxu1 %v17321_v39  ;;  %v12172_v39 = vrot.slane %v24555_v2, 1 }
 0x83f   :  { %16288 = vmatprep.subr.bf16.mxu1 %v24341_v13  ;;  %15895 = vmatpush3.bf16.msra.mxu0 %v17323_v22  ;;  %v9012_v17 = vpop.f32.mrb[144].mxu0  ;;  %v17339_v22 = vld [vmem:[#allocation9 + $0x968] sm:$0xff]  }
 0x840   :  { %15896 = vmatprep.subr.bf16.mxu0 %v17325_v31  ;;  %v9013_v57 = vadd.f32 %v23341_v46, %v9012_v17  ;;  %v16166_v7 = vpop.f32.mrb[145].mxu0  ;;  %v12466_v46 = vsel %vm7929_vm4, %v12465_v35, %v12464_v0  ;;  %v12176_v31 = vrot.slane %v24553_v38, 6  ;;  %v12180_v35 = vrot.slane %v24556_v34, 4 }
 0x841   :  { %12347 = vmatmul.mubr.bf16.vlgmr.msra.gmra.mrb[208].mxu1 %v12186_v45  ;;  %v9015_v16 = vpop.f32.mrb[146].mxu0  ;;  %v12467_v59 = vsel %vm4522_vm14, %v24552_v42, %v12466_v46  ;;  %v12182_v17 = vrot.slane %v24557_v3, 3  ;;  %v12184_v7 = vrot.slane %v24558_v23, 2  ;;  %v17347_v23 = vld [vmem:[#allocation9 + $0x9c0] sm:$0xff]   ;;  %v17350_v46 = vld [vmem:[#allocation9 + $0x908] sm:$0xff]  }
 0x842   :  { %16289 = vmatpush3.bf16.msra.mxu1 %v17324_v60  ;;  %16296 = vmatprep.mubr.msk.bf16.mxu1 %vm17785_vm8, %v24341_v13  ;;  %v23363_v47 = vadd.f32 %v9013_v57, %v8726_v26  ;;  %v16167_v20 = vpop.f32.mrb[147].mxu0  ;;  %v12469_v21 = vsel %vm7935_vm5, %v12468_v49, %v12467_v59  ;;  %v12771_v26 = vpack.c.b16 %v22960_v58, %v22960_v58  ;;  %v17340_v60 = vld [vmem:[#allocation9 + $0x9b0] sm:$0xff]   ;;  %v12178_v58 = vrot.slane %v24554_v11, 5  ;;  %v17344_v16 = vld [vmem:[#allocation9 + $0x8b8] sm:$0xff]   ;;  %v17346_v49 = vld [vmem:[#allocation9 + $0x900] sm:$0xff]  }
 0x843   :  { %16290 = vmatprep.subr.bf16.mxu1 %v24341_v13  ;;  %15897 = vmatpush3.bf16.msra.mxu0 %v17326_v51  ;;  %v12471_v63 = vsel %vm4524_vm0, %v12470_v1, %v12469_v21  ;;  %v17341_v51 = vld [vmem:[#allocation9 + $0x8b0] sm:$0xff]   ;;  %v17345_v20 = vld [vmem:[#allocation9 + $0x978] sm:$0xff]   ;;  %v17348_v1 = vld [vmem:[#allocation9 + $0x8c0] sm:$0xff]  }
 0x844   :  { %15898 = vmatprep.subr.bf16.mxu0 %v17328_v43  ;;  %v12473_v27 = vsel %vm7941_vm6, %v12472_v19, %v12471_v63  ;;  %v12173_v43 = vsel %vm7929_vm4, %v24551_v41, %v12172_v39  ;;  %v17342_v11 = vld [vmem:[#allocation9 + $0x970] sm:$0xff]   ;;  %v17343_v41 = vld [vmem:[#allocation9 + $0x9b8] sm:$0xff]   ;;  %v12479_v19 = vpack.c.b16 %v22982_v37, %v22982_v37  ;;  %v17349_v59 = vld [vmem:[#allocation9 + $0x980] sm:$0xff]  }
 0x845   :  { %v12475_v54 = vsel %vm4526_vm2, %v12474_v9, %v12473_v27  ;;  %v12175_v2 = vsel %vm4522_vm14, %v12174_v48, %v12173_v43  ;;  %v17351_v9 = vld [vmem:[#allocation9 + $0x9c8] sm:$0xff]   ;;  %v17354_v21 = vld [vmem:[#allocation9 + $0x910] sm:$0xff]   ;;  %v17359_v48 = vld [vmem:[#allocation9 + $0x9d8] sm:$0xff]  }
 0x846   :  { %16291 = vmatpush3.bf16.msra.mxu1 %v17327_v36  ;;  %v12477_v55 = vsel %vm7947_vm7, %v12476_v32, %v12475_v54  ;;  %v12177_v57 = vsel %vm7935_vm5, %v12176_v31, %v12175_v2  ;;  %v17353_v63 = vld [vmem:[#allocation9 + $0x988] sm:$0xff]   ;;  %v17355_v27 = vld [vmem:[#allocation9 + $0x9d0] sm:$0xff]   ;;  %v17360_v39 = vld [vmem:[#allocation9 + $0x8d8] sm:$0xff]  }
 0x847   :  { %16292 = vmatprep.subr.bf16.mxu1 %v24341_v13  ;;  %15899 = vmatpush3.bf16.msra.mxu0 %v17329_v53  ;;  %v12480_v12 = vpack.c.b16 %v12477_v55, %v12477_v55  ;;  %v12179_v34 = vsel %vm4524_vm0, %v12178_v58, %v12177_v57  ;;  %v17356_v55 = vld [vmem:[#allocation9 + $0x8d0] sm:$0xff]   ;;  %v17362_v31 = vld [vmem:[#allocation9 + $0x920] sm:$0xff]   ;;  %v17366_v43 = vld [vmem:[#allocation9 + $0x8e8] sm:$0xff]  }
 0x848   :  { %15900 = vmatprep.subr.bf16.mxu0 %v17331_v33  ;;  %v12181_v53 = vsel %vm7941_vm6, %v12180_v35, %v12179_v34  ;;  %v17363_v58 = vld [vmem:[#allocation9 + $0x8e0] sm:$0xff]   ;;  %v24560_v35 = vld [vmem:[#allocation30_spill] sm:$0xff] }
 0x849   :  { %v12183_v3 = vsel %vm4526_vm2, %v12182_v17, %v12181_v53  ;;  %v17367_v17 = vld [vmem:[#allocation9 + $0xa88] sm:$0xff]  }
 0x84a   :  { %16293 = vmatpush3.bf16.msra.mxu1 %v17330_v61  ;;  %v12185_v33 = vsel %vm7947_vm7, %v12184_v7, %v12183_v3  ;;  %v17371_v3 = vld [vmem:[#allocation9 + $0x938] sm:$0xff]  }
 0x84b   :  { %16294 = vmatprep.subr.bf16.mxu1 %v24341_v13  ;;  %15901 = vmatpush3.bf16.msra.mxu0 %v17332_v14  ;;  %v12188_v61 = vpack.c.b16 %v12185_v33, %v12185_v33  ;;  %v17352_v14 = vld [vmem:[#allocation9 + $0x8c8] sm:$0xff]   ;;  %v17370_v33 = vld [vmem:[#allocation9 + $0xa90] sm:$0xff]  }
 0x84c   :  { %16276 = vmatprep.subr.bf16.mxu0 %v24341_v13 }
 0x84e   :  { %16295 = vmatpush3.bf16.msra.mxu1 %v17333_v62  ;;  %12055 = vmatmul.mubr.bf16.vlgmr.msra.gmra.mrb[180].mxu0 %v11894_v15 }
 0x84f   :  { %15967 = vmatprep.subr.bf16.mxu1 %v17334_v25  ;;  %16277 = vmatpush3.bf16.msra.mxu0 %v17335_v8 }
 0x850   :  { %16284 = vmatprep.mubr.msk.bf16.mxu0 %vm17785_vm8, %v24341_v13  ;;  %16278 = vmatprep.subr.bf16.mxu0 %v24341_v13 }
 0x851   :  { %16297 = vmatmul.mubr.msk.bf16.vlgmr.msra.gmra.mrb[212].mxu1 %vm3586_vm10, %v12480_v12 }
 0x852   :  { %15968 = vmatpush3.bf16.msra.mxu1 %v17336_v44  ;;  %12930 = vmatprep.mubr.bf16.mxu1 %v12771_v26  ;;  %v17358_v44 = vld [vmem:[#allocation9 + $0x918] sm:$0xff]   ;;  %v17357_v26 = vld [vmem:[#allocation9 + $0x990] sm:$0xff]  }
 0x853   :  { %15969 = vmatprep.subr.bf16.mxu1 %v17337_v5  ;;  %v15713_v45 = vpop.f32.mrb[176].mxu1  ;;  %16279 = vmatpush3.bf16.msra.mxu0 %v17338_v4 }
 0x854   :  { %v15714_v42 = vpop.f32.mrb[177].mxu1  ;;  %16280 = vmatprep.subr.bf16.mxu0 %v24341_v13 }
 0x855   :  { %v23398_v38 = vadd.f32 %v15714_v42, %v15713_v45  ;;  %v15716_v36 = vpop.f32.mrb[178].mxu1  ;;  %v17365_v45 = vld [vmem:[#allocation9 + $0x928] sm:$0xff]   ;;  %v13200_v42 = vrot.slane %v24560_v35, 7 }
 0x856   :  { %15970 = vmatpush3.bf16.msra.mxu1 %v17339_v22  ;;  %v15717_v0 = vpop.f32.mrb[179].mxu1 }
 0x857   :  { %15971 = vmatprep.subr.bf16.mxu1 %v17340_v60  ;;  %16281 = vmatpush3.bf16.msra.mxu0 %v17341_v51  ;;  %v17361_v60 = vld [vmem:[#allocation9 + $0x998] sm:$0xff]   ;;  %v12770_v51 = vpack.c.b16 %v22998_v56, %v22998_v56  ;;  %v24561_v56 = vld [vmem:[#allocation41_spill] sm:$0xff] }
 0x858   :  { %16282 = vmatprep.subr.bf16.mxu0 %v24341_v13  ;;  %v13202_v57 = vrot.slane %v24561_v56, 6  ;;  %v17369_v0 = vld [vmem:[#allocation9 + $0x8f0] sm:$0xff]  }
 0x85a   :  { %15972 = vmatpush3.bf16.msra.mxu1 %v17342_v11 }
 0x85b   :  { %15973 = vmatprep.subr.bf16.mxu1 %v17343_v41  ;;  %16283 = vmatpush3.bf16.msra.mxu0 %v17344_v16  ;;  %v24562_v41 = vld [vmem:[#allocation32_spill] sm:$0xff] }
 0x85c   :  { %15940 = vmatprep.subr.bf16.mxu0 %v17346_v49  ;;  %v13204_v34 = vrot.slane %v24562_v41, 5  ;;  %v24563_v49 = vld [vmem:[#allocation25_spill] sm:$0xff] }
 0x85e   :  { %15974 = vmatpush3.bf16.msra.mxu1 %v17345_v20  ;;  %16285 = vmatmul.mubr.msk.bf16.vlgmr.msra.gmra.mrb[184].mxu0 %vm3586_vm10, %v12188_v61  ;;  %v13206_v20 = vrot.slane %v24563_v49, 4 }
 0x85f   :  { %15975 = vmatprep.subr.bf16.mxu1 %v17347_v23  ;;  %15941 = vmatpush3.bf16.msra.mxu0 %v17348_v1  ;;  %v24565_v1 = vld [vmem:[#allocation28_spill] sm:$0xff] }
 0x860   :  { %12638 = vmatprep.mubr.bf16.mxu0 %v12479_v19  ;;  %15942 = vmatprep.subr.bf16.mxu0 %v17350_v46  ;;  %v13208_v61 = vrot.slane %v24565_v1, 3  ;;  %v24566_v19 = vld [vmem:[#allocation31_spill] sm:$0xff] }
 0x861   :  { %v15686_v32 = vpop.f32.mrb[148].mxu0 }
 0x862   :  { %15976 = vmatpush3.bf16.msra.mxu1 %v17349_v59  ;;  %v15687_v62 = vpop.f32.mrb[149].mxu0  ;;  %v13210_v59 = vrot.slane %v24566_v19, 2 }
 0x863   :  { %15977 = vmatprep.subr.bf16.mxu1 %v17351_v9  ;;  %v15688_v25 = vadd.f32 %v15687_v62, %v15686_v32  ;;  %v15689_v37 = vpop.f32.mrb[150].mxu0  ;;  %15943 = vmatpush3.bf16.msra.mxu0 %v17352_v14  ;;  %v17372_v9 = vld [vmem:[#allocation9 + $0x8f8] sm:$0xff]  }
 0x864   :  { %v23410_v54 = vpop.f32.mrb[180].mxu1  ;;  %v15690_v15 = vpop.f32.mrb[151].mxu0  ;;  %15944 = vmatprep.subr.bf16.mxu0 %v17354_v21  ;;  %v24567_v21 = vld [vmem:[#allocation37_spill] sm:$0xff]  ;;  %v17373_v62 = vld [vmem:[#allocation9 + $0xa98] sm:$0xff]   ;;  %v17374_v37 = vld [vmem:[#allocation9 + $0xae0] sm:$0xff]  }
 0x865   :  { %v16202_v8 = vpop.f32.mrb[181].mxu1  ;;  %v9457_v12 = vadd.f32 %v15688_v25, %v23349_v50  ;;  %v17364_v50 = vld [vmem:[#allocation9 + $0xa80] sm:$0xff]   ;;  %v13212_v32 = vrot.slane %v24567_v21, 1  ;;  %v12478_v15 = vpack.c.b16 %v23025_v10, %v23025_v10  ;;  %v17379_v10 = vld [vmem:[#allocation9 + $0xaa8] sm:$0xff]  }
 0x866   :  { %v10043_v5 = vpop.f32.mrb[182].mxu1  ;;  %15978 = vmatpush3.bf16.msra.mxu1 %v17353_v63  ;;  %v17375_v8 = vld [vmem:[#allocation9 + $0x9e0] sm:$0xff]  }
 0x867   :  { %v16203_v4 = vpop.f32.mrb[183].mxu1  ;;  %15979 = vmatprep.subr.bf16.mxu1 %v17355_v27  ;;  %15945 = vmatpush3.bf16.msra.mxu0 %v17356_v55  ;;  %v9462_v22 = vadd.f32 %v9457_v12, %v23363_v47  ;;  %v17368_v47 = vld [vmem:[#allocation9 + $0x930] sm:$0xff]   ;;  %v17377_v5 = vld [vmem:[#allocation9 + $0xae8] sm:$0xff]  }
 0x868   :  { %15946 = vmatprep.subr.bf16.mxu0 %v17358_v44  ;;  %v17376_v44 = vld [vmem:[#allocation9 + $0xaa0] sm:$0xff]   ;;  %v17378_v4 = vld [vmem:[#allocation9 + $0x9e8] sm:$0xff]  }
 0x86a   :  { %15980 = vmatpush3.bf16.msra.mxu1 %v17357_v26  ;;  %v13507_v26 = vpack.c.b16 %v23046_v30, %v23046_v30 }
 0x86b   :  { %15981 = vmatprep.subr.bf16.mxu1 %v17359_v48  ;;  %15947 = vmatpush3.bf16.msra.mxu0 %v17360_v39  ;;  %v17380_v48 = vld [vmem:[#allocation9 + $0xaf0] sm:$0xff]  }
 0x86c   :  { %15948 = vmatprep.subr.bf16.mxu0 %v17362_v31 }
 0x86e   :  { %15982 = vmatpush3.bf16.msra.mxu1 %v17361_v60 }
 0x86f   :  { %16312 = vmatprep.subr.bf16.mxu1 %v24341_v13  ;;  %15949 = vmatpush3.bf16.msra.mxu0 %v17363_v58  ;;  %v17382_v58 = vld [vmem:[#allocation9 + $0xab0] sm:$0xff]  }
 0x870   :  { %15950 = vmatprep.subr.bf16.mxu0 %v17365_v45 }
 0x871   :  { %12931 = vmatmul.mubr.bf16.vlgmr.msra.gmra.mrb[216].mxu1 %v12770_v51  ;;  %v9748_v2 = vpop.f32.mrb[152].mxu0  ;;  %v17384_v51 = vld [vmem:[#allocation9 + $0x9f8] sm:$0xff]  }
 0x872   :  { %16313 = vmatpush3.bf16.msra.mxu1 %v17364_v50  ;;  %16320 = vmatprep.mubr.msk.bf16.mxu1 %vm17785_vm8, %v24341_v13  ;;  %v9749_v36 = vadd.f32 %v23398_v38, %v9748_v2  ;;  %v16190_v11 = vpop.f32.mrb[153].mxu0  ;;  %v24564_v38 = vld [vmem:[#allocation38_spill] sm:$0xff]  ;;  %v17388_v2 = vld [vmem:[#allocation9 + $0xa00] sm:$0xff]  }
 0x873   :  { %16314 = vmatprep.subr.bf16.mxu1 %v24341_v13  ;;  %v9751_v7 = vpop.f32.mrb[154].mxu0  ;;  %15951 = vmatpush3.bf16.msra.mxu0 %v17366_v43  ;;  %v13201_v23 = vsel %vm7929_vm4, %v13200_v42, %v24564_v38  ;;  %v17383_v50 = vld [vmem:[#allocation9 + $0xaf8] sm:$0xff]   ;;  %v17386_v43 = vld [vmem:[#allocation9 + $0xa40] sm:$0xff]   ;;  %v17390_v11 = vld [vmem:[#allocation9 + $0xa48] sm:$0xff]  }
 0x874   :  { %v23424_v16 = vadd.f32 %v9749_v36, %v9462_v22  ;;  %v16191_v53 = vpop.f32.mrb[155].mxu0  ;;  %15952 = vmatprep.subr.bf16.mxu0 %v17368_v47  ;;  %v13203_v46 = vsel %vm4522_vm14, %v13202_v57, %v13201_v23  ;;  %v17381_v22 = vld [vmem:[#allocation9 + $0x9f0] sm:$0xff]   ;;  %v17385_v47 = vld [vmem:[#allocation9 + $0xab8] sm:$0xff]   ;;  %v17387_v42 = vld [vmem:[#allocation9 + $0xb00] sm:$0xff]   ;;  %v13215_v57 = vpack.c.b16 %v23065_v40, %v23065_v40 }
 0x875   :  { %v13205_v14 = vsel %vm7935_vm5, %v13204_v34, %v13203_v46  ;;  %v17389_v7 = vld [vmem:[#allocation9 + $0xac0] sm:$0xff]   ;;  %v17392_v34 = vld [vmem:[#allocation9 + $0xa08] sm:$0xff]   ;;  %v17394_v53 = vld [vmem:[#allocation9 + $0xa50] sm:$0xff]  }
 0x876   :  { %16315 = vmatpush3.bf16.msra.mxu1 %v17367_v17  ;;  %v13207_v63 = vsel %vm4524_vm0, %v13206_v20, %v13205_v14  ;;  %v24568_v17 = vld [vmem:[#allocation46_spill] sm:$0xff]  ;;  %v17393_v20 = vld [vmem:[#allocation9 + $0xac8] sm:$0xff]  }
 0x877   :  { %16316 = vmatprep.subr.bf16.mxu1 %v24341_v13  ;;  %15953 = vmatpush3.bf16.msra.mxu0 %v17369_v0  ;;  %v13209_v27 = vsel %vm7941_vm6, %v13208_v61, %v13207_v63  ;;  %v12772_v36 = vpack.c.b16 %v24568_v17, %v24568_v17  ;;  %v17391_v0 = vld [vmem:[#allocation9 + $0xb08] sm:$0xff]   ;;  %v17395_v23 = vld [vmem:[#allocation9 + $0xb10] sm:$0xff]  }
 0x878   :  { %15954 = vmatprep.subr.bf16.mxu0 %v17371_v3  ;;  %v13211_v25 = vsel %vm4526_vm2, %v13210_v59, %v13209_v27  ;;  %v17396_v59 = vld [vmem:[#allocation9 + $0xa10] sm:$0xff]  }
 0x879   :  { %v13213_v55 = vsel %vm7947_vm7, %v13212_v32, %v13211_v25  ;;  %v17398_v32 = vld [vmem:[#allocation9 + $0xa58] sm:$0xff]   ;;  %v17397_v27 = vld [vmem:[#allocation9 + $0xad0] sm:$0xff]  }
 0x87a   :  { %16317 = vmatpush3.bf16.msra.mxu1 %v17370_v33  ;;  %v13216_v12 = vpack.c.b16 %v13213_v55, %v13213_v55  ;;  %v17400_v55 = vld [vmem:[#allocation9 + $0xa18] sm:$0xff]  }
 0x87b   :  { %16318 = vmatprep.subr.bf16.mxu1 %v24341_v13  ;;  %15955 = vmatpush3.bf16.msra.mxu0 %v17372_v9 }
 0x87c   :  { %16300 = vmatprep.subr.bf16.mxu0 %v24341_v13 }
 0x87e   :  { %16319 = vmatpush3.bf16.msra.mxu1 %v17373_v62  ;;  %12639 = vmatmul.mubr.bf16.vlgmr.msra.gmra.mrb[188].mxu0 %v12478_v15  ;;  %v17402_v15 = vld [vmem:[#allocation9 + $0xa60] sm:$0xff]  }
 0x87f   :  { %16021 = vmatprep.subr.bf16.mxu1 %v17374_v37  ;;  %16301 = vmatpush3.bf16.msra.mxu0 %v17375_v8  ;;  %v17399_v37 = vld [vmem:[#allocation9 + $0xb18] sm:$0xff]  }
 0x880   :  { %16308 = vmatprep.mubr.msk.bf16.mxu0 %vm17785_vm8, %v24341_v13  ;;  %16302 = vmatprep.subr.bf16.mxu0 %v24341_v13 }
 0x881   :  { %16321 = vmatmul.mubr.msk.bf16.vlgmr.msra.gmra.mrb[220].mxu1 %vm3586_vm10, %v13216_v12  ;;  %v17403_v12 = vld [vmem:[#allocation9 + $0xa20] sm:$0xff]  }
 0x882   :  { %16022 = vmatpush3.bf16.msra.mxu1 %v17376_v44  ;;  %13666 = vmatprep.mubr.bf16.mxu1 %v13507_v26  ;;  %v17401_v44 = vld [vmem:[#allocation9 + $0xad8] sm:$0xff]   ;;  %v13506_v26 = vpack.c.b16 %v23084_v24, %v23084_v24  ;;  %v13784_v24 = vrot.slane %v24564_v38, 2 }
 0x883   :  { %16023 = vmatprep.subr.bf16.mxu1 %v17377_v5  ;;  %16303 = vmatpush3.bf16.msra.mxu0 %v17378_v4  ;;  %v17405_v5 = vld [vmem:[#allocation9 + $0xa68] sm:$0xff]  }
 0x884   :  { %v15767_v39 = vpop.f32.mrb[184].mxu1  ;;  %16304 = vmatprep.subr.bf16.mxu0 %v24341_v13  ;;  %v17406_v4 = vld [vmem:[#allocation9 + $0xa28] sm:$0xff]  }
 0x885   :  { %v15768_v31 = vpop.f32.mrb[185].mxu1 }
 0x886   :  { %v23450_v30 = vadd.f32 %v15768_v31, %v15767_v39  ;;  %v15770_v60 = vpop.f32.mrb[186].mxu1  ;;  %16024 = vmatpush3.bf16.msra.mxu1 %v17379_v10  ;;  %v13785_v10 = vrot.slane %v24560_v35, 1  ;;  %v17407_v39 = vld [vmem:[#allocation9 + $0xbc8] sm:$0xff]  }
 0x887   :  { %v15771_v45 = vpop.f32.mrb[187].mxu1  ;;  %16025 = vmatprep.subr.bf16.mxu1 %v17380_v48  ;;  %16305 = vmatpush3.bf16.msra.mxu0 %v17381_v22 }
 0x888   :  { %16306 = vmatprep.subr.bf16.mxu0 %v24341_v13  ;;  %v13788_v45 = vrot.slane %v24562_v41, 7 }
 0x88a   :  { %16026 = vmatpush3.bf16.msra.mxu1 %v17382_v58  ;;  %v17409_v58 = vld [vmem:[#allocation9 + $0xa30] sm:$0xff]  }
 0x88b   :  { %16027 = vmatprep.subr.bf16.mxu1 %v17383_v50  ;;  %16307 = vmatpush3.bf16.msra.mxu0 %v17384_v51 }
 0x88c   :  { %15994 = vmatprep.subr.bf16.mxu0 %v17386_v43  ;;  %v17411_v43 = vld [vmem:[#allocation9 + $0xa78] sm:$0xff]  }
 0x88e   :  { %16028 = vmatpush3.bf16.msra.mxu1 %v17385_v47  ;;  %16309 = vmatmul.mubr.msk.bf16.vlgmr.msra.gmra.mrb[192].mxu0 %vm3586_vm10, %v12772_v36  ;;  %v13790_v47 = vrot.slane %v24563_v49, 6  ;;  %v13794_v36 = vrot.slane %v24566_v19, 4 }
 0x88f   :  { %16029 = vmatprep.subr.bf16.mxu1 %v17387_v42  ;;  %15995 = vmatpush3.bf16.msra.mxu0 %v17388_v2  ;;  %v17410_v42 = vld [vmem:[#allocation9 + $0xbd0] sm:$0xff]   ;;  %v13792_v2 = vrot.slane %v24565_v1, 5 }
 0x890   :  { %13374 = vmatprep.mubr.bf16.mxu0 %v13215_v57  ;;  %15996 = vmatprep.subr.bf16.mxu0 %v17390_v11  ;;  %v17412_v11 = vld [vmem:[#allocation9 + $0xa38] sm:$0xff]  }
 0x891   :  { %v15740_v3 = vpop.f32.mrb[156].mxu0 }
 0x892   :  { %16030 = vmatpush3.bf16.msra.mxu1 %v17389_v7  ;;  %v15741_v33 = vpop.f32.mrb[157].mxu0  ;;  %v13796_v7 = vrot.slane %v24567_v21, 3 }
 0x893   :  { %16031 = vmatprep.subr.bf16.mxu1 %v17391_v0  ;;  %v15742_v46 = vadd.f32 %v15741_v33, %v15740_v3  ;;  %v15743_v40 = vpop.f32.mrb[158].mxu0  ;;  %15997 = vmatpush3.bf16.msra.mxu0 %v17392_v34  ;;  %v17413_v34 = vld [vmem:[#allocation9 + $0xbd8] sm:$0xff]  }
 0x894   :  { %v23458_v61 = vpop.f32.mrb[188].mxu1  ;;  %v15744_v14 = vpop.f32.mrb[159].mxu0  ;;  %15998 = vmatprep.subr.bf16.mxu0 %v17394_v53  ;;  %v17416_v40 = vld [vmem:[#allocation9 + $0xbe0] sm:$0xff]  }
 0x895   :  { %v16226_v9 = vpop.f32.mrb[189].mxu1  ;;  %v10041_v63 = vadd.f32 %v15742_v46, %v23410_v54  ;;  %v17404_v54 = vld [vmem:[#allocation9 + $0xbc0] sm:$0xff]   ;;  %v13214_v46 = vpack.c.b16 %v23107_v18, %v23107_v18  ;;  %v14091_v14 = vpack.c.b16 %v23129_v28, %v23129_v28  ;;  %v13494_v18 = vrot.slane %v24561_v56, 7 }
 0x896   :  { %v10779_v62 = vpop.f32.mrb[190].mxu1  ;;  %16032 = vmatpush3.bf16.msra.mxu1 %v17393_v20  ;;  %v17414_v20 = vld [vmem:[#allocation9 + $0xc20] sm:$0xff]   ;;  %v17417_v9 = vld [vmem:[#allocation9 + $0xc28] sm:$0xff]   ;;  %v13498_v28 = vrot.slane %v24563_v49, 5  ;;  %v17422_v49 = vld [vmem:[#allocation9 + $0xbf0] sm:$0xff]  }
 0x897   :  { %v16227_v25 = vpop.f32.mrb[191].mxu1  ;;  %16033 = vmatprep.subr.bf16.mxu1 %v17395_v23  ;;  %15999 = vmatpush3.bf16.msra.mxu0 %v17396_v59  ;;  %v10046_v8 = vadd.f32 %v10041_v63, %v23424_v16  ;;  %v17408_v16 = vld [vmem:[#allocation9 + $0xa70] sm:$0xff]   ;;  %v17415_v23 = vld [vmem:[#allocation9 + $0xb20] sm:$0xff]   ;;  %v13492_v63 = vrot.slane %v24564_v38, 1  ;;  %v17419_v62 = vld [vmem:[#allocation9 + $0xbe8] sm:$0xff]  }
 0x898   :  { %16000 = vmatprep.subr.bf16.mxu0 %v17398_v32  ;;  %v17418_v32 = vld [vmem:[#allocation9 + $0xb28] sm:$0xff]   ;;  %v17420_v25 = vld [vmem:[#allocation9 + $0xc30] sm:$0xff]  }
 0x89a   :  { %16034 = vmatpush3.bf16.msra.mxu1 %v17397_v27  ;;  %v13496_v27 = vrot.slane %v24562_v41, 6 }
 0x89b   :  { %16035 = vmatprep.subr.bf16.mxu1 %v17399_v37  ;;  %16001 = vmatpush3.bf16.msra.mxu0 %v17400_v55  ;;  %v17421_v55 = vld [vmem:[#allocation9 + $0xb30] sm:$0xff]  }
 0x89c   :  { %16002 = vmatprep.subr.bf16.mxu0 %v17402_v15  ;;  %v13500_v15 = vrot.slane %v24565_v1, 4 }
 0x89e   :  { %16036 = vmatpush3.bf16.msra.mxu1 %v17401_v44  ;;  %v13502_v44 = vrot.slane %v24566_v19, 3 }
 0x89f   :  { %16336 = vmatprep.subr.bf16.mxu1 %v24341_v13  ;;  %16003 = vmatpush3.bf16.msra.mxu0 %v17403_v12 }
 0x8a0   :  { %16004 = vmatprep.subr.bf16.mxu0 %v17405_v5 }
 0x8a1   :  { %13667 = vmatmul.mubr.bf16.vlgmr.msra.gmra.mrb[224].mxu1 %v13506_v26  ;;  %v10332_v48 = vpop.f32.mrb[160].mxu0 }
 0x8a2   :  { %16337 = vmatpush3.bf16.msra.mxu1 %v17404_v54  ;;  %16344 = vmatprep.mubr.msk.bf16.mxu1 %vm17785_vm8, %v24341_v13  ;;  %v10333_v22 = vadd.f32 %v23450_v30, %v10332_v48  ;;  %v16214_v31 = vpop.f32.mrb[161].mxu0  ;;  %v13786_v30 = vsel %vm7929_vm4, %v13785_v10, %v13784_v24  ;;  %v13504_v54 = vrot.slane %v24567_v21, 2  ;;  %v17426_v10 = vld [vmem:[#allocation9 + $0xb80] sm:$0xff]   ;;  %v17425_v48 = vld [vmem:[#allocation9 + $0xbf8] sm:$0xff]   ;;  %v17430_v24 = vld [vmem:[#allocation9 + $0xb88] sm:$0xff]  }
 0x8a3   :  { %16338 = vmatprep.subr.bf16.mxu1 %v24341_v13  ;;  %v10335_v60 = vpop.f32.mrb[162].mxu0  ;;  %16005 = vmatpush3.bf16.msra.mxu0 %v17406_v4  ;;  %v13787_v17 = vsel %vm4522_vm14, %v24561_v56, %v13786_v30  ;;  %v17424_v4 = vld [vmem:[#allocation9 + $0xb38] sm:$0xff]   ;;  %v17427_v21 = vld [vmem:[#allocation9 + $0xc40] sm:$0xff]  }
 0x8a4   :  { %v23472_v50 = vadd.f32 %v10333_v22, %v10046_v8  ;;  %v16215_v51 = vpop.f32.mrb[163].mxu0  ;;  %16006 = vmatprep.subr.bf16.mxu0 %v17408_v16  ;;  %v13789_v57 = vsel %vm7935_vm5, %v13788_v45, %v13787_v17  ;;  %v13493_v8 = vsel %vm7929_vm4, %v24560_v35, %v13492_v63  ;;  %v17423_v35 = vld [vmem:[#allocation9 + $0xc38] sm:$0xff]   ;;  %v17428_v22 = vld [vmem:[#allocation9 + $0xb40] sm:$0xff]   ;;  %v13799_v60 = vpack.c.b16 %v23149_v6, %v23149_v6  ;;  %v17431_v45 = vld [vmem:[#allocation9 + $0xc48] sm:$0xff]  }
 0x8a5   :  { %v13791_v0 = vsel %vm4524_vm0, %v13790_v47, %v13789_v57  ;;  %v13495_v38 = vsel %vm4522_vm14, %v13494_v18, %v13493_v8  ;;  %v17432_v51 = vld [vmem:[#allocation9 + $0xb48] sm:$0xff]   ;;  %v17450_v8 = vld [vmem:[#allocation9 + $0xc60] sm:$0xff]  }
 0x8a6   :  { %16339 = vmatpush3.bf16.msra.mxu1 %v17407_v39  ;;  %v13793_v53 = vsel %vm7941_vm6, %v13792_v2, %v13791_v0  ;;  %v13497_v5 = vsel %vm7935_vm5, %v13496_v27, %v13495_v38  ;;  %v17435_v2 = vld [vmem:[#allocation9 + $0xc50] sm:$0xff]   ;;  %v17438_v0 = vld [vmem:[#allocation9 + $0xb98] sm:$0xff]  }
 0x8a7   :  { %16340 = vmatprep.subr.bf16.mxu1 %v24341_v13  ;;  %16007 = vmatpush3.bf16.msra.mxu0 %v17409_v58  ;;  %v13795_v3 = vsel %vm4526_vm2, %v13794_v36, %v13793_v53  ;;  %v13499_v1 = vsel %vm4524_vm0, %v13498_v28, %v13497_v5  ;;  %v17429_v58 = vld [vmem:[#allocation9 + $0xc00] sm:$0xff]  }
 0x8a8   :  { %16008 = vmatprep.subr.bf16.mxu0 %v17411_v43  ;;  %v13797_v33 = vsel %vm7947_vm7, %v13796_v7, %v13795_v3  ;;  %v13501_v16 = vsel %vm7941_vm6, %v13500_v15, %v13499_v1  ;;  %v17434_v43 = vld [vmem:[#allocation9 + $0xb90] sm:$0xff]   ;;  %v13798_v15 = vpack.c.b16 %v23185_v29, %v23185_v29  ;;  %v17453_v29 = vld [vmem:[#allocation9 + $0xc78] sm:$0xff]  }
 0x8a9   :  { %v13800_v59 = vpack.c.b16 %v13797_v33, %v13797_v33  ;;  %v13503_v19 = vsel %vm4526_vm2, %v13502_v44, %v13501_v16  ;;  %v17437_v3 = vld [vmem:[#allocation9 + $0xc10] sm:$0xff]   ;;  %v17439_v33 = vld [vmem:[#allocation9 + $0xc58] sm:$0xff]  }
 0x8aa   :  { %16341 = vmatpush3.bf16.msra.mxu1 %v17410_v42  ;;  %v13505_v39 = vsel %vm7947_vm7, %v13504_v54, %v13503_v19  ;;  %v17433_v42 = vld [vmem:[#allocation9 + $0xc08] sm:$0xff]   ;;  %v17452_v44 = vld [vmem:[#allocation9 + $0xc70] sm:$0xff]  }
 0x8ab   :  { %16342 = vmatprep.subr.bf16.mxu1 %v24341_v13  ;;  %16009 = vmatpush3.bf16.msra.mxu0 %v17412_v11  ;;  %v13508_v31 = vpack.c.b16 %v13505_v39, %v13505_v39  ;;  %v17436_v11 = vld [vmem:[#allocation9 + $0xb50] sm:$0xff]   ;;  %v24569_v54 = vld [vmem:[#allocation56_spill] sm:$0xff] }
 0x8ac   :  { %16324 = vmatprep.subr.bf16.mxu0 %v24341_v13 }
 0x8ae   :  { %16343 = vmatpush3.bf16.msra.mxu1 %v17413_v34  ;;  %13375 = vmatmul.mubr.bf16.vlgmr.msra.gmra.mrb[196].mxu0 %v13214_v46 }
 0x8af   :  { %16075 = vmatprep.subr.bf16.mxu1 %v17414_v20  ;;  %16325 = vmatpush3.bf16.msra.mxu0 %v17415_v23  ;;  %v17440_v23 = vld [vmem:[#allocation9 + $0xb58] sm:$0xff]  }
 0x8b0   :  { %16332 = vmatprep.mubr.msk.bf16.mxu0 %vm17785_vm8, %v24341_v13  ;;  %16326 = vmatprep.subr.bf16.mxu0 %v24341_v13 }
 0x8b1   :  { %16345 = vmatmul.mubr.msk.bf16.vlgmr.msra.gmra.mrb[228].mxu1 %vm3586_vm10, %v13800_v59  ;;  %v17441_v59 = vld [vmem:[#allocation9 + $0xc18] sm:$0xff]  }
 0x8b2   :  { %16076 = vmatpush3.bf16.msra.mxu1 %v17416_v40  ;;  %14250 = vmatprep.mubr.bf16.mxu1 %v14091_v14  ;;  %v17442_v40 = vld [vmem:[#allocation9 + $0xba0] sm:$0xff]   ;;  %v17444_v14 = vld [vmem:[#allocation9 + $0xba8] sm:$0xff]  }
 0x8b3   :  { %16077 = vmatprep.subr.bf16.mxu1 %v17417_v9  ;;  %16327 = vmatpush3.bf16.msra.mxu0 %v17418_v32  ;;  %v17443_v9 = vld [vmem:[#allocation9 + $0xb60] sm:$0xff]   ;;  %v17445_v32 = vld [vmem:[#allocation9 + $0xb68] sm:$0xff]  }
 0x8b4   :  { %v15821_v37 = vpop.f32.mrb[192].mxu1  ;;  %16328 = vmatprep.subr.bf16.mxu0 %v24341_v13 }
 0x8b5   :  { %v15822_v56 = vpop.f32.mrb[193].mxu1 }
 0x8b6   :  { %v23507_v41 = vadd.f32 %v15822_v56, %v15821_v37  ;;  %v15824_v12 = vpop.f32.mrb[194].mxu1  ;;  %16078 = vmatpush3.bf16.msra.mxu1 %v17419_v62  ;;  %v17451_v56 = vld [vmem:[#allocation9 + $0xc68] sm:$0xff]  }
 0x8b7   :  { %v15825_v26 = vpop.f32.mrb[195].mxu1  ;;  %16079 = vmatprep.subr.bf16.mxu1 %v17420_v25  ;;  %16329 = vmatpush3.bf16.msra.mxu0 %v17421_v55  ;;  %v17447_v25 = vld [vmem:[#allocation9 + $0xb70] sm:$0xff]   ;;  %v17449_v55 = vld [vmem:[#allocation9 + $0xb78] sm:$0xff]  }
 0x8b8   :  { %16330 = vmatprep.subr.bf16.mxu0 %v24341_v13  ;;  %v14092_v26 = vpack.c.b16 %v24569_v54, %v24569_v54 }
 0x8ba   :  { %16080 = vmatpush3.bf16.msra.mxu1 %v17422_v49 }
 0x8bb   :  { %16081 = vmatprep.subr.bf16.mxu1 %v17423_v35  ;;  %16331 = vmatpush3.bf16.msra.mxu0 %v17424_v4 }
 0x8bc   :  { %16048 = vmatprep.subr.bf16.mxu0 %v17426_v10 }
 0x8be   :  { %16082 = vmatpush3.bf16.msra.mxu1 %v17425_v48  ;;  %16333 = vmatmul.mubr.msk.bf16.vlgmr.msra.gmra.mrb[200].mxu0 %vm3586_vm10, %v13508_v31 }
 0x8bf   :  { %16083 = vmatprep.subr.bf16.mxu1 %v17427_v21  ;;  %16049 = vmatpush3.bf16.msra.mxu0 %v17428_v22 }
 0x8c0   :  { %13958 = vmatprep.mubr.bf16.mxu0 %v13799_v60  ;;  %16050 = vmatprep.subr.bf16.mxu0 %v17430_v24 }
 0x8c1   :  { %v15794_v47 = vpop.f32.mrb[164].mxu0 }
 0x8c2   :  { %16084 = vmatpush3.bf16.msra.mxu1 %v17429_v58  ;;  %v15795_v30 = vpop.f32.mrb[165].mxu0 }
 0x8c3   :  { %16085 = vmatprep.subr.bf16.mxu1 %v17431_v45  ;;  %v15796_v36 = vadd.f32 %v15795_v30, %v15794_v47  ;;  %v15797_v6 = vpop.f32.mrb[166].mxu0  ;;  %16051 = vmatpush3.bf16.msra.mxu0 %v17432_v51 }
 0x8c4   :  { %v23519_v17 = vpop.f32.mrb[196].mxu1  ;;  %v15798_v7 = vpop.f32.mrb[167].mxu0  ;;  %16052 = vmatprep.subr.bf16.mxu0 %v17434_v43 }
 0x8c5   :  { %v16250_v57 = vpop.f32.mrb[197].mxu1  ;;  %v10777_v34 = vadd.f32 %v15796_v36, %v23458_v61  ;;  %v14090_v61 = vpack.c.b16 %v23170_v52, %v23170_v52  ;;  %v17448_v52 = vld [vmem:[#allocation9 + $0xbb8] sm:$0xff]  }
 0x8c6   :  { %v11363_v53 = vpop.f32.mrb[198].mxu1  ;;  %16086 = vmatpush3.bf16.msra.mxu1 %v17433_v42 }
 0x8c7   :  { %v16251_v20 = vpop.f32.mrb[199].mxu1  ;;  %16087 = vmatprep.subr.bf16.mxu1 %v17435_v2  ;;  %16053 = vmatpush3.bf16.msra.mxu0 %v17436_v11  ;;  %v10782_v46 = vadd.f32 %v10777_v34, %v23472_v50  ;;  %v17446_v50 = vld [vmem:[#allocation9 + $0xbb0] sm:$0xff]  }
 0x8c8   :  { %16054 = vmatprep.subr.bf16.mxu0 %v17438_v0 }
 0x8ca   :  { %16088 = vmatpush3.bf16.msra.mxu1 %v17437_v3 }
 0x8cb   :  { %16089 = vmatprep.subr.bf16.mxu1 %v17439_v33  ;;  %16055 = vmatpush3.bf16.msra.mxu0 %v17440_v23  ;;  %v17454_v33 = vld [vmem:[#allocation12] sm:$0xff]  }
 0x8cc   :  { %16056 = vmatprep.subr.bf16.mxu0 %v17442_v40  ;;  %v17455_v40 = vld [vmem:[#allocation12 + $0x8] sm:$0xff]  }
 0x8ce   :  { %16090 = vmatpush3.bf16.msra.mxu1 %v17441_v59 }
 0x8cf   :  { %16380 = vmatprep.subr.bf16.mxu1 %v24341_v13  ;;  %16057 = vmatpush3.bf16.msra.mxu0 %v17443_v9 }
 0x8d0   :  { %16058 = vmatprep.subr.bf16.mxu0 %v17444_v14 }
 0x8d1   :  { %14251 = vmatmul.mubr.bf16.vlgmr.msra.gmra.mrb[232].mxu1 %v14090_v61  ;;  %v11068_v18 = vpop.f32.mrb[168].mxu0 }
 0x8d2   :  { %16396 = vmatprep.mubr.msk.bf16.mxu1 %vm17785_vm8, %v24341_v13  ;;  %v11069_v63 = vadd.f32 %v23507_v41, %v11068_v18  ;;  %v16238_v62 = vpop.f32.mrb[169].mxu0  ;;  %v17457_v18 = vld [vmem:[#allocation12 + $0x18] sm:$0xff]  }
 0x8d3   :  { %v11071_v27 = vpop.f32.mrb[170].mxu0  ;;  %16059 = vmatpush3.bf16.msra.mxu0 %v17445_v32 }
 0x8d4   :  { %v11074_v28 = vadd.f32 %v11069_v63, %v10782_v46  ;;  %v16239_v37 = vpop.f32.mrb[171].mxu0  ;;  %16060 = vmatprep.subr.bf16.mxu0 %v17446_v50  ;;  %v17456_v50 = vld [vmem:[#allocation12 + $0x10] sm:$0xff]   ;;  %v17458_v63 = vld [vmem:[#allocation12 + $0x20] sm:$0xff]  }
 0x8d7   :  { %16061 = vmatpush3.bf16.msra.mxu0 %v17447_v25 }
 0x8d8   :  { %16062 = vmatprep.subr.bf16.mxu0 %v17448_v52  ;;  %v17459_v52 = vld [vmem:[#allocation12 + $0x28] sm:$0xff]  }
 0x8db   :  { %16063 = vmatpush3.bf16.msra.mxu0 %v17449_v55  ;;  %v17460_v55 = vld [vmem:[#allocation12 + $0x30] sm:$0xff]  }
 0x8dc   :  { %16348 = vmatprep.subr.bf16.mxu0 %v24341_v13 }
 0x8de   :  { %13959 = vmatmul.mubr.bf16.vlgmr.msra.gmra.mrb[204].mxu0 %v13798_v15  ;;  %v17463_v15 = vld [vmem:[#allocation15 + $0x8] sm:$0xff]  }
 0x8df   :  { %16349 = vmatpush3.bf16.msra.mxu0 %v17450_v8  ;;  %16356 = vmatprep.mubr.msk.bf16.mxu0 %vm17785_vm8, %v24341_v13  ;;  %v17462_v8 = vld [vmem:[#allocation15] sm:$0xff]  }
 0x8e0   :  { %16350 = vmatprep.subr.bf16.mxu0 %v24341_v13  ;;  %16381 = vmatpush3.bf16.msra.mxu1 %v17462_v8 }
 0x8e1   :  { %16382 = vmatprep.subr.bf16.mxu1 %v24341_v13 }
 0x8e3   :  { %16351 = vmatpush3.bf16.msra.mxu0 %v17451_v56  ;;  %v17461_v56 = vld [vmem:[#allocation12 + $0x38] sm:$0xff]  }
 0x8e4   :  { %v15875_v38 = vpop.f32.mrb[200].mxu1  ;;  %16352 = vmatprep.subr.bf16.mxu0 %v24341_v13  ;;  %16383 = vmatpush3.bf16.msra.mxu1 %v17463_v15 }
 0x8e5   :  { %v15876_v41 = vpop.f32.mrb[201].mxu1  ;;  %16384 = vmatprep.subr.bf16.mxu1 %v24341_v13 }
 0x8e6   :  { %v15877_v12 = vadd.f32 %v15876_v41, %v15875_v38  ;;  %v15878_v49 = vpop.f32.mrb[202].mxu1  ;;  %v17464_v41 = vld [vmem:[#allocation15 + $0x10] sm:$0xff]  }
 0x8e7   :  { %v15879_v5 = vpop.f32.mrb[203].mxu1  ;;  %16353 = vmatpush3.bf16.msra.mxu0 %v17452_v44 }
 0x8e8   :  { %16354 = vmatprep.subr.bf16.mxu0 %v24341_v13  ;;  %16385 = vmatpush3.bf16.msra.mxu1 %v17464_v41  ;;  %v17468_v41 = vld [vmem:[#allocation15 + $0x30] sm:$0xff]  }
 0x8e9   :  { %16386 = vmatprep.subr.bf16.mxu1 %v24341_v13 }
 0x8eb   :  { %16355 = vmatpush3.bf16.msra.mxu0 %v17453_v29 }
 0x8ec   :  { %16360 = vmatprep.subr.bf16.mxu0 %v24341_v13 }
 0x8ee   :  { %16357 = vmatmul.mubr.msk.bf16.vlgmr.msra.gmra.mrb[208].mxu0 %vm3586_vm10, %v14092_v26 }
 0x8ef   :  { %16376 = vmatprep.mubr.msk.bf16.mxu0 %vm17785_vm8, %v24341_v13  ;;  %16361 = vmatpush3.bf16.msra.mxu0 %v17454_v33 }
 0x8f0   :  { %16362 = vmatprep.subr.bf16.mxu0 %v24341_v13 }
 0x8f1   :  { %v15848_v35 = vpop.f32.mrb[172].mxu0 }
 0x8f2   :  { %v15849_v1 = vpop.f32.mrb[173].mxu0 }
 0x8f3   :  { %v15850_v16 = vadd.f32 %v15849_v1, %v15848_v35  ;;  %v15851_v19 = vpop.f32.mrb[174].mxu0  ;;  %16363 = vmatpush3.bf16.msra.mxu0 %v17455_v40 }
 0x8f4   :  { %v12096_v4 = vpop.f32.mrb[204].mxu1  ;;  %v15852_v48 = vpop.f32.mrb[175].mxu0  ;;  %16364 = vmatprep.subr.bf16.mxu0 %v24341_v13  ;;  %v17466_v19 = vld [vmem:[#allocation15 + $0x20] sm:$0xff]  }
 0x8f5   :  { %v16274_v10 = vpop.f32.mrb[205].mxu1  ;;  %v11361_v39 = vadd.f32 %v15850_v16, %v23519_v17 }
 0x8f6   :  { %v12099_v21 = vpop.f32.mrb[206].mxu1  ;;  %v17467_v10 = vld [vmem:[#allocation15 + $0x28] sm:$0xff]  }
 0x8f7   :  { %v16275_v22 = vpop.f32.mrb[207].mxu1  ;;  %v11366_v31 = vadd.f32 %v11361_v39, %v11074_v28  ;;  %16365 = vmatpush3.bf16.msra.mxu0 %v17456_v50 }
 0x8f8   :  { %16366 = vmatprep.subr.bf16.mxu0 %v24341_v13 }
 0x8fb   :  { %16367 = vmatpush3.bf16.msra.mxu0 %v17457_v18 }
 0x8fc   :  { %16368 = vmatprep.subr.bf16.mxu0 %v24341_v13 }
 0x8ff   :  { %16369 = vmatpush3.bf16.msra.mxu0 %v17458_v63 }
 0x900   :  { %16370 = vmatprep.subr.bf16.mxu0 %v24341_v13 }
 0x901   :  { %v11652_v24 = vpop.f32.mrb[176].mxu0 }
 0x902   :  { %v11653_v60 = vadd.f32 %v15877_v12, %v11652_v24  ;;  %v16262_v58 = vpop.f32.mrb[177].mxu0 }
 0x903   :  { %v11655_v45 = vpop.f32.mrb[178].mxu0  ;;  %16371 = vmatpush3.bf16.msra.mxu0 %v17459_v52  ;;  %v15519_v52 = vld [vmem:[#allocation10] ss:$0 sm:$0xff] }
 0x904   :  { %v11658_v51 = vadd.f32 %v11653_v60, %v11366_v31  ;;  %v16263_v43 = vpop.f32.mrb[179].mxu0  ;;  %16372 = vmatprep.subr.bf16.mxu0 %v24341_v13 }
 0x907   :  { %16373 = vmatpush3.bf16.msra.mxu0 %v17460_v55 }
 0x908   :  { %16374 = vmatprep.subr.bf16.mxu0 %v24341_v13 }
 0x90b   :  { %16375 = vmatpush3.bf16.msra.mxu0 %v17461_v56 }
 0x914   :  { %v15929_v47 = vpop.f32.mrb[208].mxu1 }
 0x915   :  { %v15930_v42 = vpop.f32.mrb[209].mxu1 }
 0x916   :  { %v15931_v30 = vadd.f32 %v15930_v42, %v15929_v47  ;;  %v15932_v2 = vpop.f32.mrb[210].mxu1 }
 0x917   :  { %v15933_v36 = vpop.f32.mrb[211].mxu1 }
 0x921   :  { %v15902_v6 = vpop.f32.mrb[180].mxu0 }
 0x922   :  { %v15903_v11 = vpop.f32.mrb[181].mxu0 }
 0x923   :  { %v15904_v7 = vadd.f32 %v15903_v11, %v15902_v6  ;;  %v15905_v0 = vpop.f32.mrb[182].mxu0 }
 0x924   :  { %v12680_v57 = vpop.f32.mrb[212].mxu1  ;;  %v15906_v34 = vpop.f32.mrb[183].mxu0 }
 0x925   :  { %v16298_v17 = vpop.f32.mrb[213].mxu1  ;;  %v12097_v53 = vadd.f32 %v15904_v7, %v12096_v4  ;;  %v17465_v4 = vld [vmem:[#allocation15 + $0x18] sm:$0xff]  }
 0x926   :  { %v12683_v3 = vpop.f32.mrb[214].mxu1  ;;  %16387 = vmatpush3.bf16.msra.mxu1 %v17465_v4 }
 0x927   :  { %v16299_v20 = vpop.f32.mrb[215].mxu1  ;;  %v12102_v23 = vadd.f32 %v12097_v53, %v11658_v51  ;;  %16388 = vmatprep.subr.bf16.mxu1 %v24341_v13 }
 0x92a   :  { %16389 = vmatpush3.bf16.msra.mxu1 %v17466_v19 }
 0x92b   :  { %16390 = vmatprep.subr.bf16.mxu1 %v24341_v13 }
 0x92e   :  { %16391 = vmatpush3.bf16.msra.mxu1 %v17467_v10 }
 0x92f   :  { %16392 = vmatprep.subr.bf16.mxu1 %v24341_v13 }
 0x931   :  { %v12388_v46 = vpop.f32.mrb[184].mxu0 }
 0x932   :  { %v12389_v59 = vadd.f32 %v15931_v30, %v12388_v46  ;;  %v16286_v9 = vpop.f32.mrb[185].mxu0  ;;  %16393 = vmatpush3.bf16.msra.mxu1 %v17468_v41 }
 0x933   :  { %v12391_v14 = vpop.f32.mrb[186].mxu0  ;;  %16394 = vmatprep.subr.bf16.mxu1 %v24341_v13 }
 0x934   :  { %v12394_v61 = vadd.f32 %v12389_v59, %v12102_v23  ;;  %v16287_v32 = vpop.f32.mrb[187].mxu0 }
 0x944   :  { %v15983_v62 = vpop.f32.mrb[216].mxu1 }
 0x945   :  { %v15984_v27 = vpop.f32.mrb[217].mxu1 }
 0x946   :  { %v15985_v25 = vadd.f32 %v15984_v27, %v15983_v62  ;;  %v15986_v28 = vpop.f32.mrb[218].mxu1 }
 0x947   :  { %v15987_v37 = vpop.f32.mrb[219].mxu1 }
 0x951   :  { %v15956_v38 = vpop.f32.mrb[188].mxu0 }
 0x952   :  { %v15957_v44 = vpop.f32.mrb[189].mxu0 }
 0x953   :  { %v15958_v49 = vadd.f32 %v15957_v44, %v15956_v38  ;;  %v15959_v5 = vpop.f32.mrb[190].mxu0 }
 0x954   :  { %v13416_v12 = vpop.f32.mrb[220].mxu1  ;;  %v15960_v54 = vpop.f32.mrb[191].mxu0 }
 0x955   :  { %v16322_v29 = vpop.f32.mrb[221].mxu1  ;;  %v12681_v26 = vadd.f32 %v15958_v49, %v12680_v57  ;;  %v15520_v49 = vld [vmem:[#allocation13] ss:$0 sm:$0xff] }
 0x956   :  { %v13419_v35 = vpop.f32.mrb[222].mxu1 }
 0x957   :  { %v16323_v1 = vpop.f32.mrb[223].mxu1  ;;  %v12686_v16 = vadd.f32 %v12681_v26, %v12394_v61 }
 0x961   :  { %v12972_v48 = vpop.f32.mrb[192].mxu0 }
 0x962   :  { %v12973_v39 = vadd.f32 %v15985_v25, %v12972_v48  ;;  %v16310_v21 = vpop.f32.mrb[193].mxu0 }
 0x963   :  { %v12975_v22 = vpop.f32.mrb[194].mxu0 }
 0x964   :  { %v12978_v31 = vadd.f32 %v12973_v39, %v12686_v16  ;;  %v16311_v24 = vpop.f32.mrb[195].mxu0  ;;  %v15529_v16 = vld [vmem:[#allocation16] ss:$0 sm:$0xff] }
 0x974   :  { %v16037_v60 = vpop.f32.mrb[224].mxu1 }
 0x975   :  { %v16038_v58 = vpop.f32.mrb[225].mxu1 }
 0x976   :  { %v16039_v45 = vadd.f32 %v16038_v58, %v16037_v60  ;;  %v16040_v51 = vpop.f32.mrb[226].mxu1 }
 0x977   :  { %v16041_v43 = vpop.f32.mrb[227].mxu1 }
 0x981   :  { %v16010_v47 = vpop.f32.mrb[196].mxu0 }
 0x982   :  { %v16011_v42 = vpop.f32.mrb[197].mxu0 }
 0x983   :  { %v16012_v2 = vadd.f32 %v16011_v42, %v16010_v47  ;;  %v16013_v36 = vpop.f32.mrb[198].mxu0 }
 0x984   :  { %v14000_v30 = vpop.f32.mrb[228].mxu1  ;;  %v16014_v11 = vpop.f32.mrb[199].mxu0 }
 0x985   :  { %v16346_v6 = vpop.f32.mrb[229].mxu1  ;;  %v13417_v57 = vadd.f32 %v16012_v2, %v13416_v12  ;;  %v17469_v12 = vld [vmem:[#allocation15 + $0x38] sm:$0xff]  }
 0x986   :  { %v14003_v7 = vpop.f32.mrb[230].mxu1  ;;  %16395 = vmatpush3.bf16.msra.mxu1 %v17469_v12 }
 0x987   :  { %v16347_v0 = vpop.f32.mrb[231].mxu1  ;;  %v13422_v17 = vadd.f32 %v13417_v57, %v12978_v31 }
 0x991   :  { %v13708_v34 = vpop.f32.mrb[200].mxu0 }
 0x992   :  { %v13709_v53 = vadd.f32 %v16039_v45, %v13708_v34  ;;  %v16334_v3 = vpop.f32.mrb[201].mxu0 }
 0x993   :  { %v13711_v20 = vpop.f32.mrb[202].mxu0 }
 0x994   :  { %v13714_v33 = vadd.f32 %v13709_v53, %v13422_v17  ;;  %v16335_v23 = vpop.f32.mrb[203].mxu0 }
 0x9a4   :  { %v16091_v46 = vpop.f32.mrb[232].mxu1 }
 0x9a5   :  { %v16092_v40 = vpop.f32.mrb[233].mxu1 }
 0x9a6   :  { %v16093_v59 = vadd.f32 %v16092_v40, %v16091_v46  ;;  %v16094_v9 = vpop.f32.mrb[234].mxu1 }
 0x9a7   :  { %v16095_v14 = vpop.f32.mrb[235].mxu1 }
 0x9b1   :  { %v16064_v61 = vpop.f32.mrb[204].mxu0 }
 0x9b2   :  { %v16065_v32 = vpop.f32.mrb[205].mxu0 }
 0x9b3   :  { %v16066_v50 = vadd.f32 %v16065_v32, %v16064_v61  ;;  %v16067_v18 = vpop.f32.mrb[206].mxu0 }
 0x9b4   :  { %v16068_v63 = vpop.f32.mrb[207].mxu0 }
 0x9b5   :  { %v14001_v62 = vadd.f32 %v16066_v50, %v14000_v30 }
 0x9b7   :  { %v14006_v27 = vadd.f32 %v14001_v62, %v13714_v33 }
 0x9c1   :  { %v14292_v25 = vpop.f32.mrb[208].mxu0 }
 0x9c2   :  { %v14293_v28 = vadd.f32 %v16093_v59, %v14292_v25  ;;  %v16358_v37 = vpop.f32.mrb[209].mxu0 }
 0x9c3   :  { %v14295_v55 = vpop.f32.mrb[210].mxu0 }
 0x9c4   :  { %v14298_v8 = vadd.f32 %v14293_v28, %v14006_v27  ;;  %v16359_v15 = vpop.f32.mrb[211].mxu0 }
 0x9c6   :  { %v14306_v56 = vadd.f32 %v15519_v52, %v14298_v8 }
 0x9c8   :  { %v14307_v38 = vmax.f32 %v14306_v56, 0.0 }
 0x9ca   :  { %v14308_v44 = vpack.c.bf16 %v14307_v38, %v14307_v38 }
 0x9cc   :  { %16377 = vmatmul.mubr.bf16.vlgmr.msra.gmra.mrb[212].mxu0 %v14308_v44 }
 0xa9f   :  { %v14414_v5 = vpop.f32.mrb[212].mxu0 }
 0xaa0   :  { %v14415_v29 = vadd.f32 %v15520_v49, %v14414_v5  ;;  %v16378_v54 = vpop.f32.mrb[213].mxu0 }
 0xaa1   :  { %v14417_v26 = vpop.f32.mrb[214].mxu0 }
 0xaa2   :  { %v14420_v35 = vmax.f32 %v14415_v29, 0.0  ;;  %v16379_v1 = vpop.f32.mrb[215].mxu0 }
 0xaa4   :  { %v14421_v4 = vpack.c.bf16 %v14420_v35, %v14420_v35 }
 0xaa6   :  { %16397 = vmatmul.mubr.bf16.vlgmr.msra.gmra.mrb[236].mxu1 %v14421_v4 }
 0xb79   :  { %v14527_v19 = vpop.f32.mrb[236].mxu1 }
 0xb7a   :  { %v14528_v10 = vadd.f32 %v15529_v16, %v14527_v19  ;;  %v16398_v48 = vpop.f32.mrb[237].mxu1 }
 0xb7b   :  { %v14530_v39 = vpop.f32.mrb[238].mxu1 }
 0xb7c   :  { %14533 = vst [vmem:[%s23572_s11] sm:$0xff] %v14528_v10  ;;  %v16399_v13 = vpop.f32.mrb[239].mxu1 }
 0xb7d   :  { %14538 = vsyncpa [#allocation3], 1 }
 0xb7e   :  { %14539 = vsyncpa [#allocation5], 1 }
 0xb7f   :  { %14540 = vsyncpa [#allocation8], 1 }
 0xb80   :  { %14541 = vsyncpa [#allocation11], 1 }
 0xb81   :  { %14542 = vsyncpa [#allocation14], 1 }
 0xb82   :  { %14543 = vsyncpa [#allocation17], 1 }

</bundles_post_ra>
